<compile_context>
chip_gen: v7x
topology: tpu7x:2x2x1
jax: 0.10.0
libtpu: 0.0.40
codegen_flags: <defaults>
</compile_context>

<pallas_src>
import math
from functools import partial

import numpy as np

import jax
import jax.numpy as jnp
from jax.experimental import pallas as pl
from jax.experimental.pallas import tpu as pltpu

LANE = 128
PAD = 2                      # nn.Conv1d(..., padding=2) in Block
BF16 = jnp.bfloat16
F32 = jnp.float32


def _rup(c, m=LANE):
    """Round channel count up to a multiple of the 128-wide lane dimension."""
    return ((c + m - 1) // m) * m


# ----------------------------------------------------------------------------
# Fused per-stage kernel
# ----------------------------------------------------------------------------
def make_stage_kernel(B, T_in, T_out, Kp, K5, eps):
    """One decoder stage, fully fused, whole batch per invocation (grid-less)."""
    S = T_out + 2 * PAD          # per-batch chunk length inside the padded slab
    R = B * S                    # slab rows
    Rm = R - (K5 - 1)            # rows produced by the batched shifted-window conv

    def kernel(x_ref, enc_ref, g_ref, wup_ref, bup_ref,
               w1x_ref, w1e_ref, b1_ref, g1_ref, be1_ref,
               w2_ref, b2_ref, g2_ref, be2_ref,
               o_ref, slab_ref):
        CPO = o_ref.shape[-1]                     # padded output channels (=128*n)

        # ---- hoisted parameter loads (each read exactly once) -----------------
        g = g_ref[...]                            # (Kp, T_out, T_in) bf16
        bup = bup_ref[...]                        # (1, CPO) f32
        b1, g1, be1 = b1_ref[...], g1_ref[...], be1_ref[...]
        b2, g2, be2 = b2_ref[...], g2_ref[...], be2_ref[...]

        # ---- fused Upsample(linear) + up-conv ---------------------------------
        # Deep contraction first, batched over B: U[:, k*CPO:(k+1)*CPO] = x @ Wup_k.
        U = jnp.dot(x_ref[...], wup_ref[...],
                    preferred_element_type=F32)   # (B*T_in, Kp*CPO) f32

        # Zero the slab once: halo rows double as the convs' zero padding and are
        # never overwritten afterwards.
        slab_ref[...] = jnp.zeros((R, CPO), F32)
        for b in range(B):
            acc = jnp.zeros((T_out, CPO), F32)
            for k in range(Kp):
                uk = U[b * T_in:(b + 1) * T_in,
                       k * CPO:(k + 1) * CPO].astype(BF16)
                acc = acc + jnp.dot(g[k], uk, preferred_element_type=F32)
            slab_ref[pl.ds(b * S + PAD, T_out), :] = acc + bup     # up-conv out

        # ---- Block conv1 (x half + cropped-skip half) + ReLU -------------------
        # Batched over B: one MXU contraction per (tap, half) via shifted windows
        # of the zero-haloed slabs — no im2col materialization.
        acc1 = jnp.zeros((Rm, CPO), F32)
        for k in range(K5):
            acc1 = acc1 + jnp.dot(slab_ref[pl.ds(k, Rm), :].astype(BF16),
                                  w1x_ref[k], preferred_element_type=F32)
            acc1 = acc1 + jnp.dot(enc_ref[pl.ds(k, Rm), :].astype(BF16),
                                  w1e_ref[k], preferred_element_type=F32)
        z1 = jnp.maximum(acc1 + b1, 0.0)          # rows between batch chunks = junk

        # ---- BatchNorm1d #1: training-mode biased stats over valid (B, T_out) --
        n = float(B * T_out)
        s1 = jnp.zeros((1, CPO), F32)
        q1 = jnp.zeros((1, CPO), F32)
        for b in range(B):
            zb = z1[b * S:b * S + T_out, :]
            s1 = s1 + jnp.sum(zb, axis=0, keepdims=True)
            q1 = q1 + jnp.sum(zb * zb, axis=0, keepdims=True)
        m1 = s1 / n
        v1 = jnp.maximum(q1 / n - m1 * m1, 0.0)   # clamp single-pass variance
        inv1 = jax.lax.rsqrt(v1 + eps) * g1

        # normalized activations back into the (still zero-haloed) slab -> conv2 in
        for b in range(B):
            zb = z1[b * S:b * S + T_out, :]
            slab_ref[pl.ds(b * S + PAD, T_out), :] = (zb - m1) * inv1 + be1

        # ---- Block conv2 + ReLU (same batched shifted-window scheme) -----------
        acc2 = jnp.zeros((Rm, CPO), F32)
        for k in range(K5):
            acc2 = acc2 + jnp.dot(slab_ref[pl.ds(k, Rm), :].astype(BF16),
                                  w2_ref[k], preferred_element_type=F32)
        z2 = jnp.maximum(acc2 + b2, 0.0)

        # ---- BatchNorm1d #2 + lane-dense store ----------------------------------
        s2 = jnp.zeros((1, CPO), F32)
        q2 = jnp.zeros((1, CPO), F32)
        for b in range(B):
            zb = z2[b * S:b * S + T_out, :]
            s2 = s2 + jnp.sum(zb, axis=0, keepdims=True)
            q2 = q2 + jnp.sum(zb * zb, axis=0, keepdims=True)
        m2 = s2 / n
        v2 = jnp.maximum(q2 / n - m2 * m2, 0.0)
        inv2 = jax.lax.rsqrt(v2 + eps) * g2
        for b in range(B):
            zb = z2[b * S:b * S + T_out, :]
            o_ref[b] = (zb - m2) * inv2 + be2

    return kernel


# ----------------------------------------------------------------------------
# Host-side constant folding: upsample + up-conv padding -> per-tap matrices
# ----------------------------------------------------------------------------
def build_upconv_interp(T_in, pool):
    """Fold Upsample(linear, align_corners=False) and the up-conv's padding=1 into
    per-tap matrices G_k so that up-conv(x) = sum_k G_k @ (x @ W_k) + b."""
    T_up = T_in * pool
    M = np.zeros((T_up, T_in), np.float32)
    scale = 1.0 / pool
    for j in range(T_up):
        src = (j + 0.5) * scale - 0.5
        if src < 0.0:
            src = 0.0
        i0 = int(np.floor(src))
        lam = src - i0
        i1 = min(i0 + 1, T_in - 1)
        M[j, i0] += 1.0 - lam
        M[j, i1] += lam
    Mp = np.zeros((T_up + 2, T_in), np.float32)      # conv padding=1 -> zero rows
    Mp[1:-1] = M
    Kp = pool                                        # up-conv kernel_size == pool
    T_out = T_up + 2 - Kp + 1
    G = np.stack([Mp[k:k + T_out] for k in range(Kp)], axis=0)   # (Kp, T_out, T_in)
    return jnp.asarray(G), T_out


def _pad_w(w, ci_pad, co_pad):
    """(K, C_in, C_out) -> (K, ci_pad, co_pad), zero-padded."""
    K, ci, co = w.shape
    return jnp.zeros((K, ci_pad, co_pad), jnp.float32).at[:, :ci, :co].set(w)


def _pad_row(v, c_pad, fill=0.0):
    return jnp.full((1, c_pad), fill, jnp.float32).at[0, :v.shape[0]].set(v)


# ----------------------------------------------------------------------------
# Decoder forward
# ----------------------------------------------------------------------------
@partial(jax.jit, static_argnames=("pools",))
def decoder_forward(x_bct, encblocks_bct, params, *, pools):
    eps = 1e-5
    B, C0, T = x_bct.shape
    CP = _rup(C0)
    # (B, C, T) -> lane-dense, channel-padded, batch-flattened (B*T, 128*n) bf16 slab.
    x = jnp.zeros((B, T, CP), jnp.float32).at[:, :, :C0].set(
        jnp.transpose(x_bct, (0, 2, 1)))
    x = x.reshape(B * T, CP).astype(BF16)

    out = None
    for i, pool in enumerate(pools):
        wup = params['up_w'][i]                      # (Kp, C_in, C_out)
        blk = params['blocks'][i]
        Kp, C_in, C_out = wup.shape
        CPI, CPO = _rup(C_in), _rup(C_out)
        K5 = blk['w1'].shape[0]
        assert C_in == 2 * C_out                     # torch.cat([x, enc]) channel count

        G, T_out = build_upconv_interp(T, pool)      # (Kp, T_out, T)
        S = T_out + 2 * PAD

        # Encoder skip: CenterCrop([C_out, T_out]) folded on the host (time AND
        # channel offsets), packed into a zero-haloed, lane-dense slab.
        enc = encblocks_bct[i]                       # (B, C_enc, T_enc)
        _, C_enc, T_enc = enc.shape
        ot = int(round((T_enc - T_out) / 2.0))       # torchvision CenterCrop offsets
        oc = int(round((C_enc - C_out) / 2.0))
        # TODO(synk): CenterCrop pad-when-smaller branch not implemented (skip
        #             features are always at least as large as the decoder tensor).
        enc_c = jnp.transpose(enc[:, oc:oc + C_out, ot:ot + T_out], (0, 2, 1))
        enc_slab = (jnp.zeros((B, S, CPO), jnp.float32)
                    .at[:, PAD:PAD + T_out, :C_out].set(enc_c)
                    .reshape(B * S, CPO))

        # Weights as bf16 MXU operands, channel-padded, lane-dense.
        wup_cat = (jnp.transpose(_pad_w(wup, CPI, CPO), (1, 0, 2))
                   .reshape(CPI, Kp * CPO).astype(BF16))
        w1 = blk['w1']                               # (K5, 2*C_out, C_out)
        w1x = _pad_w(w1[:, :C_out, :], CPO, CPO).astype(BF16)   # x-half
        w1e = _pad_w(w1[:, C_out:, :], CPO, CPO).astype(BF16)   # enc-half
        w2 = _pad_w(blk['w2'], CPO, CPO).astype(BF16)

        operands = (x, enc_slab, G.astype(BF16), wup_cat,
                    _pad_row(params['up_b'][i], CPO),
                    w1x, w1e,
                    _pad_row(blk['b1'], CPO),
                    _pad_row(blk['g1'], CPO, 1.0),
                    _pad_row(blk['be1'], CPO),
                    w2,
                    _pad_row(blk['b2'], CPO),
                    _pad_row(blk['g2'], CPO, 1.0),
                    _pad_row(blk['be2'], CPO))

        # VMEM budget for this grid-less call: operands + output + scratch + the
        # largest in-flight f32 temporaries, with 2x headroom.
        Rm = B * S - (K5 - 1)
        tmp_bytes = 4 * (3 * Rm * CPO + B * T * Kp * CPO)
        tot = sum(int(np.prod(a.shape)) * a.dtype.itemsize for a in operands)
        tot += 4 * B * T_out * CPO + 4 * B * S * CPO + tmp_bytes
        vmem_limit = int(min(100 << 20, max(32 << 20, 2 * tot + (4 << 20))))

        out = pl.pallas_call(
            make_stage_kernel(B, T, T_out, Kp, K5, eps),
            out_shape=jax.ShapeDtypeStruct((B, T_out, CPO), jnp.float32),
            scratch_shapes=[pltpu.VMEM((B * S, CPO), jnp.float32)],
            compiler_params=pltpu.CompilerParams(vmem_limit_bytes=vmem_limit),
        )(*operands)

        # next stage consumes the lane-dense activation as a bf16 (B*T, C) slab
        x = out.reshape(B * T_out, CPO).astype(BF16)
        T, C0 = T_out, C_out

    # strip channel padding, back to PyTorch (B, C, T) layout
    return jnp.transpose(out[:, :, :C0], (0, 2, 1))


# ----------------------------------------------------------------------------
# Deterministic parameter init (shapes follow the PyTorch module; weight layout
# here is (K, C_in, C_out) == torch's (C_out, C_in, K) transposed)
# ----------------------------------------------------------------------------
def init_params(key, filters, pools, kernel_size):
    params = {'up_w': [], 'up_b': [], 'blocks': []}
    keys = jax.random.split(key, 6 * len(pools))
    ki = [0]

    def nxt():
        k = keys[ki[0]]
        ki[0] += 1
        return k

    for i in range(len(pools)):
        cin, cout = filters[i], filters[i + 1]
        K = pools[i]
        bound = 1.0 / math.sqrt(cin * K)
        params['up_w'].append(jax.random.uniform(nxt(), (K, cin, cout), jnp.float32, -bound, bound))
        params['up_b'].append(jax.random.uniform(nxt(), (cout,), jnp.float32, -bound, bound))

        blk = {}
        K5 = kernel_size
        b1 = 1.0 / math.sqrt(cin * K5)
        blk['w1'] = jax.random.uniform(nxt(), (K5, cin, cout), jnp.float32, -b1, b1)
        blk['b1'] = jax.random.uniform(nxt(), (cout,), jnp.float32, -b1, b1)
        blk['g1'] = jnp.ones((cout,), jnp.float32)
        blk['be1'] = jnp.zeros((cout,), jnp.float32)
        b2 = 1.0 / math.sqrt(cout * K5)
        blk['w2'] = jax.random.uniform(nxt(), (K5, cout, cout), jnp.float32, -b2, b2)
        blk['b2'] = jax.random.uniform(nxt(), (cout,), jnp.float32, -b2, b2)
        blk['g2'] = jnp.ones((cout,), jnp.float32)
        blk['be2'] = jnp.zeros((cout,), jnp.float32)
        params['blocks'].append(blk)
    return params


# ----------------------------------------------------------------------------
if __name__ == "__main__":
    key = jax.random.PRNGKey(0)
    B = 2
    filters = (32, 16, 8, 4)          # scaled-down version of (1024, 512, 256, 128)
    pools = (2, 2, 3)
    kernel_size = 5
    T0 = 8

    k_x, k_e0, k_e1, k_e2, k_p = jax.random.split(key, 5)
    # PyTorch layout (B, C, T)
    x = jax.random.normal(k_x, (B, filters[0], T0), jnp.float32)
    # encoder skip features (B, C_enc, T_enc); T_enc >= decoder T so crop is a pure crop
    enc0 = jax.random.normal(k_e0, (B, filters[1], 20), jnp.float32)
    enc1 = jax.random.normal(k_e1, (B, filters[2], 40), jnp.float32)
    enc2 = jax.random.normal(k_e2, (B, filters[3], 110), jnp.float32)
    encblocks = [enc0, enc1, enc2]

    params = init_params(k_p, filters, pools, kernel_size)

    out = decoder_forward(x, encblocks, params, pools=pools)
    out = jax.block_until_ready(out)

    # expected time length: ((8*2+1)*2+1)*3 = 105
    assert out.shape == (B, filters[-1], 105), out.shape
    assert bool(jnp.all(jnp.isfinite(out)))
    print("KERNEL_OK")
</pallas_src>

<mosaic_0001>
module attributes {stable_mosaic.version = 11 : i64} {
  func.func @kernel(%arg0: memref<16x128xbf16, #tpu.memory_space<vmem>>, %arg1: memref<42x128xf32, #tpu.memory_space<vmem>>, %arg2: memref<2x17x8xbf16, #tpu.memory_space<vmem>>, %arg3: memref<128x256xbf16, #tpu.memory_space<vmem>>, %arg4: memref<1x128xf32, #tpu.memory_space<vmem>>, %arg5: memref<5x128x128xbf16, #tpu.memory_space<vmem>>, %arg6: memref<5x128x128xbf16, #tpu.memory_space<vmem>>, %arg7: memref<1x128xf32, #tpu.memory_space<vmem>>, %arg8: memref<1x128xf32, #tpu.memory_space<vmem>>, %arg9: memref<1x128xf32, #tpu.memory_space<vmem>>, %arg10: memref<5x128x128xbf16, #tpu.memory_space<vmem>>, %arg11: memref<1x128xf32, #tpu.memory_space<vmem>>, %arg12: memref<1x128xf32, #tpu.memory_space<vmem>>, %arg13: memref<1x128xf32, #tpu.memory_space<vmem>>, %arg14: memref<2x17x128xf32, #tpu.memory_space<vmem>>, %arg15: memref<42x128xf32, #tpu.memory_space<vmem>>) attributes {dimension_semantics = [], scalar_prefetch = 0 : i64, scratch_operands = 1 : i64, tpu.core_type = #tpu.core_type<tc>} {
    %c0 = arith.constant 0 : index
    %c0_0 = arith.constant 0 : index
    %c0_1 = arith.constant 0 : index
    %0 = vector.load %arg2[%c0, %c0_0, %c0_1] : memref<2x17x8xbf16, #tpu.memory_space<vmem>>, vector<2x17x8xbf16>
    %c0_2 = arith.constant 0 : index
    %c0_3 = arith.constant 0 : index
    %1 = vector.load %arg4[%c0_2, %c0_3] : memref<1x128xf32, #tpu.memory_space<vmem>>, vector<1x128xf32>
    %c0_4 = arith.constant 0 : index
    %c0_5 = arith.constant 0 : index
    %2 = vector.load %arg7[%c0_4, %c0_5] : memref<1x128xf32, #tpu.memory_space<vmem>>, vector<1x128xf32>
    %c0_6 = arith.constant 0 : index
    %c0_7 = arith.constant 0 : index
    %3 = vector.load %arg8[%c0_6, %c0_7] : memref<1x128xf32, #tpu.memory_space<vmem>>, vector<1x128xf32>
    %c0_8 = arith.constant 0 : index
    %c0_9 = arith.constant 0 : index
    %4 = vector.load %arg9[%c0_8, %c0_9] : memref<1x128xf32, #tpu.memory_space<vmem>>, vector<1x128xf32>
    %c0_10 = arith.constant 0 : index
    %c0_11 = arith.constant 0 : index
    %5 = vector.load %arg11[%c0_10, %c0_11] : memref<1x128xf32, #tpu.memory_space<vmem>>, vector<1x128xf32>
    %c0_12 = arith.constant 0 : index
    %c0_13 = arith.constant 0 : index
    %6 = vector.load %arg12[%c0_12, %c0_13] : memref<1x128xf32, #tpu.memory_space<vmem>>, vector<1x128xf32>
    %c0_14 = arith.constant 0 : index
    %c0_15 = arith.constant 0 : index
    %7 = vector.load %arg13[%c0_14, %c0_15] : memref<1x128xf32, #tpu.memory_space<vmem>>, vector<1x128xf32>
    %c0_16 = arith.constant 0 : index
    %c0_17 = arith.constant 0 : index
    %8 = vector.load %arg0[%c0_16, %c0_17] : memref<16x128xbf16, #tpu.memory_space<vmem>>, vector<16x128xbf16>
    %c0_18 = arith.constant 0 : index
    %c0_19 = arith.constant 0 : index
    %9 = vector.load %arg3[%c0_18, %c0_19] : memref<128x256xbf16, #tpu.memory_space<vmem>>, vector<128x256xbf16>
    %cst = arith.constant dense<0.000000e+00> : vector<16x256xf32>
    %10 = tpu.matmul %8, %9, %cst {dimension_numbers = #tpu.dot_dimension_numbers<[1], [0], [0], [1], [0, 0, 1, 1], [], []>} : vector<16x128xbf16>, vector<128x256xbf16>, vector<16x256xf32> -> vector<16x256xf32>
    %cst_20 = arith.constant 0.000000e+00 : f32
    %11 = vector.broadcast %cst_20 : f32 to vector<42x128xf32>
    %c0_21 = arith.constant 0 : index
    %c0_22 = arith.constant 0 : index
    %12 = vector.load %arg15[%c0_21, %c0_22] : memref<42x128xf32, #tpu.memory_space<vmem>>, vector<42x128xf32>
    tpu.vector_store %arg15[%c0_21, %c0_22], %11 {strides = array<i32>} : memref<42x128xf32, #tpu.memory_space<vmem>>, vector<42x128xf32>,
    %cst_23 = arith.constant 0.000000e+00 : f32
    %13 = vector.broadcast %cst_23 : f32 to vector<17x128xf32>
    %14 = vector.extract_strided_slice %10 {offsets = [0, 0], sizes = [8, 128], strides = [1, 1]} : vector<16x256xf32> to vector<8x128xf32>
    %15 = arith.truncf %14 : vector<8x128xf32> to vector<8x128xbf16>
    %16 = vector.extract_strided_slice %0 {offsets = [0, 0, 0], sizes = [1, 17, 8], strides = [1, 1, 1]} : vector<2x17x8xbf16> to vector<1x17x8xbf16>
    %17 = vector.shape_cast %16 : vector<1x17x8xbf16> to vector<17x8xbf16>
    %cst_24 = arith.constant dense<0.000000e+00> : vector<17x128xf32>
    %18 = tpu.matmul %17, %15, %cst_24 {dimension_numbers = #tpu.dot_dimension_numbers<[1], [0], [0], [1], [0, 0, 1, 1], [], []>} : vector<17x8xbf16>, vector<8x128xbf16>, vector<17x128xf32> -> vector<17x128xf32>
    %19 = arith.addf %13, %18 : vector<17x128xf32>
    %20 = vector.extract_strided_slice %10 {offsets = [0, 128], sizes = [8, 128], strides = [1, 1]} : vector<16x256xf32> to vector<8x128xf32>
    %21 = arith.truncf %20 : vector<8x128xf32> to vector<8x128xbf16>
    %22 = vector.extract_strided_slice %0 {offsets = [1, 0, 0], sizes = [1, 17, 8], strides = [1, 1, 1]} : vector<2x17x8xbf16> to vector<1x17x8xbf16>
    %23 = vector.shape_cast %22 : vector<1x17x8xbf16> to vector<17x8xbf16>
    %cst_25 = arith.constant dense<0.000000e+00> : vector<17x128xf32>
    %24 = tpu.matmul %23, %21, %cst_25 {dimension_numbers = #tpu.dot_dimension_numbers<[1], [0], [0], [1], [0, 0, 1, 1], [], []>} : vector<17x8xbf16>, vector<8x128xbf16>, vector<17x128xf32> -> vector<17x128xf32>
    %25 = arith.addf %19, %24 : vector<17x128xf32>
    %26 = vector.broadcast %1 : vector<1x128xf32> to vector<17x128xf32>
    %27 = arith.addf %25, %26 : vector<17x128xf32>
    %c2 = arith.constant 2 : index
    %c0_26 = arith.constant 0 : index
    %28 = vector.load %arg15[%c2, %c0_26] : memref<42x128xf32, #tpu.memory_space<vmem>>, vector<17x128xf32>
    tpu.vector_store %arg15[%c2, %c0_26], %27 {strides = array<i32>} : memref<42x128xf32, #tpu.memory_space<vmem>>, vector<17x128xf32>,
    %cst_27 = arith.constant 0.000000e+00 : f32
    %29 = vector.broadcast %cst_27 : f32 to vector<17x128xf32>
    %30 = vector.extract_strided_slice %10 {offsets = [8, 0], sizes = [8, 128], strides = [1, 1]} : vector<16x256xf32> to vector<8x128xf32>
    %31 = arith.truncf %30 : vector<8x128xf32> to vector<8x128xbf16>
    %32 = vector.extract_strided_slice %0 {offsets = [0, 0, 0], sizes = [1, 17, 8], strides = [1, 1, 1]} : vector<2x17x8xbf16> to vector<1x17x8xbf16>
    %33 = vector.shape_cast %32 : vector<1x17x8xbf16> to vector<17x8xbf16>
    %cst_28 = arith.constant dense<0.000000e+00> : vector<17x128xf32>
    %34 = tpu.matmul %33, %31, %cst_28 {dimension_numbers = #tpu.dot_dimension_numbers<[1], [0], [0], [1], [0, 0, 1, 1], [], []>} : vector<17x8xbf16>, vector<8x128xbf16>, vector<17x128xf32> -> vector<17x128xf32>
    %35 = arith.addf %29, %34 : vector<17x128xf32>
    %36 = vector.extract_strided_slice %10 {offsets = [8, 128], sizes = [8, 128], strides = [1, 1]} : vector<16x256xf32> to vector<8x128xf32>
    %37 = arith.truncf %36 : vector<8x128xf32> to vector<8x128xbf16>
    %38 = vector.extract_strided_slice %0 {offsets = [1, 0, 0], sizes = [1, 17, 8], strides = [1, 1, 1]} : vector<2x17x8xbf16> to vector<1x17x8xbf16>
    %39 = vector.shape_cast %38 : vector<1x17x8xbf16> to vector<17x8xbf16>
    %cst_29 = arith.constant dense<0.000000e+00> : vector<17x128xf32>
    %40 = tpu.matmul %39, %37, %cst_29 {dimension_numbers = #tpu.dot_dimension_numbers<[1], [0], [0], [1], [0, 0, 1, 1], [], []>} : vector<17x8xbf16>, vector<8x128xbf16>, vector<17x128xf32> -> vector<17x128xf32>
    %41 = arith.addf %35, %40 : vector<17x128xf32>
    %42 = vector.broadcast %1 : vector<1x128xf32> to vector<17x128xf32>
    %43 = arith.addf %41, %42 : vector<17x128xf32>
    %c23 = arith.constant 23 : index
    %c0_30 = arith.constant 0 : index
    %44 = vector.load %arg15[%c23, %c0_30] : memref<42x128xf32, #tpu.memory_space<vmem>>, vector<17x128xf32>
    tpu.vector_store %arg15[%c23, %c0_30], %43 {strides = array<i32>} : memref<42x128xf32, #tpu.memory_space<vmem>>, vector<17x128xf32>,
    %cst_31 = arith.constant 0.000000e+00 : f32
    %45 = vector.broadcast %cst_31 : f32 to vector<38x128xf32>
    %c0_32 = arith.constant 0 : index
    %c0_33 = arith.constant 0 : index
    %46 = vector.load %arg15[%c0_32, %c0_33] : memref<42x128xf32, #tpu.memory_space<vmem>>, vector<38x128xf32>
    %47 = arith.truncf %46 : vector<38x128xf32> to vector<38x128xbf16>
    %c0_34 = arith.constant 0 : index
    %c0_35 = arith.constant 0 : index
    %c0_36 = arith.constant 0 : index
    %48 = vector.load %arg5[%c0_34, %c0_35, %c0_36] : memref<5x128x128xbf16, #tpu.memory_space<vmem>>, vector<1x128x128xbf16>
    %49 = vector.shape_cast %48 : vector<1x128x128xbf16> to vector<128x128xbf16>
    %cst_37 = arith.constant dense<0.000000e+00> : vector<38x128xf32>
    %50 = tpu.matmul %47, %49, %cst_37 {dimension_numbers = #tpu.dot_dimension_numbers<[1], [0], [0], [1], [0, 0, 1, 1], [], []>} : vector<38x128xbf16>, vector<128x128xbf16>, vector<38x128xf32> -> vector<38x128xf32>
    %51 = arith.addf %45, %50 : vector<38x128xf32>
    %c0_38 = arith.constant 0 : index
    %c0_39 = arith.constant 0 : index
    %52 = vector.load %arg1[%c0_38, %c0_39] : memref<42x128xf32, #tpu.memory_space<vmem>>, vector<38x128xf32>
    %53 = arith.truncf %52 : vector<38x128xf32> to vector<38x128xbf16>
    %c0_40 = arith.constant 0 : index
    %c0_41 = arith.constant 0 : index
    %c0_42 = arith.constant 0 : index
    %54 = vector.load %arg6[%c0_40, %c0_41, %c0_42] : memref<5x128x128xbf16, #tpu.memory_space<vmem>>, vector<1x128x128xbf16>
    %55 = vector.shape_cast %54 : vector<1x128x128xbf16> to vector<128x128xbf16>
    %cst_43 = arith.constant dense<0.000000e+00> : vector<38x128xf32>
    %56 = tpu.matmul %53, %55, %cst_43 {dimension_numbers = #tpu.dot_dimension_numbers<[1], [0], [0], [1], [0, 0, 1, 1], [], []>} : vector<38x128xbf16>, vector<128x128xbf16>, vector<38x128xf32> -> vector<38x128xf32>
    %57 = arith.addf %51, %56 : vector<38x128xf32>
    %c1 = arith.constant 1 : index
    %c0_44 = arith.constant 0 : index
    %58 = vector.load %arg15[%c1, %c0_44] : memref<42x128xf32, #tpu.memory_space<vmem>>, vector<38x128xf32>
    %59 = arith.truncf %58 : vector<38x128xf32> to vector<38x128xbf16>
    %c1_45 = arith.constant 1 : index
    %c0_46 = arith.constant 0 : index
    %c0_47 = arith.constant 0 : index
    %60 = vector.load %arg5[%c1_45, %c0_46, %c0_47] : memref<5x128x128xbf16, #tpu.memory_space<vmem>>, vector<1x128x128xbf16>
    %61 = vector.shape_cast %60 : vector<1x128x128xbf16> to vector<128x128xbf16>
    %cst_48 = arith.constant dense<0.000000e+00> : vector<38x128xf32>
    %62 = tpu.matmul %59, %61, %cst_48 {dimension_numbers = #tpu.dot_dimension_numbers<[1], [0], [0], [1], [0, 0, 1, 1], [], []>} : vector<38x128xbf16>, vector<128x128xbf16>, vector<38x128xf32> -> vector<38x128xf32>
    %63 = arith.addf %57, %62 : vector<38x128xf32>
    %c1_49 = arith.constant 1 : index
    %c0_50 = arith.constant 0 : index
    %64 = vector.load %arg1[%c1_49, %c0_50] : memref<42x128xf32, #tpu.memory_space<vmem>>, vector<38x128xf32>
    %65 = arith.truncf %64 : vector<38x128xf32> to vector<38x128xbf16>
    %c1_51 = arith.constant 1 : index
    %c0_52 = arith.constant 0 : index
    %c0_53 = arith.constant 0 : index
    %66 = vector.load %arg6[%c1_51, %c0_52, %c0_53] : memref<5x128x128xbf16, #tpu.memory_space<vmem>>, vector<1x128x128xbf16>
    %67 = vector.shape_cast %66 : vector<1x128x128xbf16> to vector<128x128xbf16>
    %cst_54 = arith.constant dense<0.000000e+00> : vector<38x128xf32>
    %68 = tpu.matmul %65, %67, %cst_54 {dimension_numbers = #tpu.dot_dimension_numbers<[1], [0], [0], [1], [0, 0, 1, 1], [], []>} : vector<38x128xbf16>, vector<128x128xbf16>, vector<38x128xf32> -> vector<38x128xf32>
    %69 = arith.addf %63, %68 : vector<38x128xf32>
    %c2_55 = arith.constant 2 : index
    %c0_56 = arith.constant 0 : index
    %70 = vector.load %arg15[%c2_55, %c0_56] : memref<42x128xf32, #tpu.memory_space<vmem>>, vector<38x128xf32>
    %71 = arith.truncf %70 : vector<38x128xf32> to vector<38x128xbf16>
    %c2_57 = arith.constant 2 : index
    %c0_58 = arith.constant 0 : index
    %c0_59 = arith.constant 0 : index
    %72 = vector.load %arg5[%c2_57, %c0_58, %c0_59] : memref<5x128x128xbf16, #tpu.memory_space<vmem>>, vector<1x128x128xbf16>
    %73 = vector.shape_cast %72 : vector<1x128x128xbf16> to vector<128x128xbf16>
    %cst_60 = arith.constant dense<0.000000e+00> : vector<38x128xf32>
    %74 = tpu.matmul %71, %73, %cst_60 {dimension_numbers = #tpu.dot_dimension_numbers<[1], [0], [0], [1], [0, 0, 1, 1], [], []>} : vector<38x128xbf16>, vector<128x128xbf16>, vector<38x128xf32> -> vector<38x128xf32>
    %75 = arith.addf %69, %74 : vector<38x128xf32>
    %c2_61 = arith.constant 2 : index
    %c0_62 = arith.constant 0 : index
    %76 = vector.load %arg1[%c2_61, %c0_62] : memref<42x128xf32, #tpu.memory_space<vmem>>, vector<38x128xf32>
    %77 = arith.truncf %76 : vector<38x128xf32> to vector<38x128xbf16>
    %c2_63 = arith.constant 2 : index
    %c0_64 = arith.constant 0 : index
    %c0_65 = arith.constant 0 : index
    %78 = vector.load %arg6[%c2_63, %c0_64, %c0_65] : memref<5x128x128xbf16, #tpu.memory_space<vmem>>, vector<1x128x128xbf16>
    %79 = vector.shape_cast %78 : vector<1x128x128xbf16> to vector<128x128xbf16>
    %cst_66 = arith.constant dense<0.000000e+00> : vector<38x128xf32>
    %80 = tpu.matmul %77, %79, %cst_66 {dimension_numbers = #tpu.dot_dimension_numbers<[1], [0], [0], [1], [0, 0, 1, 1], [], []>} : vector<38x128xbf16>, vector<128x128xbf16>, vector<38x128xf32> -> vector<38x128xf32>
    %81 = arith.addf %75, %80 : vector<38x128xf32>
    %c3 = arith.constant 3 : index
    %c0_67 = arith.constant 0 : index
    %82 = vector.load %arg15[%c3, %c0_67] : memref<42x128xf32, #tpu.memory_space<vmem>>, vector<38x128xf32>
    %83 = arith.truncf %82 : vector<38x128xf32> to vector<38x128xbf16>
    %c3_68 = arith.constant 3 : index
    %c0_69 = arith.constant 0 : index
    %c0_70 = arith.constant 0 : index
    %84 = vector.load %arg5[%c3_68, %c0_69, %c0_70] : memref<5x128x128xbf16, #tpu.memory_space<vmem>>, vector<1x128x128xbf16>
    %85 = vector.shape_cast %84 : vector<1x128x128xbf16> to vector<128x128xbf16>
    %cst_71 = arith.constant dense<0.000000e+00> : vector<38x128xf32>
    %86 = tpu.matmul %83, %85, %cst_71 {dimension_numbers = #tpu.dot_dimension_numbers<[1], [0], [0], [1], [0, 0, 1, 1], [], []>} : vector<38x128xbf16>, vector<128x128xbf16>, vector<38x128xf32> -> vector<38x128xf32>
    %87 = arith.addf %81, %86 : vector<38x128xf32>
    %c3_72 = arith.constant 3 : index
    %c0_73 = arith.constant 0 : index
    %88 = vector.load %arg1[%c3_72, %c0_73] : memref<42x128xf32, #tpu.memory_space<vmem>>, vector<38x128xf32>
    %89 = arith.truncf %88 : vector<38x128xf32> to vector<38x128xbf16>
    %c3_74 = arith.constant 3 : index
    %c0_75 = arith.constant 0 : index
    %c0_76 = arith.constant 0 : index
    %90 = vector.load %arg6[%c3_74, %c0_75, %c0_76] : memref<5x128x128xbf16, #tpu.memory_space<vmem>>, vector<1x128x128xbf16>
    %91 = vector.shape_cast %90 : vector<1x128x128xbf16> to vector<128x128xbf16>
    %cst_77 = arith.constant dense<0.000000e+00> : vector<38x128xf32>
    %92 = tpu.matmul %89, %91, %cst_77 {dimension_numbers = #tpu.dot_dimension_numbers<[1], [0], [0], [1], [0, 0, 1, 1], [], []>} : vector<38x128xbf16>, vector<128x128xbf16>, vector<38x128xf32> -> vector<38x128xf32>
    %93 = arith.addf %87, %92 : vector<38x128xf32>
    %c4 = arith.constant 4 : index
    %c0_78 = arith.constant 0 : index
    %94 = vector.load %arg15[%c4, %c0_78] : memref<42x128xf32, #tpu.memory_space<vmem>>, vector<38x128xf32>
    %95 = arith.truncf %94 : vector<38x128xf32> to vector<38x128xbf16>
    %c4_79 = arith.constant 4 : index
    %c0_80 = arith.constant 0 : index
    %c0_81 = arith.constant 0 : index
    %96 = vector.load %arg5[%c4_79, %c0_80, %c0_81] : memref<5x128x128xbf16, #tpu.memory_space<vmem>>, vector<1x128x128xbf16>
    %97 = vector.shape_cast %96 : vector<1x128x128xbf16> to vector<128x128xbf16>
    %cst_82 = arith.constant dense<0.000000e+00> : vector<38x128xf32>
    %98 = tpu.matmul %95, %97, %cst_82 {dimension_numbers = #tpu.dot_dimension_numbers<[1], [0], [0], [1], [0, 0, 1, 1], [], []>} : vector<38x128xbf16>, vector<128x128xbf16>, vector<38x128xf32> -> vector<38x128xf32>
    %99 = arith.addf %93, %98 : vector<38x128xf32>
    %c4_83 = arith.constant 4 : index
    %c0_84 = arith.constant 0 : index
    %100 = vector.load %arg1[%c4_83, %c0_84] : memref<42x128xf32, #tpu.memory_space<vmem>>, vector<38x128xf32>
    %101 = arith.truncf %100 : vector<38x128xf32> to vector<38x128xbf16>
    %c4_85 = arith.constant 4 : index
    %c0_86 = arith.constant 0 : index
    %c0_87 = arith.constant 0 : index
    %102 = vector.load %arg6[%c4_85, %c0_86, %c0_87] : memref<5x128x128xbf16, #tpu.memory_space<vmem>>, vector<1x128x128xbf16>
    %103 = vector.shape_cast %102 : vector<1x128x128xbf16> to vector<128x128xbf16>
    %cst_88 = arith.constant dense<0.000000e+00> : vector<38x128xf32>
    %104 = tpu.matmul %101, %103, %cst_88 {dimension_numbers = #tpu.dot_dimension_numbers<[1], [0], [0], [1], [0, 0, 1, 1], [], []>} : vector<38x128xbf16>, vector<128x128xbf16>, vector<38x128xf32> -> vector<38x128xf32>
    %105 = arith.addf %99, %104 : vector<38x128xf32>
    %106 = vector.broadcast %2 : vector<1x128xf32> to vector<38x128xf32>
    %107 = arith.addf %105, %106 : vector<38x128xf32>
    %cst_89 = arith.constant 0.000000e+00 : f32
    %108 = vector.broadcast %cst_89 : f32 to vector<38x128xf32>
    %109 = arith.maximumf %107, %108 : vector<38x128xf32>
    %cst_90 = arith.constant 0.000000e+00 : f32
    %110 = vector.broadcast %cst_90 : f32 to vector<1x128xf32>
    %cst_91 = arith.constant 0.000000e+00 : f32
    %111 = vector.broadcast %cst_91 : f32 to vector<1x128xf32>
    %112 = vector.extract_strided_slice %109 {offsets = [0, 0], sizes = [17, 128], strides = [1, 1]} : vector<38x128xf32> to vector<17x128xf32>
    %cst_92 = arith.constant dense<0.000000e+00> : vector<128xf32>
    %113 = vector.multi_reduction <add>, %112, %cst_92 [0] : vector<17x128xf32> to vector<128xf32>
    %114 = vector.shape_cast %113 : vector<128xf32> to vector<1x128xf32>
    %115 = arith.addf %110, %114 : vector<1x128xf32>
    %116 = arith.mulf %112, %112 : vector<17x128xf32>
    %cst_93 = arith.constant dense<0.000000e+00> : vector<128xf32>
    %117 = vector.multi_reduction <add>, %116, %cst_93 [0] : vector<17x128xf32> to vector<128xf32>
    %118 = vector.shape_cast %117 : vector<128xf32> to vector<1x128xf32>
    %119 = arith.addf %111, %118 : vector<1x128xf32>
    %120 = vector.extract_strided_slice %109 {offsets = [21, 0], sizes = [17, 128], strides = [1, 1]} : vector<38x128xf32> to vector<17x128xf32>
    %cst_94 = arith.constant dense<0.000000e+00> : vector<128xf32>
    %121 = vector.multi_reduction <add>, %120, %cst_94 [0] : vector<17x128xf32> to vector<128xf32>
    %122 = vector.shape_cast %121 : vector<128xf32> to vector<1x128xf32>
    %123 = arith.addf %115, %122 : vector<1x128xf32>
    %124 = arith.mulf %120, %120 : vector<17x128xf32>
    %cst_95 = arith.constant dense<0.000000e+00> : vector<128xf32>
    %125 = vector.multi_reduction <add>, %124, %cst_95 [0] : vector<17x128xf32> to vector<128xf32>
    %126 = vector.shape_cast %125 : vector<128xf32> to vector<1x128xf32>
    %127 = arith.addf %119, %126 : vector<1x128xf32>
    %cst_96 = arith.constant 3.400000e+01 : f32
    %128 = vector.broadcast %cst_96 : f32 to vector<1x128xf32>
    %129 = arith.divf %123, %128 : vector<1x128xf32>
    %cst_97 = arith.constant 3.400000e+01 : f32
    %130 = vector.broadcast %cst_97 : f32 to vector<1x128xf32>
    %131 = arith.divf %127, %130 : vector<1x128xf32>
    %132 = arith.mulf %129, %129 : vector<1x128xf32>
    %133 = arith.subf %131, %132 : vector<1x128xf32>
    %cst_98 = arith.constant 0.000000e+00 : f32
    %134 = vector.broadcast %cst_98 : f32 to vector<1x128xf32>
    %135 = arith.maximumf %133, %134 : vector<1x128xf32>
    %cst_99 = arith.constant 9.99999974E-6 : f32
    %136 = vector.broadcast %cst_99 : f32 to vector<1x128xf32>
    %137 = arith.addf %135, %136 : vector<1x128xf32>
    %138 = math.rsqrt %137 : vector<1x128xf32>
    %139 = arith.mulf %138, %3 : vector<1x128xf32>
    %140 = vector.extract_strided_slice %109 {offsets = [0, 0], sizes = [17, 128], strides = [1, 1]} : vector<38x128xf32> to vector<17x128xf32>
    %141 = vector.broadcast %129 : vector<1x128xf32> to vector<17x128xf32>
    %142 = arith.subf %140, %141 : vector<17x128xf32>
    %143 = vector.broadcast %139 : vector<1x128xf32> to vector<17x128xf32>
    %144 = arith.mulf %142, %143 : vector<17x128xf32>
    %145 = vector.broadcast %4 : vector<1x128xf32> to vector<17x128xf32>
    %146 = arith.addf %144, %145 : vector<17x128xf32>
    %c2_100 = arith.constant 2 : index
    %c0_101 = arith.constant 0 : index
    %147 = vector.load %arg15[%c2_100, %c0_101] : memref<42x128xf32, #tpu.memory_space<vmem>>, vector<17x128xf32>
    tpu.vector_store %arg15[%c2_100, %c0_101], %146 {strides = array<i32>} : memref<42x128xf32, #tpu.memory_space<vmem>>, vector<17x128xf32>,
    %148 = vector.extract_strided_slice %109 {offsets = [21, 0], sizes = [17, 128], strides = [1, 1]} : vector<38x128xf32> to vector<17x128xf32>
    %149 = vector.broadcast %129 : vector<1x128xf32> to vector<17x128xf32>
    %150 = arith.subf %148, %149 : vector<17x128xf32>
    %151 = vector.broadcast %139 : vector<1x128xf32> to vector<17x128xf32>
    %152 = arith.mulf %150, %151 : vector<17x128xf32>
    %153 = vector.broadcast %4 : vector<1x128xf32> to vector<17x128xf32>
    %154 = arith.addf %152, %153 : vector<17x128xf32>
    %c23_102 = arith.constant 23 : index
    %c0_103 = arith.constant 0 : index
    %155 = vector.load %arg15[%c23_102, %c0_103] : memref<42x128xf32, #tpu.memory_space<vmem>>, vector<17x128xf32>
    tpu.vector_store %arg15[%c23_102, %c0_103], %154 {strides = array<i32>} : memref<42x128xf32, #tpu.memory_space<vmem>>, vector<17x128xf32>,
    %cst_104 = arith.constant 0.000000e+00 : f32
    %156 = vector.broadcast %cst_104 : f32 to vector<38x128xf32>
    %c0_105 = arith.constant 0 : index
    %c0_106 = arith.constant 0 : index
    %157 = vector.load %arg15[%c0_105, %c0_106] : memref<42x128xf32, #tpu.memory_space<vmem>>, vector<38x128xf32>
    %158 = arith.truncf %157 : vector<38x128xf32> to vector<38x128xbf16>
    %c0_107 = arith.constant 0 : index
    %c0_108 = arith.constant 0 : index
    %c0_109 = arith.constant 0 : index
    %159 = vector.load %arg10[%c0_107, %c0_108, %c0_109] : memref<5x128x128xbf16, #tpu.memory_space<vmem>>, vector<1x128x128xbf16>
    %160 = vector.shape_cast %159 : vector<1x128x128xbf16> to vector<128x128xbf16>
    %cst_110 = arith.constant dense<0.000000e+00> : vector<38x128xf32>
    %161 = tpu.matmul %158, %160, %cst_110 {dimension_numbers = #tpu.dot_dimension_numbers<[1], [0], [0], [1], [0, 0, 1, 1], [], []>} : vector<38x128xbf16>, vector<128x128xbf16>, vector<38x128xf32> -> vector<38x128xf32>
    %162 = arith.addf %156, %161 : vector<38x128xf32>
    %c1_111 = arith.constant 1 : index
    %c0_112 = arith.constant 0 : index
    %163 = vector.load %arg15[%c1_111, %c0_112] : memref<42x128xf32, #tpu.memory_space<vmem>>, vector<38x128xf32>
    %164 = arith.truncf %163 : vector<38x128xf32> to vector<38x128xbf16>
    %c1_113 = arith.constant 1 : index
    %c0_114 = arith.constant 0 : index
    %c0_115 = arith.constant 0 : index
    %165 = vector.load %arg10[%c1_113, %c0_114, %c0_115] : memref<5x128x128xbf16, #tpu.memory_space<vmem>>, vector<1x128x128xbf16>
    %166 = vector.shape_cast %165 : vector<1x128x128xbf16> to vector<128x128xbf16>
    %cst_116 = arith.constant dense<0.000000e+00> : vector<38x128xf32>
    %167 = tpu.matmul %164, %166, %cst_116 {dimension_numbers = #tpu.dot_dimension_numbers<[1], [0], [0], [1], [0, 0, 1, 1], [], []>} : vector<38x128xbf16>, vector<128x128xbf16>, vector<38x128xf32> -> vector<38x128xf32>
    %168 = arith.addf %162, %167 : vector<38x128xf32>
    %c2_117 = arith.constant 2 : index
    %c0_118 = arith.constant 0 : index
    %169 = vector.load %arg15[%c2_117, %c0_118] : memref<42x128xf32, #tpu.memory_space<vmem>>, vector<38x128xf32>
    %170 = arith.truncf %169 : vector<38x128xf32> to vector<38x128xbf16>
    %c2_119 = arith.constant 2 : index
    %c0_120 = arith.constant 0 : index
    %c0_121 = arith.constant 0 : index
    %171 = vector.load %arg10[%c2_119, %c0_120, %c0_121] : memref<5x128x128xbf16, #tpu.memory_space<vmem>>, vector<1x128x128xbf16>
    %172 = vector.shape_cast %171 : vector<1x128x128xbf16> to vector<128x128xbf16>
    %cst_122 = arith.constant dense<0.000000e+00> : vector<38x128xf32>
    %173 = tpu.matmul %170, %172, %cst_122 {dimension_numbers = #tpu.dot_dimension_numbers<[1], [0], [0], [1], [0, 0, 1, 1], [], []>} : vector<38x128xbf16>, vector<128x128xbf16>, vector<38x128xf32> -> vector<38x128xf32>
    %174 = arith.addf %168, %173 : vector<38x128xf32>
    %c3_123 = arith.constant 3 : index
    %c0_124 = arith.constant 0 : index
    %175 = vector.load %arg15[%c3_123, %c0_124] : memref<42x128xf32, #tpu.memory_space<vmem>>, vector<38x128xf32>
    %176 = arith.truncf %175 : vector<38x128xf32> to vector<38x128xbf16>
    %c3_125 = arith.constant 3 : index
    %c0_126 = arith.constant 0 : index
    %c0_127 = arith.constant 0 : index
    %177 = vector.load %arg10[%c3_125, %c0_126, %c0_127] : memref<5x128x128xbf16, #tpu.memory_space<vmem>>, vector<1x128x128xbf16>
    %178 = vector.shape_cast %177 : vector<1x128x128xbf16> to vector<128x128xbf16>
    %cst_128 = arith.constant dense<0.000000e+00> : vector<38x128xf32>
    %179 = tpu.matmul %176, %178, %cst_128 {dimension_numbers = #tpu.dot_dimension_numbers<[1], [0], [0], [1], [0, 0, 1, 1], [], []>} : vector<38x128xbf16>, vector<128x128xbf16>, vector<38x128xf32> -> vector<38x128xf32>
    %180 = arith.addf %174, %179 : vector<38x128xf32>
    %c4_129 = arith.constant 4 : index
    %c0_130 = arith.constant 0 : index
    %181 = vector.load %arg15[%c4_129, %c0_130] : memref<42x128xf32, #tpu.memory_space<vmem>>, vector<38x128xf32>
    %182 = arith.truncf %181 : vector<38x128xf32> to vector<38x128xbf16>
    %c4_131 = arith.constant 4 : index
    %c0_132 = arith.constant 0 : index
    %c0_133 = arith.constant 0 : index
    %183 = vector.load %arg10[%c4_131, %c0_132, %c0_133] : memref<5x128x128xbf16, #tpu.memory_space<vmem>>, vector<1x128x128xbf16>
    %184 = vector.shape_cast %183 : vector<1x128x128xbf16> to vector<128x128xbf16>
    %cst_134 = arith.constant dense<0.000000e+00> : vector<38x128xf32>
    %185 = tpu.matmul %182, %184, %cst_134 {dimension_numbers = #tpu.dot_dimension_numbers<[1], [0], [0], [1], [0, 0, 1, 1], [], []>} : vector<38x128xbf16>, vector<128x128xbf16>, vector<38x128xf32> -> vector<38x128xf32>
    %186 = arith.addf %180, %185 : vector<38x128xf32>
    %187 = vector.broadcast %5 : vector<1x128xf32> to vector<38x128xf32>
    %188 = arith.addf %186, %187 : vector<38x128xf32>
    %cst_135 = arith.constant 0.000000e+00 : f32
    %189 = vector.broadcast %cst_135 : f32 to vector<38x128xf32>
    %190 = arith.maximumf %188, %189 : vector<38x128xf32>
    %cst_136 = arith.constant 0.000000e+00 : f32
    %191 = vector.broadcast %cst_136 : f32 to vector<1x128xf32>
    %cst_137 = arith.constant 0.000000e+00 : f32
    %192 = vector.broadcast %cst_137 : f32 to vector<1x128xf32>
    %193 = vector.extract_strided_slice %190 {offsets = [0, 0], sizes = [17, 128], strides = [1, 1]} : vector<38x128xf32> to vector<17x128xf32>
    %cst_138 = arith.constant dense<0.000000e+00> : vector<128xf32>
    %194 = vector.multi_reduction <add>, %193, %cst_138 [0] : vector<17x128xf32> to vector<128xf32>
    %195 = vector.shape_cast %194 : vector<128xf32> to vector<1x128xf32>
    %196 = arith.addf %191, %195 : vector<1x128xf32>
    %197 = arith.mulf %193, %193 : vector<17x128xf32>
    %cst_139 = arith.constant dense<0.000000e+00> : vector<128xf32>
    %198 = vector.multi_reduction <add>, %197, %cst_139 [0] : vector<17x128xf32> to vector<128xf32>
    %199 = vector.shape_cast %198 : vector<128xf32> to vector<1x128xf32>
    %200 = arith.addf %192, %199 : vector<1x128xf32>
    %201 = vector.extract_strided_slice %190 {offsets = [21, 0], sizes = [17, 128], strides = [1, 1]} : vector<38x128xf32> to vector<17x128xf32>
    %cst_140 = arith.constant dense<0.000000e+00> : vector<128xf32>
    %202 = vector.multi_reduction <add>, %201, %cst_140 [0] : vector<17x128xf32> to vector<128xf32>
    %203 = vector.shape_cast %202 : vector<128xf32> to vector<1x128xf32>
    %204 = arith.addf %196, %203 : vector<1x128xf32>
    %205 = arith.mulf %201, %201 : vector<17x128xf32>
    %cst_141 = arith.constant dense<0.000000e+00> : vector<128xf32>
    %206 = vector.multi_reduction <add>, %205, %cst_141 [0] : vector<17x128xf32> to vector<128xf32>
    %207 = vector.shape_cast %206 : vector<128xf32> to vector<1x128xf32>
    %208 = arith.addf %200, %207 : vector<1x128xf32>
    %cst_142 = arith.constant 3.400000e+01 : f32
    %209 = vector.broadcast %cst_142 : f32 to vector<1x128xf32>
    %210 = arith.divf %204, %209 : vector<1x128xf32>
    %cst_143 = arith.constant 3.400000e+01 : f32
    %211 = vector.broadcast %cst_143 : f32 to vector<1x128xf32>
    %212 = arith.divf %208, %211 : vector<1x128xf32>
    %213 = arith.mulf %210, %210 : vector<1x128xf32>
    %214 = arith.subf %212, %213 : vector<1x128xf32>
    %cst_144 = arith.constant 0.000000e+00 : f32
    %215 = vector.broadcast %cst_144 : f32 to vector<1x128xf32>
    %216 = arith.maximumf %214, %215 : vector<1x128xf32>
    %cst_145 = arith.constant 9.99999974E-6 : f32
    %217 = vector.broadcast %cst_145 : f32 to vector<1x128xf32>
    %218 = arith.addf %216, %217 : vector<1x128xf32>
    %219 = math.rsqrt %218 : vector<1x128xf32>
    %220 = arith.mulf %219, %6 : vector<1x128xf32>
    %221 = vector.extract_strided_slice %190 {offsets = [0, 0], sizes = [17, 128], strides = [1, 1]} : vector<38x128xf32> to vector<17x128xf32>
    %222 = vector.broadcast %210 : vector<1x128xf32> to vector<17x128xf32>
    %223 = arith.subf %221, %222 : vector<17x128xf32>
    %224 = vector.broadcast %220 : vector<1x128xf32> to vector<17x128xf32>
    %225 = arith.mulf %223, %224 : vector<17x128xf32>
    %226 = vector.broadcast %7 : vector<1x128xf32> to vector<17x128xf32>
    %227 = arith.addf %225, %226 : vector<17x128xf32>
    %c0_146 = arith.constant 0 : index
    %c0_147 = arith.constant 0 : index
    %c0_148 = arith.constant 0 : index
    %228 = vector.load %arg14[%c0_146, %c0_147, %c0_148] : memref<2x17x128xf32, #tpu.memory_space<vmem>>, vector<1x17x128xf32>
    %229 = vector.shape_cast %228 : vector<1x17x128xf32> to vector<17x128xf32>
    %230 = vector.shape_cast %227 : vector<17x128xf32> to vector<1x17x128xf32>
    tpu.vector_store %arg14[%c0_146, %c0_147, %c0_148], %230 {strides = array<i32>} : memref<2x17x128xf32, #tpu.memory_space<vmem>>, vector<1x17x128xf32>,
    %231 = vector.extract_strided_slice %190 {offsets = [21, 0], sizes = [17, 128], strides = [1, 1]} : vector<38x128xf32> to vector<17x128xf32>
    %232 = vector.broadcast %210 : vector<1x128xf32> to vector<17x128xf32>
    %233 = arith.subf %231, %232 : vector<17x128xf32>
    %234 = vector.broadcast %220 : vector<1x128xf32> to vector<17x128xf32>
    %235 = arith.mulf %233, %234 : vector<17x128xf32>
    %236 = vector.broadcast %7 : vector<1x128xf32> to vector<17x128xf32>
    %237 = arith.addf %235, %236 : vector<17x128xf32>
    %c1_149 = arith.constant 1 : index
    %c0_150 = arith.constant 0 : index
    %c0_151 = arith.constant 0 : index
    %238 = vector.load %arg14[%c1_149, %c0_150, %c0_151] : memref<2x17x128xf32, #tpu.memory_space<vmem>>, vector<1x17x128xf32>
    %239 = vector.shape_cast %238 : vector<1x17x128xf32> to vector<17x128xf32>
    %240 = vector.shape_cast %237 : vector<17x128xf32> to vector<1x17x128xf32>
    tpu.vector_store %arg14[%c1_149, %c0_150, %c0_151], %240 {strides = array<i32>} : memref<2x17x128xf32, #tpu.memory_space<vmem>>, vector<1x17x128xf32>,
    return
  }
}

module attributes {stable_mosaic.version = 11 : i64} {
  func.func @kernel(%arg0: memref<34x128xbf16, #tpu.memory_space<vmem>>, %arg1: memref<78x128xf32, #tpu.memory_space<vmem>>, %arg2: memref<2x35x17xbf16, #tpu.memory_space<vmem>>, %arg3: memref<128x256xbf16, #tpu.memory_space<vmem>>, %arg4: memref<1x128xf32, #tpu.memory_space<vmem>>, %arg5: memref<5x128x128xbf16, #tpu.memory_space<vmem>>, %arg6: memref<5x128x128xbf16, #tpu.memory_space<vmem>>, %arg7: memref<1x128xf32, #tpu.memory_space<vmem>>, %arg8: memref<1x128xf32, #tpu.memory_space<vmem>>, %arg9: memref<1x128xf32, #tpu.memory_space<vmem>>, %arg10: memref<5x128x128xbf16, #tpu.memory_space<vmem>>, %arg11: memref<1x128xf32, #tpu.memory_space<vmem>>, %arg12: memref<1x128xf32, #tpu.memory_space<vmem>>, %arg13: memref<1x128xf32, #tpu.memory_space<vmem>>, %arg14: memref<2x35x128xf32, #tpu.memory_space<vmem>>, %arg15: memref<78x128xf32, #tpu.memory_space<vmem>>) attributes {dimension_semantics = [], scalar_prefetch = 0 : i64, scratch_operands = 1 : i64, tpu.core_type = #tpu.core_type<tc>} {
    %c0 = arith.constant 0 : index
    %c0_0 = arith.constant 0 : index
    %c0_1 = arith.constant 0 : index
    %0 = vector.load %arg2[%c0, %c0_0, %c0_1] : memref<2x35x17xbf16, #tpu.memory_space<vmem>>, vector<2x35x17xbf16>
    %c0_2 = arith.constant 0 : index
    %c0_3 = arith.constant 0 : index
    %1 = vector.load %arg4[%c0_2, %c0_3] : memref<1x128xf32, #tpu.memory_space<vmem>>, vector<1x128xf32>
    %c0_4 = arith.constant 0 : index
    %c0_5 = arith.constant 0 : index
    %2 = vector.load %arg7[%c0_4, %c0_5] : memref<1x128xf32, #tpu.memory_space<vmem>>, vector<1x128xf32>
    %c0_6 = arith.constant 0 : index
    %c0_7 = arith.constant 0 : index
    %3 = vector.load %arg8[%c0_6, %c0_7] : memref<1x128xf32, #tpu.memory_space<vmem>>, vector<1x128xf32>
    %c0_8 = arith.constant 0 : index
    %c0_9 = arith.constant 0 : index
    %4 = vector.load %arg9[%c0_8, %c0_9] : memref<1x128xf32, #tpu.memory_space<vmem>>, vector<1x128xf32>
    %c0_10 = arith.constant 0 : index
    %c0_11 = arith.constant 0 : index
    %5 = vector.load %arg11[%c0_10, %c0_11] : memref<1x128xf32, #tpu.memory_space<vmem>>, vector<1x128xf32>
    %c0_12 = arith.constant 0 : index
    %c0_13 = arith.constant 0 : index
    %6 = vector.load %arg12[%c0_12, %c0_13] : memref<1x128xf32, #tpu.memory_space<vmem>>, vector<1x128xf32>
    %c0_14 = arith.constant 0 : index
    %c0_15 = arith.constant 0 : index
    %7 = vector.load %arg13[%c0_14, %c0_15] : memref<1x128xf32, #tpu.memory_space<vmem>>, vector<1x128xf32>
    %c0_16 = arith.constant 0 : index
    %c0_17 = arith.constant 0 : index
    %8 = vector.load %arg0[%c0_16, %c0_17] : memref<34x128xbf16, #tpu.memory_space<vmem>>, vector<34x128xbf16>
    %c0_18 = arith.constant 0 : index
    %c0_19 = arith.constant 0 : index
    %9 = vector.load %arg3[%c0_18, %c0_19] : memref<128x256xbf16, #tpu.memory_space<vmem>>, vector<128x256xbf16>
    %cst = arith.constant dense<0.000000e+00> : vector<34x256xf32>
    %10 = tpu.matmul %8, %9, %cst {dimension_numbers = #tpu.dot_dimension_numbers<[1], [0], [0], [1], [0, 0, 1, 1], [], []>} : vector<34x128xbf16>, vector<128x256xbf16>, vector<34x256xf32> -> vector<34x256xf32>
    %cst_20 = arith.constant 0.000000e+00 : f32
    %11 = vector.broadcast %cst_20 : f32 to vector<78x128xf32>
    %c0_21 = arith.constant 0 : index
    %c0_22 = arith.constant 0 : index
    %12 = vector.load %arg15[%c0_21, %c0_22] : memref<78x128xf32, #tpu.memory_space<vmem>>, vector<78x128xf32>
    tpu.vector_store %arg15[%c0_21, %c0_22], %11 {strides = array<i32>} : memref<78x128xf32, #tpu.memory_space<vmem>>, vector<78x128xf32>,
    %cst_23 = arith.constant 0.000000e+00 : f32
    %13 = vector.broadcast %cst_23 : f32 to vector<35x128xf32>
    %14 = vector.extract_strided_slice %10 {offsets = [0, 0], sizes = [17, 128], strides = [1, 1]} : vector<34x256xf32> to vector<17x128xf32>
    %15 = arith.truncf %14 : vector<17x128xf32> to vector<17x128xbf16>
    %16 = vector.extract_strided_slice %0 {offsets = [0, 0, 0], sizes = [1, 35, 17], strides = [1, 1, 1]} : vector<2x35x17xbf16> to vector<1x35x17xbf16>
    %17 = vector.shape_cast %16 : vector<1x35x17xbf16> to vector<35x17xbf16>
    %cst_24 = arith.constant dense<0.000000e+00> : vector<35x128xf32>
    %18 = tpu.matmul %17, %15, %cst_24 {dimension_numbers = #tpu.dot_dimension_numbers<[1], [0], [0], [1], [0, 0, 1, 1], [], []>} : vector<35x17xbf16>, vector<17x128xbf16>, vector<35x128xf32> -> vector<35x128xf32>
    %19 = arith.addf %13, %18 : vector<35x128xf32>
    %20 = vector.extract_strided_slice %10 {offsets = [0, 128], sizes = [17, 128], strides = [1, 1]} : vector<34x256xf32> to vector<17x128xf32>
    %21 = arith.truncf %20 : vector<17x128xf32> to vector<17x128xbf16>
    %22 = vector.extract_strided_slice %0 {offsets = [1, 0, 0], sizes = [1, 35, 17], strides = [1, 1, 1]} : vector<2x35x17xbf16> to vector<1x35x17xbf16>
    %23 = vector.shape_cast %22 : vector<1x35x17xbf16> to vector<35x17xbf16>
    %cst_25 = arith.constant dense<0.000000e+00> : vector<35x128xf32>
    %24 = tpu.matmul %23, %21, %cst_25 {dimension_numbers = #tpu.dot_dimension_numbers<[1], [0], [0], [1], [0, 0, 1, 1], [], []>} : vector<35x17xbf16>, vector<17x128xbf16>, vector<35x128xf32> -> vector<35x128xf32>
    %25 = arith.addf %19, %24 : vector<35x128xf32>
    %26 = vector.broadcast %1 : vector<1x128xf32> to vector<35x128xf32>
    %27 = arith.addf %25, %26 : vector<35x128xf32>
    %c2 = arith.constant 2 : index
    %c0_26 = arith.constant 0 : index
    %28 = vector.load %arg15[%c2, %c0_26] : memref<78x128xf32, #tpu.memory_space<vmem>>, vector<35x128xf32>
    tpu.vector_store %arg15[%c2, %c0_26], %27 {strides = array<i32>} : memref<78x128xf32, #tpu.memory_space<vmem>>, vector<35x128xf32>,
    %cst_27 = arith.constant 0.000000e+00 : f32
    %29 = vector.broadcast %cst_27 : f32 to vector<35x128xf32>
    %30 = vector.extract_strided_slice %10 {offsets = [17, 0], sizes = [17, 128], strides = [1, 1]} : vector<34x256xf32> to vector<17x128xf32>
    %31 = arith.truncf %30 : vector<17x128xf32> to vector<17x128xbf16>
    %32 = vector.extract_strided_slice %0 {offsets = [0, 0, 0], sizes = [1, 35, 17], strides = [1, 1, 1]} : vector<2x35x17xbf16> to vector<1x35x17xbf16>
    %33 = vector.shape_cast %32 : vector<1x35x17xbf16> to vector<35x17xbf16>
    %cst_28 = arith.constant dense<0.000000e+00> : vector<35x128xf32>
    %34 = tpu.matmul %33, %31, %cst_28 {dimension_numbers = #tpu.dot_dimension_numbers<[1], [0], [0], [1], [0, 0, 1, 1], [], []>} : vector<35x17xbf16>, vector<17x128xbf16>, vector<35x128xf32> -> vector<35x128xf32>
    %35 = arith.addf %29, %34 : vector<35x128xf32>
    %36 = vector.extract_strided_slice %10 {offsets = [17, 128], sizes = [17, 128], strides = [1, 1]} : vector<34x256xf32> to vector<17x128xf32>
    %37 = arith.truncf %36 : vector<17x128xf32> to vector<17x128xbf16>
    %38 = vector.extract_strided_slice %0 {offsets = [1, 0, 0], sizes = [1, 35, 17], strides = [1, 1, 1]} : vector<2x35x17xbf16> to vector<1x35x17xbf16>
    %39 = vector.shape_cast %38 : vector<1x35x17xbf16> to vector<35x17xbf16>
    %cst_29 = arith.constant dense<0.000000e+00> : vector<35x128xf32>
    %40 = tpu.matmul %39, %37, %cst_29 {dimension_numbers = #tpu.dot_dimension_numbers<[1], [0], [0], [1], [0, 0, 1, 1], [], []>} : vector<35x17xbf16>, vector<17x128xbf16>, vector<35x128xf32> -> vector<35x128xf32>
    %41 = arith.addf %35, %40 : vector<35x128xf32>
    %42 = vector.broadcast %1 : vector<1x128xf32> to vector<35x128xf32>
    %43 = arith.addf %41, %42 : vector<35x128xf32>
    %c41 = arith.constant 41 : index
    %c0_30 = arith.constant 0 : index
    %44 = vector.load %arg15[%c41, %c0_30] : memref<78x128xf32, #tpu.memory_space<vmem>>, vector<35x128xf32>
    tpu.vector_store %arg15[%c41, %c0_30], %43 {strides = array<i32>} : memref<78x128xf32, #tpu.memory_space<vmem>>, vector<35x128xf32>,
    %cst_31 = arith.constant 0.000000e+00 : f32
    %45 = vector.broadcast %cst_31 : f32 to vector<74x128xf32>
    %c0_32 = arith.constant 0 : index
    %c0_33 = arith.constant 0 : index
    %46 = vector.load %arg15[%c0_32, %c0_33] : memref<78x128xf32, #tpu.memory_space<vmem>>, vector<74x128xf32>
    %47 = arith.truncf %46 : vector<74x128xf32> to vector<74x128xbf16>
    %c0_34 = arith.constant 0 : index
    %c0_35 = arith.constant 0 : index
    %c0_36 = arith.constant 0 : index
    %48 = vector.load %arg5[%c0_34, %c0_35, %c0_36] : memref<5x128x128xbf16, #tpu.memory_space<vmem>>, vector<1x128x128xbf16>
    %49 = vector.shape_cast %48 : vector<1x128x128xbf16> to vector<128x128xbf16>
    %cst_37 = arith.constant dense<0.000000e+00> : vector<74x128xf32>
    %50 = tpu.matmul %47, %49, %cst_37 {dimension_numbers = #tpu.dot_dimension_numbers<[1], [0], [0], [1], [0, 0, 1, 1], [], []>} : vector<74x128xbf16>, vector<128x128xbf16>, vector<74x128xf32> -> vector<74x128xf32>
    %51 = arith.addf %45, %50 : vector<74x128xf32>
    %c0_38 = arith.constant 0 : index
    %c0_39 = arith.constant 0 : index
    %52 = vector.load %arg1[%c0_38, %c0_39] : memref<78x128xf32, #tpu.memory_space<vmem>>, vector<74x128xf32>
    %53 = arith.truncf %52 : vector<74x128xf32> to vector<74x128xbf16>
    %c0_40 = arith.constant 0 : index
    %c0_41 = arith.constant 0 : index
    %c0_42 = arith.constant 0 : index
    %54 = vector.load %arg6[%c0_40, %c0_41, %c0_42] : memref<5x128x128xbf16, #tpu.memory_space<vmem>>, vector<1x128x128xbf16>
    %55 = vector.shape_cast %54 : vector<1x128x128xbf16> to vector<128x128xbf16>
    %cst_43 = arith.constant dense<0.000000e+00> : vector<74x128xf32>
    %56 = tpu.matmul %53, %55, %cst_43 {dimension_numbers = #tpu.dot_dimension_numbers<[1], [0], [0], [1], [0, 0, 1, 1], [], []>} : vector<74x128xbf16>, vector<128x128xbf16>, vector<74x128xf32> -> vector<74x128xf32>
    %57 = arith.addf %51, %56 : vector<74x128xf32>
    %c1 = arith.constant 1 : index
    %c0_44 = arith.constant 0 : index
    %58 = vector.load %arg15[%c1, %c0_44] : memref<78x128xf32, #tpu.memory_space<vmem>>, vector<74x128xf32>
    %59 = arith.truncf %58 : vector<74x128xf32> to vector<74x128xbf16>
    %c1_45 = arith.constant 1 : index
    %c0_46 = arith.constant 0 : index
    %c0_47 = arith.constant 0 : index
    %60 = vector.load %arg5[%c1_45, %c0_46, %c0_47] : memref<5x128x128xbf16, #tpu.memory_space<vmem>>, vector<1x128x128xbf16>
    %61 = vector.shape_cast %60 : vector<1x128x128xbf16> to vector<128x128xbf16>
    %cst_48 = arith.constant dense<0.000000e+00> : vector<74x128xf32>
    %62 = tpu.matmul %59, %61, %cst_48 {dimension_numbers = #tpu.dot_dimension_numbers<[1], [0], [0], [1], [0, 0, 1, 1], [], []>} : vector<74x128xbf16>, vector<128x128xbf16>, vector<74x128xf32> -> vector<74x128xf32>
    %63 = arith.addf %57, %62 : vector<74x128xf32>
    %c1_49 = arith.constant 1 : index
    %c0_50 = arith.constant 0 : index
    %64 = vector.load %arg1[%c1_49, %c0_50] : memref<78x128xf32, #tpu.memory_space<vmem>>, vector<74x128xf32>
    %65 = arith.truncf %64 : vector<74x128xf32> to vector<74x128xbf16>
    %c1_51 = arith.constant 1 : index
    %c0_52 = arith.constant 0 : index
    %c0_53 = arith.constant 0 : index
    %66 = vector.load %arg6[%c1_51, %c0_52, %c0_53] : memref<5x128x128xbf16, #tpu.memory_space<vmem>>, vector<1x128x128xbf16>
    %67 = vector.shape_cast %66 : vector<1x128x128xbf16> to vector<128x128xbf16>
    %cst_54 = arith.constant dense<0.000000e+00> : vector<74x128xf32>
    %68 = tpu.matmul %65, %67, %cst_54 {dimension_numbers = #tpu.dot_dimension_numbers<[1], [0], [0], [1], [0, 0, 1, 1], [], []>} : vector<74x128xbf16>, vector<128x128xbf16>, vector<74x128xf32> -> vector<74x128xf32>
    %69 = arith.addf %63, %68 : vector<74x128xf32>
    %c2_55 = arith.constant 2 : index
    %c0_56 = arith.constant 0 : index
    %70 = vector.load %arg15[%c2_55, %c0_56] : memref<78x128xf32, #tpu.memory_space<vmem>>, vector<74x128xf32>
    %71 = arith.truncf %70 : vector<74x128xf32> to vector<74x128xbf16>
    %c2_57 = arith.constant 2 : index
    %c0_58 = arith.constant 0 : index
    %c0_59 = arith.constant 0 : index
    %72 = vector.load %arg5[%c2_57, %c0_58, %c0_59] : memref<5x128x128xbf16, #tpu.memory_space<vmem>>, vector<1x128x128xbf16>
    %73 = vector.shape_cast %72 : vector<1x128x128xbf16> to vector<128x128xbf16>
    %cst_60 = arith.constant dense<0.000000e+00> : vector<74x128xf32>
    %74 = tpu.matmul %71, %73, %cst_60 {dimension_numbers = #tpu.dot_dimension_numbers<[1], [0], [0], [1], [0, 0, 1, 1], [], []>} : vector<74x128xbf16>, vector<128x128xbf16>, vector<74x128xf32> -> vector<74x128xf32>
    %75 = arith.addf %69, %74 : vector<74x128xf32>
    %c2_61 = arith.constant 2 : index
    %c0_62 = arith.constant 0 : index
    %76 = vector.load %arg1[%c2_61, %c0_62] : memref<78x128xf32, #tpu.memory_space<vmem>>, vector<74x128xf32>
    %77 = arith.truncf %76 : vector<74x128xf32> to vector<74x128xbf16>
    %c2_63 = arith.constant 2 : index
    %c0_64 = arith.constant 0 : index
    %c0_65 = arith.constant 0 : index
    %78 = vector.load %arg6[%c2_63, %c0_64, %c0_65] : memref<5x128x128xbf16, #tpu.memory_space<vmem>>, vector<1x128x128xbf16>
    %79 = vector.shape_cast %78 : vector<1x128x128xbf16> to vector<128x128xbf16>
    %cst_66 = arith.constant dense<0.000000e+00> : vector<74x128xf32>
    %80 = tpu.matmul %77, %79, %cst_66 {dimension_numbers = #tpu.dot_dimension_numbers<[1], [0], [0], [1], [0, 0, 1, 1], [], []>} : vector<74x128xbf16>, vector<128x128xbf16>, vector<74x128xf32> -> vector<74x128xf32>
    %81 = arith.addf %75, %80 : vector<74x128xf32>
    %c3 = arith.constant 3 : index
    %c0_67 = arith.constant 0 : index
    %82 = vector.load %arg15[%c3, %c0_67] : memref<78x128xf32, #tpu.memory_space<vmem>>, vector<74x128xf32>
    %83 = arith.truncf %82 : vector<74x128xf32> to vector<74x128xbf16>
    %c3_68 = arith.constant 3 : index
    %c0_69 = arith.constant 0 : index
    %c0_70 = arith.constant 0 : index
    %84 = vector.load %arg5[%c3_68, %c0_69, %c0_70] : memref<5x128x128xbf16, #tpu.memory_space<vmem>>, vector<1x128x128xbf16>
    %85 = vector.shape_cast %84 : vector<1x128x128xbf16> to vector<128x128xbf16>
    %cst_71 = arith.constant dense<0.000000e+00> : vector<74x128xf32>
    %86 = tpu.matmul %83, %85, %cst_71 {dimension_numbers = #tpu.dot_dimension_numbers<[1], [0], [0], [1], [0, 0, 1, 1], [], []>} : vector<74x128xbf16>, vector<128x128xbf16>, vector<74x128xf32> -> vector<74x128xf32>
    %87 = arith.addf %81, %86 : vector<74x128xf32>
    %c3_72 = arith.constant 3 : index
    %c0_73 = arith.constant 0 : index
    %88 = vector.load %arg1[%c3_72, %c0_73] : memref<78x128xf32, #tpu.memory_space<vmem>>, vector<74x128xf32>
    %89 = arith.truncf %88 : vector<74x128xf32> to vector<74x128xbf16>
    %c3_74 = arith.constant 3 : index
    %c0_75 = arith.constant 0 : index
    %c0_76 = arith.constant 0 : index
    %90 = vector.load %arg6[%c3_74, %c0_75, %c0_76] : memref<5x128x128xbf16, #tpu.memory_space<vmem>>, vector<1x128x128xbf16>
    %91 = vector.shape_cast %90 : vector<1x128x128xbf16> to vector<128x128xbf16>
    %cst_77 = arith.constant dense<0.000000e+00> : vector<74x128xf32>
    %92 = tpu.matmul %89, %91, %cst_77 {dimension_numbers = #tpu.dot_dimension_numbers<[1], [0], [0], [1], [0, 0, 1, 1], [], []>} : vector<74x128xbf16>, vector<128x128xbf16>, vector<74x128xf32> -> vector<74x128xf32>
    %93 = arith.addf %87, %92 : vector<74x128xf32>
    %c4 = arith.constant 4 : index
    %c0_78 = arith.constant 0 : index
    %94 = vector.load %arg15[%c4, %c0_78] : memref<78x128xf32, #tpu.memory_space<vmem>>, vector<74x128xf32>
    %95 = arith.truncf %94 : vector<74x128xf32> to vector<74x128xbf16>
    %c4_79 = arith.constant 4 : index
    %c0_80 = arith.constant 0 : index
    %c0_81 = arith.constant 0 : index
    %96 = vector.load %arg5[%c4_79, %c0_80, %c0_81] : memref<5x128x128xbf16, #tpu.memory_space<vmem>>, vector<1x128x128xbf16>
    %97 = vector.shape_cast %96 : vector<1x128x128xbf16> to vector<128x128xbf16>
    %cst_82 = arith.constant dense<0.000000e+00> : vector<74x128xf32>
    %98 = tpu.matmul %95, %97, %cst_82 {dimension_numbers = #tpu.dot_dimension_numbers<[1], [0], [0], [1], [0, 0, 1, 1], [], []>} : vector<74x128xbf16>, vector<128x128xbf16>, vector<74x128xf32> -> vector<74x128xf32>
    %99 = arith.addf %93, %98 : vector<74x128xf32>
    %c4_83 = arith.constant 4 : index
    %c0_84 = arith.constant 0 : index
    %100 = vector.load %arg1[%c4_83, %c0_84] : memref<78x128xf32, #tpu.memory_space<vmem>>, vector<74x128xf32>
    %101 = arith.truncf %100 : vector<74x128xf32> to vector<74x128xbf16>
    %c4_85 = arith.constant 4 : index
    %c0_86 = arith.constant 0 : index
    %c0_87 = arith.constant 0 : index
    %102 = vector.load %arg6[%c4_85, %c0_86, %c0_87] : memref<5x128x128xbf16, #tpu.memory_space<vmem>>, vector<1x128x128xbf16>
    %103 = vector.shape_cast %102 : vector<1x128x128xbf16> to vector<128x128xbf16>
    %cst_88 = arith.constant dense<0.000000e+00> : vector<74x128xf32>
    %104 = tpu.matmul %101, %103, %cst_88 {dimension_numbers = #tpu.dot_dimension_numbers<[1], [0], [0], [1], [0, 0, 1, 1], [], []>} : vector<74x128xbf16>, vector<128x128xbf16>, vector<74x128xf32> -> vector<74x128xf32>
    %105 = arith.addf %99, %104 : vector<74x128xf32>
    %106 = vector.broadcast %2 : vector<1x128xf32> to vector<74x128xf32>
    %107 = arith.addf %105, %106 : vector<74x128xf32>
    %cst_89 = arith.constant 0.000000e+00 : f32
    %108 = vector.broadcast %cst_89 : f32 to vector<74x128xf32>
    %109 = arith.maximumf %107, %108 : vector<74x128xf32>
    %cst_90 = arith.constant 0.000000e+00 : f32
    %110 = vector.broadcast %cst_90 : f32 to vector<1x128xf32>
    %cst_91 = arith.constant 0.000000e+00 : f32
    %111 = vector.broadcast %cst_91 : f32 to vector<1x128xf32>
    %112 = vector.extract_strided_slice %109 {offsets = [0, 0], sizes = [35, 128], strides = [1, 1]} : vector<74x128xf32> to vector<35x128xf32>
    %cst_92 = arith.constant dense<0.000000e+00> : vector<128xf32>
    %113 = vector.multi_reduction <add>, %112, %cst_92 [0] : vector<35x128xf32> to vector<128xf32>
    %114 = vector.shape_cast %113 : vector<128xf32> to vector<1x128xf32>
    %115 = arith.addf %110, %114 : vector<1x128xf32>
    %116 = arith.mulf %112, %112 : vector<35x128xf32>
    %cst_93 = arith.constant dense<0.000000e+00> : vector<128xf32>
    %117 = vector.multi_reduction <add>, %116, %cst_93 [0] : vector<35x128xf32> to vector<128xf32>
    %118 = vector.shape_cast %117 : vector<128xf32> to vector<1x128xf32>
    %119 = arith.addf %111, %118 : vector<1x128xf32>
    %120 = vector.extract_strided_slice %109 {offsets = [39, 0], sizes = [35, 128], strides = [1, 1]} : vector<74x128xf32> to vector<35x128xf32>
    %cst_94 = arith.constant dense<0.000000e+00> : vector<128xf32>
    %121 = vector.multi_reduction <add>, %120, %cst_94 [0] : vector<35x128xf32> to vector<128xf32>
    %122 = vector.shape_cast %121 : vector<128xf32> to vector<1x128xf32>
    %123 = arith.addf %115, %122 : vector<1x128xf32>
    %124 = arith.mulf %120, %120 : vector<35x128xf32>
    %cst_95 = arith.constant dense<0.000000e+00> : vector<128xf32>
    %125 = vector.multi_reduction <add>, %124, %cst_95 [0] : vector<35x128xf32> to vector<128xf32>
    %126 = vector.shape_cast %125 : vector<128xf32> to vector<1x128xf32>
    %127 = arith.addf %119, %126 : vector<1x128xf32>
    %cst_96 = arith.constant 7.000000e+01 : f32
    %128 = vector.broadcast %cst_96 : f32 to vector<1x128xf32>
    %129 = arith.divf %123, %128 : vector<1x128xf32>
    %cst_97 = arith.constant 7.000000e+01 : f32
    %130 = vector.broadcast %cst_97 : f32 to vector<1x128xf32>
    %131 = arith.divf %127, %130 : vector<1x128xf32>
    %132 = arith.mulf %129, %129 : vector<1x128xf32>
    %133 = arith.subf %131, %132 : vector<1x128xf32>
    %cst_98 = arith.constant 0.000000e+00 : f32
    %134 = vector.broadcast %cst_98 : f32 to vector<1x128xf32>
    %135 = arith.maximumf %133, %134 : vector<1x128xf32>
    %cst_99 = arith.constant 9.99999974E-6 : f32
    %136 = vector.broadcast %cst_99 : f32 to vector<1x128xf32>
    %137 = arith.addf %135, %136 : vector<1x128xf32>
    %138 = math.rsqrt %137 : vector<1x128xf32>
    %139 = arith.mulf %138, %3 : vector<1x128xf32>
    %140 = vector.extract_strided_slice %109 {offsets = [0, 0], sizes = [35, 128], strides = [1, 1]} : vector<74x128xf32> to vector<35x128xf32>
    %141 = vector.broadcast %129 : vector<1x128xf32> to vector<35x128xf32>
    %142 = arith.subf %140, %141 : vector<35x128xf32>
    %143 = vector.broadcast %139 : vector<1x128xf32> to vector<35x128xf32>
    %144 = arith.mulf %142, %143 : vector<35x128xf32>
    %145 = vector.broadcast %4 : vector<1x128xf32> to vector<35x128xf32>
    %146 = arith.addf %144, %145 : vector<35x128xf32>
    %c2_100 = arith.constant 2 : index
    %c0_101 = arith.constant 0 : index
    %147 = vector.load %arg15[%c2_100, %c0_101] : memref<78x128xf32, #tpu.memory_space<vmem>>, vector<35x128xf32>
    tpu.vector_store %arg15[%c2_100, %c0_101], %146 {strides = array<i32>} : memref<78x128xf32, #tpu.memory_space<vmem>>, vector<35x128xf32>,
    %148 = vector.extract_strided_slice %109 {offsets = [39, 0], sizes = [35, 128], strides = [1, 1]} : vector<74x128xf32> to vector<35x128xf32>
    %149 = vector.broadcast %129 : vector<1x128xf32> to vector<35x128xf32>
    %150 = arith.subf %148, %149 : vector<35x128xf32>
    %151 = vector.broadcast %139 : vector<1x128xf32> to vector<35x128xf32>
    %152 = arith.mulf %150, %151 : vector<35x128xf32>
    %153 = vector.broadcast %4 : vector<1x128xf32> to vector<35x128xf32>
    %154 = arith.addf %152, %153 : vector<35x128xf32>
    %c41_102 = arith.constant 41 : index
    %c0_103 = arith.constant 0 : index
    %155 = vector.load %arg15[%c41_102, %c0_103] : memref<78x128xf32, #tpu.memory_space<vmem>>, vector<35x128xf32>
    tpu.vector_store %arg15[%c41_102, %c0_103], %154 {strides = array<i32>} : memref<78x128xf32, #tpu.memory_space<vmem>>, vector<35x128xf32>,
    %cst_104 = arith.constant 0.000000e+00 : f32
    %156 = vector.broadcast %cst_104 : f32 to vector<74x128xf32>
    %c0_105 = arith.constant 0 : index
    %c0_106 = arith.constant 0 : index
    %157 = vector.load %arg15[%c0_105, %c0_106] : memref<78x128xf32, #tpu.memory_space<vmem>>, vector<74x128xf32>
    %158 = arith.truncf %157 : vector<74x128xf32> to vector<74x128xbf16>
    %c0_107 = arith.constant 0 : index
    %c0_108 = arith.constant 0 : index
    %c0_109 = arith.constant 0 : index
    %159 = vector.load %arg10[%c0_107, %c0_108, %c0_109] : memref<5x128x128xbf16, #tpu.memory_space<vmem>>, vector<1x128x128xbf16>
    %160 = vector.shape_cast %159 : vector<1x128x128xbf16> to vector<128x128xbf16>
    %cst_110 = arith.constant dense<0.000000e+00> : vector<74x128xf32>
    %161 = tpu.matmul %158, %160, %cst_110 {dimension_numbers = #tpu.dot_dimension_numbers<[1], [0], [0], [1], [0, 0, 1, 1], [], []>} : vector<74x128xbf16>, vector<128x128xbf16>, vector<74x128xf32> -> vector<74x128xf32>
    %162 = arith.addf %156, %161 : vector<74x128xf32>
    %c1_111 = arith.constant 1 : index
    %c0_112 = arith.constant 0 : index
    %163 = vector.load %arg15[%c1_111, %c0_112] : memref<78x128xf32, #tpu.memory_space<vmem>>, vector<74x128xf32>
    %164 = arith.truncf %163 : vector<74x128xf32> to vector<74x128xbf16>
    %c1_113 = arith.constant 1 : index
    %c0_114 = arith.constant 0 : index
    %c0_115 = arith.constant 0 : index
    %165 = vector.load %arg10[%c1_113, %c0_114, %c0_115] : memref<5x128x128xbf16, #tpu.memory_space<vmem>>, vector<1x128x128xbf16>
    %166 = vector.shape_cast %165 : vector<1x128x128xbf16> to vector<128x128xbf16>
    %cst_116 = arith.constant dense<0.000000e+00> : vector<74x128xf32>
    %167 = tpu.matmul %164, %166, %cst_116 {dimension_numbers = #tpu.dot_dimension_numbers<[1], [0], [0], [1], [0, 0, 1, 1], [], []>} : vector<74x128xbf16>, vector<128x128xbf16>, vector<74x128xf32> -> vector<74x128xf32>
    %168 = arith.addf %162, %167 : vector<74x128xf32>
    %c2_117 = arith.constant 2 : index
    %c0_118 = arith.constant 0 : index
    %169 = vector.load %arg15[%c2_117, %c0_118] : memref<78x128xf32, #tpu.memory_space<vmem>>, vector<74x128xf32>
    %170 = arith.truncf %169 : vector<74x128xf32> to vector<74x128xbf16>
    %c2_119 = arith.constant 2 : index
    %c0_120 = arith.constant 0 : index
    %c0_121 = arith.constant 0 : index
    %171 = vector.load %arg10[%c2_119, %c0_120, %c0_121] : memref<5x128x128xbf16, #tpu.memory_space<vmem>>, vector<1x128x128xbf16>
    %172 = vector.shape_cast %171 : vector<1x128x128xbf16> to vector<128x128xbf16>
    %cst_122 = arith.constant dense<0.000000e+00> : vector<74x128xf32>
    %173 = tpu.matmul %170, %172, %cst_122 {dimension_numbers = #tpu.dot_dimension_numbers<[1], [0], [0], [1], [0, 0, 1, 1], [], []>} : vector<74x128xbf16>, vector<128x128xbf16>, vector<74x128xf32> -> vector<74x128xf32>
    %174 = arith.addf %168, %173 : vector<74x128xf32>
    %c3_123 = arith.constant 3 : index
    %c0_124 = arith.constant 0 : index
    %175 = vector.load %arg15[%c3_123, %c0_124] : memref<78x128xf32, #tpu.memory_space<vmem>>, vector<74x128xf32>
    %176 = arith.truncf %175 : vector<74x128xf32> to vector<74x128xbf16>
    %c3_125 = arith.constant 3 : index
    %c0_126 = arith.constant 0 : index
    %c0_127 = arith.constant 0 : index
    %177 = vector.load %arg10[%c3_125, %c0_126, %c0_127] : memref<5x128x128xbf16, #tpu.memory_space<vmem>>, vector<1x128x128xbf16>
    %178 = vector.shape_cast %177 : vector<1x128x128xbf16> to vector<128x128xbf16>
    %cst_128 = arith.constant dense<0.000000e+00> : vector<74x128xf32>
    %179 = tpu.matmul %176, %178, %cst_128 {dimension_numbers = #tpu.dot_dimension_numbers<[1], [0], [0], [1], [0, 0, 1, 1], [], []>} : vector<74x128xbf16>, vector<128x128xbf16>, vector<74x128xf32> -> vector<74x128xf32>
    %180 = arith.addf %174, %179 : vector<74x128xf32>
    %c4_129 = arith.constant 4 : index
    %c0_130 = arith.constant 0 : index
    %181 = vector.load %arg15[%c4_129, %c0_130] : memref<78x128xf32, #tpu.memory_space<vmem>>, vector<74x128xf32>
    %182 = arith.truncf %181 : vector<74x128xf32> to vector<74x128xbf16>
    %c4_131 = arith.constant 4 : index
    %c0_132 = arith.constant 0 : index
    %c0_133 = arith.constant 0 : index
    %183 = vector.load %arg10[%c4_131, %c0_132, %c0_133] : memref<5x128x128xbf16, #tpu.memory_space<vmem>>, vector<1x128x128xbf16>
    %184 = vector.shape_cast %183 : vector<1x128x128xbf16> to vector<128x128xbf16>
    %cst_134 = arith.constant dense<0.000000e+00> : vector<74x128xf32>
    %185 = tpu.matmul %182, %184, %cst_134 {dimension_numbers = #tpu.dot_dimension_numbers<[1], [0], [0], [1], [0, 0, 1, 1], [], []>} : vector<74x128xbf16>, vector<128x128xbf16>, vector<74x128xf32> -> vector<74x128xf32>
    %186 = arith.addf %180, %185 : vector<74x128xf32>
    %187 = vector.broadcast %5 : vector<1x128xf32> to vector<74x128xf32>
    %188 = arith.addf %186, %187 : vector<74x128xf32>
    %cst_135 = arith.constant 0.000000e+00 : f32
    %189 = vector.broadcast %cst_135 : f32 to vector<74x128xf32>
    %190 = arith.maximumf %188, %189 : vector<74x128xf32>
    %cst_136 = arith.constant 0.000000e+00 : f32
    %191 = vector.broadcast %cst_136 : f32 to vector<1x128xf32>
    %cst_137 = arith.constant 0.000000e+00 : f32
    %192 = vector.broadcast %cst_137 : f32 to vector<1x128xf32>
    %193 = vector.extract_strided_slice %190 {offsets = [0, 0], sizes = [35, 128], strides = [1, 1]} : vector<74x128xf32> to vector<35x128xf32>
    %cst_138 = arith.constant dense<0.000000e+00> : vector<128xf32>
    %194 = vector.multi_reduction <add>, %193, %cst_138 [0] : vector<35x128xf32> to vector<128xf32>
    %195 = vector.shape_cast %194 : vector<128xf32> to vector<1x128xf32>
    %196 = arith.addf %191, %195 : vector<1x128xf32>
    %197 = arith.mulf %193, %193 : vector<35x128xf32>
    %cst_139 = arith.constant dense<0.000000e+00> : vector<128xf32>
    %198 = vector.multi_reduction <add>, %197, %cst_139 [0] : vector<35x128xf32> to vector<128xf32>
    %199 = vector.shape_cast %198 : vector<128xf32> to vector<1x128xf32>
    %200 = arith.addf %192, %199 : vector<1x128xf32>
    %201 = vector.extract_strided_slice %190 {offsets = [39, 0], sizes = [35, 128], strides = [1, 1]} : vector<74x128xf32> to vector<35x128xf32>
    %cst_140 = arith.constant dense<0.000000e+00> : vector<128xf32>
    %202 = vector.multi_reduction <add>, %201, %cst_140 [0] : vector<35x128xf32> to vector<128xf32>
    %203 = vector.shape_cast %202 : vector<128xf32> to vector<1x128xf32>
    %204 = arith.addf %196, %203 : vector<1x128xf32>
    %205 = arith.mulf %201, %201 : vector<35x128xf32>
    %cst_141 = arith.constant dense<0.000000e+00> : vector<128xf32>
    %206 = vector.multi_reduction <add>, %205, %cst_141 [0] : vector<35x128xf32> to vector<128xf32>
    %207 = vector.shape_cast %206 : vector<128xf32> to vector<1x128xf32>
    %208 = arith.addf %200, %207 : vector<1x128xf32>
    %cst_142 = arith.constant 7.000000e+01 : f32
    %209 = vector.broadcast %cst_142 : f32 to vector<1x128xf32>
    %210 = arith.divf %204, %209 : vector<1x128xf32>
    %cst_143 = arith.constant 7.000000e+01 : f32
    %211 = vector.broadcast %cst_143 : f32 to vector<1x128xf32>
    %212 = arith.divf %208, %211 : vector<1x128xf32>
    %213 = arith.mulf %210, %210 : vector<1x128xf32>
    %214 = arith.subf %212, %213 : vector<1x128xf32>
    %cst_144 = arith.constant 0.000000e+00 : f32
    %215 = vector.broadcast %cst_144 : f32 to vector<1x128xf32>
    %216 = arith.maximumf %214, %215 : vector<1x128xf32>
    %cst_145 = arith.constant 9.99999974E-6 : f32
    %217 = vector.broadcast %cst_145 : f32 to vector<1x128xf32>
    %218 = arith.addf %216, %217 : vector<1x128xf32>
    %219 = math.rsqrt %218 : vector<1x128xf32>
    %220 = arith.mulf %219, %6 : vector<1x128xf32>
    %221 = vector.extract_strided_slice %190 {offsets = [0, 0], sizes = [35, 128], strides = [1, 1]} : vector<74x128xf32> to vector<35x128xf32>
    %222 = vector.broadcast %210 : vector<1x128xf32> to vector<35x128xf32>
    %223 = arith.subf %221, %222 : vector<35x128xf32>
    %224 = vector.broadcast %220 : vector<1x128xf32> to vector<35x128xf32>
    %225 = arith.mulf %223, %224 : vector<35x128xf32>
    %226 = vector.broadcast %7 : vector<1x128xf32> to vector<35x128xf32>
    %227 = arith.addf %225, %226 : vector<35x128xf32>
    %c0_146 = arith.constant 0 : index
    %c0_147 = arith.constant 0 : index
    %c0_148 = arith.constant 0 : index
    %228 = vector.load %arg14[%c0_146, %c0_147, %c0_148] : memref<2x35x128xf32, #tpu.memory_space<vmem>>, vector<1x35x128xf32>
    %229 = vector.shape_cast %228 : vector<1x35x128xf32> to vector<35x128xf32>
    %230 = vector.shape_cast %227 : vector<35x128xf32> to vector<1x35x128xf32>
    tpu.vector_store %arg14[%c0_146, %c0_147, %c0_148], %230 {strides = array<i32>} : memref<2x35x128xf32, #tpu.memory_space<vmem>>, vector<1x35x128xf32>,
    %231 = vector.extract_strided_slice %190 {offsets = [39, 0], sizes = [35, 128], strides = [1, 1]} : vector<74x128xf32> to vector<35x128xf32>
    %232 = vector.broadcast %210 : vector<1x128xf32> to vector<35x128xf32>
    %233 = arith.subf %231, %232 : vector<35x128xf32>
    %234 = vector.broadcast %220 : vector<1x128xf32> to vector<35x128xf32>
    %235 = arith.mulf %233, %234 : vector<35x128xf32>
    %236 = vector.broadcast %7 : vector<1x128xf32> to vector<35x128xf32>
    %237 = arith.addf %235, %236 : vector<35x128xf32>
    %c1_149 = arith.constant 1 : index
    %c0_150 = arith.constant 0 : index
    %c0_151 = arith.constant 0 : index
    %238 = vector.load %arg14[%c1_149, %c0_150, %c0_151] : memref<2x35x128xf32, #tpu.memory_space<vmem>>, vector<1x35x128xf32>
    %239 = vector.shape_cast %238 : vector<1x35x128xf32> to vector<35x128xf32>
    %240 = vector.shape_cast %237 : vector<35x128xf32> to vector<1x35x128xf32>
    tpu.vector_store %arg14[%c1_149, %c0_150, %c0_151], %240 {strides = array<i32>} : memref<2x35x128xf32, #tpu.memory_space<vmem>>, vector<1x35x128xf32>,
    return
  }
}

module attributes {stable_mosaic.version = 11 : i64} {
  func.func @kernel(%arg0: memref<70x128xbf16, #tpu.memory_space<vmem>>, %arg1: memref<218x128xf32, #tpu.memory_space<vmem>>, %arg2: memref<3x105x35xbf16, #tpu.memory_space<vmem>>, %arg3: memref<128x384xbf16, #tpu.memory_space<vmem>>, %arg4: memref<1x128xf32, #tpu.memory_space<vmem>>, %arg5: memref<5x128x128xbf16, #tpu.memory_space<vmem>>, %arg6: memref<5x128x128xbf16, #tpu.memory_space<vmem>>, %arg7: memref<1x128xf32, #tpu.memory_space<vmem>>, %arg8: memref<1x128xf32, #tpu.memory_space<vmem>>, %arg9: memref<1x128xf32, #tpu.memory_space<vmem>>, %arg10: memref<5x128x128xbf16, #tpu.memory_space<vmem>>, %arg11: memref<1x128xf32, #tpu.memory_space<vmem>>, %arg12: memref<1x128xf32, #tpu.memory_space<vmem>>, %arg13: memref<1x128xf32, #tpu.memory_space<vmem>>, %arg14: memref<2x105x128xf32, #tpu.memory_space<vmem>>, %arg15: memref<218x128xf32, #tpu.memory_space<vmem>>) attributes {dimension_semantics = [], scalar_prefetch = 0 : i64, scratch_operands = 1 : i64, tpu.core_type = #tpu.core_type<tc>} {
    %c0 = arith.constant 0 : index
    %c0_0 = arith.constant 0 : index
    %c0_1 = arith.constant 0 : index
    %0 = vector.load %arg2[%c0, %c0_0, %c0_1] : memref<3x105x35xbf16, #tpu.memory_space<vmem>>, vector<3x105x35xbf16>
    %c0_2 = arith.constant 0 : index
    %c0_3 = arith.constant 0 : index
    %1 = vector.load %arg4[%c0_2, %c0_3] : memref<1x128xf32, #tpu.memory_space<vmem>>, vector<1x128xf32>
    %c0_4 = arith.constant 0 : index
    %c0_5 = arith.constant 0 : index
    %2 = vector.load %arg7[%c0_4, %c0_5] : memref<1x128xf32, #tpu.memory_space<vmem>>, vector<1x128xf32>
    %c0_6 = arith.constant 0 : index
    %c0_7 = arith.constant 0 : index
    %3 = vector.load %arg8[%c0_6, %c0_7] : memref<1x128xf32, #tpu.memory_space<vmem>>, vector<1x128xf32>
    %c0_8 = arith.constant 0 : index
    %c0_9 = arith.constant 0 : index
    %4 = vector.load %arg9[%c0_8, %c0_9] : memref<1x128xf32, #tpu.memory_space<vmem>>, vector<1x128xf32>
    %c0_10 = arith.constant 0 : index
    %c0_11 = arith.constant 0 : index
    %5 = vector.load %arg11[%c0_10, %c0_11] : memref<1x128xf32, #tpu.memory_space<vmem>>, vector<1x128xf32>
    %c0_12 = arith.constant 0 : index
    %c0_13 = arith.constant 0 : index
    %6 = vector.load %arg12[%c0_12, %c0_13] : memref<1x128xf32, #tpu.memory_space<vmem>>, vector<1x128xf32>
    %c0_14 = arith.constant 0 : index
    %c0_15 = arith.constant 0 : index
    %7 = vector.load %arg13[%c0_14, %c0_15] : memref<1x128xf32, #tpu.memory_space<vmem>>, vector<1x128xf32>
    %c0_16 = arith.constant 0 : index
    %c0_17 = arith.constant 0 : index
    %8 = vector.load %arg0[%c0_16, %c0_17] : memref<70x128xbf16, #tpu.memory_space<vmem>>, vector<70x128xbf16>
    %c0_18 = arith.constant 0 : index
    %c0_19 = arith.constant 0 : index
    %9 = vector.load %arg3[%c0_18, %c0_19] : memref<128x384xbf16, #tpu.memory_space<vmem>>, vector<128x384xbf16>
    %cst = arith.constant dense<0.000000e+00> : vector<70x384xf32>
    %10 = tpu.matmul %8, %9, %cst {dimension_numbers = #tpu.dot_dimension_numbers<[1], [0], [0], [1], [0, 0, 1, 1], [], []>} : vector<70x128xbf16>, vector<128x384xbf16>, vector<70x384xf32> -> vector<70x384xf32>
    %cst_20 = arith.constant 0.000000e+00 : f32
    %11 = vector.broadcast %cst_20 : f32 to vector<218x128xf32>
    %c0_21 = arith.constant 0 : index
    %c0_22 = arith.constant 0 : index
    %12 = vector.load %arg15[%c0_21, %c0_22] : memref<218x128xf32, #tpu.memory_space<vmem>>, vector<218x128xf32>
    tpu.vector_store %arg15[%c0_21, %c0_22], %11 {strides = array<i32>} : memref<218x128xf32, #tpu.memory_space<vmem>>, vector<218x128xf32>,
    %cst_23 = arith.constant 0.000000e+00 : f32
    %13 = vector.broadcast %cst_23 : f32 to vector<105x128xf32>
    %14 = vector.extract_strided_slice %10 {offsets = [0, 0], sizes = [35, 128], strides = [1, 1]} : vector<70x384xf32> to vector<35x128xf32>
    %15 = arith.truncf %14 : vector<35x128xf32> to vector<35x128xbf16>
    %16 = vector.extract_strided_slice %0 {offsets = [0, 0, 0], sizes = [1, 105, 35], strides = [1, 1, 1]} : vector<3x105x35xbf16> to vector<1x105x35xbf16>
    %17 = vector.shape_cast %16 : vector<1x105x35xbf16> to vector<105x35xbf16>
    %cst_24 = arith.constant dense<0.000000e+00> : vector<105x128xf32>
    %18 = tpu.matmul %17, %15, %cst_24 {dimension_numbers = #tpu.dot_dimension_numbers<[1], [0], [0], [1], [0, 0, 1, 1], [], []>} : vector<105x35xbf16>, vector<35x128xbf16>, vector<105x128xf32> -> vector<105x128xf32>
    %19 = arith.addf %13, %18 : vector<105x128xf32>
    %20 = vector.extract_strided_slice %10 {offsets = [0, 128], sizes = [35, 128], strides = [1, 1]} : vector<70x384xf32> to vector<35x128xf32>
    %21 = arith.truncf %20 : vector<35x128xf32> to vector<35x128xbf16>
    %22 = vector.extract_strided_slice %0 {offsets = [1, 0, 0], sizes = [1, 105, 35], strides = [1, 1, 1]} : vector<3x105x35xbf16> to vector<1x105x35xbf16>
    %23 = vector.shape_cast %22 : vector<1x105x35xbf16> to vector<105x35xbf16>
    %cst_25 = arith.constant dense<0.000000e+00> : vector<105x128xf32>
    %24 = tpu.matmul %23, %21, %cst_25 {dimension_numbers = #tpu.dot_dimension_numbers<[1], [0], [0], [1], [0, 0, 1, 1], [], []>} : vector<105x35xbf16>, vector<35x128xbf16>, vector<105x128xf32> -> vector<105x128xf32>
    %25 = arith.addf %19, %24 : vector<105x128xf32>
    %26 = vector.extract_strided_slice %10 {offsets = [0, 256], sizes = [35, 128], strides = [1, 1]} : vector<70x384xf32> to vector<35x128xf32>
    %27 = arith.truncf %26 : vector<35x128xf32> to vector<35x128xbf16>
    %28 = vector.extract_strided_slice %0 {offsets = [2, 0, 0], sizes = [1, 105, 35], strides = [1, 1, 1]} : vector<3x105x35xbf16> to vector<1x105x35xbf16>
    %29 = vector.shape_cast %28 : vector<1x105x35xbf16> to vector<105x35xbf16>
    %cst_26 = arith.constant dense<0.000000e+00> : vector<105x128xf32>
    %30 = tpu.matmul %29, %27, %cst_26 {dimension_numbers = #tpu.dot_dimension_numbers<[1], [0], [0], [1], [0, 0, 1, 1], [], []>} : vector<105x35xbf16>, vector<35x128xbf16>, vector<105x128xf32> -> vector<105x128xf32>
    %31 = arith.addf %25, %30 : vector<105x128xf32>
    %32 = vector.broadcast %1 : vector<1x128xf32> to vector<105x128xf32>
    %33 = arith.addf %31, %32 : vector<105x128xf32>
    %c2 = arith.constant 2 : index
    %c0_27 = arith.constant 0 : index
    %34 = vector.load %arg15[%c2, %c0_27] : memref<218x128xf32, #tpu.memory_space<vmem>>, vector<105x128xf32>
    tpu.vector_store %arg15[%c2, %c0_27], %33 {strides = array<i32>} : memref<218x128xf32, #tpu.memory_space<vmem>>, vector<105x128xf32>,
    %cst_28 = arith.constant 0.000000e+00 : f32
    %35 = vector.broadcast %cst_28 : f32 to vector<105x128xf32>
    %36 = vector.extract_strided_slice %10 {offsets = [35, 0], sizes = [35, 128], strides = [1, 1]} : vector<70x384xf32> to vector<35x128xf32>
    %37 = arith.truncf %36 : vector<35x128xf32> to vector<35x128xbf16>
    %38 = vector.extract_strided_slice %0 {offsets = [0, 0, 0], sizes = [1, 105, 35], strides = [1, 1, 1]} : vector<3x105x35xbf16> to vector<1x105x35xbf16>
    %39 = vector.shape_cast %38 : vector<1x105x35xbf16> to vector<105x35xbf16>
    %cst_29 = arith.constant dense<0.000000e+00> : vector<105x128xf32>
    %40 = tpu.matmul %39, %37, %cst_29 {dimension_numbers = #tpu.dot_dimension_numbers<[1], [0], [0], [1], [0, 0, 1, 1], [], []>} : vector<105x35xbf16>, vector<35x128xbf16>, vector<105x128xf32> -> vector<105x128xf32>
    %41 = arith.addf %35, %40 : vector<105x128xf32>
    %42 = vector.extract_strided_slice %10 {offsets = [35, 128], sizes = [35, 128], strides = [1, 1]} : vector<70x384xf32> to vector<35x128xf32>
    %43 = arith.truncf %42 : vector<35x128xf32> to vector<35x128xbf16>
    %44 = vector.extract_strided_slice %0 {offsets = [1, 0, 0], sizes = [1, 105, 35], strides = [1, 1, 1]} : vector<3x105x35xbf16> to vector<1x105x35xbf16>
    %45 = vector.shape_cast %44 : vector<1x105x35xbf16> to vector<105x35xbf16>
    %cst_30 = arith.constant dense<0.000000e+00> : vector<105x128xf32>
    %46 = tpu.matmul %45, %43, %cst_30 {dimension_numbers = #tpu.dot_dimension_numbers<[1], [0], [0], [1], [0, 0, 1, 1], [], []>} : vector<105x35xbf16>, vector<35x128xbf16>, vector<105x128xf32> -> vector<105x128xf32>
    %47 = arith.addf %41, %46 : vector<105x128xf32>
    %48 = vector.extract_strided_slice %10 {offsets = [35, 256], sizes = [35, 128], strides = [1, 1]} : vector<70x384xf32> to vector<35x128xf32>
    %49 = arith.truncf %48 : vector<35x128xf32> to vector<35x128xbf16>
    %50 = vector.extract_strided_slice %0 {offsets = [2, 0, 0], sizes = [1, 105, 35], strides = [1, 1, 1]} : vector<3x105x35xbf16> to vector<1x105x35xbf16>
    %51 = vector.shape_cast %50 : vector<1x105x35xbf16> to vector<105x35xbf16>
    %cst_31 = arith.constant dense<0.000000e+00> : vector<105x128xf32>
    %52 = tpu.matmul %51, %49, %cst_31 {dimension_numbers = #tpu.dot_dimension_numbers<[1], [0], [0], [1], [0, 0, 1, 1], [], []>} : vector<105x35xbf16>, vector<35x128xbf16>, vector<105x128xf32> -> vector<105x128xf32>
    %53 = arith.addf %47, %52 : vector<105x128xf32>
    %54 = vector.broadcast %1 : vector<1x128xf32> to vector<105x128xf32>
    %55 = arith.addf %53, %54 : vector<105x128xf32>
    %c111 = arith.constant 111 : index
    %c0_32 = arith.constant 0 : index
    %56 = vector.load %arg15[%c111, %c0_32] : memref<218x128xf32, #tpu.memory_space<vmem>>, vector<105x128xf32>
    tpu.vector_store %arg15[%c111, %c0_32], %55 {strides = array<i32>} : memref<218x128xf32, #tpu.memory_space<vmem>>, vector<105x128xf32>,
    %cst_33 = arith.constant 0.000000e+00 : f32
    %57 = vector.broadcast %cst_33 : f32 to vector<214x128xf32>
    %c0_34 = arith.constant 0 : index
    %c0_35 = arith.constant 0 : index
    %58 = vector.load %arg15[%c0_34, %c0_35] : memref<218x128xf32, #tpu.memory_space<vmem>>, vector<214x128xf32>
    %59 = arith.truncf %58 : vector<214x128xf32> to vector<214x128xbf16>
    %c0_36 = arith.constant 0 : index
    %c0_37 = arith.constant 0 : index
    %c0_38 = arith.constant 0 : index
    %60 = vector.load %arg5[%c0_36, %c0_37, %c0_38] : memref<5x128x128xbf16, #tpu.memory_space<vmem>>, vector<1x128x128xbf16>
    %61 = vector.shape_cast %60 : vector<1x128x128xbf16> to vector<128x128xbf16>
    %cst_39 = arith.constant dense<0.000000e+00> : vector<214x128xf32>
    %62 = tpu.matmul %59, %61, %cst_39 {dimension_numbers = #tpu.dot_dimension_numbers<[1], [0], [0], [1], [0, 0, 1, 1], [], []>} : vector<214x128xbf16>, vector<128x128xbf16>, vector<214x128xf32> -> vector<214x128xf32>
    %63 = arith.addf %57, %62 : vector<214x128xf32>
    %c0_40 = arith.constant 0 : index
    %c0_41 = arith.constant 0 : index
    %64 = vector.load %arg1[%c0_40, %c0_41] : memref<218x128xf32, #tpu.memory_space<vmem>>, vector<214x128xf32>
    %65 = arith.truncf %64 : vector<214x128xf32> to vector<214x128xbf16>
    %c0_42 = arith.constant 0 : index
    %c0_43 = arith.constant 0 : index
    %c0_44 = arith.constant 0 : index
    %66 = vector.load %arg6[%c0_42, %c0_43, %c0_44] : memref<5x128x128xbf16, #tpu.memory_space<vmem>>, vector<1x128x128xbf16>
    %67 = vector.shape_cast %66 : vector<1x128x128xbf16> to vector<128x128xbf16>
    %cst_45 = arith.constant dense<0.000000e+00> : vector<214x128xf32>
    %68 = tpu.matmul %65, %67, %cst_45 {dimension_numbers = #tpu.dot_dimension_numbers<[1], [0], [0], [1], [0, 0, 1, 1], [], []>} : vector<214x128xbf16>, vector<128x128xbf16>, vector<214x128xf32> -> vector<214x128xf32>
    %69 = arith.addf %63, %68 : vector<214x128xf32>
    %c1 = arith.constant 1 : index
    %c0_46 = arith.constant 0 : index
    %70 = vector.load %arg15[%c1, %c0_46] : memref<218x128xf32, #tpu.memory_space<vmem>>, vector<214x128xf32>
    %71 = arith.truncf %70 : vector<214x128xf32> to vector<214x128xbf16>
    %c1_47 = arith.constant 1 : index
    %c0_48 = arith.constant 0 : index
    %c0_49 = arith.constant 0 : index
    %72 = vector.load %arg5[%c1_47, %c0_48, %c0_49] : memref<5x128x128xbf16, #tpu.memory_space<vmem>>, vector<1x128x128xbf16>
    %73 = vector.shape_cast %72 : vector<1x128x128xbf16> to vector<128x128xbf16>
    %cst_50 = arith.constant dense<0.000000e+00> : vector<214x128xf32>
    %74 = tpu.matmul %71, %73, %cst_50 {dimension_numbers = #tpu.dot_dimension_numbers<[1], [0], [0], [1], [0, 0, 1, 1], [], []>} : vector<214x128xbf16>, vector<128x128xbf16>, vector<214x128xf32> -> vector<214x128xf32>
    %75 = arith.addf %69, %74 : vector<214x128xf32>
    %c1_51 = arith.constant 1 : index
    %c0_52 = arith.constant 0 : index
    %76 = vector.load %arg1[%c1_51, %c0_52] : memref<218x128xf32, #tpu.memory_space<vmem>>, vector<214x128xf32>
    %77 = arith.truncf %76 : vector<214x128xf32> to vector<214x128xbf16>
    %c1_53 = arith.constant 1 : index
    %c0_54 = arith.constant 0 : index
    %c0_55 = arith.constant 0 : index
    %78 = vector.load %arg6[%c1_53, %c0_54, %c0_55] : memref<5x128x128xbf16, #tpu.memory_space<vmem>>, vector<1x128x128xbf16>
    %79 = vector.shape_cast %78 : vector<1x128x128xbf16> to vector<128x128xbf16>
    %cst_56 = arith.constant dense<0.000000e+00> : vector<214x128xf32>
    %80 = tpu.matmul %77, %79, %cst_56 {dimension_numbers = #tpu.dot_dimension_numbers<[1], [0], [0], [1], [0, 0, 1, 1], [], []>} : vector<214x128xbf16>, vector<128x128xbf16>, vector<214x128xf32> -> vector<214x128xf32>
    %81 = arith.addf %75, %80 : vector<214x128xf32>
    %c2_57 = arith.constant 2 : index
    %c0_58 = arith.constant 0 : index
    %82 = vector.load %arg15[%c2_57, %c0_58] : memref<218x128xf32, #tpu.memory_space<vmem>>, vector<214x128xf32>
    %83 = arith.truncf %82 : vector<214x128xf32> to vector<214x128xbf16>
    %c2_59 = arith.constant 2 : index
    %c0_60 = arith.constant 0 : index
    %c0_61 = arith.constant 0 : index
    %84 = vector.load %arg5[%c2_59, %c0_60, %c0_61] : memref<5x128x128xbf16, #tpu.memory_space<vmem>>, vector<1x128x128xbf16>
    %85 = vector.shape_cast %84 : vector<1x128x128xbf16> to vector<128x128xbf16>
    %cst_62 = arith.constant dense<0.000000e+00> : vector<214x128xf32>
    %86 = tpu.matmul %83, %85, %cst_62 {dimension_numbers = #tpu.dot_dimension_numbers<[1], [0], [0], [1], [0, 0, 1, 1], [], []>} : vector<214x128xbf16>, vector<128x128xbf16>, vector<214x128xf32> -> vector<214x128xf32>
    %87 = arith.addf %81, %86 : vector<214x128xf32>
    %c2_63 = arith.constant 2 : index
    %c0_64 = arith.constant 0 : index
    %88 = vector.load %arg1[%c2_63, %c0_64] : memref<218x128xf32, #tpu.memory_space<vmem>>, vector<214x128xf32>
    %89 = arith.truncf %88 : vector<214x128xf32> to vector<214x128xbf16>
    %c2_65 = arith.constant 2 : index
    %c0_66 = arith.constant 0 : index
    %c0_67 = arith.constant 0 : index
    %90 = vector.load %arg6[%c2_65, %c0_66, %c0_67] : memref<5x128x128xbf16, #tpu.memory_space<vmem>>, vector<1x128x128xbf16>
    %91 = vector.shape_cast %90 : vector<1x128x128xbf16> to vector<128x128xbf16>
    %cst_68 = arith.constant dense<0.000000e+00> : vector<214x128xf32>
    %92 = tpu.matmul %89, %91, %cst_68 {dimension_numbers = #tpu.dot_dimension_numbers<[1], [0], [0], [1], [0, 0, 1, 1], [], []>} : vector<214x128xbf16>, vector<128x128xbf16>, vector<214x128xf32> -> vector<214x128xf32>
    %93 = arith.addf %87, %92 : vector<214x128xf32>
    %c3 = arith.constant 3 : index
    %c0_69 = arith.constant 0 : index
    %94 = vector.load %arg15[%c3, %c0_69] : memref<218x128xf32, #tpu.memory_space<vmem>>, vector<214x128xf32>
    %95 = arith.truncf %94 : vector<214x128xf32> to vector<214x128xbf16>
    %c3_70 = arith.constant 3 : index
    %c0_71 = arith.constant 0 : index
    %c0_72 = arith.constant 0 : index
    %96 = vector.load %arg5[%c3_70, %c0_71, %c0_72] : memref<5x128x128xbf16, #tpu.memory_space<vmem>>, vector<1x128x128xbf16>
    %97 = vector.shape_cast %96 : vector<1x128x128xbf16> to vector<128x128xbf16>
    %cst_73 = arith.constant dense<0.000000e+00> : vector<214x128xf32>
    %98 = tpu.matmul %95, %97, %cst_73 {dimension_numbers = #tpu.dot_dimension_numbers<[1], [0], [0], [1], [0, 0, 1, 1], [], []>} : vector<214x128xbf16>, vector<128x128xbf16>, vector<214x128xf32> -> vector<214x128xf32>
    %99 = arith.addf %93, %98 : vector<214x128xf32>
    %c3_74 = arith.constant 3 : index
    %c0_75 = arith.constant 0 : index
    %100 = vector.load %arg1[%c3_74, %c0_75] : memref<218x128xf32, #tpu.memory_space<vmem>>, vector<214x128xf32>
    %101 = arith.truncf %100 : vector<214x128xf32> to vector<214x128xbf16>
    %c3_76 = arith.constant 3 : index
    %c0_77 = arith.constant 0 : index
    %c0_78 = arith.constant 0 : index
    %102 = vector.load %arg6[%c3_76, %c0_77, %c0_78] : memref<5x128x128xbf16, #tpu.memory_space<vmem>>, vector<1x128x128xbf16>
    %103 = vector.shape_cast %102 : vector<1x128x128xbf16> to vector<128x128xbf16>
    %cst_79 = arith.constant dense<0.000000e+00> : vector<214x128xf32>
    %104 = tpu.matmul %101, %103, %cst_79 {dimension_numbers = #tpu.dot_dimension_numbers<[1], [0], [0], [1], [0, 0, 1, 1], [], []>} : vector<214x128xbf16>, vector<128x128xbf16>, vector<214x128xf32> -> vector<214x128xf32>
    %105 = arith.addf %99, %104 : vector<214x128xf32>
    %c4 = arith.constant 4 : index
    %c0_80 = arith.constant 0 : index
    %106 = vector.load %arg15[%c4, %c0_80] : memref<218x128xf32, #tpu.memory_space<vmem>>, vector<214x128xf32>
    %107 = arith.truncf %106 : vector<214x128xf32> to vector<214x128xbf16>
    %c4_81 = arith.constant 4 : index
    %c0_82 = arith.constant 0 : index
    %c0_83 = arith.constant 0 : index
    %108 = vector.load %arg5[%c4_81, %c0_82, %c0_83] : memref<5x128x128xbf16, #tpu.memory_space<vmem>>, vector<1x128x128xbf16>
    %109 = vector.shape_cast %108 : vector<1x128x128xbf16> to vector<128x128xbf16>
    %cst_84 = arith.constant dense<0.000000e+00> : vector<214x128xf32>
    %110 = tpu.matmul %107, %109, %cst_84 {dimension_numbers = #tpu.dot_dimension_numbers<[1], [0], [0], [1], [0, 0, 1, 1], [], []>} : vector<214x128xbf16>, vector<128x128xbf16>, vector<214x128xf32> -> vector<214x128xf32>
    %111 = arith.addf %105, %110 : vector<214x128xf32>
    %c4_85 = arith.constant 4 : index
    %c0_86 = arith.constant 0 : index
    %112 = vector.load %arg1[%c4_85, %c0_86] : memref<218x128xf32, #tpu.memory_space<vmem>>, vector<214x128xf32>
    %113 = arith.truncf %112 : vector<214x128xf32> to vector<214x128xbf16>
    %c4_87 = arith.constant 4 : index
    %c0_88 = arith.constant 0 : index
    %c0_89 = arith.constant 0 : index
    %114 = vector.load %arg6[%c4_87, %c0_88, %c0_89] : memref<5x128x128xbf16, #tpu.memory_space<vmem>>, vector<1x128x128xbf16>
    %115 = vector.shape_cast %114 : vector<1x128x128xbf16> to vector<128x128xbf16>
    %cst_90 = arith.constant dense<0.000000e+00> : vector<214x128xf32>
    %116 = tpu.matmul %113, %115, %cst_90 {dimension_numbers = #tpu.dot_dimension_numbers<[1], [0], [0], [1], [0, 0, 1, 1], [], []>} : vector<214x128xbf16>, vector<128x128xbf16>, vector<214x128xf32> -> vector<214x128xf32>
    %117 = arith.addf %111, %116 : vector<214x128xf32>
    %118 = vector.broadcast %2 : vector<1x128xf32> to vector<214x128xf32>
    %119 = arith.addf %117, %118 : vector<214x128xf32>
    %cst_91 = arith.constant 0.000000e+00 : f32
    %120 = vector.broadcast %cst_91 : f32 to vector<214x128xf32>
    %121 = arith.maximumf %119, %120 : vector<214x128xf32>
    %cst_92 = arith.constant 0.000000e+00 : f32
    %122 = vector.broadcast %cst_92 : f32 to vector<1x128xf32>
    %cst_93 = arith.constant 0.000000e+00 : f32
    %123 = vector.broadcast %cst_93 : f32 to vector<1x128xf32>
    %124 = vector.extract_strided_slice %121 {offsets = [0, 0], sizes = [105, 128], strides = [1, 1]} : vector<214x128xf32> to vector<105x128xf32>
    %cst_94 = arith.constant dense<0.000000e+00> : vector<128xf32>
    %125 = vector.multi_reduction <add>, %124, %cst_94 [0] : vector<105x128xf32> to vector<128xf32>
    %126 = vector.shape_cast %125 : vector<128xf32> to vector<1x128xf32>
    %127 = arith.addf %122, %126 : vector<1x128xf32>
    %128 = arith.mulf %124, %124 : vector<105x128xf32>
    %cst_95 = arith.constant dense<0.000000e+00> : vector<128xf32>
    %129 = vector.multi_reduction <add>, %128, %cst_95 [0] : vector<105x128xf32> to vector<128xf32>
    %130 = vector.shape_cast %129 : vector<128xf32> to vector<1x128xf32>
    %131 = arith.addf %123, %130 : vector<1x128xf32>
    %132 = vector.extract_strided_slice %121 {offsets = [109, 0], sizes = [105, 128], strides = [1, 1]} : vector<214x128xf32> to vector<105x128xf32>
    %cst_96 = arith.constant dense<0.000000e+00> : vector<128xf32>
    %133 = vector.multi_reduction <add>, %132, %cst_96 [0] : vector<105x128xf32> to vector<128xf32>
    %134 = vector.shape_cast %133 : vector<128xf32> to vector<1x128xf32>
    %135 = arith.addf %127, %134 : vector<1x128xf32>
    %136 = arith.mulf %132, %132 : vector<105x128xf32>
    %cst_97 = arith.constant dense<0.000000e+00> : vector<128xf32>
    %137 = vector.multi_reduction <add>, %136, %cst_97 [0] : vector<105x128xf32> to vector<128xf32>
    %138 = vector.shape_cast %137 : vector<128xf32> to vector<1x128xf32>
    %139 = arith.addf %131, %138 : vector<1x128xf32>
    %cst_98 = arith.constant 2.100000e+02 : f32
    %140 = vector.broadcast %cst_98 : f32 to vector<1x128xf32>
    %141 = arith.divf %135, %140 : vector<1x128xf32>
    %cst_99 = arith.constant 2.100000e+02 : f32
    %142 = vector.broadcast %cst_99 : f32 to vector<1x128xf32>
    %143 = arith.divf %139, %142 : vector<1x128xf32>
    %144 = arith.mulf %141, %141 : vector<1x128xf32>
    %145 = arith.subf %143, %144 : vector<1x128xf32>
    %cst_100 = arith.constant 0.000000e+00 : f32
    %146 = vector.broadcast %cst_100 : f32 to vector<1x128xf32>
    %147 = arith.maximumf %145, %146 : vector<1x128xf32>
    %cst_101 = arith.constant 9.99999974E-6 : f32
    %148 = vector.broadcast %cst_101 : f32 to vector<1x128xf32>
    %149 = arith.addf %147, %148 : vector<1x128xf32>
    %150 = math.rsqrt %149 : vector<1x128xf32>
    %151 = arith.mulf %150, %3 : vector<1x128xf32>
    %152 = vector.extract_strided_slice %121 {offsets = [0, 0], sizes = [105, 128], strides = [1, 1]} : vector<214x128xf32> to vector<105x128xf32>
    %153 = vector.broadcast %141 : vector<1x128xf32> to vector<105x128xf32>
    %154 = arith.subf %152, %153 : vector<105x128xf32>
    %155 = vector.broadcast %151 : vector<1x128xf32> to vector<105x128xf32>
    %156 = arith.mulf %154, %155 : vector<105x128xf32>
    %157 = vector.broadcast %4 : vector<1x128xf32> to vector<105x128xf32>
    %158 = arith.addf %156, %157 : vector<105x128xf32>
    %c2_102 = arith.constant 2 : index
    %c0_103 = arith.constant 0 : index
    %159 = vector.load %arg15[%c2_102, %c0_103] : memref<218x128xf32, #tpu.memory_space<vmem>>, vector<105x128xf32>
    tpu.vector_store %arg15[%c2_102, %c0_103], %158 {strides = array<i32>} : memref<218x128xf32, #tpu.memory_space<vmem>>, vector<105x128xf32>,
    %160 = vector.extract_strided_slice %121 {offsets = [109, 0], sizes = [105, 128], strides = [1, 1]} : vector<214x128xf32> to vector<105x128xf32>
    %161 = vector.broadcast %141 : vector<1x128xf32> to vector<105x128xf32>
    %162 = arith.subf %160, %161 : vector<105x128xf32>
    %163 = vector.broadcast %151 : vector<1x128xf32> to vector<105x128xf32>
    %164 = arith.mulf %162, %163 : vector<105x128xf32>
    %165 = vector.broadcast %4 : vector<1x128xf32> to vector<105x128xf32>
    %166 = arith.addf %164, %165 : vector<105x128xf32>
    %c111_104 = arith.constant 111 : index
    %c0_105 = arith.constant 0 : index
    %167 = vector.load %arg15[%c111_104, %c0_105] : memref<218x128xf32, #tpu.memory_space<vmem>>, vector<105x128xf32>
    tpu.vector_store %arg15[%c111_104, %c0_105], %166 {strides = array<i32>} : memref<218x128xf32, #tpu.memory_space<vmem>>, vector<105x128xf32>,
    %cst_106 = arith.constant 0.000000e+00 : f32
    %168 = vector.broadcast %cst_106 : f32 to vector<214x128xf32>
    %c0_107 = arith.constant 0 : index
    %c0_108 = arith.constant 0 : index
    %169 = vector.load %arg15[%c0_107, %c0_108] : memref<218x128xf32, #tpu.memory_space<vmem>>, vector<214x128xf32>
    %170 = arith.truncf %169 : vector<214x128xf32> to vector<214x128xbf16>
    %c0_109 = arith.constant 0 : index
    %c0_110 = arith.constant 0 : index
    %c0_111 = arith.constant 0 : index
    %171 = vector.load %arg10[%c0_109, %c0_110, %c0_111] : memref<5x128x128xbf16, #tpu.memory_space<vmem>>, vector<1x128x128xbf16>
    %172 = vector.shape_cast %171 : vector<1x128x128xbf16> to vector<128x128xbf16>
    %cst_112 = arith.constant dense<0.000000e+00> : vector<214x128xf32>
    %173 = tpu.matmul %170, %172, %cst_112 {dimension_numbers = #tpu.dot_dimension_numbers<[1], [0], [0], [1], [0, 0, 1, 1], [], []>} : vector<214x128xbf16>, vector<128x128xbf16>, vector<214x128xf32> -> vector<214x128xf32>
    %174 = arith.addf %168, %173 : vector<214x128xf32>
    %c1_113 = arith.constant 1 : index
    %c0_114 = arith.constant 0 : index
    %175 = vector.load %arg15[%c1_113, %c0_114] : memref<218x128xf32, #tpu.memory_space<vmem>>, vector<214x128xf32>
    %176 = arith.truncf %175 : vector<214x128xf32> to vector<214x128xbf16>
    %c1_115 = arith.constant 1 : index
    %c0_116 = arith.constant 0 : index
    %c0_117 = arith.constant 0 : index
    %177 = vector.load %arg10[%c1_115, %c0_116, %c0_117] : memref<5x128x128xbf16, #tpu.memory_space<vmem>>, vector<1x128x128xbf16>
    %178 = vector.shape_cast %177 : vector<1x128x128xbf16> to vector<128x128xbf16>
    %cst_118 = arith.constant dense<0.000000e+00> : vector<214x128xf32>
    %179 = tpu.matmul %176, %178, %cst_118 {dimension_numbers = #tpu.dot_dimension_numbers<[1], [0], [0], [1], [0, 0, 1, 1], [], []>} : vector<214x128xbf16>, vector<128x128xbf16>, vector<214x128xf32> -> vector<214x128xf32>
    %180 = arith.addf %174, %179 : vector<214x128xf32>
    %c2_119 = arith.constant 2 : index
    %c0_120 = arith.constant 0 : index
    %181 = vector.load %arg15[%c2_119, %c0_120] : memref<218x128xf32, #tpu.memory_space<vmem>>, vector<214x128xf32>
    %182 = arith.truncf %181 : vector<214x128xf32> to vector<214x128xbf16>
    %c2_121 = arith.constant 2 : index
    %c0_122 = arith.constant 0 : index
    %c0_123 = arith.constant 0 : index
    %183 = vector.load %arg10[%c2_121, %c0_122, %c0_123] : memref<5x128x128xbf16, #tpu.memory_space<vmem>>, vector<1x128x128xbf16>
    %184 = vector.shape_cast %183 : vector<1x128x128xbf16> to vector<128x128xbf16>
    %cst_124 = arith.constant dense<0.000000e+00> : vector<214x128xf32>
    %185 = tpu.matmul %182, %184, %cst_124 {dimension_numbers = #tpu.dot_dimension_numbers<[1], [0], [0], [1], [0, 0, 1, 1], [], []>} : vector<214x128xbf16>, vector<128x128xbf16>, vector<214x128xf32> -> vector<214x128xf32>
    %186 = arith.addf %180, %185 : vector<214x128xf32>
    %c3_125 = arith.constant 3 : index
    %c0_126 = arith.constant 0 : index
    %187 = vector.load %arg15[%c3_125, %c0_126] : memref<218x128xf32, #tpu.memory_space<vmem>>, vector<214x128xf32>
    %188 = arith.truncf %187 : vector<214x128xf32> to vector<214x128xbf16>
    %c3_127 = arith.constant 3 : index
    %c0_128 = arith.constant 0 : index
    %c0_129 = arith.constant 0 : index
    %189 = vector.load %arg10[%c3_127, %c0_128, %c0_129] : memref<5x128x128xbf16, #tpu.memory_space<vmem>>, vector<1x128x128xbf16>
    %190 = vector.shape_cast %189 : vector<1x128x128xbf16> to vector<128x128xbf16>
    %cst_130 = arith.constant dense<0.000000e+00> : vector<214x128xf32>
    %191 = tpu.matmul %188, %190, %cst_130 {dimension_numbers = #tpu.dot_dimension_numbers<[1], [0], [0], [1], [0, 0, 1, 1], [], []>} : vector<214x128xbf16>, vector<128x128xbf16>, vector<214x128xf32> -> vector<214x128xf32>
    %192 = arith.addf %186, %191 : vector<214x128xf32>
    %c4_131 = arith.constant 4 : index
    %c0_132 = arith.constant 0 : index
    %193 = vector.load %arg15[%c4_131, %c0_132] : memref<218x128xf32, #tpu.memory_space<vmem>>, vector<214x128xf32>
    %194 = arith.truncf %193 : vector<214x128xf32> to vector<214x128xbf16>
    %c4_133 = arith.constant 4 : index
    %c0_134 = arith.constant 0 : index
    %c0_135 = arith.constant 0 : index
    %195 = vector.load %arg10[%c4_133, %c0_134, %c0_135] : memref<5x128x128xbf16, #tpu.memory_space<vmem>>, vector<1x128x128xbf16>
    %196 = vector.shape_cast %195 : vector<1x128x128xbf16> to vector<128x128xbf16>
    %cst_136 = arith.constant dense<0.000000e+00> : vector<214x128xf32>
    %197 = tpu.matmul %194, %196, %cst_136 {dimension_numbers = #tpu.dot_dimension_numbers<[1], [0], [0], [1], [0, 0, 1, 1], [], []>} : vector<214x128xbf16>, vector<128x128xbf16>, vector<214x128xf32> -> vector<214x128xf32>
    %198 = arith.addf %192, %197 : vector<214x128xf32>
    %199 = vector.broadcast %5 : vector<1x128xf32> to vector<214x128xf32>
    %200 = arith.addf %198, %199 : vector<214x128xf32>
    %cst_137 = arith.constant 0.000000e+00 : f32
    %201 = vector.broadcast %cst_137 : f32 to vector<214x128xf32>
    %202 = arith.maximumf %200, %201 : vector<214x128xf32>
    %cst_138 = arith.constant 0.000000e+00 : f32
    %203 = vector.broadcast %cst_138 : f32 to vector<1x128xf32>
    %cst_139 = arith.constant 0.000000e+00 : f32
    %204 = vector.broadcast %cst_139 : f32 to vector<1x128xf32>
    %205 = vector.extract_strided_slice %202 {offsets = [0, 0], sizes = [105, 128], strides = [1, 1]} : vector<214x128xf32> to vector<105x128xf32>
    %cst_140 = arith.constant dense<0.000000e+00> : vector<128xf32>
    %206 = vector.multi_reduction <add>, %205, %cst_140 [0] : vector<105x128xf32> to vector<128xf32>
    %207 = vector.shape_cast %206 : vector<128xf32> to vector<1x128xf32>
    %208 = arith.addf %203, %207 : vector<1x128xf32>
    %209 = arith.mulf %205, %205 : vector<105x128xf32>
    %cst_141 = arith.constant dense<0.000000e+00> : vector<128xf32>
    %210 = vector.multi_reduction <add>, %209, %cst_141 [0] : vector<105x128xf32> to vector<128xf32>
    %211 = vector.shape_cast %210 : vector<128xf32> to vector<1x128xf32>
    %212 = arith.addf %204, %211 : vector<1x128xf32>
    %213 = vector.extract_strided_slice %202 {offsets = [109, 0], sizes = [105, 128], strides = [1, 1]} : vector<214x128xf32> to vector<105x128xf32>
    %cst_142 = arith.constant dense<0.000000e+00> : vector<128xf32>
    %214 = vector.multi_reduction <add>, %213, %cst_142 [0] : vector<105x128xf32> to vector<128xf32>
    %215 = vector.shape_cast %214 : vector<128xf32> to vector<1x128xf32>
    %216 = arith.addf %208, %215 : vector<1x128xf32>
    %217 = arith.mulf %213, %213 : vector<105x128xf32>
    %cst_143 = arith.constant dense<0.000000e+00> : vector<128xf32>
    %218 = vector.multi_reduction <add>, %217, %cst_143 [0] : vector<105x128xf32> to vector<128xf32>
    %219 = vector.shape_cast %218 : vector<128xf32> to vector<1x128xf32>
    %220 = arith.addf %212, %219 : vector<1x128xf32>
    %cst_144 = arith.constant 2.100000e+02 : f32
    %221 = vector.broadcast %cst_144 : f32 to vector<1x128xf32>
    %222 = arith.divf %216, %221 : vector<1x128xf32>
    %cst_145 = arith.constant 2.100000e+02 : f32
    %223 = vector.broadcast %cst_145 : f32 to vector<1x128xf32>
    %224 = arith.divf %220, %223 : vector<1x128xf32>
    %225 = arith.mulf %222, %222 : vector<1x128xf32>
    %226 = arith.subf %224, %225 : vector<1x128xf32>
    %cst_146 = arith.constant 0.000000e+00 : f32
    %227 = vector.broadcast %cst_146 : f32 to vector<1x128xf32>
    %228 = arith.maximumf %226, %227 : vector<1x128xf32>
    %cst_147 = arith.constant 9.99999974E-6 : f32
    %229 = vector.broadcast %cst_147 : f32 to vector<1x128xf32>
    %230 = arith.addf %228, %229 : vector<1x128xf32>
    %231 = math.rsqrt %230 : vector<1x128xf32>
    %232 = arith.mulf %231, %6 : vector<1x128xf32>
    %233 = vector.extract_strided_slice %202 {offsets = [0, 0], sizes = [105, 128], strides = [1, 1]} : vector<214x128xf32> to vector<105x128xf32>
    %234 = vector.broadcast %222 : vector<1x128xf32> to vector<105x128xf32>
    %235 = arith.subf %233, %234 : vector<105x128xf32>
    %236 = vector.broadcast %232 : vector<1x128xf32> to vector<105x128xf32>
    %237 = arith.mulf %235, %236 : vector<105x128xf32>
    %238 = vector.broadcast %7 : vector<1x128xf32> to vector<105x128xf32>
    %239 = arith.addf %237, %238 : vector<105x128xf32>
    %c0_148 = arith.constant 0 : index
    %c0_149 = arith.constant 0 : index
    %c0_150 = arith.constant 0 : index
    %240 = vector.load %arg14[%c0_148, %c0_149, %c0_150] : memref<2x105x128xf32, #tpu.memory_space<vmem>>, vector<1x105x128xf32>
    %241 = vector.shape_cast %240 : vector<1x105x128xf32> to vector<105x128xf32>
    %242 = vector.shape_cast %239 : vector<105x128xf32> to vector<1x105x128xf32>
    tpu.vector_store %arg14[%c0_148, %c0_149, %c0_150], %242 {strides = array<i32>} : memref<2x105x128xf32, #tpu.memory_space<vmem>>, vector<1x105x128xf32>,
    %243 = vector.extract_strided_slice %202 {offsets = [109, 0], sizes = [105, 128], strides = [1, 1]} : vector<214x128xf32> to vector<105x128xf32>
    %244 = vector.broadcast %222 : vector<1x128xf32> to vector<105x128xf32>
    %245 = arith.subf %243, %244 : vector<105x128xf32>
    %246 = vector.broadcast %232 : vector<1x128xf32> to vector<105x128xf32>
    %247 = arith.mulf %245, %246 : vector<105x128xf32>
    %248 = vector.broadcast %7 : vector<1x128xf32> to vector<105x128xf32>
    %249 = arith.addf %247, %248 : vector<105x128xf32>
    %c1_151 = arith.constant 1 : index
    %c0_152 = arith.constant 0 : index
    %c0_153 = arith.constant 0 : index
    %250 = vector.load %arg14[%c1_151, %c0_152, %c0_153] : memref<2x105x128xf32, #tpu.memory_space<vmem>>, vector<1x105x128xf32>
    %251 = vector.shape_cast %250 : vector<1x105x128xf32> to vector<105x128xf32>
    %252 = vector.shape_cast %249 : vector<105x128xf32> to vector<1x105x128xf32>
    tpu.vector_store %arg14[%c1_151, %c0_152, %c0_153], %252 {strides = array<i32>} : memref<2x105x128xf32, #tpu.memory_space<vmem>>, vector<1x105x128xf32>,
    return
  }
}

</mosaic_0001>

<bundles_post_ra>
// kernel: decoder_forward.3
= control target key start
LH: loop header
LB: loop body
LE: loop exit
PB: predicated region body
PF: predicated region fallthrough
CT: control target
= control target key end

     0   :  { %v3839_v1 = vmov 0   ;;  %vm224_vm0 = vcmask 64512   ;;  %v3840_v19 = vmov 0.0   ;;  %vm231_vm1 = vcmask 1043456   ;;  %s4809_s3 = inlined_call_operand.vmem [shape: bf16[128,256], index: 3, kind: input, shape index: {}]   ;;  %s4810_s0 = inlined_call_operand.vmem [shape: bf16[16,128], index: 0, kind: input, shape index: {}]   ;;  %s4811_s2 = inlined_call_operand.vmem [shape: bf16[2,17,8], index: 2, kind: input, shape index: {}]   ;;  %s4812_s6 = inlined_call_operand.vmem [shape: bf16[5,128,128], index: 6, kind: input, shape index: {}]   ;;  %s4813_s5 = inlined_call_operand.vmem [shape: bf16[5,128,128], index: 5, kind: input, shape index: {}]   ;;  %s4814_s1 = inlined_call_operand.vmem [shape: f32[42,128], index: 1, kind: input, shape index: {}]   ;;  %s4815_s4 = inlined_call_operand.vmem [shape: f32[1,128], index: 4, kind: input, shape index: {}]   ;;  %s4816_s10 = inlined_call_operand.vmem [shape: bf16[5,128,128], index: 10, kind: input, shape index: {}]   ;;  %s4817_s7 = inlined_call_operand.vmem [shape: f32[1,128], index: 7, kind: input, shape index: {}]   ;;  %s4818_s8 = inlined_call_operand.vmem [shape: f32[1,128], index: 8, kind: input, shape index: {}]   ;;  %s4819_s9 = inlined_call_operand.vmem [shape: f32[1,128], index: 9, kind: input, shape index: {}]   ;;  %s4820_s11 = inlined_call_operand.vmem [shape: f32[1,128], index: 11, kind: input, shape index: {}]   ;;  %s4821_s12 = inlined_call_operand.vmem [shape: f32[1,128], index: 12, kind: input, shape index: {}]   ;;  %s4822_s13 = inlined_call_operand.vmem [shape: f32[1,128], index: 13, kind: input, shape index: {}]   ;;  %s4823_s14 = inlined_call_operand.vmem [shape: f32[2,17,128], index: 14, kind: output, shape index: {}]  }
   0x1   :  { %v3686_v0 = vld [vmem:[%s4809_s3 + $0x4] ss:$8 sps:$4 sm:$0xff]   ;;  %197 = vmatprep.mubr.bf16.mxu0 %v3839_v1  ;;  %v3688_v2 = vld [vmem:[%s4809_s3] ss:$8 sps:$4 sm:$0xff]   ;;  %v3689_v3 = vld [vmem:[%s4809_s3 + $0x14] ss:$8 sps:$4 sm:$0xff]  }
   0x2   :  { %165 = vmatprep.subr.bf16.mxu0 %v3686_v0  ;;  %v3691_v4 = vld [vmem:[%s4809_s3 + $0x10] ss:$8 sps:$4 sm:$0xff]   ;;  %v3692_v5 = vld [vmem:[%s4809_s3 + $0x24] ss:$8 sps:$4 sm:$0xff]   ;;  %v3694_v6 = vld [vmem:[%s4809_s3 + $0x20] ss:$8 sps:$4 sm:$0xff]  }
   0x3   :  { %166 = vmatpush1.bf16.msra.mxu0 %v3688_v2  ;;  %v3695_v7 = vld [vmem:[%s4809_s3 + $0x34] ss:$8 sps:$4 sm:$0xff]   ;;  %v3697_v8 = vld [vmem:[%s4809_s3 + $0x30] ss:$8 sps:$4 sm:$0xff]   ;;  %v3698_v9 = vld [vmem:[%s4809_s3 + $0x44] ss:$8 sps:$4 sm:$0xff]  }
   0x4   :  { %167 = vmatprep.subr.bf16.mxu0 %v3689_v3  ;;  %v3700_v10 = vld [vmem:[%s4809_s3 + $0x40] ss:$8 sps:$4 sm:$0xff]   ;;  %v3701_v11 = vld [vmem:[%s4809_s3 + $0x54] ss:$8 sps:$4 sm:$0xff]   ;;  %v3703_v12 = vld [vmem:[%s4809_s3 + $0x50] ss:$8 sps:$4 sm:$0xff]  }
   0x5   :  { %v3704_v13 = vld [vmem:[%s4809_s3 + $0x64] ss:$8 sps:$4 sm:$0xff]   ;;  %v3706_v14 = vld [vmem:[%s4809_s3 + $0x60] ss:$8 sps:$4 sm:$0xff]   ;;  %v3707_v15 = vld [vmem:[%s4809_s3 + $0x74] ss:$8 sps:$4 sm:$0xff]  }
   0x6   :  { %v3709_v16 = vld [vmem:[%s4809_s3 + $0x70] ss:$8 sps:$4 sm:$0xff]   ;;  %v3710_v17 = vld [vmem:[%s4810_s0] sm:$0xff]   ;;  %208 = vst [vmem:[#allocation2] sm:$0xff] %v3840_v19  ;;  %209 = vst [vmem:[#allocation2 + $0x8] sm:$0xff] %v3840_v19  ;;  %vm3841_vm2 = vmmov 0  }
   0x7   :  { %168 = vmatpush1.bf16.msra.mxu0 %v3691_v4  ;;  %v3711_v18 = vld [vmem:[%s4811_s2 + $0xc] sm:$0xff]   ;;  %210 = vst [vmem:[#allocation2 + $0x10] sm:$0xff] %v3840_v19  ;;  %211 = vst [vmem:[#allocation2 + $0x18] sm:$0xff] %v3840_v19  ;;  %v3712_v28 = vld [vmem:[%s4811_s2 + $0x14] ss:$0 sps:$4 sm:$0x11]  }
   0x8   :  { %169 = vmatprep.subr.bf16.mxu0 %v3692_v5  ;;  %3249 = vmatprep.mubr.msk.bf16.mxu1 %vm224_vm0, %v3711_v18  ;;  %212 = vst [vmem:[#allocation2 + $0x20] sm:$0xff] %v3840_v19  ;;  %213 = vst [vmem:[#allocation2 + $0x28] sm:$0x3] %v3840_v19  ;;  %v3713_v29 = vld [vmem:[%s4811_s2] sm:$0xff]   ;;  %v3725_v37 = vld [vmem:[%s4813_s5 + $0x8] sm:$0xff]   ;;  %vm1815_vm3 = vcmask 1040384  }
   0x9   :  { %v3714_v34 = vld [vmem:[%s4811_s2 + $0x8] ss:$0 sps:$4 sm:$0x11]   ;;  %v3723_v35 = vld [vmem:[%s4813_s5] sm:$0xff]   ;;  %v3717_v39 = vld [vmem:[%s4812_s6 + $0x10] sm:$0xff]   ;;  %vm1841_vm4 = vcmask 1042432  }
   0xa   :  { %v3715_v36 = vld [vmem:[%s4812_s6] sm:$0xff]   ;;  %v3716_v38 = vld [vmem:[%s4812_s6 + $0x8] sm:$0xff]   ;;  %v3718_v40 = vld [vmem:[%s4812_s6 + $0x18] sm:$0xff]  }
   0xb   :  { %170 = vmatpush1.bf16.msra.mxu0 %v3694_v6  ;;  %v3719_v41 = vld [vmem:[%s4812_s6 + $0x20] sm:$0xff]   ;;  %v3720_v42 = vld [vmem:[%s4812_s6 + $0x28] sm:$0xff]   ;;  %v3721_v43 = vld [vmem:[%s4812_s6 + $0x30] sm:$0xff]  }
   0xc   :  { %171 = vmatprep.subr.bf16.mxu0 %v3695_v7  ;;  %v3722_v44 = vld [vmem:[%s4812_s6 + $0x38] sm:$0xff]   ;;  %v494_v45 = vld [vmem:[%s4814_s1] sm:$0xff]  ;;  %v495_v46 = vld [vmem:[%s4814_s1 + $0x8] sm:$0xff] }
   0xd   :  { %v499_v47 = vpack.c.bf16 %v495_v46, %v494_v45  ;;  %v3724_v48 = vld [vmem:[%s4813_s5 + $0x40] sm:$0xff]   ;;  %v3726_v49 = vld [vmem:[%s4813_s5 + $0x48] sm:$0xff]   ;;  %v3727_v50 = vld [vmem:[%s4813_s5 + $0x10] sm:$0xff]  }
   0xe   :  { %v3728_v51 = vld [vmem:[%s4813_s5 + $0x50] sm:$0xff]   ;;  %v3729_v52 = vld [vmem:[%s4813_s5 + $0x18] sm:$0xff]   ;;  %v3731_v57 = vld [vmem:[%s4813_s5 + $0x20] sm:$0xff]  }
   0xf   :  { %172 = vmatpush1.bf16.msra.mxu0 %v3697_v8  ;;  %v3730_v53 = vld [vmem:[%s4813_s5 + $0x58] sm:$0xff]   ;;  %v496_v54 = vld [vmem:[%s4814_s1 + $0x10] sm:$0xff]  ;;  %v3732_v58 = vld [vmem:[%s4813_s5 + $0x60] sm:$0xff]  }
  0x10   :  { %173 = vmatprep.subr.bf16.mxu0 %v3698_v9  ;;  %v497_v55 = vld [vmem:[%s4814_s1 + $0x18] sm:$0xff]  ;;  %v3733_v59 = vld [vmem:[%s4813_s5 + $0x28] sm:$0xff]   ;;  %v498_v61 = vld [vmem:[%s4814_s1 + $0x20] sm:$0x3f] }
  0x11   :  { %v500_v56 = vpack.c.bf16 %v497_v55, %v496_v54  ;;  %v3734_v60 = vld [vmem:[%s4813_s5 + $0x68] sm:$0xff]   ;;  %v501_v62 = vpack.c.bf16 %v498_v61, %v498_v61  ;;  %v3735_v63 = vld [vmem:[%s4813_s5 + $0x30] sm:$0xff]   ;;  %v3737_v1 = vld [vmem:[%s4813_s5 + $0x38] sm:$0xff]  }
  0x12   :  { %v3736_v0 = vld [vmem:[%s4813_s5 + $0x70] sm:$0xff]   ;;  %v3738_v2 = vld [vmem:[%s4813_s5 + $0x78] sm:$0xff]   ;;  %v3749_v61 = vld [vmem:[%s4812_s6 + $0x68] sm:$0xff]  }
  0x13   :  { %174 = vmatpush1.bf16.msra.mxu0 %v3700_v10  ;;  %v3743_v46 = vld [vmem:[%s4812_s6 + $0x50] sm:$0xff]  }
  0x14   :  { %175 = vmatprep.subr.bf16.mxu0 %v3701_v11  ;;  %v2734_v11 = vld [vmem:[%s4815_s4] ss:$0 sm:$0xff] }
  0x17   :  { %176 = vmatpush1.bf16.msra.mxu0 %v3703_v12 }
  0x18   :  { %177 = vmatprep.subr.bf16.mxu0 %v3704_v13 }
  0x1b   :  { %178 = vmatpush1.bf16.msra.mxu0 %v3706_v14 }
  0x1c   :  { %179 = vmatprep.subr.bf16.mxu0 %v3707_v15 }
  0x1f   :  { %180 = vmatpush1.bf16.msra.mxu0 %v3709_v16 }
  0x22   :  { %198 = vmatmul.mubr.bf16.vlgmr.msra.gmra.mrb[0].mxu0 %v3710_v17 }
  0x23   :  { %3237 = vmatprep.mubr.msk.bf16.mxu0 %vm224_vm0, %v3711_v18 }
  0xf5   :  { %v199_v20 = vpop.f32.mrb[0].mxu0 }
  0xf6   :  { %v201_v21 = vpop.f32.mrb[1].mxu0  ;;  %v214_v25 = vpack.c.bf16 %v199_v20, %v199_v20 }
  0xf7   :  { %v215_v22 = vpack.c.bf16 %v201_v21, %v201_v21  ;;  %v203_v23 = vpop.f32.mrb[2].mxu0 }
  0xf8   :  { %v205_v24 = vpop.f32.mrb[3].mxu0  ;;  %v360_v30 = vpack.c.bf16 %v203_v23, %v203_v23  ;;  %v298_v32 = vsel %vm231_vm1, %v214_v25, 0 }
  0xf9   :  { %v233_v26 = vsel %vm231_vm1, %v215_v22, 0  ;;  %v361_v27 = vpack.c.bf16 %v205_v24, %v205_v24  ;;  %3679 = vmatprep.subr.msk.bf16.mxu0 %vm231_vm1, %v215_v22 }
  0xfa   :  { %3236 = vmatpush3.bf16.msra.mxu0 %v233_v26  ;;  %v414_v33 = vsel %vm231_vm1, %v360_v30, 0 }
  0xfb   :  { %3680 = vmatprep.subr.msk.bf16.mxu0 %vm231_vm1, %v214_v25  ;;  %3681 = vmatprep.subr.msk.bf16.mxu1 %vm231_vm1, %v361_v27  ;;  %v363_v31 = vsel %vm231_vm1, %v361_v27, 0 }
  0xfc   :  { %3248 = vmatpush3.bf16.msra.mxu1 %v363_v31 }
  0xfd   :  { %3238 = vmatmul.mubr.msk.bf16.vlgmr.msra.gmra.mrb[4].mxu0 %vm224_vm0, %v3712_v28  ;;  %3682 = vmatprep.subr.msk.bf16.mxu1 %vm231_vm1, %v360_v30 }
  0xfe   :  { %3242 = vmatpush3.bf16.msra.mxu0 %v298_v32  ;;  %3243 = vmatprep.mubr.msk.bf16.mxu0 %vm224_vm0, %v3713_v29 }
  0xff   :  { %3250 = vmatmul.mubr.msk.bf16.vlgmr.msra.gmra.mrb[0].mxu1 %vm224_vm0, %v3712_v28  ;;  %3287 = vmatprep.subr.bf16.mxu0 %v3840_v19 }
 0x100   :  { %3254 = vmatpush3.bf16.msra.mxu1 %v414_v33  ;;  %3255 = vmatprep.mubr.msk.bf16.mxu1 %vm224_vm0, %v3713_v29 }
 0x101   :  { %3259 = vmatprep.subr.bf16.mxu1 %v3840_v19 }
 0x105   :  { %3244 = vmatmul.mubr.msk.bf16.vlgmr.msra.gmra.mrb[8].mxu0 %vm224_vm0, %v3714_v34 }
 0x106   :  { %3288 = vmatpush3.bf16.msra.mxu0 %v3723_v35  ;;  %3303 = vmatprep.mubr.msk.bf16.mxu0 %vm3841_vm2, %v3840_v19  ;;  %v3739_v35 = vld [vmem:[%s4812_s6 + $0x40] sm:$0xff]  }
 0x107   :  { %3256 = vmatmul.mubr.msk.bf16.vlgmr.msra.gmra.mrb[4].mxu1 %vm224_vm0, %v3714_v34  ;;  %3289 = vmatprep.subr.bf16.mxu0 %v3840_v19 }
 0x108   :  { %3260 = vmatpush3.bf16.msra.mxu1 %v3715_v36  ;;  %3275 = vmatprep.mubr.msk.bf16.mxu1 %vm3841_vm2, %v3840_v19  ;;  %v3740_v36 = vld [vmem:[%s4813_s5 + $0x80] sm:$0xff]  }
 0x109   :  { %3261 = vmatprep.subr.bf16.mxu1 %v3840_v19 }
 0x10a   :  { %3290 = vmatpush3.bf16.msra.mxu0 %v3725_v37 }
 0x10b   :  { %3291 = vmatprep.subr.bf16.mxu0 %v3840_v19 }
 0x10c   :  { %3262 = vmatpush3.bf16.msra.mxu1 %v3716_v38 }
 0x10d   :  { %3263 = vmatprep.subr.bf16.mxu1 %v3840_v19 }
 0x10e   :  { %3292 = vmatpush3.bf16.msra.mxu0 %v3727_v50 }
 0x10f   :  { %3293 = vmatprep.subr.bf16.mxu0 %v3840_v19 }
 0x110   :  { %3264 = vmatpush3.bf16.msra.mxu1 %v3717_v39 }
 0x111   :  { %3265 = vmatprep.subr.bf16.mxu1 %v3840_v19 }
 0x112   :  { %3294 = vmatpush3.bf16.msra.mxu0 %v3729_v52  ;;  %v3745_v52 = vld [vmem:[%s4812_s6 + $0x58] sm:$0xff]  }
 0x113   :  { %3295 = vmatprep.subr.bf16.mxu0 %v3840_v19 }
 0x114   :  { %3266 = vmatpush3.bf16.msra.mxu1 %v3718_v40 }
 0x115   :  { %3267 = vmatprep.subr.bf16.mxu1 %v3840_v19 }
 0x116   :  { %3296 = vmatpush3.bf16.msra.mxu0 %v3731_v57  ;;  %v3748_v57 = vld [vmem:[%s4813_s5 + $0xa0] sm:$0xff]  }
 0x117   :  { %3297 = vmatprep.subr.bf16.mxu0 %v3840_v19 }
 0x118   :  { %3268 = vmatpush3.bf16.msra.mxu1 %v3719_v41 }
 0x119   :  { %3269 = vmatprep.subr.bf16.mxu1 %v3840_v19 }
 0x11a   :  { %3298 = vmatpush3.bf16.msra.mxu0 %v3733_v59 }
 0x11b   :  { %3299 = vmatprep.subr.bf16.mxu0 %v3840_v19 }
 0x11c   :  { %3270 = vmatpush3.bf16.msra.mxu1 %v3720_v42  ;;  %v3741_v42 = vld [vmem:[%s4812_s6 + $0x48] sm:$0xff]  }
 0x11d   :  { %3271 = vmatprep.subr.bf16.mxu1 %v3840_v19 }
 0x11e   :  { %3300 = vmatpush3.bf16.msra.mxu0 %v3735_v63 }
 0x11f   :  { %3301 = vmatprep.subr.bf16.mxu0 %v3840_v19 }
 0x120   :  { %3272 = vmatpush3.bf16.msra.mxu1 %v3721_v43  ;;  %v3742_v43 = vld [vmem:[%s4813_s5 + $0x88] sm:$0xff]  }
 0x121   :  { %3273 = vmatprep.subr.bf16.mxu1 %v3840_v19 }
 0x122   :  { %3302 = vmatpush3.bf16.msra.mxu0 %v3737_v1 }
 0x123   :  { %3343 = vmatprep.subr.bf16.mxu0 %v3840_v19 }
 0x124   :  { %3274 = vmatpush3.bf16.msra.mxu1 %v3722_v44 }
 0x125   :  { %3315 = vmatprep.subr.bf16.mxu1 %v3840_v19 }
 0x127   :  { %3276 = vmatmul.mubr.bf16.vlgmr.msra.gmra.mrb[8].mxu1 %v499_v47 }
 0x128   :  { %3316 = vmatpush3.bf16.msra.mxu1 %v3724_v48  ;;  %3279 = vmatprep.mubr.msk.bf16.mxu1 %vm3841_vm2, %v3840_v19 }
 0x129   :  { %3317 = vmatprep.subr.bf16.mxu1 %v3840_v19 }
 0x12c   :  { %3318 = vmatpush3.bf16.msra.mxu1 %v3726_v49  ;;  %v3744_v49 = vld [vmem:[%s4813_s5 + $0x90] sm:$0xff]  }
 0x12d   :  { %3319 = vmatprep.subr.bf16.mxu1 %v3840_v19 }
 0x12f   :  { %3280 = vmatmul.mubr.bf16.gmra.mrb[12].mxu1 %v500_v56  ;;  %v3747_v56 = vld [vmem:[%s4812_s6 + $0x60] sm:$0xff]  }
 0x130   :  { %3320 = vmatpush3.bf16.msra.mxu1 %v3728_v51  ;;  %3283 = vmatprep.mubr.msk.bf16.mxu1 %vm3841_vm2, %v3840_v19 }
 0x131   :  { %3321 = vmatprep.subr.bf16.mxu1 %v3840_v19 }
 0x134   :  { %3322 = vmatpush3.bf16.msra.mxu1 %v3730_v53  ;;  %v3746_v53 = vld [vmem:[%s4813_s5 + $0x98] sm:$0xff]  }
 0x135   :  { %3323 = vmatprep.subr.bf16.mxu1 %v3840_v19 }
 0x137   :  { %3284 = vmatmul.mubr.bf16.gmra.mrb[16].mxu1 %v501_v62  ;;  %v3750_v62 = vld [vmem:[%s4813_s5 + $0xa8] sm:$0xff]  }
 0x138   :  { %3324 = vmatpush3.bf16.msra.mxu1 %v3732_v58  ;;  %3331 = vmatprep.mubr.msk.bf16.mxu1 %vm3841_vm2, %v3840_v19 }
 0x139   :  { %3325 = vmatprep.subr.bf16.mxu1 %v3840_v19 }
 0x13c   :  { %3326 = vmatpush3.bf16.msra.mxu1 %v3734_v60 }
 0x13d   :  { %3327 = vmatprep.subr.bf16.mxu1 %v3840_v19 }
 0x140   :  { %3328 = vmatpush3.bf16.msra.mxu1 %v3736_v0 }
 0x141   :  { %3329 = vmatprep.subr.bf16.mxu1 %v3840_v19 }
 0x144   :  { %3330 = vmatpush3.bf16.msra.mxu1 %v3738_v2  ;;  %v3751_v2 = vld [vmem:[%s4812_s6 + $0x70] sm:$0xff]  }
 0x145   :  { %3371 = vmatprep.subr.bf16.mxu1 %v3840_v19 }
 0x1d0   :  { %v3239_v3 = vpop.f32.mrb[4].mxu0 }
 0x1d1   :  { %v269_v4 = vpop.f32.mrb[5].mxu0 }
 0x1d2   :  { %v3240_v5 = vpop.f32.mrb[6].mxu0  ;;  %v3251_v6 = vpop.f32.mrb[0].mxu1 }
 0x1d3   :  { %v272_v7 = vpop.f32.mrb[7].mxu0  ;;  %v399_v8 = vpop.f32.mrb[1].mxu1  ;;  %v3754_v5 = vld [vmem:[%s4813_s5 + $0xb8] sm:$0xff]  }
 0x1d4   :  { %v3252_v9 = vpop.f32.mrb[2].mxu1 }
 0x1d5   :  { %v402_v10 = vpop.f32.mrb[3].mxu1  ;;  %v3755_v9 = vld [vmem:[%s4812_s6 + $0x80] sm:$0xff]  }
 0x1d8   :  { %v3245_v12 = vpop.f32.mrb[8].mxu0 }
 0x1d9   :  { %v343_v13 = vadd.f32 %v3245_v12, %v3239_v3  ;;  %v334_v14 = vpop.f32.mrb[9].mxu0  ;;  %v3752_v3 = vld [vmem:[%s4813_s5 + $0xb0] sm:$0xff]   ;;  %v3758_v12 = vld [vmem:[%s4813_s5 + $0xc8] sm:$0xff]  }
 0x1da   :  { %v335_v15 = vadd.f32 %v334_v14, %v269_v4  ;;  %v3246_v16 = vpop.f32.mrb[10].mxu0  ;;  %v3257_v17 = vpop.f32.mrb[4].mxu1  ;;  %v3753_v4 = vld [vmem:[%s4812_s6 + $0x78] sm:$0xff]  }
 0x1db   :  { %v356_v18 = vadd.f32 %v2734_v11, %v343_v13  ;;  %v459_v20 = vadd.f32 %v3257_v17, %v3251_v6  ;;  %v337_v21 = vpop.f32.mrb[11].mxu0  ;;  %v450_v22 = vpop.f32.mrb[5].mxu1  ;;  %v860_v6 = vld [vmem:[%s4814_s1 + $0x1] sm:$0xff]  ;;  %v862_v13 = vld [vmem:[%s4814_s1 + $0x11] sm:$0xff]  ;;  %v863_v14 = vld [vmem:[%s4814_s1 + $0x19] sm:$0xff] }
 0x1dc   :  { %v4128_v23 = vadd.f32 %v2734_v11, %v335_v15  ;;  %v338_v24 = vadd.f32 %v337_v21, %v272_v7  ;;  %v451_v25 = vadd.f32 %v450_v22, %v399_v8  ;;  %v3258_v26 = vpop.f32.mrb[6].mxu1  ;;  %v861_v7 = vld [vmem:[%s4814_s1 + $0x9] sm:$0xff]  ;;  %v866_v16 = vpack.c.bf16 %v863_v14, %v862_v13  ;;  %v3761_v22 = vld [vmem:[%s4812_s6 + $0x98] sm:$0xff]  }
 0x1dd   :  { %359 = vst [vmem:[#allocation2 + $0x12] sm:$0x1] %v356_v18  ;;  %v466_v27 = vadd.f32 %v2734_v11, %v459_v20  ;;  %v453_v28 = vpop.f32.mrb[7].mxu1  ;;  %v865_v8 = vpack.c.bf16 %v861_v7, %v860_v6  ;;  %v3759_v18 = vld [vmem:[%s4812_s6 + $0x90] sm:$0xff]   ;;  %v3786_v13 = vld [vmem:[%s4813_s5 + $0x138] sm:$0xff]   ;;  %v1396_v14 = vld [vmem:[%s4814_s1 + $0x3] sm:$0xff] }
 0x1de   :  { %357 = vst [vmem:[#allocation2 + $0x2] sm:$0xff] %v4128_v23  ;;  %v4131_v29 = vadd.f32 %v2734_v11, %v338_v24  ;;  %v464_v30 = vadd.f32 %v2734_v11, %v451_v25  ;;  %v454_v31 = vadd.f32 %v453_v28, %v402_v10  ;;  %v3756_v10 = vld [vmem:[%s4813_s5 + $0xc0] sm:$0xff]   ;;  %v3760_v20 = vld [vmem:[%s4813_s5 + $0xd0] sm:$0xff]  }
 0x1df   :  { %469 = vst [vmem:[#allocation2 + $0x27] sm:$0x1] %v466_v27  ;;  %v864_v24 = vld [vmem:[%s4814_s1 + $0x21] sm:$0x3f] }
 0x1e0   :  { %358 = vst [vmem:[#allocation2 + $0xa] sm:$0xff] %v4131_v29  ;;  %467 = vst [vmem:[#allocation2 + $0x17] sm:$0xff] %v464_v30  ;;  %v465_v32 = vadd.f32 %v2734_v11, %v454_v31  ;;  %v999_v33 = vpack.c.bf16 %v4131_v29, %v4128_v23  ;;  %v3757_v11 = vld [vmem:[%s4812_s6 + $0x88] sm:$0xff]   ;;  %v3762_v23 = vld [vmem:[%s4813_s5 + $0xd8] sm:$0xff]   ;;  %v867_v26 = vpack.c.bf16 %v864_v24, %v864_v24 }
 0x1e1   :  { %v3763_v27 = vld [vmem:[%s4812_s6 + $0xa0] sm:$0xff]   ;;  %v3765_v30 = vld [vmem:[%s4812_s6 + $0xa8] sm:$0xff]  }
 0x1e2   :  { %468 = vst [vmem:[#allocation2 + $0x1f] sm:$0xff] %v465_v32  ;;  %v3764_v28 = vld [vmem:[%s4813_s5 + $0xe0] sm:$0xff]   ;;  %v3766_v31 = vld [vmem:[%s4813_s5 + $0xe8] sm:$0xff]   ;;  %v3767_v32 = vld [vmem:[%s4812_s6 + $0xb0] sm:$0xff]  }
 0x1e3   :  { %v1399_v24 = vld [vmem:[%s4814_s1 + $0x1b] sm:$0xff] }
 0x1e5   :  { %v470_v34 = vld [vmem:[#allocation2] sm:$0xff] }
 0x1e6   :  { %v726_v38 = vld [vmem:[#allocation2 + $0x1] sm:$0xff] }
 0x1e7   :  { %v471_v37 = vld [vmem:[#allocation2 + $0x8] sm:$0xff]  ;;  %v472_v47 = vld [vmem:[#allocation2 + $0x10] sm:$0xff] }
 0x1e8   :  { %v727_v39 = vld [vmem:[#allocation2 + $0x9] sm:$0xff]  ;;  %v475_v40 = vpack.c.bf16 %v471_v37, %v470_v34  ;;  %v728_v48 = vld [vmem:[#allocation2 + $0x11] sm:$0xff] }
 0x1e9   :  { %v731_v41 = vpack.c.bf16 %v727_v39, %v726_v38  ;;  %v473_v44 = vld [vmem:[#allocation2 + $0x18] sm:$0xff]  ;;  %v474_v54 = vld [vmem:[#allocation2 + $0x20] sm:$0x3f]  ;;  %v1129_v37 = vld [vmem:[%s4814_s1 + $0xa] sm:$0xff] }
 0x1ea   :  { %3304 = vmatmul.mubr.bf16.vlgmr.msra.gmra.mrb[12].mxu0 %v475_v40  ;;  %v729_v45 = vld [vmem:[#allocation2 + $0x19] sm:$0xff]  ;;  %v476_v50 = vpack.c.bf16 %v473_v44, %v472_v47  ;;  %v730_v55 = vld [vmem:[#allocation2 + $0x21] sm:$0x3f]  ;;  %v477_v58 = vpack.c.bf16 %v474_v54, %v474_v54  ;;  %v1263_v39 = vld [vmem:[#allocation2 + $0xb] sm:$0xff] }
 0x1eb   :  { %3332 = vmatmul.mubr.bf16.vlgmr.msra.gmra.mrb[20].mxu1 %v731_v41  ;;  %3344 = vmatpush3.bf16.msra.mxu0 %v3739_v35  ;;  %v732_v51 = vpack.c.bf16 %v729_v45, %v728_v48  ;;  %v733_v59 = vpack.c.bf16 %v730_v55, %v730_v55  ;;  %v997_v15 = vld [vmem:[#allocation2 + $0x1a] sm:$0xff]  ;;  %v996_v17 = vld [vmem:[#allocation2 + $0x12] sm:$0xff]  ;;  %v998_v25 = vld [vmem:[#allocation2 + $0x22] sm:$0x3f] }
 0x1ec   :  { %3372 = vmatpush3.bf16.msra.mxu1 %v3740_v36  ;;  %3345 = vmatprep.subr.bf16.mxu0 %v3840_v19  ;;  %v1000_v21 = vpack.c.bf16 %v997_v15, %v996_v17  ;;  %v1001_v29 = vpack.c.bf16 %v998_v25, %v998_v25  ;;  %v3769_v34 = vld [vmem:[%s4812_s6 + $0xb8] sm:$0xff]   ;;  %v1128_v36 = vld [vmem:[%s4814_s1 + $0x2] sm:$0xff]  ;;  %v3776_v54 = vld [vmem:[%s4813_s5 + $0x110] sm:$0xff]  }
 0x1ed   :  { %3373 = vmatprep.subr.bf16.mxu1 %v3840_v19  ;;  %3307 = vmatprep.mubr.msk.bf16.mxu0 %vm3841_vm2, %v3840_v19  ;;  %v3770_v35 = vld [vmem:[%s4813_s5 + $0xf8] sm:$0xff]   ;;  %v1262_v38 = vld [vmem:[#allocation2 + $0x3] sm:$0xff]  ;;  %v1133_v40 = vpack.c.bf16 %v1129_v37, %v1128_v36  ;;  %v1397_v15 = vld [vmem:[%s4814_s1 + $0xb] sm:$0xff] }
 0x1ee   :  { %3335 = vmatprep.mubr.msk.bf16.mxu1 %vm3841_vm2, %v3840_v19  ;;  %v3771_v41 = vld [vmem:[%s4812_s6 + $0xc0] sm:$0xff]   ;;  %v3773_v44 = vld [vmem:[%s4812_s6 + $0xc8] sm:$0xff]   ;;  %v1264_v48 = vld [vmem:[#allocation2 + $0x13] sm:$0xff] }
 0x1ef   :  { %3346 = vmatpush3.bf16.msra.mxu0 %v3741_v42  ;;  %v3772_v42 = vld [vmem:[%s4813_s5 + $0x100] sm:$0xff]   ;;  %v3774_v45 = vld [vmem:[%s4813_s5 + $0x108] sm:$0xff]   ;;  %v1532_v25 = vld [vmem:[#allocation2 + $0x14] sm:$0xff] }
 0x1f0   :  { %3374 = vmatpush3.bf16.msra.mxu1 %v3742_v43  ;;  %3347 = vmatprep.subr.bf16.mxu0 %v3840_v19  ;;  %v1267_v43 = vpack.c.bf16 %v1263_v39, %v1262_v38  ;;  %v1131_v47 = vld [vmem:[%s4814_s1 + $0x1a] sm:$0xff]  ;;  %v1531_v17 = vld [vmem:[#allocation2 + $0xc] sm:$0xff]  ;;  %v1664_v39 = vld [vmem:[%s4814_s1 + $0x4] sm:$0xff] }
 0x1f1   :  { %3375 = vmatprep.subr.bf16.mxu1 %v3840_v19  ;;  %v3792_v36 = vld [vmem:[%s4812_s6 + $0x128] sm:$0xff]   ;;  %v3793_v37 = vld [vmem:[%s4812_s6 + $0x130] sm:$0xff]   ;;  %v3794_v38 = vld [vmem:[%s4812_s6 + $0x138] sm:$0xff]  }
 0x1f2   :  { %3308 = vmatmul.mubr.bf16.gmra.mrb[16].mxu0 %v476_v50 }
 0x1f3   :  { %3336 = vmatmul.mubr.bf16.gmra.mrb[24].mxu1 %v732_v51  ;;  %3348 = vmatpush3.bf16.msra.mxu0 %v3743_v46  ;;  %v1130_v46 = vld [vmem:[%s4814_s1 + $0x12] sm:$0xff] }
 0x1f4   :  { %3376 = vmatpush3.bf16.msra.mxu1 %v3744_v49  ;;  %3349 = vmatprep.subr.bf16.mxu0 %v3840_v19  ;;  %v1265_v49 = vld [vmem:[#allocation2 + $0x1b] sm:$0xff]  ;;  %v1134_v51 = vpack.c.bf16 %v1131_v47, %v1130_v46 }
 0x1f5   :  { %3377 = vmatprep.subr.bf16.mxu1 %v3840_v19  ;;  %3311 = vmatprep.mubr.msk.bf16.mxu0 %vm3841_vm2, %v3840_v19 }
 0x1f6   :  { %3339 = vmatprep.mubr.msk.bf16.mxu1 %vm3841_vm2, %v3840_v19 }
 0x1f7   :  { %3350 = vmatpush3.bf16.msra.mxu0 %v3745_v52 }
 0x1f8   :  { %3378 = vmatpush3.bf16.msra.mxu1 %v3746_v53  ;;  %3351 = vmatprep.subr.bf16.mxu0 %v3840_v19  ;;  %v3775_v53 = vld [vmem:[%s4812_s6 + $0xd0] sm:$0xff]  }
 0x1f9   :  { %3379 = vmatprep.subr.bf16.mxu1 %v3840_v19 }
 0x1fa   :  { %3312 = vmatmul.mubr.bf16.gmra.mrb[20].mxu0 %v477_v58  ;;  %v4182_v60 = vpop.f32.mrb[8].mxu1  ;;  %v3777_v58 = vld [vmem:[%s4812_s6 + $0xd8] sm:$0xff]  }
 0x1fb   :  { %3340 = vmatmul.mubr.bf16.gmra.mrb[28].mxu1 %v733_v59  ;;  %3352 = vmatpush3.bf16.msra.mxu0 %v3747_v56  ;;  %v3277_v63 = vpop.f32.mrb[9].mxu1  ;;  %v1268_v56 = vpack.c.bf16 %v1265_v49, %v1264_v48  ;;  %v3778_v59 = vld [vmem:[%s4813_s5 + $0x118] sm:$0xff]  }
 0x1fc   :  { %3380 = vmatpush3.bf16.msra.mxu1 %v3748_v57  ;;  %3353 = vmatprep.subr.bf16.mxu0 %v3840_v19  ;;  %v4192_v0 = vpop.f32.mrb[10].mxu1 }
 0x1fd   :  { %3381 = vmatprep.subr.bf16.mxu1 %v3840_v19  ;;  %3359 = vmatprep.mubr.msk.bf16.mxu0 %vm3841_vm2, %v3840_v19  ;;  %v3278_v1 = vpop.f32.mrb[11].mxu1 }
 0x1fe   :  { %3387 = vmatprep.mubr.msk.bf16.mxu1 %vm3841_vm2, %v3840_v19 }
 0x1ff   :  { %3354 = vmatpush3.bf16.msra.mxu0 %v3749_v61  ;;  %v1132_v61 = vld [vmem:[%s4814_s1 + $0x22] sm:$0x3f] }
 0x200   :  { %3382 = vmatpush3.bf16.msra.mxu1 %v3750_v62  ;;  %3355 = vmatprep.subr.bf16.mxu0 %v3840_v19  ;;  %v1266_v62 = vld [vmem:[#allocation2 + $0x23] sm:$0x3f]  ;;  %v1135_v1 = vpack.c.bf16 %v1132_v61, %v1132_v61 }
 0x201   :  { %3383 = vmatprep.subr.bf16.mxu1 %v3840_v19  ;;  %v1269_v6 = vpack.c.bf16 %v1266_v62, %v1266_v62 }
 0x202   :  { %v4340_v50 = vpop.f32.mrb[12].mxu1 }
 0x203   :  { %3356 = vmatpush3.bf16.msra.mxu0 %v3751_v2  ;;  %v3281_v52 = vpop.f32.mrb[13].mxu1 }
 0x204   :  { %3384 = vmatpush3.bf16.msra.mxu1 %v3752_v3  ;;  %3357 = vmatprep.subr.bf16.mxu0 %v3840_v19  ;;  %v4348_v55 = vpop.f32.mrb[14].mxu1  ;;  %v3779_v3 = vld [vmem:[%s4812_s6 + $0xe0] sm:$0xff]  }
 0x205   :  { %3385 = vmatprep.subr.bf16.mxu1 %v3840_v19  ;;  %v3282_v57 = vpop.f32.mrb[15].mxu1 }
 0x207   :  { %3358 = vmatpush3.bf16.msra.mxu0 %v3753_v4  ;;  %v3780_v4 = vld [vmem:[%s4813_s5 + $0x120] sm:$0xff]  }
 0x208   :  { %3386 = vmatpush3.bf16.msra.mxu1 %v3754_v5  ;;  %3399 = vmatprep.subr.bf16.mxu0 %v3840_v19 }
 0x209   :  { %3427 = vmatprep.subr.bf16.mxu1 %v3840_v19 }
 0x20a   :  { %3360 = vmatmul.mubr.bf16.vlgmr.msra.gmra.mrb[24].mxu0 %v865_v8  ;;  %v4367_v63 = vpop.f32.mrb[16].mxu1  ;;  %v3781_v8 = vld [vmem:[%s4812_s6 + $0xe8] sm:$0xff]  }
 0x20b   :  { %3388 = vmatmul.mubr.bf16.vlgmr.msra.gmra.mrb[32].mxu1 %v999_v33  ;;  %3400 = vmatpush3.bf16.msra.mxu0 %v3755_v9  ;;  %v3768_v33 = vld [vmem:[%s4813_s5 + $0xf0] sm:$0xff]   ;;  %v3285_v2 = vpop.f32.mrb[17].mxu1  ;;  %v3782_v9 = vld [vmem:[%s4813_s5 + $0x128] sm:$0xff]  }
 0x20c   :  { %3428 = vmatpush3.bf16.msra.mxu1 %v3756_v10  ;;  %3401 = vmatprep.subr.bf16.mxu0 %v3840_v19  ;;  %v619_v5 = vpop.f32.mrb[18].mxu1  ;;  %v3783_v10 = vld [vmem:[%s4812_s6 + $0xf0] sm:$0xff]  }
 0x20d   :  { %3429 = vmatprep.subr.bf16.mxu1 %v3840_v19  ;;  %3363 = vmatprep.mubr.msk.bf16.mxu0 %vm3841_vm2, %v3840_v19  ;;  %v3286_v7 = vpop.f32.mrb[19].mxu1 }
 0x20e   :  { %3391 = vmatprep.mubr.msk.bf16.mxu1 %vm3841_vm2, %v3840_v19 }
 0x20f   :  { %3402 = vmatpush3.bf16.msra.mxu0 %v3757_v11  ;;  %v3784_v11 = vld [vmem:[%s4813_s5 + $0x130] sm:$0xff]  }
 0x210   :  { %3430 = vmatpush3.bf16.msra.mxu1 %v3758_v12  ;;  %3403 = vmatprep.subr.bf16.mxu0 %v3840_v19  ;;  %v3785_v12 = vld [vmem:[%s4812_s6 + $0xf8] sm:$0xff]  }
 0x211   :  { %3431 = vmatprep.subr.bf16.mxu1 %v3840_v19 }
 0x212   :  { %3364 = vmatmul.mubr.bf16.gmra.mrb[28].mxu0 %v866_v16  ;;  %v1530_v16 = vld [vmem:[#allocation2 + $0x4] sm:$0xff] }
 0x213   :  { %3392 = vmatmul.mubr.bf16.gmra.mrb[36].mxu1 %v1000_v21  ;;  %3404 = vmatpush3.bf16.msra.mxu0 %v3759_v18  ;;  %v1401_v18 = vpack.c.bf16 %v1397_v15, %v1396_v14  ;;  %v1535_v21 = vpack.c.bf16 %v1531_v17, %v1530_v16 }
 0x214   :  { %3432 = vmatpush3.bf16.msra.mxu1 %v3760_v20  ;;  %3405 = vmatprep.subr.bf16.mxu0 %v3840_v19  ;;  %v3787_v20 = vld [vmem:[%s4812_s6 + $0x100] sm:$0xff]  }
 0x215   :  { %3433 = vmatprep.subr.bf16.mxu1 %v3840_v19  ;;  %3367 = vmatprep.mubr.msk.bf16.mxu0 %vm3841_vm2, %v3840_v19 }
 0x216   :  { %3395 = vmatprep.mubr.msk.bf16.mxu1 %vm3841_vm2, %v3840_v19 }
 0x217   :  { %3406 = vmatpush3.bf16.msra.mxu0 %v3761_v22  ;;  %v3788_v22 = vld [vmem:[%s4812_s6 + $0x108] sm:$0xff]  }
 0x218   :  { %3434 = vmatpush3.bf16.msra.mxu1 %v3762_v23  ;;  %3407 = vmatprep.subr.bf16.mxu0 %v3840_v19  ;;  %v1398_v23 = vld [vmem:[%s4814_s1 + $0x13] sm:$0xff] }
 0x219   :  { %3435 = vmatprep.subr.bf16.mxu1 %v3840_v19 }
 0x21a   :  { %3368 = vmatmul.mubr.bf16.gmra.mrb[32].mxu0 %v867_v26  ;;  %v1533_v26 = vld [vmem:[#allocation2 + $0x1c] sm:$0xff] }
 0x21b   :  { %3396 = vmatmul.mubr.bf16.gmra.mrb[40].mxu1 %v1001_v29  ;;  %3408 = vmatpush3.bf16.msra.mxu0 %v3763_v27  ;;  %v1402_v27 = vpack.c.bf16 %v1399_v24, %v1398_v23  ;;  %v1536_v29 = vpack.c.bf16 %v1533_v26, %v1532_v25 }
 0x21c   :  { %3436 = vmatpush3.bf16.msra.mxu1 %v3764_v28  ;;  %3409 = vmatprep.subr.bf16.mxu0 %v3840_v19  ;;  %v3789_v28 = vld [vmem:[%s4812_s6 + $0x110] sm:$0xff]  }
 0x21d   :  { %3437 = vmatprep.subr.bf16.mxu1 %v3840_v19  ;;  %3415 = vmatprep.mubr.msk.bf16.mxu0 %vm3841_vm2, %v3840_v19 }
 0x21e   :  { %3443 = vmatprep.mubr.msk.bf16.mxu1 %vm3841_vm2, %v3840_v19 }
 0x21f   :  { %3410 = vmatpush3.bf16.msra.mxu0 %v3765_v30  ;;  %v3790_v30 = vld [vmem:[%s4812_s6 + $0x118] sm:$0xff]  }
 0x220   :  { %3438 = vmatpush3.bf16.msra.mxu1 %v3766_v31  ;;  %3411 = vmatprep.subr.bf16.mxu0 %v3840_v19  ;;  %v1400_v31 = vld [vmem:[%s4814_s1 + $0x23] sm:$0x3f] }
 0x221   :  { %3439 = vmatprep.subr.bf16.mxu1 %v3840_v19 }
 0x223   :  { %3412 = vmatpush3.bf16.msra.mxu0 %v3767_v32  ;;  %v1534_v32 = vld [vmem:[#allocation2 + $0x24] sm:$0x3f] }
 0x224   :  { %3440 = vmatpush3.bf16.msra.mxu1 %v3768_v33  ;;  %3413 = vmatprep.subr.bf16.mxu0 %v3840_v19  ;;  %v1403_v33 = vpack.c.bf16 %v1400_v31, %v1400_v31 }
 0x225   :  { %3441 = vmatprep.subr.bf16.mxu1 %v3840_v19 }
 0x227   :  { %3414 = vmatpush3.bf16.msra.mxu0 %v3769_v34  ;;  %v3791_v34 = vld [vmem:[%s4812_s6 + $0x120] sm:$0xff]  }
 0x228   :  { %3442 = vmatpush3.bf16.msra.mxu1 %v3770_v35  ;;  %3455 = vmatprep.subr.bf16.mxu0 %v3840_v19  ;;  %v1537_v35 = vpack.c.bf16 %v1534_v32, %v1534_v32 }
 0x229   :  { %3483 = vmatprep.subr.bf16.mxu1 %v3840_v19 }
 0x22a   :  { %3416 = vmatmul.mubr.bf16.vlgmr.msra.gmra.mrb[36].mxu0 %v1133_v40  ;;  %v1665_v40 = vld [vmem:[%s4814_s1 + $0xc] sm:$0xff] }
 0x22b   :  { %3444 = vmatmul.mubr.bf16.vlgmr.msra.gmra.mrb[44].mxu1 %v1267_v43  ;;  %3456 = vmatpush3.bf16.msra.mxu0 %v3771_v41  ;;  %v1669_v41 = vpack.c.bf16 %v1665_v40, %v1664_v39  ;;  %v1667_v43 = vld [vmem:[%s4814_s1 + $0x1c] sm:$0xff] }
 0x22c   :  { %3484 = vmatpush3.bf16.msra.mxu1 %v3772_v42  ;;  %3457 = vmatprep.subr.bf16.mxu0 %v3840_v19  ;;  %v1666_v42 = vld [vmem:[%s4814_s1 + $0x14] sm:$0xff] }
 0x22d   :  { %3485 = vmatprep.subr.bf16.mxu1 %v3840_v19  ;;  %3419 = vmatprep.mubr.msk.bf16.mxu0 %vm3841_vm2, %v3840_v19 }
 0x22e   :  { %3447 = vmatprep.mubr.msk.bf16.mxu1 %vm3841_vm2, %v3840_v19 }
 0x22f   :  { %3458 = vmatpush3.bf16.msra.mxu0 %v3773_v44  ;;  %v1670_v44 = vpack.c.bf16 %v1667_v43, %v1666_v42 }
 0x230   :  { %3486 = vmatpush3.bf16.msra.mxu1 %v3774_v45  ;;  %3459 = vmatprep.subr.bf16.mxu0 %v3840_v19  ;;  %v1668_v45 = vld [vmem:[%s4814_s1 + $0x24] sm:$0x3f] }
 0x231   :  { %3487 = vmatprep.subr.bf16.mxu1 %v3840_v19  ;;  %v1671_v46 = vpack.c.bf16 %v1668_v45, %v1668_v45 }
 0x232   :  { %3420 = vmatmul.mubr.bf16.gmra.mrb[40].mxu0 %v1134_v51 }
 0x233   :  { %3448 = vmatmul.mubr.bf16.gmra.mrb[48].mxu1 %v1268_v56  ;;  %3460 = vmatpush3.bf16.msra.mxu0 %v3775_v53 }
 0x234   :  { %3488 = vmatpush3.bf16.msra.mxu1 %v3776_v54  ;;  %3461 = vmatprep.subr.bf16.mxu0 %v3840_v19 }
 0x235   :  { %3489 = vmatprep.subr.bf16.mxu1 %v3840_v19  ;;  %3423 = vmatprep.mubr.msk.bf16.mxu0 %vm3841_vm2, %v3840_v19 }
 0x236   :  { %3451 = vmatprep.mubr.msk.bf16.mxu1 %vm3841_vm2, %v3840_v19 }
 0x237   :  { %3462 = vmatpush3.bf16.msra.mxu0 %v3777_v58 }
 0x238   :  { %3490 = vmatpush3.bf16.msra.mxu1 %v3778_v59  ;;  %3463 = vmatprep.subr.bf16.mxu0 %v3840_v19 }
 0x239   :  { %3491 = vmatprep.subr.bf16.mxu1 %v3840_v19 }
 0x23a   :  { %3424 = vmatmul.mubr.bf16.gmra.mrb[44].mxu0 %v1135_v1 }
 0x23b   :  { %3452 = vmatmul.mubr.bf16.gmra.mrb[52].mxu1 %v1269_v6  ;;  %3464 = vmatpush3.bf16.msra.mxu0 %v3779_v3 }
 0x23c   :  { %3492 = vmatpush3.bf16.msra.mxu1 %v3780_v4  ;;  %3465 = vmatprep.subr.bf16.mxu0 %v3840_v19 }
 0x23d   :  { %3493 = vmatprep.subr.bf16.mxu1 %v3840_v19  ;;  %3471 = vmatprep.mubr.msk.bf16.mxu0 %vm3841_vm2, %v3840_v19 }
 0x23e   :  { %3499 = vmatprep.mubr.msk.bf16.mxu1 %vm3841_vm2, %v3840_v19 }
 0x23f   :  { %3466 = vmatpush3.bf16.msra.mxu0 %v3781_v8 }
 0x240   :  { %3494 = vmatpush3.bf16.msra.mxu1 %v3782_v9  ;;  %3467 = vmatprep.subr.bf16.mxu0 %v3840_v19 }
 0x241   :  { %3495 = vmatprep.subr.bf16.mxu1 %v3840_v19 }
 0x243   :  { %3468 = vmatpush3.bf16.msra.mxu0 %v3783_v10 }
 0x244   :  { %3496 = vmatpush3.bf16.msra.mxu1 %v3784_v11  ;;  %3469 = vmatprep.subr.bf16.mxu0 %v3840_v19 }
 0x245   :  { %3497 = vmatprep.subr.bf16.mxu1 %v3840_v19 }
 0x247   :  { %3470 = vmatpush3.bf16.msra.mxu0 %v3785_v12 }
 0x248   :  { %3498 = vmatpush3.bf16.msra.mxu1 %v3786_v13  ;;  %3511 = vmatprep.subr.bf16.mxu0 %v3840_v19 }
 0x249   :  { %3539 = vmatprep.subr.bf16.mxu1 %v3840_v19 }
 0x24a   :  { %3472 = vmatmul.mubr.bf16.vlgmr.msra.gmra.mrb[48].mxu0 %v1401_v18 }
 0x24b   :  { %3500 = vmatmul.mubr.bf16.vlgmr.msra.gmra.mrb[56].mxu1 %v1535_v21  ;;  %3512 = vmatpush3.bf16.msra.mxu0 %v3787_v20 }
 0x24c   :  { %3475 = vmatprep.mubr.msk.bf16.mxu0 %vm3841_vm2, %v3840_v19  ;;  %3513 = vmatprep.subr.bf16.mxu0 %v3840_v19 }
 0x24d   :  { %3503 = vmatprep.mubr.msk.bf16.mxu1 %vm3841_vm2, %v3840_v19 }
 0x24f   :  { %3514 = vmatpush3.bf16.msra.mxu0 %v3788_v22 }
 0x250   :  { %3515 = vmatprep.subr.bf16.mxu0 %v3840_v19 }
 0x252   :  { %3476 = vmatmul.mubr.bf16.gmra.mrb[52].mxu0 %v1402_v27 }
 0x253   :  { %3504 = vmatmul.mubr.bf16.gmra.mrb[60].mxu1 %v1536_v29  ;;  %3516 = vmatpush3.bf16.msra.mxu0 %v3789_v28 }
 0x254   :  { %3479 = vmatprep.mubr.msk.bf16.mxu0 %vm3841_vm2, %v3840_v19  ;;  %3517 = vmatprep.subr.bf16.mxu0 %v3840_v19 }
 0x255   :  { %3507 = vmatprep.mubr.msk.bf16.mxu1 %vm3841_vm2, %v3840_v19 }
 0x257   :  { %3518 = vmatpush3.bf16.msra.mxu0 %v3790_v30 }
 0x258   :  { %3519 = vmatprep.subr.bf16.mxu0 %v3840_v19 }
 0x25a   :  { %3480 = vmatmul.mubr.bf16.gmra.mrb[56].mxu0 %v1403_v33 }
 0x25b   :  { %3508 = vmatmul.mubr.bf16.gmra.mrb[64].mxu1 %v1537_v35  ;;  %3520 = vmatpush3.bf16.msra.mxu0 %v3791_v34 }
 0x25c   :  { %3527 = vmatprep.mubr.msk.bf16.mxu0 %vm3841_vm2, %v3840_v19  ;;  %3521 = vmatprep.subr.bf16.mxu0 %v3840_v19 }
 0x25d   :  { %3555 = vmatprep.mubr.msk.bf16.mxu1 %vm3841_vm2, %v3840_v19 }
 0x25f   :  { %3522 = vmatpush3.bf16.msra.mxu0 %v3792_v36 }
 0x260   :  { %3523 = vmatprep.subr.bf16.mxu0 %v3840_v19 }
 0x263   :  { %3524 = vmatpush3.bf16.msra.mxu0 %v3793_v37 }
 0x264   :  { %3525 = vmatprep.subr.bf16.mxu0 %v3840_v19 }
 0x267   :  { %3526 = vmatpush3.bf16.msra.mxu0 %v3794_v38 }
 0x268   :  { %3567 = vmatprep.subr.bf16.mxu0 %v3840_v19 }
 0x26a   :  { %3528 = vmatmul.mubr.bf16.vlgmr.msra.gmra.mrb[60].mxu0 %v1669_v41 }
 0x26b   :  { %3531 = vmatprep.mubr.msk.bf16.mxu0 %vm3841_vm2, %v3840_v19 }
 0x272   :  { %3532 = vmatmul.mubr.bf16.gmra.mrb[64].mxu0 %v1670_v44 }
 0x273   :  { %3535 = vmatprep.mubr.msk.bf16.mxu0 %vm3841_vm2, %v3840_v19 }
 0x27a   :  { %3536 = vmatmul.mubr.bf16.gmra.mrb[68].mxu0 %v1671_v46 }
 0x27b   :  { %3583 = vmatprep.mubr.msk.bf16.mxu0 %vm3841_vm2, %v3840_v19 }
 0x2bd   :  { %v704_v47 = vpop.f32.mrb[12].mxu0 }
 0x2be   :  { %v833_v48 = vpop.f32.mrb[20].mxu1  ;;  %v705_v49 = vadd.f32 %v704_v47, %v4182_v60  ;;  %v3305_v51 = vpop.f32.mrb[13].mxu0 }
 0x2bf   :  { %v3333_v52 = vpop.f32.mrb[21].mxu1  ;;  %v707_v53 = vpop.f32.mrb[14].mxu0 }
 0x2c0   :  { %v836_v54 = vpop.f32.mrb[22].mxu1  ;;  %v855_v56 = vadd.f32 %v833_v48, %v705_v49  ;;  %v708_v57 = vadd.f32 %v707_v53, %v4192_v0  ;;  %v3306_v58 = vpop.f32.mrb[15].mxu0  ;;  %v3795_v53 = vld [vmem:[%s4816_s10 + $0x40] sm:$0xff]  }
 0x2c1   :  { %v3334_v59 = vpop.f32.mrb[23].mxu1  ;;  %3540 = vmatpush3.bf16.msra.mxu1 %v3795_v53  ;;  %v3799_v58 = vld [vmem:[%s4816_s10 + $0x50] sm:$0xff]  }
 0x2c2   :  { %v856_v61 = vadd.f32 %v836_v54, %v708_v57  ;;  %v3796_v54 = vld [vmem:[%s4816_s10] sm:$0xff]   ;;  %3541 = vmatprep.subr.bf16.mxu1 %v3840_v19  ;;  %v3798_v57 = vld [vmem:[%s4816_s10 + $0x8] sm:$0xff]   ;;  %v3800_v59 = vld [vmem:[%s4816_s10 + $0x10] sm:$0xff]  }
 0x2c3   :  { %3568 = vmatpush3.bf16.msra.mxu0 %v3796_v54 }
 0x2c4   :  { %3569 = vmatprep.subr.bf16.mxu0 %v3840_v19 }
 0x2c5   :  { %v712_v62 = vpop.f32.mrb[16].mxu0 }
 0x2c6   :  { %v841_v1 = vpop.f32.mrb[24].mxu1  ;;  %v713_v2 = vadd.f32 %v712_v62, %v4340_v50  ;;  %v3309_v3 = vpop.f32.mrb[17].mxu0 }
 0x2c7   :  { %v3337_v4 = vpop.f32.mrb[25].mxu1  ;;  %v715_v5 = vpop.f32.mrb[18].mxu0  ;;  %3570 = vmatpush3.bf16.msra.mxu0 %v3798_v57 }
 0x2c8   :  { %v844_v6 = vpop.f32.mrb[26].mxu1  ;;  %v857_v7 = vadd.f32 %v841_v1, %v713_v2  ;;  %v716_v60 = vadd.f32 %v715_v5, %v4348_v55  ;;  %v3310_v8 = vpop.f32.mrb[19].mxu0  ;;  %3571 = vmatprep.subr.bf16.mxu0 %v3840_v19  ;;  %v3801_v4 = vld [vmem:[%s4816_s10 + $0x58] sm:$0xff]  }
 0x2c9   :  { %v3338_v9 = vpop.f32.mrb[27].mxu1  ;;  %v3802_v5 = vld [vmem:[%s4816_s10 + $0x18] sm:$0xff]  }
 0x2ca   :  { %v858_v10 = vadd.f32 %v844_v6, %v716_v60 }
 0x2cb   :  { %3572 = vmatpush3.bf16.msra.mxu0 %v3800_v59 }
 0x2cc   :  { %3573 = vmatprep.subr.bf16.mxu0 %v3840_v19 }
 0x2cd   :  { %v720_v11 = vpop.f32.mrb[20].mxu0 }
 0x2ce   :  { %v849_v12 = vpop.f32.mrb[28].mxu1  ;;  %v721_v0 = vadd.f32 %v720_v11, %v4367_v63  ;;  %v3313_v13 = vpop.f32.mrb[21].mxu0 }
 0x2cf   :  { %v3341_v14 = vpop.f32.mrb[29].mxu1  ;;  %v723_v15 = vpop.f32.mrb[22].mxu0  ;;  %3574 = vmatpush3.bf16.msra.mxu0 %v3802_v5 }
 0x2d0   :  { %v852_v16 = vpop.f32.mrb[30].mxu1  ;;  %v859_v17 = vadd.f32 %v849_v12, %v721_v0  ;;  %v3314_v50 = vpop.f32.mrb[23].mxu0  ;;  %3575 = vmatprep.subr.bf16.mxu0 %v3840_v19  ;;  %v3803_v12 = vld [vmem:[%s4816_s10 + $0x60] sm:$0xff]  }
 0x2d1   :  { %v3342_v18 = vpop.f32.mrb[31].mxu1  ;;  %v3804_v0 = vld [vmem:[%s4816_s10 + $0x20] sm:$0xff]   ;;  %v3805_v50 = vld [vmem:[%s4816_s10 + $0x68] sm:$0xff]  }
 0x2d2   :  { %v3806_v18 = vld [vmem:[%s4816_s10 + $0x28] sm:$0xff]  }
 0x2d3   :  { %3576 = vmatpush3.bf16.msra.mxu0 %v3804_v0  ;;  %v2947_v0 = vld [vmem:[%s4817_s7] ss:$0 sm:$0xff] }
 0x2d4   :  { %3577 = vmatprep.subr.bf16.mxu0 %v3840_v19 }
 0x2d7   :  { %3578 = vmatpush3.bf16.msra.mxu0 %v3806_v18 }
 0x2d8   :  { %3579 = vmatprep.subr.bf16.mxu0 %v3840_v19 }
 0x2dd   :  { %v967_v20 = vpop.f32.mrb[24].mxu0 }
 0x2de   :  { %v1101_v21 = vpop.f32.mrb[32].mxu1  ;;  %v989_v22 = vadd.f32 %v967_v20, %v855_v56  ;;  %v3361_v23 = vpop.f32.mrb[25].mxu0  ;;  %v3797_v56 = vld [vmem:[%s4816_s10 + $0x48] sm:$0xff]  }
 0x2df   :  { %v3389_v24 = vpop.f32.mrb[33].mxu1  ;;  %v970_v55 = vpop.f32.mrb[26].mxu0  ;;  %3542 = vmatpush3.bf16.msra.mxu1 %v3797_v56 }
 0x2e0   :  { %v1104_v25 = vpop.f32.mrb[34].mxu1  ;;  %v1123_v26 = vadd.f32 %v1101_v21, %v989_v22  ;;  %v990_v27 = vadd.f32 %v970_v55, %v856_v61  ;;  %v3362_v29 = vpop.f32.mrb[27].mxu0  ;;  %3543 = vmatprep.subr.bf16.mxu1 %v3840_v19 }
 0x2e1   :  { %v3390_v28 = vpop.f32.mrb[35].mxu1  ;;  %v3810_v29 = vld [vmem:[%s4816_s10 + $0x38] sm:$0xff]  }
 0x2e2   :  { %v1124_v30 = vadd.f32 %v1104_v25, %v990_v27  ;;  %v3807_v25 = vld [vmem:[%s4816_s10 + $0x70] sm:$0xff]   ;;  %v3809_v28 = vld [vmem:[%s4816_s10 + $0x78] sm:$0xff]  }
 0x2e3   :  { %3544 = vmatpush3.bf16.msra.mxu1 %v3799_v58 }
 0x2e4   :  { %3545 = vmatprep.subr.bf16.mxu1 %v3840_v19 }
 0x2e5   :  { %v975_v63 = vpop.f32.mrb[28].mxu0 }
 0x2e6   :  { %v1109_v31 = vpop.f32.mrb[36].mxu1  ;;  %v991_v32 = vadd.f32 %v975_v63, %v857_v7  ;;  %v3365_v33 = vpop.f32.mrb[29].mxu0 }
 0x2e7   :  { %v3393_v34 = vpop.f32.mrb[37].mxu1  ;;  %v978_v35 = vpop.f32.mrb[30].mxu0  ;;  %3546 = vmatpush3.bf16.msra.mxu1 %v3801_v4 }
 0x2e8   :  { %v1112_v36 = vpop.f32.mrb[38].mxu1  ;;  %v1125_v37 = vadd.f32 %v1109_v31, %v991_v32  ;;  %v992_v38 = vadd.f32 %v978_v35, %v858_v10  ;;  %v3366_v40 = vpop.f32.mrb[31].mxu0  ;;  %3547 = vmatprep.subr.bf16.mxu1 %v3840_v19 }
 0x2e9   :  { %v3394_v39 = vpop.f32.mrb[39].mxu1 }
 0x2ea   :  { %v4492_v41 = vadd.f32 %v1112_v36, %v992_v38 }
 0x2eb   :  { %3548 = vmatpush3.bf16.msra.mxu1 %v3803_v12 }
 0x2ec   :  { %3549 = vmatprep.subr.bf16.mxu1 %v3840_v19 }
 0x2ed   :  { %v983_v42 = vpop.f32.mrb[32].mxu0 }
 0x2ee   :  { %v1117_v43 = vpop.f32.mrb[40].mxu1  ;;  %v993_v44 = vadd.f32 %v983_v42, %v859_v17  ;;  %v3369_v46 = vpop.f32.mrb[33].mxu0 }
 0x2ef   :  { %v3397_v45 = vpop.f32.mrb[41].mxu1  ;;  %v986_v48 = vpop.f32.mrb[34].mxu0  ;;  %3550 = vmatpush3.bf16.msra.mxu1 %v3805_v50 }
 0x2f0   :  { %v1120_v47 = vpop.f32.mrb[42].mxu1  ;;  %v4494_v49 = vadd.f32 %v1117_v43, %v993_v44  ;;  %v3370_v52 = vpop.f32.mrb[35].mxu0  ;;  %3551 = vmatprep.subr.bf16.mxu1 %v3840_v19 }
 0x2f1   :  { %v3398_v51 = vpop.f32.mrb[43].mxu1 }
 0x2f3   :  { %3552 = vmatpush3.bf16.msra.mxu1 %v3807_v25 }
 0x2f4   :  { %3553 = vmatprep.subr.bf16.mxu1 %v3840_v19 }
 0x2f7   :  { %3554 = vmatpush3.bf16.msra.mxu1 %v3809_v28 }
 0x2f8   :  { %3595 = vmatprep.subr.bf16.mxu1 %v3840_v19 }
 0x2fd   :  { %v1235_v61 = vpop.f32.mrb[36].mxu0 }
 0x2fe   :  { %v1369_v62 = vpop.f32.mrb[44].mxu1  ;;  %v1257_v1 = vadd.f32 %v1235_v61, %v1123_v26  ;;  %v3417_v2 = vpop.f32.mrb[37].mxu0  ;;  %v3808_v26 = vld [vmem:[%s4816_s10 + $0x30] sm:$0xff]  }
 0x2ff   :  { %v3445_v3 = vpop.f32.mrb[45].mxu1  ;;  %v1238_v6 = vpop.f32.mrb[38].mxu0  ;;  %3580 = vmatpush3.bf16.msra.mxu0 %v3808_v26 }
 0x300   :  { %v1372_v7 = vpop.f32.mrb[46].mxu1  ;;  %v1391_v60 = vadd.f32 %v1369_v62, %v1257_v1  ;;  %v1258_v8 = vadd.f32 %v1238_v6, %v1124_v30  ;;  %v3418_v10 = vpop.f32.mrb[39].mxu0  ;;  %3581 = vmatprep.subr.bf16.mxu0 %v3840_v19 }
 0x301   :  { %v3446_v9 = vpop.f32.mrb[47].mxu1 }
 0x302   :  { %v1392_v11 = vadd.f32 %v1372_v7, %v1258_v8 }
 0x303   :  { %3582 = vmatpush3.bf16.msra.mxu0 %v3810_v29 }
 0x304   :  { %3623 = vmatprep.subr.bf16.mxu0 %v3840_v19 }
 0x305   :  { %v1243_v13 = vpop.f32.mrb[40].mxu0 }
 0x306   :  { %v1377_v14 = vpop.f32.mrb[48].mxu1  ;;  %v1259_v15 = vadd.f32 %v1243_v13, %v1125_v37  ;;  %v3421_v16 = vpop.f32.mrb[41].mxu0 }
 0x307   :  { %v3449_v17 = vpop.f32.mrb[49].mxu1  ;;  %v1246_v20 = vpop.f32.mrb[42].mxu0 }
 0x308   :  { %v1380_v21 = vpop.f32.mrb[50].mxu1  ;;  %v1393_v22 = vadd.f32 %v1377_v14, %v1259_v15  ;;  %v1260_v23 = vadd.f32 %v1246_v20, %v4492_v41  ;;  %v3422_v55 = vpop.f32.mrb[43].mxu0 }
 0x309   :  { %v3450_v24 = vpop.f32.mrb[51].mxu1 }
 0x30a   :  { %v1394_v27 = vadd.f32 %v1380_v21, %v1260_v23 }
 0x30d   :  { %v1251_v30 = vpop.f32.mrb[44].mxu0 }
 0x30e   :  { %v1385_v63 = vpop.f32.mrb[52].mxu1  ;;  %v1261_v31 = vadd.f32 %v1251_v30, %v4494_v49  ;;  %v3425_v33 = vpop.f32.mrb[45].mxu0 }
 0x30f   :  { %v3453_v32 = vpop.f32.mrb[53].mxu1  ;;  %v1254_v35 = vpop.f32.mrb[46].mxu0 }
 0x310   :  { %v1388_v34 = vpop.f32.mrb[54].mxu1  ;;  %v1395_v36 = vadd.f32 %v1385_v63, %v1261_v31  ;;  %v3426_v38 = vpop.f32.mrb[47].mxu0 }
 0x311   :  { %v3454_v37 = vpop.f32.mrb[55].mxu1 }
 0x31d   :  { %v1503_v39 = vpop.f32.mrb[48].mxu0 }
 0x31e   :  { %v1637_v40 = vpop.f32.mrb[56].mxu1  ;;  %v1525_v41 = vadd.f32 %v1503_v39, %v1391_v60  ;;  %v3473_v42 = vpop.f32.mrb[49].mxu0 }
 0x31f   :  { %v3501_v43 = vpop.f32.mrb[57].mxu1  ;;  %v1506_v44 = vpop.f32.mrb[50].mxu0 }
 0x320   :  { %v1640_v45 = vpop.f32.mrb[58].mxu1  ;;  %v1659_v46 = vadd.f32 %v1637_v40, %v1525_v41  ;;  %v1526_v47 = vadd.f32 %v1506_v44, %v1392_v11  ;;  %v3474_v49 = vpop.f32.mrb[51].mxu0 }
 0x321   :  { %v3502_v48 = vpop.f32.mrb[59].mxu1 }
 0x322   :  { %v1660_v51 = vadd.f32 %v1640_v45, %v1526_v47 }
 0x325   :  { %v1511_v52 = vpop.f32.mrb[52].mxu0 }
 0x326   :  { %v1645_v53 = vpop.f32.mrb[60].mxu1  ;;  %v1527_v54 = vadd.f32 %v1511_v52, %v1393_v22  ;;  %v3477_v56 = vpop.f32.mrb[53].mxu0 }
 0x327   :  { %v3505_v57 = vpop.f32.mrb[61].mxu1  ;;  %v1514_v58 = vpop.f32.mrb[54].mxu0 }
 0x328   :  { %v1648_v59 = vpop.f32.mrb[62].mxu1  ;;  %v1661_v61 = vadd.f32 %v1645_v53, %v1527_v54  ;;  %v1528_v62 = vadd.f32 %v1514_v58, %v1394_v27  ;;  %v3478_v2 = vpop.f32.mrb[55].mxu0 }
 0x329   :  { %v3506_v1 = vpop.f32.mrb[63].mxu1 }
 0x32a   :  { %v1662_v3 = vadd.f32 %v1648_v59, %v1528_v62 }
 0x32d   :  { %v1519_v4 = vpop.f32.mrb[56].mxu0 }
 0x32e   :  { %v1653_v5 = vpop.f32.mrb[64].mxu1  ;;  %v1529_v6 = vadd.f32 %v1519_v4, %v1395_v36  ;;  %v3481_v60 = vpop.f32.mrb[57].mxu0 }
 0x32f   :  { %v3509_v7 = vpop.f32.mrb[65].mxu1  ;;  %v1522_v9 = vpop.f32.mrb[58].mxu0 }
 0x330   :  { %v1656_v8 = vpop.f32.mrb[66].mxu1  ;;  %v1663_v10 = vadd.f32 %v1653_v5, %v1529_v6  ;;  %v3482_v12 = vpop.f32.mrb[59].mxu0 }
 0x331   :  { %v3510_v11 = vpop.f32.mrb[67].mxu1 }
 0x33d   :  { %v1771_v13 = vpop.f32.mrb[60].mxu0 }
 0x33e   :  { %v1793_v14 = vadd.f32 %v1771_v13, %v1659_v46  ;;  %v3529_v15 = vpop.f32.mrb[61].mxu0 }
 0x33f   :  { %v1774_v16 = vpop.f32.mrb[62].mxu0 }
 0x340   :  { %v1804_v17 = vadd.f32 %v2947_v0, %v1793_v14  ;;  %v1794_v50 = vadd.f32 %v1774_v16, %v1660_v51  ;;  %v3530_v18 = vpop.f32.mrb[63].mxu0 }
 0x342   :  { %v4565_v20 = vmax.f32 %v1804_v17, 0.0  ;;  %v1805_v21 = vadd.f32 %v2947_v0, %v1794_v50 }
 0x344   :  { %v4567_v22 = vmax.f32 %v1805_v21, 0.0  ;;  %v1825_v24 = vmul.f32 %v4565_v20, %v4565_v20 }
 0x345   :  { %v1779_v23 = vpop.f32.mrb[64].mxu0 }
 0x346   :  { %v1814_v55 = vadd.f32 %v4567_v22, %v4565_v20  ;;  %v1826_v25 = vmul.f32 %v4567_v22, %v4567_v22  ;;  %v1795_v26 = vadd.f32 %v1779_v23, %v1661_v61  ;;  %v3533_v27 = vpop.f32.mrb[65].mxu0 }
 0x347   :  { %v1782_v28 = vpop.f32.mrb[66].mxu0 }
 0x348   :  { %v1828_v29 = vadd.f32 %v1826_v25, %v1825_v24  ;;  %v1806_v30 = vadd.f32 %v2947_v0, %v1795_v26  ;;  %v1796_v63 = vadd.f32 %v1782_v28, %v1662_v3  ;;  %v3534_v31 = vpop.f32.mrb[67].mxu0 }
 0x34a   :  { %v4575_v32 = vmax.f32 %v1806_v30, 0.0  ;;  %v1807_v33 = vadd.f32 %v2947_v0, %v1796_v63 }
 0x34c   :  { %v1816_v34 = vsel %vm1815_vm3, %v4575_v32, 0.0  ;;  %v1827_v35 = vmul.f32 %v4575_v32, %v4575_v32  ;;  %v4581_v36 = vmax.f32 %v1807_v33, 0.0  ;;  %v1842_v40 = vrot.slane %v4575_v32, 5 }
 0x34d   :  { %v1817_v37 = vadd.f32 %v1816_v34, %v1814_v55  ;;  %v1787_v38 = vpop.f32.mrb[68].mxu0 }
 0x34e   :  { %v1829_v39 = vsel %vm1815_vm3, %v1827_v35, 0.0  ;;  %v1843_v41 = vrot.slane %v4581_v36, 5  ;;  %v1860_v42 = vmul.f32 %v4581_v36, %v4581_v36  ;;  %v3537_v43 = vpop.f32.mrb[69].mxu0  ;;  %v1797_v45 = vadd.f32 %v1787_v38, %v1663_v10 }
 0x34f   :  { %v1830_v44 = vadd.f32 %v1829_v39, %v1828_v29  ;;  %v1790_v46 = vpop.f32.mrb[70].mxu0  ;;  %v1865_v47 = vrot.slane %v1827_v35, 5  ;;  %v1818_v53 = vrot.slane %v1817_v37, 4  ;;  %v1895_v43 = vlaneseq }
 0x350   :  { %v1844_v48 = vsel %vm1841_vm4, %v1842_v40, %v1843_v41  ;;  %v1866_v49 = vrot.slane %v1860_v42, 5  ;;  %v3538_v51 = vpop.f32.mrb[71].mxu0  ;;  %v1808_v52 = vadd.f32 %v2947_v0, %v1797_v45  ;;  %v2948_v46 = vld [vmem:[%s4819_s9] ss:$0 sm:$0xff] }
 0x351   :  { %v1831_v57 = vrot.slane %v1830_v44, 4  ;;  %v1819_v61 = vadd.f32 %v1818_v53, %v1817_v37 }
 0x352   :  { %v1867_v54 = vsel %vm1841_vm4, %v1865_v47, %v1866_v49  ;;  %v4590_v56 = vmax.f32 %v1808_v52, 0.0 }
 0x353   :  { %v1832_v3 = vadd.f32 %v1831_v57, %v1830_v44  ;;  %v1820_v5 = vrot.slane %v1819_v61, 2  ;;  %v4604_v44 = vshrl.u32 %v1895_v43, 7 }
 0x354   :  { %v1845_v58 = vrot.slane %v4590_v56, 5  ;;  %v1861_v59 = vmul.f32 %v4590_v56, %v4590_v56 }
 0x355   :  { %v1833_v10 = vrot.slane %v1832_v3, 2  ;;  %v1821_v12 = vadd.f32 %v1820_v5, %v1819_v61  ;;  %v3811_v61 = vld [vmem:[%s4816_s10 + $0x80] sm:$0xff]  }
 0x356   :  { %v1846_v62 = vsel %vm1841_vm4, %v1843_v41, %v1845_v58  ;;  %v1868_v2 = vrot.slane %v1861_v59, 5  ;;  %v1851_v4 = vsel %vm1815_vm3, %v1845_v58, 0.0  ;;  %v3812_v5 = vld [vmem:[%s4816_s10 + $0xc0] sm:$0xff]  }
 0x357   :  { %v1850_v1 = vadd.f32 %v1846_v62, %v1844_v48  ;;  %v1834_v15 = vadd.f32 %v1833_v10, %v1832_v3  ;;  %v1822_v17 = vrot.slane %v1821_v12, 1 }
 0x358   :  { %v1869_v7 = vsel %vm1841_vm4, %v1866_v49, %v1868_v2  ;;  %v1874_v9 = vsel %vm1815_vm3, %v1868_v2, 0.0 }
 0x359   :  { %v1852_v6 = vadd.f32 %v1851_v4, %v1850_v1  ;;  %v1873_v60 = vadd.f32 %v1869_v7, %v1867_v54  ;;  %v1835_v23 = vrot.slane %v1834_v15, 1  ;;  %v1823_v55 = vadd.f32 %v1822_v17, %v1821_v12  ;;  %v3813_v7 = vld [vmem:[%s4816_s10 + $0x88] sm:$0xff]   ;;  %v3815_v12 = vld [vmem:[%s4816_s10 + $0x90] sm:$0xff]  }
 0x35b   :  { %v1853_v8 = vrot.slane %v1852_v6, 4  ;;  %v1875_v11 = vadd.f32 %v1874_v9, %v1873_v60  ;;  %v1836_v28 = vadd.f32 %v1835_v23, %v1834_v15  ;;  %v3814_v60 = vld [vmem:[%s4816_s10 + $0xc8] sm:$0xff]   ;;  %v3817_v15 = vld [vmem:[%s4816_s10 + $0x98] sm:$0xff]   ;;  %v3820_v23 = vld [vmem:[%s4816_s10 + $0xe0] sm:$0xff]  }
 0x35d   :  { %v1854_v0 = vadd.f32 %v1853_v8, %v1852_v6  ;;  %v1876_v13 = vrot.slane %v1875_v11, 4 }
 0x35f   :  { %v1855_v14 = vrot.slane %v1854_v0, 2  ;;  %v1877_v16 = vadd.f32 %v1876_v13, %v1875_v11  ;;  %v3816_v13 = vld [vmem:[%s4816_s10 + $0xd0] sm:$0xff]  }
 0x361   :  { %v1856_v50 = vadd.f32 %v1855_v14, %v1854_v0  ;;  %v1878_v18 = vrot.slane %v1877_v16, 2 }
 0x363   :  { %v1857_v21 = vrot.slane %v1856_v50, 1  ;;  %v1879_v24 = vadd.f32 %v1878_v18, %v1877_v16  ;;  %v3818_v16 = vld [vmem:[%s4816_s10 + $0xd8] sm:$0xff]   ;;  %v3819_v18 = vld [vmem:[%s4816_s10 + $0xa0] sm:$0xff]  }
 0x365   :  { %v1858_v25 = vadd.f32 %v1857_v21, %v1856_v50  ;;  %v1880_v26 = vrot.slane %v1879_v24, 1 }
 0x367   :  { %v1859_v27 = vadd.f32 %v1858_v25, %v1823_v55  ;;  %v1881_v29 = vadd.f32 %v1880_v26, %v1879_v24  ;;  %v3821_v55 = vld [vmem:[%s4816_s10 + $0xa8] sm:$0xff]   ;;  %v3823_v26 = vld [vmem:[%s4816_s10 + $0xb0] sm:$0xff]  }
 0x368   :  { %v3822_v25 = vld [vmem:[%s4816_s10 + $0xe8] sm:$0xff]  }
 0x369   :  { %v1884_v30 = vmul.f32 0.029411765, %v1859_v27  ;;  %v1882_v63 = vadd.f32 %v1881_v29, %v1836_v28  ;;  %v3824_v27 = vld [vmem:[%s4816_s10 + $0xf0] sm:$0xff]   ;;  %v3825_v28 = vld [vmem:[%s4816_s10 + $0xb8] sm:$0xff]  }
 0x36a   :  { %v3826_v29 = vld [vmem:[%s4816_s10 + $0xf8] sm:$0xff]  }
 0x36b   :  { %v1886_v31 = vmul.f32 %v1884_v30, %v1884_v30  ;;  %v1892_v33 = vsub.f32 %v4565_v20, %v1884_v30  ;;  %v1893_v34 = vsub.f32 %v4567_v22, %v1884_v30  ;;  %v1894_v35 = vsub.f32 %v4575_v32, %v1884_v30  ;;  %v56_v20 = vld [vmem:[%s4818_s8] sm:$0x1] }
 0x36c   :  { %v1885_v37 = vmul.f32 0.029411765, %v1882_v63  ;;  %v1914_v38 = vsub.f32 %v4581_v36, %v1884_v30  ;;  %v1915_v39 = vsub.f32 %v4590_v56, %v1884_v30  ;;  %v1897_v22 = vsub.s32 0, %v4604_v44 }
 0x36e   :  { %v1887_v40 = vsub.f32 %v1885_v37, %v1886_v31  ;;  %v3827_v31 = vld [vmem:[%s4816_s10 + $0x100] sm:$0xff]  }
 0x370   :  { %v1888_v41 = vmax.f32 %v1887_v40, 0.0 }
 0x372   :  { %v1889_v42 = vadd.f32 1e-05, %v1888_v41 }
 0x374   :  { %3835 = vrsqrt.f32 %v1889_v42  ;;  %v3830_v42 = vld [vmem:[%s4816_s10 + $0x118] sm:$0xff]  }
 0x37e   :  { %v3836_v45 = vpop.eup %3835 }
 0x37f   :  { %v1891_v32 = vmul.f32 %v3836_v45, %v56_v20  ;;  %v3831_v45 = vld [vmem:[%s4816_s10 + $0x120] sm:$0xff]  }
 0x381   :  { %v1898_v36 = vrot.slane %v1891_v32, %v1897_v22 }
 0x383   :  { %v1899_v47 = vmul.f32 %v1898_v36, %v1892_v33  ;;  %v1900_v48 = vmul.f32 %v1898_v36, %v1893_v34  ;;  %v1901_v49 = vmul.f32 %v1898_v36, %v1894_v35  ;;  %v1916_v51 = vmul.f32 %v1914_v38, %v1898_v36  ;;  %v3828_v34 = vld [vmem:[%s4816_s10 + $0x108] sm:$0xff]  }
 0x384   :  { %v1917_v52 = vmul.f32 %v1915_v39, %v1898_v36  ;;  %v3829_v39 = vld [vmem:[%s4816_s10 + $0x110] sm:$0xff]  }
 0x385   :  { %v4615_v53 = vadd.f32 %v2948_v46, %v1899_v47  ;;  %v4617_v54 = vadd.f32 %v2948_v46, %v1900_v48  ;;  %v1910_v56 = vadd.f32 %v2948_v46, %v1901_v49  ;;  %v4619_v57 = vadd.f32 %v2948_v46, %v1916_v51  ;;  %v3833_v47 = vld [vmem:[%s4816_s10 + $0x130] sm:$0xff]   ;;  %v3834_v48 = vld [vmem:[%s4816_s10 + $0x138] sm:$0xff]  }
 0x386   :  { %v1919_v58 = vadd.f32 %v2948_v46, %v1917_v52  ;;  %v3832_v46 = vld [vmem:[%s4816_s10 + $0x128] sm:$0xff]  }
 0x387   :  { %1911 = vst [vmem:[#allocation2 + $0x2] sm:$0xff] %v4615_v53  ;;  %1912 = vst [vmem:[#allocation2 + $0xa] sm:$0xff] %v4617_v54  ;;  %v2185_v59 = vpack.c.bf16 %v4617_v54, %v4615_v53 }
 0x388   :  { %1913 = vst [vmem:[#allocation2 + $0x12] sm:$0xe1] %v1910_v56   ;;  %1921 = vst [vmem:[#allocation2 + $0x1a] sm:$0xff] %v4619_v57 }
 0x389   :  { %1922 = vst [vmem:[#allocation2 + $0x22] sm:$0x3f] %v1919_v58 }
 0x38e   :  { %v1947_v62 = vld [vmem:[#allocation2 + $0x1] sm:$0xff]  ;;  %v1948_v1 = vld [vmem:[#allocation2 + $0x9] sm:$0xff] }
 0x38f   :  { %v1923_v2 = vld [vmem:[#allocation2] sm:$0xff]  ;;  %v1952_v3 = vpack.c.bf16 %v1948_v1, %v1947_v62  ;;  %v1924_v4 = vld [vmem:[#allocation2 + $0x8] sm:$0xff]  ;;  %v1949_v8 = vld [vmem:[#allocation2 + $0x11] sm:$0xff] }
 0x390   :  { %v1928_v6 = vpack.c.bf16 %v1924_v4, %v1923_v2  ;;  %v1950_v9 = vld [vmem:[#allocation2 + $0x19] sm:$0xff]  ;;  %v1925_v10 = vld [vmem:[#allocation2 + $0x10] sm:$0xff]  ;;  %v1951_v17 = vld [vmem:[#allocation2 + $0x21] sm:$0x3f] }
 0x391   :  { %3556 = vmatmul.mubr.bf16.vlgmr.msra.gmra.mrb[68].mxu1 %v1952_v3  ;;  %v1926_v11 = vld [vmem:[#allocation2 + $0x18] sm:$0xff]  ;;  %v1953_v0 = vpack.c.bf16 %v1950_v9, %v1949_v8  ;;  %v1927_v50 = vld [vmem:[#allocation2 + $0x20] sm:$0x3f]  ;;  %v1954_v21 = vpack.c.bf16 %v1951_v17, %v1951_v17  ;;  %v2315_v63 = vld [vmem:[#allocation2 + $0xb] sm:$0xff] }
 0x392   :  { %3584 = vmatmul.mubr.bf16.vlgmr.msra.gmra.mrb[72].mxu0 %v1928_v6  ;;  %3596 = vmatpush3.bf16.msra.mxu1 %v3811_v61  ;;  %v1929_v14 = vpack.c.bf16 %v1926_v11, %v1925_v10  ;;  %v1930_v24 = vpack.c.bf16 %v1927_v50, %v1927_v50  ;;  %v2314_v30 = vld [vmem:[#allocation2 + $0x3] sm:$0xff]  ;;  %v2182_v35 = vld [vmem:[#allocation2 + $0x12] sm:$0xff]  ;;  %v2317_v38 = vld [vmem:[#allocation2 + $0x1b] sm:$0xff] }
 0x393   :  { %3624 = vmatpush3.bf16.msra.mxu0 %v3812_v5  ;;  %3597 = vmatprep.subr.bf16.mxu1 %v3840_v19  ;;  %v2319_v33 = vpack.c.bf16 %v2315_v63, %v2314_v30  ;;  %v2316_v37 = vld [vmem:[#allocation2 + $0x13] sm:$0xff]  ;;  %v2186_v40 = vpack.c.bf16 %v4619_v57, %v2182_v35  ;;  %v2184_v43 = vld [vmem:[#allocation2 + $0x22] sm:$0x3f] }
 0x394   :  { %3625 = vmatprep.subr.bf16.mxu0 %v3840_v19  ;;  %3559 = vmatprep.mubr.msk.bf16.mxu1 %vm3841_vm2, %v3840_v19  ;;  %v2320_v41 = vpack.c.bf16 %v2317_v38, %v2316_v37  ;;  %v2318_v20 = vld [vmem:[#allocation2 + $0x23] sm:$0x3f]  ;;  %v2187_v32 = vpack.c.bf16 %v2184_v43, %v2184_v43  ;;  %v2449_v51 = vld [vmem:[#allocation2 + $0xc] sm:$0xff]  ;;  %v2450_v53 = vld [vmem:[#allocation2 + $0x14] sm:$0xff] }
 0x395   :  { %3587 = vmatprep.mubr.msk.bf16.mxu0 %vm3841_vm2, %v3840_v19  ;;  %v2321_v36 = vpack.c.bf16 %v2318_v20, %v2318_v20  ;;  %v2448_v49 = vld [vmem:[#allocation2 + $0x4] sm:$0xff]  ;;  %v2451_v54 = vld [vmem:[#allocation2 + $0x1c] sm:$0xff] }
 0x396   :  { %3598 = vmatpush3.bf16.msra.mxu1 %v3813_v7  ;;  %v2453_v52 = vpack.c.bf16 %v2449_v51, %v2448_v49  ;;  %v2454_v56 = vpack.c.bf16 %v2451_v54, %v2450_v53  ;;  %v2452_v57 = vld [vmem:[#allocation2 + $0x24] sm:$0x3f] }
 0x397   :  { %3626 = vmatpush3.bf16.msra.mxu0 %v3814_v60  ;;  %3599 = vmatprep.subr.bf16.mxu1 %v3840_v19  ;;  %v2455_v58 = vpack.c.bf16 %v2452_v57, %v2452_v57 }
 0x398   :  { %3627 = vmatprep.subr.bf16.mxu0 %v3840_v19 }
 0x399   :  { %3560 = vmatmul.mubr.bf16.gmra.mrb[72].mxu1 %v1953_v0 }
 0x39a   :  { %3588 = vmatmul.mubr.bf16.gmra.mrb[76].mxu0 %v1929_v14  ;;  %3600 = vmatpush3.bf16.msra.mxu1 %v3815_v12 }
 0x39b   :  { %3628 = vmatpush3.bf16.msra.mxu0 %v3816_v13  ;;  %3601 = vmatprep.subr.bf16.mxu1 %v3840_v19 }
 0x39c   :  { %3629 = vmatprep.subr.bf16.mxu0 %v3840_v19  ;;  %3563 = vmatprep.mubr.msk.bf16.mxu1 %vm3841_vm2, %v3840_v19 }
 0x39d   :  { %3591 = vmatprep.mubr.msk.bf16.mxu0 %vm3841_vm2, %v3840_v19 }
 0x39e   :  { %3602 = vmatpush3.bf16.msra.mxu1 %v3817_v15 }
 0x39f   :  { %3630 = vmatpush3.bf16.msra.mxu0 %v3818_v16  ;;  %3603 = vmatprep.subr.bf16.mxu1 %v3840_v19 }
 0x3a0   :  { %3631 = vmatprep.subr.bf16.mxu0 %v3840_v19 }
 0x3a1   :  { %3564 = vmatmul.mubr.bf16.gmra.mrb[76].mxu1 %v1954_v21 }
 0x3a2   :  { %3592 = vmatmul.mubr.bf16.gmra.mrb[80].mxu0 %v1930_v24  ;;  %3604 = vmatpush3.bf16.msra.mxu1 %v3819_v18 }
 0x3a3   :  { %3632 = vmatpush3.bf16.msra.mxu0 %v3820_v23  ;;  %3605 = vmatprep.subr.bf16.mxu1 %v3840_v19 }
 0x3a4   :  { %3633 = vmatprep.subr.bf16.mxu0 %v3840_v19  ;;  %3611 = vmatprep.mubr.msk.bf16.mxu1 %vm3841_vm2, %v3840_v19 }
 0x3a5   :  { %3639 = vmatprep.mubr.msk.bf16.mxu0 %vm3841_vm2, %v3840_v19 }
 0x3a6   :  { %3606 = vmatpush3.bf16.msra.mxu1 %v3821_v55 }
 0x3a7   :  { %3634 = vmatpush3.bf16.msra.mxu0 %v3822_v25  ;;  %3607 = vmatprep.subr.bf16.mxu1 %v3840_v19 }
 0x3a8   :  { %3635 = vmatprep.subr.bf16.mxu0 %v3840_v19 }
 0x3aa   :  { %3608 = vmatpush3.bf16.msra.mxu1 %v3823_v26 }
 0x3ab   :  { %3636 = vmatpush3.bf16.msra.mxu0 %v3824_v27  ;;  %3609 = vmatprep.subr.bf16.mxu1 %v3840_v19 }
 0x3ac   :  { %3637 = vmatprep.subr.bf16.mxu0 %v3840_v19 }
 0x3ae   :  { %3610 = vmatpush3.bf16.msra.mxu1 %v3825_v28 }
 0x3af   :  { %3638 = vmatpush3.bf16.msra.mxu0 %v3826_v29  ;;  %3651 = vmatprep.subr.bf16.mxu1 %v3840_v19 }
 0x3b1   :  { %3612 = vmatmul.mubr.bf16.vlgmr.msra.gmra.mrb[80].mxu1 %v2185_v59 }
 0x3b2   :  { %3640 = vmatmul.mubr.bf16.vlgmr.msra.gmra.mrb[84].mxu0 %v2319_v33  ;;  %3652 = vmatpush3.bf16.msra.mxu1 %v3827_v31 }
 0x3b3   :  { %3653 = vmatprep.subr.bf16.mxu1 %v3840_v19  ;;  %3615 = vmatprep.mubr.msk.bf16.mxu1 %vm3841_vm2, %v3840_v19 }
 0x3b4   :  { %3643 = vmatprep.mubr.msk.bf16.mxu0 %vm3841_vm2, %v3840_v19 }
 0x3b6   :  { %3654 = vmatpush3.bf16.msra.mxu1 %v3828_v34 }
 0x3b7   :  { %3655 = vmatprep.subr.bf16.mxu1 %v3840_v19 }
 0x3b9   :  { %3616 = vmatmul.mubr.bf16.gmra.mrb[84].mxu1 %v2186_v40 }
 0x3ba   :  { %3644 = vmatmul.mubr.bf16.gmra.mrb[88].mxu0 %v2320_v41  ;;  %3656 = vmatpush3.bf16.msra.mxu1 %v3829_v39 }
 0x3bb   :  { %3657 = vmatprep.subr.bf16.mxu1 %v3840_v19  ;;  %3619 = vmatprep.mubr.msk.bf16.mxu1 %vm3841_vm2, %v3840_v19 }
 0x3bc   :  { %3647 = vmatprep.mubr.msk.bf16.mxu0 %vm3841_vm2, %v3840_v19 }
 0x3be   :  { %3658 = vmatpush3.bf16.msra.mxu1 %v3830_v42 }
 0x3bf   :  { %3659 = vmatprep.subr.bf16.mxu1 %v3840_v19 }
 0x3c1   :  { %3620 = vmatmul.mubr.bf16.gmra.mrb[88].mxu1 %v2187_v32 }
 0x3c2   :  { %3648 = vmatmul.mubr.bf16.gmra.mrb[92].mxu0 %v2321_v36  ;;  %3660 = vmatpush3.bf16.msra.mxu1 %v3831_v45 }
 0x3c3   :  { %3661 = vmatprep.subr.bf16.mxu1 %v3840_v19  ;;  %3667 = vmatprep.mubr.msk.bf16.mxu1 %vm3841_vm2, %v3840_v19 }
 0x3c6   :  { %3662 = vmatpush3.bf16.msra.mxu1 %v3832_v46 }
 0x3c7   :  { %3663 = vmatprep.subr.bf16.mxu1 %v3840_v19 }
 0x3ca   :  { %3664 = vmatpush3.bf16.msra.mxu1 %v3833_v47 }
 0x3cb   :  { %3665 = vmatprep.subr.bf16.mxu1 %v3840_v19 }
 0x3ce   :  { %3666 = vmatpush3.bf16.msra.mxu1 %v3834_v48 }
 0x3d1   :  { %3668 = vmatmul.mubr.bf16.vlgmr.msra.gmra.mrb[92].mxu1 %v2453_v52 }
 0x3d2   :  { %3671 = vmatprep.mubr.msk.bf16.mxu1 %vm3841_vm2, %v3840_v19 }
 0x3d9   :  { %3672 = vmatmul.mubr.bf16.gmra.mrb[96].mxu1 %v2454_v56 }
 0x3da   :  { %3675 = vmatprep.mubr.msk.bf16.mxu1 %vm3841_vm2, %v3840_v19 }
 0x3e1   :  { %3676 = vmatmul.mubr.bf16.gmra.mrb[100].mxu1 %v2455_v58 }
 0x464   :  { %v2054_v59 = vpop.f32.mrb[68].mxu1 }
 0x465   :  { %v2158_v61 = vpop.f32.mrb[72].mxu0  ;;  %v3557_v62 = vpop.f32.mrb[69].mxu1 }
 0x466   :  { %v2159_v1 = vadd.f32 %v2158_v61, %v2054_v59  ;;  %v3585_v2 = vpop.f32.mrb[73].mxu0  ;;  %v2057_v3 = vpop.f32.mrb[70].mxu1  ;;  %v3053_v61 = vld [vmem:[%s4820_s11] ss:$0 sm:$0xff] }
 0x467   :  { %v2161_v4 = vpop.f32.mrb[74].mxu0  ;;  %v3558_v5 = vpop.f32.mrb[71].mxu1 }
 0x468   :  { %v2162_v6 = vadd.f32 %v2161_v4, %v2057_v3  ;;  %v3586_v7 = vpop.f32.mrb[75].mxu0 }
 0x46c   :  { %v2062_v60 = vpop.f32.mrb[72].mxu1 }
 0x46d   :  { %v2166_v8 = vpop.f32.mrb[76].mxu0  ;;  %v3561_v9 = vpop.f32.mrb[73].mxu1 }
 0x46e   :  { %v2167_v10 = vadd.f32 %v2166_v8, %v2062_v60  ;;  %v3589_v11 = vpop.f32.mrb[77].mxu0  ;;  %v2065_v12 = vpop.f32.mrb[74].mxu1 }
 0x46f   :  { %v2169_v19 = vpop.f32.mrb[78].mxu0  ;;  %v3562_v0 = vpop.f32.mrb[75].mxu1 }
 0x470   :  { %v2170_v13 = vadd.f32 %v2169_v19, %v2065_v12  ;;  %v3590_v14 = vpop.f32.mrb[79].mxu0 }
 0x474   :  { %v2070_v15 = vpop.f32.mrb[76].mxu1 }
 0x475   :  { %v2174_v16 = vpop.f32.mrb[80].mxu0  ;;  %v3565_v17 = vpop.f32.mrb[77].mxu1 }
 0x476   :  { %v2175_v50 = vadd.f32 %v2174_v16, %v2070_v15  ;;  %v3593_v18 = vpop.f32.mrb[81].mxu0  ;;  %v2073_v21 = vpop.f32.mrb[78].mxu1 }
 0x477   :  { %v2177_v23 = vpop.f32.mrb[82].mxu0  ;;  %v3566_v24 = vpop.f32.mrb[79].mxu1 }
 0x478   :  { %v3594_v55 = vpop.f32.mrb[83].mxu0 }
 0x484   :  { %v2287_v25 = vpop.f32.mrb[80].mxu1 }
 0x485   :  { %v2309_v26 = vadd.f32 %v2287_v25, %v2159_v1  ;;  %v2421_v27 = vpop.f32.mrb[84].mxu0  ;;  %v3613_v28 = vpop.f32.mrb[81].mxu1 }
 0x486   :  { %v3641_v29 = vpop.f32.mrb[85].mxu0  ;;  %v2290_v30 = vpop.f32.mrb[82].mxu1 }
 0x487   :  { %v2443_v63 = vadd.f32 %v2421_v27, %v2309_v26  ;;  %v2310_v31 = vadd.f32 %v2290_v30, %v2162_v6  ;;  %v2424_v33 = vpop.f32.mrb[86].mxu0  ;;  %v3614_v34 = vpop.f32.mrb[83].mxu1 }
 0x488   :  { %v3642_v35 = vpop.f32.mrb[87].mxu0 }
 0x489   :  { %v2444_v37 = vadd.f32 %v2424_v33, %v2310_v31 }
 0x48c   :  { %v2295_v38 = vpop.f32.mrb[84].mxu1 }
 0x48d   :  { %v2311_v39 = vadd.f32 %v2295_v38, %v2167_v10  ;;  %v2429_v40 = vpop.f32.mrb[88].mxu0  ;;  %v3617_v41 = vpop.f32.mrb[85].mxu1 }
 0x48e   :  { %v3645_v42 = vpop.f32.mrb[89].mxu0  ;;  %v2298_v43 = vpop.f32.mrb[86].mxu1 }
 0x48f   :  { %v2445_v20 = vadd.f32 %v2429_v40, %v2311_v39  ;;  %v2312_v45 = vadd.f32 %v2298_v43, %v2170_v13  ;;  %v2432_v32 = vpop.f32.mrb[90].mxu0  ;;  %v3618_v36 = vpop.f32.mrb[87].mxu1 }
 0x490   :  { %v3646_v46 = vpop.f32.mrb[91].mxu0 }
 0x491   :  { %v2446_v47 = vadd.f32 %v2432_v32, %v2312_v45 }
 0x494   :  { %v2303_v48 = vpop.f32.mrb[88].mxu1 }
 0x495   :  { %v2313_v49 = vadd.f32 %v2303_v48, %v2175_v50  ;;  %v2437_v51 = vpop.f32.mrb[92].mxu0  ;;  %v3621_v52 = vpop.f32.mrb[89].mxu1 }
 0x496   :  { %v3649_v53 = vpop.f32.mrb[93].mxu0  ;;  %v2306_v54 = vpop.f32.mrb[90].mxu1 }
 0x497   :  { %v2447_v56 = vadd.f32 %v2437_v51, %v2313_v49  ;;  %v2440_v57 = vpop.f32.mrb[94].mxu0  ;;  %v3622_v58 = vpop.f32.mrb[91].mxu1 }
 0x498   :  { %v3650_v59 = vpop.f32.mrb[95].mxu0 }
 0x4a4   :  { %v2555_v62 = vpop.f32.mrb[92].mxu1 }
 0x4a5   :  { %v2577_v1 = vadd.f32 %v2555_v62, %v2443_v63  ;;  %v3669_v2 = vpop.f32.mrb[93].mxu1 }
 0x4a6   :  { %v2558_v3 = vpop.f32.mrb[94].mxu1 }
 0x4a7   :  { %v2588_v4 = vadd.f32 %v3053_v61, %v2577_v1  ;;  %v2578_v5 = vadd.f32 %v2558_v3, %v2444_v37  ;;  %v3670_v6 = vpop.f32.mrb[95].mxu1 }
 0x4a9   :  { %v4753_v7 = vmax.f32 %v2588_v4, 0.0  ;;  %v2589_v60 = vadd.f32 %v3053_v61, %v2578_v5 }
 0x4ab   :  { %v4755_v8 = vmax.f32 %v2589_v60, 0.0  ;;  %v2608_v10 = vmul.f32 %v4753_v7, %v4753_v7 }
 0x4ac   :  { %v2563_v9 = vpop.f32.mrb[96].mxu1 }
 0x4ad   :  { %v2598_v11 = vadd.f32 %v4755_v8, %v4753_v7  ;;  %v2609_v12 = vmul.f32 %v4755_v8, %v4755_v8  ;;  %v2579_v19 = vadd.f32 %v2563_v9, %v2445_v20  ;;  %v3673_v0 = vpop.f32.mrb[97].mxu1 }
 0x4ae   :  { %v2566_v13 = vpop.f32.mrb[98].mxu1 }
 0x4af   :  { %v2611_v14 = vadd.f32 %v2609_v12, %v2608_v10  ;;  %v2590_v15 = vadd.f32 %v3053_v61, %v2579_v19  ;;  %v2580_v16 = vadd.f32 %v2566_v13, %v2446_v47  ;;  %v3674_v17 = vpop.f32.mrb[99].mxu1 }
 0x4b1   :  { %v4763_v50 = vmax.f32 %v2590_v15, 0.0  ;;  %v2591_v18 = vadd.f32 %v3053_v61, %v2580_v16 }
 0x4b3   :  { %v2599_v21 = vsel %vm1815_vm3, %v4763_v50, 0.0  ;;  %v2610_v23 = vmul.f32 %v4763_v50, %v4763_v50  ;;  %v4769_v24 = vmax.f32 %v2591_v18, 0.0  ;;  %v2624_v27 = vrot.slane %v4763_v50, 5 }
 0x4b4   :  { %v2600_v55 = vadd.f32 %v2599_v21, %v2598_v11  ;;  %v2571_v25 = vpop.f32.mrb[100].mxu1 }
 0x4b5   :  { %v2612_v26 = vsel %vm1815_vm3, %v2610_v23, 0.0  ;;  %v2625_v28 = vrot.slane %v4769_v24, 5  ;;  %v2642_v29 = vmul.f32 %v4769_v24, %v4769_v24  ;;  %v3677_v30 = vpop.f32.mrb[101].mxu1  ;;  %v2581_v31 = vadd.f32 %v2571_v25, %v2447_v56 }
 0x4b6   :  { %v2613_v63 = vadd.f32 %v2612_v26, %v2611_v14  ;;  %v2574_v33 = vpop.f32.mrb[102].mxu1  ;;  %v2647_v34 = vrot.slane %v2610_v23, 5  ;;  %v2601_v40 = vrot.slane %v2600_v55, 4 }
 0x4b7   :  { %v2626_v35 = vsel %vm1841_vm4, %v2624_v27, %v2625_v28  ;;  %v2648_v37 = vrot.slane %v2642_v29, 5  ;;  %v3678_v38 = vpop.f32.mrb[103].mxu1  ;;  %v2592_v39 = vadd.f32 %v3053_v61, %v2581_v31 }
 0x4b8   :  { %v2614_v43 = vrot.slane %v2613_v63, 4  ;;  %v2602_v32 = vadd.f32 %v2601_v40, %v2600_v55 }
 0x4b9   :  { %v2649_v41 = vsel %vm1841_vm4, %v2647_v34, %v2648_v37  ;;  %v2597_v42 = vmax.f32 %v2592_v39, 0.0 }
 0x4ba   :  { %v2615_v48 = vadd.f32 %v2614_v43, %v2613_v63  ;;  %v2603_v51 = vrot.slane %v2602_v32, 2  ;;  %v59_v63 = vld [vmem:[%s4821_s12] sm:$0x1] }
 0x4bb   :  { %v2627_v20 = vrot.slane %v2597_v42, 5  ;;  %v2643_v45 = vmul.f32 %v2597_v42, %v2597_v42 }
 0x4bc   :  { %v2616_v58 = vrot.slane %v2615_v48, 2  ;;  %v2604_v61 = vadd.f32 %v2603_v51, %v2602_v32 }
 0x4bd   :  { %v2628_v36 = vsel %vm1841_vm4, %v2625_v28, %v2627_v20  ;;  %v2650_v47 = vrot.slane %v2643_v45, 5  ;;  %v2633_v49 = vsel %vm1815_vm3, %v2627_v20, 0.0 }
 0x4be   :  { %v2632_v46 = vadd.f32 %v2628_v36, %v2626_v35  ;;  %v2617_v3 = vadd.f32 %v2616_v58, %v2615_v48  ;;  %v2605_v5 = vrot.slane %v2604_v61, 1 }
 0x4bf   :  { %v2651_v53 = vsel %vm1841_vm4, %v2648_v37, %v2650_v47  ;;  %v2656_v57 = vsel %vm1815_vm3, %v2650_v47, 0.0 }
 0x4c0   :  { %v2634_v52 = vadd.f32 %v2633_v49, %v2632_v46  ;;  %v2655_v54 = vadd.f32 %v2651_v53, %v2649_v41  ;;  %v2618_v10 = vrot.slane %v2617_v3, 1  ;;  %v2606_v12 = vadd.f32 %v2605_v5, %v2604_v61 }
 0x4c2   :  { %v2635_v56 = vrot.slane %v2634_v52, 4  ;;  %v2657_v59 = vadd.f32 %v2656_v57, %v2655_v54  ;;  %v2619_v14 = vadd.f32 %v2618_v10, %v2617_v3 }
 0x4c4   :  { %v2636_v62 = vadd.f32 %v2635_v56, %v2634_v52  ;;  %v2658_v1 = vrot.slane %v2657_v59, 4 }
 0x4c6   :  { %v2637_v2 = vrot.slane %v2636_v62, 2  ;;  %v2659_v4 = vadd.f32 %v2658_v1, %v2657_v59 }
 0x4c8   :  { %v2638_v6 = vadd.f32 %v2637_v2, %v2636_v62  ;;  %v2660_v60 = vrot.slane %v2659_v4, 2 }
 0x4ca   :  { %v2639_v9 = vrot.slane %v2638_v6, 1  ;;  %v2661_v11 = vadd.f32 %v2660_v60, %v2659_v4 }
 0x4cc   :  { %v2640_v19 = vadd.f32 %v2639_v9, %v2638_v6  ;;  %v2662_v0 = vrot.slane %v2661_v11, 1 }
 0x4ce   :  { %v2641_v13 = vadd.f32 %v2640_v19, %v2606_v12  ;;  %v2663_v15 = vadd.f32 %v2662_v0, %v2661_v11 }
 0x4d0   :  { %v2665_v16 = vmul.f32 0.029411765, %v2641_v13  ;;  %v2664_v17 = vadd.f32 %v2663_v15, %v2619_v14 }
 0x4d2   :  { %v2667_v18 = vmul.f32 %v2665_v16, %v2665_v16  ;;  %v2673_v21 = vsub.f32 %v4753_v7, %v2665_v16  ;;  %v2674_v23 = vsub.f32 %v4755_v8, %v2665_v16  ;;  %v2675_v55 = vsub.f32 %v4763_v50, %v2665_v16  ;;  %v3054_v8 = vld [vmem:[%s4822_s13] ss:$0 sm:$0xff] }
 0x4d3   :  { %v2666_v25 = vmul.f32 0.029411765, %v2664_v17  ;;  %v2695_v26 = vsub.f32 %v4769_v24, %v2665_v16  ;;  %v2696_v27 = vsub.f32 %v2597_v42, %v2665_v16 }
 0x4d5   :  { %v2668_v28 = vsub.f32 %v2666_v25, %v2667_v18 }
 0x4d7   :  { %v2669_v29 = vmax.f32 %v2668_v28, 0.0 }
 0x4d9   :  { %v2670_v30 = vadd.f32 1e-05, %v2669_v29 }
 0x4db   :  { %3837 = vrsqrt.f32 %v2670_v30 }
 0x4e5   :  { %v3838_v31 = vpop.eup %3837 }
 0x4e6   :  { %v2672_v33 = vmul.f32 %v3838_v31, %v59_v63 }
 0x4e8   :  { %v2679_v7 = vrot.slane %v2672_v33, %v1897_v22 }
 0x4ea   :  { %v2680_v50 = vmul.f32 %v2679_v7, %v2673_v21  ;;  %v2681_v24 = vmul.f32 %v2679_v7, %v2674_v23  ;;  %v2682_v34 = vmul.f32 %v2679_v7, %v2675_v55  ;;  %v2697_v35 = vmul.f32 %v2695_v26, %v2679_v7 }
 0x4eb   :  { %v2698_v37 = vmul.f32 %v2696_v27, %v2679_v7 }
 0x4ec   :  { %v2689_v38 = vadd.f32 %v3054_v8, %v2680_v50  ;;  %v2690_v39 = vadd.f32 %v3054_v8, %v2681_v24  ;;  %v2691_v40 = vadd.f32 %v3054_v8, %v2682_v34  ;;  %v2699_v41 = vadd.f32 %v3054_v8, %v2697_v35 }
 0x4ed   :  { %v2700_v42 = vadd.f32 %v3054_v8, %v2698_v37 }
 0x4ee   :  { %2692 = vst [vmem:[%s4823_s14] sm:$0xff] %v2689_v38  ;;  %2693 = vst [vmem:[%s4823_s14 + $0x8] sm:$0xff] %v2690_v39 }
 0x4ef   :  { %2694 = vst [vmem:[%s4823_s14 + $0x10] ss:$7 sps:$4 sm:$0xe1] %v2691_v40   ;;  %3056 = vst [vmem:[%s4823_s14 + $0x1b] sm:$0xff] %v2699_v41 }
 0x4f0   :  { %3057 = vst [vmem:[%s4823_s14 + $0x23] sm:$0x3f] %v2700_v42 }

// kernel: decoder_forward.4
= control target key start
LH: loop header
LB: loop body
LE: loop exit
PB: predicated region body
PF: predicated region fallthrough
CT: control target
= control target key end

     0   :  { %v4724_v1 = vmov 0   ;;  %v4725_v20 = vmov 0.0   ;;  %vm4726_vm0 = vmmov 0   ;;  %vm280_vm1 = vcmask 1040384   ;;  %s6125_s3 = inlined_call_operand.vmem [shape: bf16[128,256], index: 3, kind: input, shape index: {}]   ;;  %s6126_s0 = inlined_call_operand.vmem [shape: bf16[34,128], index: 0, kind: input, shape index: {}]   ;;  %s6127_s2 = inlined_call_operand.vmem [shape: bf16[2,35,17], index: 2, kind: input, shape index: {}]   ;;  %s6128_s6 = inlined_call_operand.vmem [shape: bf16[5,128,128], index: 6, kind: input, shape index: {}]   ;;  %s6129_s1 = inlined_call_operand.vmem [shape: f32[78,128], index: 1, kind: input, shape index: {}]   ;;  %s6130_s5 = inlined_call_operand.vmem [shape: bf16[5,128,128], index: 5, kind: input, shape index: {}]   ;;  %s6131_s4 = inlined_call_operand.vmem [shape: f32[1,128], index: 4, kind: input, shape index: {}]   ;;  %s6132_s10 = inlined_call_operand.vmem [shape: bf16[5,128,128], index: 10, kind: input, shape index: {}]   ;;  %s6133_s7 = inlined_call_operand.vmem [shape: f32[1,128], index: 7, kind: input, shape index: {}]   ;;  %s6134_s8 = inlined_call_operand.vmem [shape: f32[1,128], index: 8, kind: input, shape index: {}]   ;;  %s6135_s9 = inlined_call_operand.vmem [shape: f32[1,128], index: 9, kind: input, shape index: {}]   ;;  %s6136_s11 = inlined_call_operand.vmem [shape: f32[1,128], index: 11, kind: input, shape index: {}]   ;;  %s6137_s12 = inlined_call_operand.vmem [shape: f32[1,128], index: 12, kind: input, shape index: {}]   ;;  %s6138_s13 = inlined_call_operand.vmem [shape: f32[1,128], index: 13, kind: input, shape index: {}]   ;;  %s6139_s14 = inlined_call_operand.vmem [shape: f32[2,35,128], index: 14, kind: output, shape index: {}]  }
   0x1   :  { %v4567_v0 = vld [vmem:[%s6125_s3 + $0x4] ss:$8 sps:$4 sm:$0xff]   ;;  %214 = vmatprep.mubr.bf16.mxu0 %v4724_v1  ;;  %v4569_v2 = vld [vmem:[%s6125_s3] ss:$8 sps:$4 sm:$0xff]   ;;  %v4570_v3 = vld [vmem:[%s6125_s3 + $0x14] ss:$8 sps:$4 sm:$0xff]   ;;  %3960 = vmatprep.subr.bf16.mxu1 %v4725_v20 }
   0x2   :  { %182 = vmatprep.subr.bf16.mxu0 %v4567_v0  ;;  %v4572_v4 = vld [vmem:[%s6125_s3 + $0x10] ss:$8 sps:$4 sm:$0xff]   ;;  %v4573_v5 = vld [vmem:[%s6125_s3 + $0x24] ss:$8 sps:$4 sm:$0xff]   ;;  %v4575_v6 = vld [vmem:[%s6125_s3 + $0x20] ss:$8 sps:$4 sm:$0xff]   ;;  %3964 = vmatprep.mubr.msk.bf16.mxu1 %vm4726_vm0, %v4725_v20 }
   0x3   :  { %183 = vmatpush1.bf16.msra.mxu0 %v4569_v2  ;;  %v4576_v7 = vld [vmem:[%s6125_s3 + $0x34] ss:$8 sps:$4 sm:$0xff]   ;;  %v4578_v8 = vld [vmem:[%s6125_s3 + $0x30] ss:$8 sps:$4 sm:$0xff]   ;;  %v4579_v9 = vld [vmem:[%s6125_s3 + $0x44] ss:$8 sps:$4 sm:$0xff]  }
   0x4   :  { %184 = vmatprep.subr.bf16.mxu0 %v4570_v3  ;;  %v4581_v10 = vld [vmem:[%s6125_s3 + $0x40] ss:$8 sps:$4 sm:$0xff]   ;;  %v4582_v11 = vld [vmem:[%s6125_s3 + $0x54] ss:$8 sps:$4 sm:$0xff]   ;;  %v4584_v12 = vld [vmem:[%s6125_s3 + $0x50] ss:$8 sps:$4 sm:$0xff]  }
   0x5   :  { %v4585_v13 = vld [vmem:[%s6125_s3 + $0x64] ss:$8 sps:$4 sm:$0xff]   ;;  %v4587_v14 = vld [vmem:[%s6125_s3 + $0x60] ss:$8 sps:$4 sm:$0xff]   ;;  %v4588_v15 = vld [vmem:[%s6125_s3 + $0x74] ss:$8 sps:$4 sm:$0xff]  }
   0x6   :  { %v4590_v16 = vld [vmem:[%s6125_s3 + $0x70] ss:$8 sps:$4 sm:$0xff]   ;;  %v4591_v17 = vld [vmem:[%s6126_s0] sm:$0xff]   ;;  %v4592_v18 = vld [vmem:[%s6126_s0 + $0x8] sm:$0xff]   ;;  %243 = vst [vmem:[#allocation2] sm:$0xff] %v4725_v20  ;;  %v282_v35 = vsel %vm280_vm1, 65535, %v4724_v1 }
   0x7   :  { %185 = vmatpush1.bf16.msra.mxu0 %v4572_v4  ;;  %v4593_v19 = vld [vmem:[%s6126_s0 + $0x10] ss:$0 sps:$4 sm:$0x11]   ;;  %244 = vst [vmem:[#allocation2 + $0x8] sm:$0xff] %v4725_v20  ;;  %245 = vst [vmem:[#allocation2 + $0x10] sm:$0xff] %v4725_v20  ;;  %v4600_v21 = vld [vmem:[%s6128_s6] sm:$0xff]  }
   0x8   :  { %186 = vmatprep.subr.bf16.mxu0 %v4573_v5  ;;  %246 = vst [vmem:[#allocation2 + $0x18] sm:$0xff] %v4725_v20  ;;  %247 = vst [vmem:[#allocation2 + $0x20] sm:$0xff] %v4725_v20  ;;  %v4601_v22 = vld [vmem:[%s6128_s6 + $0x8] sm:$0xff]   ;;  %v4602_v23 = vld [vmem:[%s6128_s6 + $0x10] sm:$0xff]   ;;  %vm270_vm2 = vcmask 138240   ;;  %vm2239_vm4 = vcmask 1042432  }
   0x9   :  { %248 = vst [vmem:[#allocation2 + $0x28] sm:$0xff] %v4725_v20  ;;  %249 = vst [vmem:[#allocation2 + $0x30] sm:$0xff] %v4725_v20  ;;  %v4603_v24 = vld [vmem:[%s6128_s6 + $0x18] sm:$0xff]   ;;  %v4604_v25 = vld [vmem:[%s6128_s6 + $0x20] sm:$0xff]   ;;  %vm443_vm3 = vsmask.f32 7424 }
   0xa   :  { %250 = vst [vmem:[#allocation2 + $0x38] sm:$0xff] %v4725_v20  ;;  %251 = vst [vmem:[#allocation2 + $0x40] sm:$0xff] %v4725_v20  ;;  %v4605_v26 = vld [vmem:[%s6128_s6 + $0x28] sm:$0xff]   ;;  %v4606_v28 = vld [vmem:[%s6128_s6 + $0x30] sm:$0xff]  }
   0xb   :  { %187 = vmatpush1.bf16.msra.mxu0 %v4575_v6  ;;  %252 = vst [vmem:[#allocation2 + $0x48] sm:$0x3f] %v4725_v20  ;;  %v4607_v33 = vld [vmem:[%s6128_s6 + $0x38] sm:$0xff]  }
   0xc   :  { %188 = vmatprep.subr.bf16.mxu0 %v4576_v7  ;;  %v4594_v47 = vld [vmem:[%s6127_s2 + $0x14] sm:$0xff]   ;;  %v4595_v2 = vld [vmem:[%s6127_s2 + $0x1c] sm:$0xff]  }
   0xf   :  { %189 = vmatpush1.bf16.msra.mxu0 %v4578_v8  ;;  %v4596_v8 = vld [vmem:[%s6127_s2 + $0x24] ss:$0 sps:$4 sm:$0x33]  }
  0x10   :  { %190 = vmatprep.subr.bf16.mxu0 %v4579_v9  ;;  %v4597_v9 = vld [vmem:[%s6127_s2] sm:$0xff]  }
  0x13   :  { %191 = vmatpush1.bf16.msra.mxu0 %v4581_v10  ;;  %v4598_v10 = vld [vmem:[%s6127_s2 + $0x8] sm:$0xff]  }
  0x14   :  { %192 = vmatprep.subr.bf16.mxu0 %v4582_v11  ;;  %v4599_v11 = vld [vmem:[%s6127_s2 + $0x10] ss:$0 sps:$4 sm:$0x33]  }
  0x17   :  { %193 = vmatpush1.bf16.msra.mxu0 %v4584_v12  ;;  %v633_v12 = vld [vmem:[%s6129_s1] sm:$0xff] }
  0x18   :  { %194 = vmatprep.subr.bf16.mxu0 %v4585_v13  ;;  %v634_v13 = vld [vmem:[%s6129_s1 + $0x8] sm:$0xff] }
  0x1b   :  { %195 = vmatpush1.bf16.msra.mxu0 %v4587_v14  ;;  %v643_v14 = vpack.c.bf16 %v634_v13, %v633_v12 }
  0x1c   :  { %196 = vmatprep.subr.bf16.mxu0 %v4588_v15  ;;  %v635_v15 = vld [vmem:[%s6129_s1 + $0x10] sm:$0xff] }
  0x1f   :  { %197 = vmatpush1.bf16.msra.mxu0 %v4590_v16  ;;  %v636_v16 = vld [vmem:[%s6129_s1 + $0x18] sm:$0xff] }
  0x20   :  { %4024 = vmatprep.subr.bf16.mxu0 %v4725_v20 }
  0x22   :  { %215 = vmatmul.mubr.bf16.vlgmr.msra.gmra.mrb[0].mxu0 %v4591_v17  ;;  %v644_v17 = vpack.c.bf16 %v636_v16, %v635_v15  ;;  %v4624_v16 = vld [vmem:[%s6128_s6 + $0x40] sm:$0xff]  }
  0x23   :  { %224 = vmatprep.mubr.bf16.mxu0 %v4724_v1  ;;  %4025 = vmatpush3.bf16.msra.mxu0 %v4600_v21  ;;  %v4610_v21 = vld [vmem:[%s6130_s5 + $0x8] sm:$0xff]  }
  0x24   :  { %4026 = vmatprep.subr.bf16.mxu0 %v4725_v20 }
  0x27   :  { %4027 = vmatpush3.bf16.msra.mxu0 %v4601_v22  ;;  %v4611_v22 = vld [vmem:[%s6130_s5 + $0x48] sm:$0xff]  }
  0x28   :  { %4028 = vmatprep.subr.bf16.mxu0 %v4725_v20 }
  0x2a   :  { %225 = vmatmul.mubr.bf16.gmra.mrb[4].mxu0 %v4592_v18  ;;  %v4608_v18 = vld [vmem:[%s6130_s5] sm:$0xff]  }
  0x2b   :  { %234 = vmatprep.mubr.bf16.mxu0 %v4724_v1  ;;  %4029 = vmatpush3.bf16.msra.mxu0 %v4602_v23  ;;  %v637_v23 = vld [vmem:[%s6129_s1 + $0x20] sm:$0xff] }
  0x2c   :  { %4030 = vmatprep.subr.bf16.mxu0 %v4725_v20 }
  0x2f   :  { %4031 = vmatpush3.bf16.msra.mxu0 %v4603_v24  ;;  %v638_v24 = vld [vmem:[%s6129_s1 + $0x28] sm:$0xff] }
  0x30   :  { %4032 = vmatprep.subr.bf16.mxu0 %v4725_v20 }
  0x32   :  { %235 = vmatmul.mubr.bf16.gmra.mrb[8].mxu0 %v4593_v19  ;;  %v4609_v19 = vld [vmem:[%s6130_s5 + $0x40] sm:$0xff]  }
  0x33   :  { %4040 = vmatprep.mubr.msk.bf16.mxu0 %vm4726_vm0, %v4725_v20  ;;  %4033 = vmatpush3.bf16.msra.mxu0 %v4604_v25  ;;  %v645_v25 = vpack.c.bf16 %v638_v24, %v637_v23 }
  0x34   :  { %4034 = vmatprep.subr.bf16.mxu0 %v4725_v20 }
  0x37   :  { %4035 = vmatpush3.bf16.msra.mxu0 %v4605_v26  ;;  %v4612_v26 = vld [vmem:[%s6130_s5 + $0x10] sm:$0xff]  }
  0x38   :  { %4036 = vmatprep.subr.bf16.mxu0 %v4725_v20 }
  0x3b   :  { %4037 = vmatpush3.bf16.msra.mxu0 %v4606_v28  ;;  %v4614_v28 = vld [vmem:[%s6130_s5 + $0x18] sm:$0xff]  }
  0x3c   :  { %4038 = vmatprep.subr.bf16.mxu0 %v4725_v20 }
  0x3f   :  { %4039 = vmatpush3.bf16.msra.mxu0 %v4607_v33  ;;  %v4616_v33 = vld [vmem:[%s6130_s5 + $0x20] sm:$0xff]  }
  0x40   :  { %4096 = vmatprep.subr.bf16.mxu0 %v4725_v20 }
  0x42   :  { %4041 = vmatmul.mubr.bf16.vlgmr.msra.gmra.mrb[12].mxu0 %v643_v14 }
  0x43   :  { %4044 = vmatprep.mubr.msk.bf16.mxu0 %vm4726_vm0, %v4725_v20  ;;  %4097 = vmatpush3.bf16.msra.mxu0 %v4609_v19 }
  0x44   :  { %4098 = vmatprep.subr.bf16.mxu0 %v4725_v20 }
  0x47   :  { %4099 = vmatpush3.bf16.msra.mxu0 %v4611_v22 }
  0x48   :  { %4100 = vmatprep.subr.bf16.mxu0 %v4725_v20 }
  0x4a   :  { %4045 = vmatmul.mubr.bf16.gmra.mrb[16].mxu0 %v644_v17  ;;  %v4626_v17 = vld [vmem:[%s6130_s5 + $0x80] sm:$0xff]  }
  0x4b   :  { %4048 = vmatprep.mubr.msk.bf16.mxu0 %vm4726_vm0, %v4725_v20 }
  0x52   :  { %4049 = vmatmul.mubr.bf16.gmra.mrb[20].mxu0 %v645_v25 }
  0x53   :  { %4052 = vmatprep.mubr.msk.bf16.mxu0 %vm4726_vm0, %v4725_v20 }
  0xf5   :  { %v216_v27 = vpop.f32.mrb[0].mxu0 }
  0xf6   :  { %v218_v29 = vpop.f32.mrb[1].mxu0 }
  0xf7   :  { %v220_v30 = vpop.f32.mrb[2].mxu0 }
  0xf8   :  { %v253_v31 = vpack.c.bf16 %v220_v30, %v216_v27  ;;  %v222_v32 = vpop.f32.mrb[3].mxu0  ;;  %v4613_v27 = vld [vmem:[%s6130_s5 + $0x50] sm:$0xff]  }
  0xf9   :  { %v255_v34 = vpack.c.bf16 %v222_v32, %v218_v29  ;;  %4101 = vmatpush3.bf16.msra.mxu0 %v4613_v27  ;;  %v4615_v29 = vld [vmem:[%s6130_s5 + $0x58] sm:$0xff]   ;;  %v639_v30 = vld [vmem:[%s6129_s1 + $0x30] sm:$0xff]  ;;  %v4628_v27 = vld [vmem:[%s6130_s5 + $0x88] sm:$0xff]  }
  0xfa   :  { %4102 = vmatprep.subr.bf16.mxu0 %v4725_v20 }
  0xfb   :  { %3961 = vmatpush3.bf16.msra.mxu1 %v255_v34  ;;  %v4617_v34 = vld [vmem:[%s6130_s5 + $0x60] sm:$0xff]  }
  0xfc   :  { %3962 = vmatprep.subr.bf16.mxu1 %v4725_v20 }
  0xfd   :  { %v226_v36 = vpop.f32.mrb[4].mxu0  ;;  %4103 = vmatpush3.bf16.msra.mxu0 %v4615_v29 }
  0xfe   :  { %v254_v37 = vpack.c.bf16 %v226_v36, %v226_v36  ;;  %v228_v38 = vpop.f32.mrb[5].mxu0  ;;  %4104 = vmatprep.subr.bf16.mxu0 %v4725_v20 }
  0xff   :  { %v256_v39 = vpack.c.bf16 %v228_v38, %v228_v38  ;;  %v230_v40 = vpop.f32.mrb[6].mxu0 }
 0x100   :  { %v365_v41 = vand.u32 %v282_v35, %v254_v37  ;;  %v439_v42 = vpack.c.bf16 %v230_v40, %v226_v36  ;;  %v232_v43 = vpop.f32.mrb[7].mxu0  ;;  %v4619_v36 = vld [vmem:[%s6130_s5 + $0x68] sm:$0xff]   ;;  %v641_v37 = vld [vmem:[%s6129_s1 + $0x40] sm:$0xff]  ;;  %v4620_v40 = vld [vmem:[%s6130_s5 + $0x30] sm:$0xff]  }
 0x101   :  { %v284_v44 = vand.u32 %v282_v35, %v256_v39  ;;  %v441_v45 = vpack.c.bf16 %v232_v43, %v228_v38  ;;  %4105 = vmatpush3.bf16.msra.mxu0 %v4617_v34  ;;  %v642_v38 = vld [vmem:[%s6129_s1 + $0x48] sm:$0x3]  ;;  %v4623_v43 = vld [vmem:[%s6130_s5 + $0x78] sm:$0xff]   ;;  %v4627_v34 = vld [vmem:[%s6128_s6 + $0x50] sm:$0xff]  }
 0x102   :  { %v521_v46 = vshll.u32 %v439_v42, 16  ;;  %v519_v56 = vshrl.u32 %v439_v42, 16  ;;  %4106 = vmatprep.subr.bf16.mxu0 %v4725_v20  ;;  %v647_v39 = vpack.c.bf16 %v642_v38, %v641_v37  ;;  %v4622_v42 = vld [vmem:[%s6130_s5 + $0x38] sm:$0xff]  }
 0x103   :  { %v447_v48 = vshll.u32 %v441_v45, 16  ;;  %3963 = vmatpush3.bf16.msra.mxu1 %v284_v44  ;;  %v445_v60 = vshrl.u32 %v441_v45, 16 }
 0x104   :  { %3976 = vmatprep.subr.bf16.mxu1 %v4725_v20  ;;  %v523_v50 = vrot.slane %v521_v46, 1 }
 0x105   :  { %v236_v49 = vpop.f32.mrb[8].mxu0  ;;  %v449_v53 = vrot.slane %v447_v48, 1  ;;  %4107 = vmatpush3.bf16.msra.mxu0 %v4619_v36 }
 0x106   :  { %v440_v51 = vpack.c.bf16 %v236_v49, %v236_v49  ;;  %v238_v52 = vpop.f32.mrb[9].mxu0  ;;  %3965 = vmatmul.mubr.msk.bf16.vlgmr.msra.gmra.mrb[0].mxu1 %vm270_vm2, %v4594_v47  ;;  %v524_v63 = vor.u32 %v523_v50, %v519_v56  ;;  %4108 = vmatprep.subr.bf16.mxu0 %v4725_v20  ;;  %v5081_v56 = vld [vmem:[%s6131_s4] ss:$0 sm:$0xff] }
 0x107   :  { %v442_v54 = vpack.c.bf16 %v238_v52, %v238_v52  ;;  %3977 = vmatpush3.bf16.msra.mxu1 %v253_v31  ;;  %3968 = vmatprep.mubr.msk.bf16.mxu1 %vm4726_vm0, %v4725_v20  ;;  %v240_v55 = vpop.f32.mrb[10].mxu0  ;;  %v450_v3 = vor.u32 %v449_v53, %v445_v60  ;;  %v640_v31 = vld [vmem:[%s6129_s1 + $0x38] sm:$0xff] }
 0x108   :  { %v526_v57 = vshll.u32 %v440_v51, 16  ;;  %v530_v58 = vshrl.u32 %v440_v51, 16  ;;  %3978 = vmatprep.subr.bf16.mxu1 %v4725_v20  ;;  %v241_v59 = vpop.f32.mrb[11].mxu0  ;;  %v646_v32 = vpack.c.bf16 %v640_v31, %v639_v30 }
 0x109   :  { %v452_v61 = vshll.u32 %v442_v54, 16  ;;  %v456_v62 = vshrl.u32 %v442_v54, 16 }
 0x10a   :  { %v528_v0 = vrot.slane %v526_v57, 1  ;;  %v534_v1 = vand.u32 %v530_v58, %v282_v35  ;;  %4053 = vmatmul.mubr.bf16.gmra.mrb[24].mxu0 %v646_v32 }
 0x10b   :  { %v454_v4 = vrot.slane %v452_v61, 1  ;;  %v460_v5 = vand.u32 %v456_v62, %v282_v35  ;;  %3979 = vmatpush3.bf16.msra.mxu1 %v365_v41  ;;  %4056 = vmatprep.mubr.msk.bf16.mxu0 %vm4726_vm0, %v4725_v20  ;;  %v4618_v35 = vld [vmem:[%s6130_s5 + $0x28] sm:$0xff]   ;;  %v4621_v41 = vld [vmem:[%s6130_s5 + $0x70] sm:$0xff]  }
 0x10c   :  { %3992 = vmatprep.subr.bf16.mxu1 %v4725_v20  ;;  %v529_v6 = vsel %vm443_vm3, %v524_v63, %v528_v0  ;;  %4109 = vmatpush3.bf16.msra.mxu0 %v4621_v41  ;;  %v4632_v41 = vld [vmem:[%s6130_s5 + $0x98] sm:$0xff]  }
 0x10d   :  { %v455_v7 = vsel %vm443_vm3, %v450_v3, %v454_v4  ;;  %4110 = vmatprep.subr.bf16.mxu0 %v4725_v20 }
 0x10e   :  { %3969 = vmatmul.mubr.msk.bf16.gmra.mrb[4].mxu1 %vm270_vm2, %v4595_v2 }
 0x10f   :  { %3972 = vmatprep.mubr.msk.bf16.mxu1 %vm4726_vm0, %v4725_v20 }
 0x110   :  { %4111 = vmatpush3.bf16.msra.mxu0 %v4623_v43  ;;  %v4633_v43 = vld [vmem:[%s6130_s5 + $0xa0] sm:$0xff]  }
 0x111   :  { %4168 = vmatprep.subr.bf16.mxu0 %v4725_v20 }
 0x112   :  { %4057 = vmatmul.mubr.bf16.gmra.mrb[28].mxu0 %v647_v39 }
 0x113   :  { %4112 = vmatprep.mubr.msk.bf16.mxu0 %vm4726_vm0, %v4725_v20 }
 0x116   :  { %3973 = vmatmul.mubr.msk.bf16.gmra.mrb[8].mxu1 %vm270_vm2, %v4596_v8 }
 0x117   :  { %3980 = vmatprep.mubr.msk.bf16.mxu1 %vm4726_vm0, %v4725_v20 }
 0x11e   :  { %3981 = vmatmul.mubr.msk.bf16.vlgmr.msra.gmra.mrb[12].mxu1 %vm270_vm2, %v4597_v9 }
 0x11f   :  { %3993 = vmatpush3.bf16.msra.mxu1 %v455_v7  ;;  %3984 = vmatprep.mubr.msk.bf16.mxu1 %vm4726_vm0, %v4725_v20 }
 0x120   :  { %3994 = vmatprep.subr.bf16.mxu1 %v4725_v20 }
 0x123   :  { %3995 = vmatpush3.bf16.msra.mxu1 %v460_v5 }
 0x124   :  { %4008 = vmatprep.subr.bf16.mxu1 %v4725_v20 }
 0x126   :  { %3985 = vmatmul.mubr.msk.bf16.gmra.mrb[16].mxu1 %vm270_vm2, %v4598_v10 }
 0x127   :  { %3988 = vmatprep.mubr.msk.bf16.mxu1 %vm4726_vm0, %v4725_v20 }
 0x12e   :  { %3989 = vmatmul.mubr.msk.bf16.gmra.mrb[20].mxu1 %vm270_vm2, %v4599_v11 }
 0x12f   :  { %3996 = vmatprep.mubr.msk.bf16.mxu1 %vm4726_vm0, %v4725_v20 }
 0x136   :  { %3997 = vmatmul.mubr.msk.bf16.vlgmr.msra.gmra.mrb[24].mxu1 %vm270_vm2, %v4594_v47 }
 0x137   :  { %4009 = vmatpush3.bf16.msra.mxu1 %v529_v6  ;;  %4000 = vmatprep.mubr.msk.bf16.mxu1 %vm4726_vm0, %v4725_v20 }
 0x138   :  { %4010 = vmatprep.subr.bf16.mxu1 %v4725_v20 }
 0x13b   :  { %4011 = vmatpush3.bf16.msra.mxu1 %v534_v1 }
 0x13c   :  { %4060 = vmatprep.subr.bf16.mxu1 %v4725_v20 }
 0x13e   :  { %4001 = vmatmul.mubr.msk.bf16.gmra.mrb[28].mxu1 %vm270_vm2, %v4595_v2 }
 0x13f   :  { %4004 = vmatprep.mubr.msk.bf16.mxu1 %vm4726_vm0, %v4725_v20 }
 0x146   :  { %4005 = vmatmul.mubr.msk.bf16.gmra.mrb[32].mxu1 %vm270_vm2, %v4596_v8 }
 0x147   :  { %4012 = vmatprep.mubr.msk.bf16.mxu1 %vm4726_vm0, %v4725_v20 }
 0x14e   :  { %4013 = vmatmul.mubr.msk.bf16.vlgmr.msra.gmra.mrb[36].mxu1 %vm270_vm2, %v4597_v9 }
 0x14f   :  { %4016 = vmatprep.mubr.msk.bf16.mxu1 %vm4726_vm0, %v4725_v20  ;;  %4061 = vmatpush3.bf16.msra.mxu1 %v4608_v18 }
 0x150   :  { %4062 = vmatprep.subr.bf16.mxu1 %v4725_v20 }
 0x153   :  { %4063 = vmatpush3.bf16.msra.mxu1 %v4610_v21 }
 0x154   :  { %4064 = vmatprep.subr.bf16.mxu1 %v4725_v20 }
 0x156   :  { %4017 = vmatmul.mubr.msk.bf16.gmra.mrb[40].mxu1 %vm270_vm2, %v4598_v10 }
 0x157   :  { %4020 = vmatprep.mubr.msk.bf16.mxu1 %vm4726_vm0, %v4725_v20  ;;  %4065 = vmatpush3.bf16.msra.mxu1 %v4612_v26  ;;  %v4625_v26 = vld [vmem:[%s6128_s6 + $0x48] sm:$0xff]  }
 0x158   :  { %4066 = vmatprep.subr.bf16.mxu1 %v4725_v20 }
 0x15b   :  { %4067 = vmatpush3.bf16.msra.mxu1 %v4614_v28 }
 0x15c   :  { %4068 = vmatprep.subr.bf16.mxu1 %v4725_v20 }
 0x15e   :  { %4021 = vmatmul.mubr.msk.bf16.gmra.mrb[44].mxu1 %vm270_vm2, %v4599_v11 }
 0x15f   :  { %4076 = vmatprep.mubr.msk.bf16.mxu1 %vm4726_vm0, %v4725_v20  ;;  %4069 = vmatpush3.bf16.msra.mxu1 %v4616_v33 }
 0x160   :  { %4070 = vmatprep.subr.bf16.mxu1 %v4725_v20 }
 0x163   :  { %4071 = vmatpush3.bf16.msra.mxu1 %v4618_v35  ;;  %v4630_v35 = vld [vmem:[%s6130_s5 + $0x90] sm:$0xff]  }
 0x164   :  { %4072 = vmatprep.subr.bf16.mxu1 %v4725_v20 }
 0x167   :  { %4073 = vmatpush3.bf16.msra.mxu1 %v4620_v40  ;;  %v4629_v40 = vld [vmem:[%s6128_s6 + $0x58] sm:$0xff]  }
 0x168   :  { %4074 = vmatprep.subr.bf16.mxu1 %v4725_v20 }
 0x16b   :  { %4075 = vmatpush3.bf16.msra.mxu1 %v4622_v42  ;;  %v4631_v42 = vld [vmem:[%s6128_s6 + $0x60] sm:$0xff]  }
 0x16c   :  { %4132 = vmatprep.subr.bf16.mxu1 %v4725_v20 }
 0x1d9   :  { %v320_v44 = vpop.f32.mrb[0].mxu1 }
 0x1da   :  { %v3966_v45 = vpop.f32.mrb[1].mxu1 }
 0x1db   :  { %v323_v46 = vpop.f32.mrb[2].mxu1 }
 0x1dc   :  { %v3967_v47 = vpop.f32.mrb[3].mxu1 }
 0x1e1   :  { %v328_v48 = vpop.f32.mrb[4].mxu1 }
 0x1e2   :  { %v3970_v49 = vpop.f32.mrb[5].mxu1 }
 0x1e3   :  { %v331_v50 = vpop.f32.mrb[6].mxu1  ;;  %v4635_v49 = vld [vmem:[%s6130_s5 + $0xa8] sm:$0xff]  }
 0x1e4   :  { %v3971_v51 = vpop.f32.mrb[7].mxu1 }
 0x1e5   :  { %v4637_v51 = vld [vmem:[%s6130_s5 + $0xb0] sm:$0xff]  }
 0x1e9   :  { %v336_v52 = vpop.f32.mrb[8].mxu1 }
 0x1ea   :  { %v3974_v53 = vpop.f32.mrb[9].mxu1 }
 0x1eb   :  { %v339_v54 = vpop.f32.mrb[10].mxu1 }
 0x1ec   :  { %v3975_v55 = vpop.f32.mrb[11].mxu1 }
 0x1f1   :  { %v401_v57 = vpop.f32.mrb[12].mxu1 }
 0x1f2   :  { %v402_v58 = vadd.f32 %v401_v57, %v320_v44  ;;  %v3982_v59 = vpop.f32.mrb[13].mxu1  ;;  %v4638_v57 = vld [vmem:[%s6128_s6 + $0x78] sm:$0xff]  }
 0x1f3   :  { %v404_v60 = vpop.f32.mrb[14].mxu1 }
 0x1f4   :  { %v5084_v61 = vadd.f32 %v5081_v56, %v402_v58  ;;  %v405_v62 = vadd.f32 %v404_v60, %v323_v46  ;;  %v3983_v63 = vpop.f32.mrb[15].mxu1  ;;  %v4639_v58 = vld [vmem:[%s6130_s5 + $0xb8] sm:$0xff]  }
 0x1f6   :  { %434 = vst [vmem:[#allocation2 + $0x2] sm:$0xff] %v5084_v61  ;;  %v5088_v0 = vadd.f32 %v5081_v56, %v405_v62 }
 0x1f8   :  { %435 = vst [vmem:[#allocation2 + $0xa] sm:$0xff] %v5088_v0  ;;  %v1242_v1 = vpack.c.bf16 %v5088_v0, %v5084_v61 }
 0x1f9   :  { %v409_v2 = vpop.f32.mrb[16].mxu1 }
 0x1fa   :  { %v410_v3 = vadd.f32 %v409_v2, %v328_v48  ;;  %v3986_v4 = vpop.f32.mrb[17].mxu1  ;;  %v4634_v48 = vld [vmem:[%s6128_s6 + $0x68] sm:$0xff]  }
 0x1fb   :  { %v412_v5 = vpop.f32.mrb[18].mxu1 }
 0x1fc   :  { %v5094_v6 = vadd.f32 %v5081_v56, %v410_v3  ;;  %v413_v7 = vadd.f32 %v412_v5, %v331_v50  ;;  %v3987_v8 = vpop.f32.mrb[19].mxu1  ;;  %v4636_v50 = vld [vmem:[%s6128_s6 + $0x70] sm:$0xff]  }
 0x1fd   :  { %v602_v10 = vld [vmem:[#allocation2] sm:$0xff] }
 0x1fe   :  { %436 = vst [vmem:[#allocation2 + $0x12] sm:$0xff] %v5094_v6  ;;  %v5098_v9 = vadd.f32 %v5081_v56, %v413_v7  ;;  %v906_v12 = vld [vmem:[#allocation2 + $0x1] sm:$0xff] }
 0x1ff   :  { %v603_v11 = vld [vmem:[#allocation2 + $0x8] sm:$0xff] }
 0x200   :  { %v907_v13 = vld [vmem:[#allocation2 + $0x9] sm:$0xff]  ;;  %437 = vst [vmem:[#allocation2 + $0x1a] sm:$0xff] %v5098_v9  ;;  %v612_v14 = vpack.c.bf16 %v603_v11, %v602_v10  ;;  %v1243_v18 = vpack.c.bf16 %v5098_v9, %v5094_v6  ;;  %v4645_v6 = vld [vmem:[%s6128_s6 + $0x98] sm:$0xff]  }
 0x201   :  { %v916_v15 = vpack.c.bf16 %v907_v13, %v906_v12  ;;  %v417_v19 = vpop.f32.mrb[20].mxu1 }
 0x202   :  { %v418_v21 = vadd.f32 %v417_v19, %v336_v52  ;;  %v3990_v22 = vpop.f32.mrb[21].mxu1  ;;  %4077 = vmatmul.mubr.bf16.vlgmr.msra.gmra.mrb[48].mxu1 %v612_v14 }
 0x203   :  { %4113 = vmatmul.mubr.bf16.vlgmr.msra.gmra.mrb[32].mxu0 %v916_v15  ;;  %v420_v23 = vpop.f32.mrb[22].mxu1  ;;  %4080 = vmatprep.mubr.msk.bf16.mxu1 %vm4726_vm0, %v4725_v20 }
 0x204   :  { %4116 = vmatprep.mubr.msk.bf16.mxu0 %vm4726_vm0, %v4725_v20  ;;  %v433_v24 = vadd.f32 %v5081_v56, %v418_v21  ;;  %v3991_v25 = vpop.f32.mrb[23].mxu1  ;;  %4133 = vmatpush3.bf16.msra.mxu1 %v4624_v16 }
 0x205   :  { %4169 = vmatpush3.bf16.msra.mxu0 %v4626_v17  ;;  %4134 = vmatprep.subr.bf16.mxu1 %v4725_v20  ;;  %v604_v28 = vld [vmem:[#allocation2 + $0x10] sm:$0xff] }
 0x206   :  { %4170 = vmatprep.subr.bf16.mxu0 %v4725_v20  ;;  %438 = vst [vmem:[#allocation2 + $0x22] sm:$0x7] %v433_v24  ;;  %v908_v30 = vld [vmem:[#allocation2 + $0x11] sm:$0xff] }
 0x207   :  { %v605_v29 = vld [vmem:[#allocation2 + $0x18] sm:$0xff] }
 0x208   :  { %v909_v31 = vld [vmem:[#allocation2 + $0x19] sm:$0xff]  ;;  %v613_v32 = vpack.c.bf16 %v605_v29, %v604_v28  ;;  %4135 = vmatpush3.bf16.msra.mxu1 %v4625_v26 }
 0x209   :  { %v917_v33 = vpack.c.bf16 %v909_v31, %v908_v30  ;;  %4171 = vmatpush3.bf16.msra.mxu0 %v4628_v27  ;;  %v496_v36 = vpop.f32.mrb[24].mxu1  ;;  %4136 = vmatprep.subr.bf16.mxu1 %v4725_v20 }
 0x20a   :  { %4172 = vmatprep.subr.bf16.mxu0 %v4725_v20  ;;  %v3998_v37 = vpop.f32.mrb[25].mxu1  ;;  %4081 = vmatmul.mubr.bf16.gmra.mrb[52].mxu1 %v613_v32 }
 0x20b   :  { %4117 = vmatmul.mubr.bf16.gmra.mrb[36].mxu0 %v917_v33  ;;  %v499_v38 = vpop.f32.mrb[26].mxu1  ;;  %4084 = vmatprep.mubr.msk.bf16.mxu1 %vm4726_vm0, %v4725_v20 }
 0x20c   :  { %4120 = vmatprep.mubr.msk.bf16.mxu0 %vm4726_vm0, %v4725_v20  ;;  %v3999_v39 = vpop.f32.mrb[27].mxu1  ;;  %4137 = vmatpush3.bf16.msra.mxu1 %v4627_v34 }
 0x20d   :  { %4173 = vmatpush3.bf16.msra.mxu0 %v4630_v35  ;;  %4138 = vmatprep.subr.bf16.mxu1 %v4725_v20  ;;  %v910_v5 = vld [vmem:[#allocation2 + $0x21] sm:$0xff]  ;;  %v1070_v39 = vld [vmem:[%s6129_s1 + $0x9] sm:$0xff] }
 0x20e   :  { %4174 = vmatprep.subr.bf16.mxu0 %v4725_v20  ;;  %v606_v17 = vld [vmem:[#allocation2 + $0x20] sm:$0xff] }
 0x210   :  { %4139 = vmatpush3.bf16.msra.mxu1 %v4629_v40 }
 0x211   :  { %4175 = vmatpush3.bf16.msra.mxu0 %v4632_v41  ;;  %v504_v44 = vpop.f32.mrb[28].mxu1  ;;  %4140 = vmatprep.subr.bf16.mxu1 %v4725_v20 }
 0x212   :  { %4176 = vmatprep.subr.bf16.mxu0 %v4725_v20  ;;  %v4002_v45 = vpop.f32.mrb[29].mxu1 }
 0x213   :  { %v507_v46 = vpop.f32.mrb[30].mxu1  ;;  %v4640_v45 = vld [vmem:[%s6128_s6 + $0x80] sm:$0xff]  }
 0x214   :  { %v4003_v47 = vpop.f32.mrb[31].mxu1  ;;  %4141 = vmatpush3.bf16.msra.mxu1 %v4631_v42 }
 0x215   :  { %4177 = vmatpush3.bf16.msra.mxu0 %v4633_v43  ;;  %4142 = vmatprep.subr.bf16.mxu1 %v4725_v20 }
 0x216   :  { %4178 = vmatprep.subr.bf16.mxu0 %v4725_v20 }
 0x218   :  { %4143 = vmatpush3.bf16.msra.mxu1 %v4634_v48  ;;  %v4642_v48 = vld [vmem:[%s6130_s5 + $0xc0] sm:$0xff]  }
 0x219   :  { %4179 = vmatpush3.bf16.msra.mxu0 %v4635_v49  ;;  %v512_v52 = vpop.f32.mrb[32].mxu1  ;;  %4144 = vmatprep.subr.bf16.mxu1 %v4725_v20 }
 0x21a   :  { %4180 = vmatprep.subr.bf16.mxu0 %v4725_v20  ;;  %v4006_v53 = vpop.f32.mrb[33].mxu1 }
 0x21b   :  { %v515_v54 = vpop.f32.mrb[34].mxu1  ;;  %v1072_v53 = vld [vmem:[%s6129_s1 + $0x19] sm:$0xff] }
 0x21c   :  { %v4007_v55 = vpop.f32.mrb[35].mxu1  ;;  %4145 = vmatpush3.bf16.msra.mxu1 %v4636_v50 }
 0x21d   :  { %4181 = vmatpush3.bf16.msra.mxu0 %v4637_v51  ;;  %4146 = vmatprep.subr.bf16.mxu1 %v4725_v20  ;;  %v4641_v51 = vld [vmem:[%s6128_s6 + $0x88] sm:$0xff]  }
 0x21e   :  { %4182 = vmatprep.subr.bf16.mxu0 %v4725_v20 }
 0x220   :  { %4147 = vmatpush3.bf16.msra.mxu1 %v4638_v57 }
 0x221   :  { %4183 = vmatpush3.bf16.msra.mxu0 %v4639_v58  ;;  %v570_v59 = vpop.f32.mrb[36].mxu1  ;;  %4204 = vmatprep.subr.bf16.mxu1 %v4725_v20  ;;  %v4643_v58 = vld [vmem:[%s6128_s6 + $0x90] sm:$0xff]  }
 0x222   :  { %4240 = vmatprep.subr.bf16.mxu0 %v4725_v20  ;;  %v571_v60 = vadd.f32 %v570_v59, %v496_v36  ;;  %v4014_v62 = vpop.f32.mrb[37].mxu1 }
 0x223   :  { %v573_v63 = vpop.f32.mrb[38].mxu1 }
 0x224   :  { %v592_v2 = vadd.f32 %v5081_v56, %v571_v60  ;;  %v574_v3 = vadd.f32 %v573_v63, %v499_v38  ;;  %v4015_v4 = vpop.f32.mrb[39].mxu1  ;;  %v5189_v38 = vpop.f32.mrb[12].mxu0  ;;  %v4646_v63 = vld [vmem:[%s6130_s5 + $0xd0] sm:$0xff]  }
 0x225   :  { %v4042_v40 = vpop.f32.mrb[13].mxu0  ;;  %v1074_v4 = vld [vmem:[%s6129_s1 + $0x29] sm:$0xff] }
 0x226   :  { %597 = vst [vmem:[#allocation2 + $0x29] sm:$0xff] %v592_v2  ;;  %v593_v7 = vadd.f32 %v5081_v56, %v574_v3  ;;  %v918_v8 = vpack.c.bf16 %v592_v2, %v910_v5  ;;  %v5201_v41 = vpop.f32.mrb[14].mxu0  ;;  %v1073_v3 = vld [vmem:[%s6129_s1 + $0x21] sm:$0xff] }
 0x227   :  { %v4043_v42 = vpop.f32.mrb[15].mxu0  ;;  %v4656_v40 = vld [vmem:[%s6128_s6 + $0xc0] sm:$0xff]  }
 0x228   :  { %598 = vst [vmem:[#allocation2 + $0x31] sm:$0xff] %v593_v7  ;;  %4121 = vmatmul.mubr.bf16.gmra.mrb[40].mxu0 %v918_v8  ;;  %v1081_v8 = vpack.c.bf16 %v1074_v4, %v1073_v3  ;;  %v4663_v4 = vld [vmem:[%s6128_s6 + $0xe0] sm:$0xff]  }
 0x229   :  { %v578_v10 = vpop.f32.mrb[40].mxu1  ;;  %4124 = vmatprep.mubr.msk.bf16.mxu0 %vm4726_vm0, %v4725_v20 }
 0x22a   :  { %v579_v11 = vadd.f32 %v578_v10, %v504_v44  ;;  %v4018_v12 = vpop.f32.mrb[41].mxu1  ;;  %v5203_v44 = vpop.f32.mrb[16].mxu0 }
 0x22b   :  { %v581_v13 = vpop.f32.mrb[42].mxu1  ;;  %v4648_v12 = vld [vmem:[%s6130_s5 + $0xd8] sm:$0xff]  }
 0x22c   :  { %v594_v14 = vadd.f32 %v5081_v56, %v579_v11  ;;  %v582_v15 = vadd.f32 %v581_v13, %v507_v46  ;;  %v4019_v16 = vpop.f32.mrb[43].mxu1  ;;  %v4046_v46 = vpop.f32.mrb[17].mxu0  ;;  %v4647_v11 = vld [vmem:[%s6128_s6 + $0xa0] sm:$0xff]  }
 0x22d   :  { %v607_v19 = vld [vmem:[#allocation2 + $0x28] sm:$0xff]  ;;  %v5208_v47 = vpop.f32.mrb[18].mxu0  ;;  %v4649_v16 = vld [vmem:[%s6130_s5 + $0xe0] sm:$0xff]   ;;  %v1397_v46 = vld [vmem:[%s6129_s1 + $0x12] sm:$0xff] }
 0x22e   :  { %599 = vst [vmem:[#allocation2 + $0x39] sm:$0xff] %v594_v14  ;;  %v595_v21 = vadd.f32 %v5081_v56, %v582_v15  ;;  %v614_v22 = vpack.c.bf16 %v607_v19, %v606_v17  ;;  %v919_v23 = vpack.c.bf16 %v594_v14, %v593_v7  ;;  %v4047_v49 = vpop.f32.mrb[19].mxu0  ;;  %v1236_v10 = vld [vmem:[#allocation2 + $0x22] sm:$0xff]  ;;  %v1075_v14 = vld [vmem:[%s6129_s1 + $0x31] sm:$0xff]  ;;  %v1076_v15 = vld [vmem:[%s6129_s1 + $0x39] sm:$0xff] }
 0x22f   :  { %v608_v30 = vld [vmem:[#allocation2 + $0x30] sm:$0xff]  ;;  %v5216_v50 = vpop.f32.mrb[20].mxu0  ;;  %v4650_v17 = vld [vmem:[%s6128_s6 + $0xa8] sm:$0xff]   ;;  %v1561_v49 = vld [vmem:[#allocation2 + $0x1b] sm:$0xff] }
 0x230   :  { %600 = vst [vmem:[#allocation2 + $0x41] sm:$0xff] %v595_v21  ;;  %4085 = vmatmul.mubr.bf16.gmra.mrb[56].mxu1 %v614_v22  ;;  %4125 = vmatmul.mubr.bf16.gmra.mrb[44].mxu0 %v919_v23  ;;  %v4050_v61 = vpop.f32.mrb[21].mxu0  ;;  %v1237_v5 = vld [vmem:[#allocation2 + $0x2a] sm:$0xff] }
 0x231   :  { %v586_v24 = vpop.f32.mrb[44].mxu1  ;;  %4088 = vmatprep.mubr.msk.bf16.mxu1 %vm4726_vm0, %v4725_v20  ;;  %4128 = vmatprep.mubr.msk.bf16.mxu0 %vm4726_vm0, %v4725_v20  ;;  %v5232_v0 = vpop.f32.mrb[22].mxu0  ;;  %v1244_v13 = vpack.c.bf16 %v1237_v5, %v1236_v10  ;;  %v4651_v23 = vld [vmem:[%s6130_s5 + $0xe8] sm:$0xff]   ;;  %v4659_v61 = vld [vmem:[%s6128_s6 + $0xd0] sm:$0xff]  }
 0x232   :  { %v587_v25 = vadd.f32 %v586_v24, %v512_v52  ;;  %v4022_v26 = vpop.f32.mrb[45].mxu1  ;;  %v1071_v52 = vld [vmem:[%s6129_s1 + $0x11] sm:$0xff]  ;;  %v4051_v54 = vpop.f32.mrb[23].mxu0  ;;  %v1562_v3 = vld [vmem:[#allocation2 + $0x23] sm:$0xff] }
 0x233   :  { %v589_v27 = vpop.f32.mrb[46].mxu1  ;;  %v1080_v55 = vpack.c.bf16 %v1072_v53, %v1071_v52  ;;  %v5238_v57 = vpop.f32.mrb[24].mxu0  ;;  %v1077_v26 = vld [vmem:[%s6129_s1 + $0x41] sm:$0xff]  ;;  %v1560_v53 = vld [vmem:[#allocation2 + $0x13] sm:$0xff] }
 0x234   :  { %v596_v28 = vadd.f32 %v5081_v56, %v587_v25  ;;  %v4023_v29 = vpop.f32.mrb[47].mxu1  ;;  %v1069_v56 = vld [vmem:[%s6129_s1 + $0x1] sm:$0xff]  ;;  %v4054_v59 = vpop.f32.mrb[25].mxu0  ;;  %v4652_v25 = vld [vmem:[%s6128_s6 + $0xb0] sm:$0xff]   ;;  %v1078_v27 = vld [vmem:[%s6129_s1 + $0x49] sm:$0x3] }
 0x235   :  { %v609_v31 = vld [vmem:[#allocation2 + $0x38] sm:$0xff]  ;;  %v1079_v43 = vpack.c.bf16 %v1070_v39, %v1069_v56  ;;  %v5244_v60 = vpop.f32.mrb[26].mxu0  ;;  %v1558_v39 = vld [vmem:[#allocation2 + $0x3] sm:$0xff]  ;;  %v4662_v54 = vld [vmem:[%s6130_s5 + $0x110] sm:$0xff]  }
 0x236   :  { %601 = vst [vmem:[#allocation2 + $0x49] sm:$0x7] %v596_v28  ;;  %v615_v32 = vpack.c.bf16 %v609_v31, %v608_v30  ;;  %v4055_v62 = vpop.f32.mrb[27].mxu0  ;;  %v1238_v22 = vld [vmem:[#allocation2 + $0x32] sm:$0xff]  ;;  %v4666_v10 = vld [vmem:[%s6128_s6 + $0xe8] sm:$0xff]  }
 0x237   :  { %v610_v33 = vld [vmem:[#allocation2 + $0x40] sm:$0xff]  ;;  %v5252_v2 = vpop.f32.mrb[28].mxu0  ;;  %v4653_v28 = vld [vmem:[%s6130_s5 + $0xf0] sm:$0xff]   ;;  %v4654_v29 = vld [vmem:[%s6128_s6 + $0xb8] sm:$0xff]  }
 0x238   :  { %4089 = vmatmul.mubr.bf16.gmra.mrb[60].mxu1 %v615_v32  ;;  %v4058_v9 = vpop.f32.mrb[29].mxu0  ;;  %v1239_v19 = vld [vmem:[#allocation2 + $0x3a] sm:$0xff]  ;;  %v1083_v32 = vpack.c.bf16 %v1078_v27, %v1077_v26  ;;  %v1563_v62 = vld [vmem:[#allocation2 + $0x2b] sm:$0xff] }
 0x239   :  { %4092 = vmatprep.mubr.msk.bf16.mxu1 %vm4726_vm0, %v4725_v20  ;;  %v1245_v24 = vpack.c.bf16 %v1239_v19, %v1238_v22  ;;  %v4661_v59 = vld [vmem:[%s6128_s6 + $0xd8] sm:$0xff]   ;;  %v1570_v9 = vpack.c.bf16 %v1563_v62, %v1562_v3  ;;  %v1404_v19 = vld [vmem:[%s6129_s1 + $0x4a] sm:$0x3]  ;;  %v4678_v3 = vld [vmem:[%s6128_s6 + $0x130] sm:$0xff]  }
 0x23a   :  { %v1401_v5 = vld [vmem:[%s6129_s1 + $0x32] sm:$0xff] }
 0x23b   :  { %v4670_v22 = vld [vmem:[%s6128_s6 + $0xf8] sm:$0xff]  }
 0x23c   :  { %v4671_v26 = vld [vmem:[%s6130_s5 + $0x138] sm:$0xff]  }
 0x23d   :  { %v611_v34 = vld [vmem:[#allocation2 + $0x48] sm:$0x3]  ;;  %v1241_v31 = vld [vmem:[#allocation2 + $0x4a] sm:$0x3]  ;;  %v1890_v62 = vld [vmem:[#allocation2 + $0x34] sm:$0xff] }
 0x23e   :  { %v915_v35 = vld [vmem:[#allocation2 + $0x49] sm:$0x3]  ;;  %v616_v36 = vpack.c.bf16 %v611_v34, %v610_v33  ;;  %v4655_v33 = vld [vmem:[%s6130_s5 + $0xf8] sm:$0xff]  }
 0x23f   :  { %v920_v37 = vpack.c.bf16 %v915_v35, %v595_v21  ;;  %v1082_v21 = vpack.c.bf16 %v1076_v15, %v1075_v14  ;;  %v1240_v30 = vld [vmem:[#allocation2 + $0x42] sm:$0xff] }
 0x240   :  { %4093 = vmatmul.mubr.bf16.gmra.mrb[64].mxu1 %v616_v36  ;;  %v1246_v34 = vpack.c.bf16 %v1241_v31, %v1240_v30  ;;  %v1395_v35 = vld [vmem:[%s6129_s1 + $0x2] sm:$0xff]  ;;  %v1396_v36 = vld [vmem:[%s6129_s1 + $0xa] sm:$0xff] }
 0x241   :  { %4129 = vmatmul.mubr.bf16.gmra.mrb[48].mxu0 %v920_v37  ;;  %4148 = vmatprep.mubr.msk.bf16.mxu1 %vm4726_vm0, %v4725_v20  ;;  %v1559_v37 = vld [vmem:[#allocation2 + $0xb] sm:$0xff]  ;;  %v1405_v56 = vpack.c.bf16 %v1396_v36, %v1395_v35  ;;  %v1723_v36 = vld [vmem:[%s6129_s1 + $0x13] sm:$0xff] }
 0x242   :  { %4184 = vmatprep.mubr.msk.bf16.mxu0 %vm4726_vm0, %v4725_v20  ;;  %v1568_v42 = vpack.c.bf16 %v1559_v37, %v1558_v39  ;;  %v4667_v14 = vld [vmem:[%s6130_s5 + $0x128] sm:$0xff]   ;;  %v1724_v37 = vld [vmem:[%s6129_s1 + $0x1b] sm:$0xff] }
 0x243   :  { %v1885_v30 = vld [vmem:[#allocation2 + $0xc] sm:$0xff]  ;;  %v1732_v39 = vpack.c.bf16 %v1724_v37, %v1723_v36  ;;  %v2055_v36 = vld [vmem:[%s6129_s1 + $0x44] sm:$0xff] }
 0x244   :  { %v4673_v35 = vld [vmem:[%s6128_s6 + $0x108] sm:$0xff]  }
 0x248   :  { %4149 = vmatmul.mubr.bf16.vlgmr.msra.gmra.mrb[68].mxu1 %v1079_v43  ;;  %v4658_v43 = vld [vmem:[%s6130_s5 + $0x100] sm:$0xff]  }
 0x249   :  { %4185 = vmatmul.mubr.bf16.vlgmr.msra.gmra.mrb[52].mxu0 %v1242_v1  ;;  %4205 = vmatpush3.bf16.msra.mxu1 %v4640_v45  ;;  %v4644_v1 = vld [vmem:[%s6130_s5 + $0xc8] sm:$0xff]  }
 0x24a   :  { %4152 = vmatprep.mubr.msk.bf16.mxu1 %vm4726_vm0, %v4725_v20  ;;  %4206 = vmatprep.subr.bf16.mxu1 %v4725_v20  ;;  %v4657_v45 = vld [vmem:[%s6128_s6 + $0xc8] sm:$0xff]  }
 0x24b   :  { %4188 = vmatprep.mubr.msk.bf16.mxu0 %vm4726_vm0, %v4725_v20  ;;  %4241 = vmatpush3.bf16.msra.mxu0 %v4642_v48  ;;  %v1398_v48 = vld [vmem:[%s6129_s1 + $0x1a] sm:$0xff] }
 0x24c   :  { %4242 = vmatprep.subr.bf16.mxu0 %v4725_v20  ;;  %v1406_v52 = vpack.c.bf16 %v1398_v48, %v1397_v46  ;;  %v1726_v46 = vld [vmem:[%s6129_s1 + $0x2b] sm:$0xff]  ;;  %v4675_v48 = vld [vmem:[%s6128_s6 + $0x118] sm:$0xff]  }
 0x24d   :  { %4207 = vmatpush3.bf16.msra.mxu1 %v4641_v51  ;;  %v4660_v51 = vld [vmem:[%s6130_s5 + $0x108] sm:$0xff]  }
 0x24e   :  { %4208 = vmatprep.subr.bf16.mxu1 %v4725_v20 }
 0x24f   :  { %4243 = vmatpush3.bf16.msra.mxu0 %v4644_v1  ;;  %v1569_v1 = vpack.c.bf16 %v1561_v49, %v1560_v53  ;;  %v1889_v49 = vld [vmem:[#allocation2 + $0x2c] sm:$0xff]  ;;  %v4676_v53 = vld [vmem:[%s6128_s6 + $0x120] sm:$0xff]  }
 0x250   :  { %4153 = vmatmul.mubr.bf16.gmra.mrb[72].mxu1 %v1080_v55  ;;  %4244 = vmatprep.subr.bf16.mxu0 %v4725_v20  ;;  %v1399_v55 = vld [vmem:[%s6129_s1 + $0x22] sm:$0xff] }
 0x251   :  { %4189 = vmatmul.mubr.bf16.gmra.mrb[56].mxu0 %v1243_v18  ;;  %4209 = vmatpush3.bf16.msra.mxu1 %v4643_v58  ;;  %v5268_v18 = vpop.f32.mrb[30].mxu0  ;;  %v1400_v58 = vld [vmem:[%s6129_s1 + $0x2a] sm:$0xff] }
 0x252   :  { %4156 = vmatprep.mubr.msk.bf16.mxu1 %vm4726_vm0, %v4725_v20  ;;  %4192 = vmatprep.mubr.msk.bf16.mxu0 %vm4726_vm0, %v4725_v20  ;;  %v4059_v7 = vpop.f32.mrb[31].mxu0 }
 0x253   :  { %4210 = vmatprep.subr.bf16.mxu1 %v4725_v20  ;;  %4245 = vmatpush3.bf16.msra.mxu0 %v4646_v63  ;;  %v1407_v63 = vpack.c.bf16 %v1400_v58, %v1399_v55  ;;  %v1402_v7 = vld [vmem:[%s6129_s1 + $0x3a] sm:$0xff]  ;;  %v4677_v55 = vld [vmem:[%s6128_s6 + $0x128] sm:$0xff]  }
 0x254   :  { %4246 = vmatprep.subr.bf16.mxu0 %v4725_v20  ;;  %v1891_v58 = vld [vmem:[#allocation2 + $0x3c] sm:$0xff] }
 0x255   :  { %4211 = vmatpush3.bf16.msra.mxu1 %v4645_v6  ;;  %v4664_v6 = vld [vmem:[%s6130_s5 + $0x118] sm:$0xff]  }
 0x256   :  { %4212 = vmatprep.subr.bf16.mxu1 %v4725_v20 }
 0x257   :  { %4247 = vmatpush3.bf16.msra.mxu0 %v4648_v12  ;;  %v1408_v12 = vpack.c.bf16 %v1402_v7, %v1401_v5  ;;  %v1892_v5 = vld [vmem:[#allocation2 + $0x44] sm:$0xff]  ;;  %v1893_v7 = vld [vmem:[#allocation2 + $0x4c] sm:$0x3] }
 0x258   :  { %4157 = vmatmul.mubr.bf16.gmra.mrb[76].mxu1 %v1081_v8  ;;  %4248 = vmatprep.subr.bf16.mxu0 %v4725_v20  ;;  %v4665_v8 = vld [vmem:[%s6130_s5 + $0x120] sm:$0xff]  }
 0x259   :  { %4193 = vmatmul.mubr.bf16.gmra.mrb[60].mxu0 %v1244_v13  ;;  %4213 = vmatpush3.bf16.msra.mxu1 %v4647_v11  ;;  %v1565_v11 = vld [vmem:[#allocation2 + $0x3b] sm:$0xff]  ;;  %v1564_v13 = vld [vmem:[#allocation2 + $0x33] sm:$0xff] }
 0x25a   :  { %4160 = vmatprep.mubr.msk.bf16.mxu1 %vm4726_vm0, %v4725_v20  ;;  %4196 = vmatprep.mubr.msk.bf16.mxu0 %vm4726_vm0, %v4725_v20  ;;  %v1571_v15 = vpack.c.bf16 %v1565_v11, %v1564_v13  ;;  %v2047_v11 = vld [vmem:[%s6129_s1 + $0x4] sm:$0xff] }
 0x25b   :  { %4214 = vmatprep.subr.bf16.mxu1 %v4725_v20  ;;  %4249 = vmatpush3.bf16.msra.mxu0 %v4649_v16  ;;  %v4668_v16 = vld [vmem:[%s6128_s6 + $0xf0] sm:$0xff]  }
 0x25c   :  { %4250 = vmatprep.subr.bf16.mxu0 %v4725_v20 }
 0x25d   :  { %4215 = vmatpush3.bf16.msra.mxu1 %v4650_v17  ;;  %v1403_v17 = vld [vmem:[%s6129_s1 + $0x42] sm:$0xff] }
 0x25e   :  { %4216 = vmatprep.subr.bf16.mxu1 %v4725_v20 }
 0x25f   :  { %4251 = vmatpush3.bf16.msra.mxu0 %v4651_v23  ;;  %v1566_v23 = vld [vmem:[#allocation2 + $0x43] sm:$0xff] }
 0x260   :  { %4161 = vmatmul.mubr.bf16.gmra.mrb[80].mxu1 %v1082_v21  ;;  %4252 = vmatprep.subr.bf16.mxu0 %v4725_v20  ;;  %v4669_v21 = vld [vmem:[%s6130_s5 + $0x130] sm:$0xff]  }
 0x261   :  { %4197 = vmatmul.mubr.bf16.gmra.mrb[64].mxu0 %v1245_v24  ;;  %4164 = vmatprep.mubr.msk.bf16.mxu1 %vm4726_vm0, %v4725_v20  ;;  %v1567_v24 = vld [vmem:[#allocation2 + $0x4b] sm:$0x3] }
 0x262   :  { %4200 = vmatprep.mubr.msk.bf16.mxu0 %vm4726_vm0, %v4725_v20  ;;  %4217 = vmatpush3.bf16.msra.mxu1 %v4652_v25  ;;  %v1409_v25 = vpack.c.bf16 %v1404_v19, %v1403_v17  ;;  %v1572_v27 = vpack.c.bf16 %v1567_v24, %v1566_v23  ;;  %v2051_v17 = vld [vmem:[%s6129_s1 + $0x24] sm:$0xff]  ;;  %v2052_v19 = vld [vmem:[%s6129_s1 + $0x2c] sm:$0xff]  ;;  %v2054_v23 = vld [vmem:[%s6129_s1 + $0x3c] sm:$0xff] }
 0x263   :  { %4218 = vmatprep.subr.bf16.mxu1 %v4725_v20  ;;  %4253 = vmatpush3.bf16.msra.mxu0 %v4653_v28  ;;  %v1721_v28 = vld [vmem:[%s6129_s1 + $0x3] sm:$0xff] }
 0x264   :  { %4254 = vmatprep.subr.bf16.mxu0 %v4725_v20 }
 0x266   :  { %4219 = vmatpush3.bf16.msra.mxu1 %v4654_v29  ;;  %v1722_v29 = vld [vmem:[%s6129_s1 + $0xb] sm:$0xff] }
 0x267   :  { %4276 = vmatprep.subr.bf16.mxu1 %v4725_v20  ;;  %4255 = vmatpush3.bf16.msra.mxu0 %v4655_v33  ;;  %v1731_v31 = vpack.c.bf16 %v1722_v29, %v1721_v28  ;;  %v4672_v33 = vld [vmem:[%s6128_s6 + $0x100] sm:$0xff]  }
 0x268   :  { %4165 = vmatmul.mubr.bf16.gmra.mrb[84].mxu1 %v1083_v32  ;;  %4312 = vmatprep.subr.bf16.mxu0 %v4725_v20  ;;  %v1884_v32 = vld [vmem:[#allocation2 + $0x4] sm:$0xff] }
 0x269   :  { %4201 = vmatmul.mubr.bf16.gmra.mrb[68].mxu0 %v1246_v34  ;;  %4220 = vmatprep.mubr.msk.bf16.mxu1 %vm4726_vm0, %v4725_v20  ;;  %v1894_v34 = vpack.c.bf16 %v1885_v30, %v1884_v32 }
 0x26a   :  { %4256 = vmatprep.mubr.msk.bf16.mxu0 %vm4726_vm0, %v4725_v20 }
 0x270   :  { %4221 = vmatmul.mubr.bf16.vlgmr.msra.gmra.mrb[88].mxu1 %v1405_v56  ;;  %v1887_v56 = vld [vmem:[#allocation2 + $0x1c] sm:$0xff] }
 0x271   :  { %4257 = vmatmul.mubr.bf16.vlgmr.msra.gmra.mrb[72].mxu0 %v1568_v42  ;;  %4277 = vmatpush3.bf16.msra.mxu1 %v4656_v40  ;;  %v1886_v40 = vld [vmem:[#allocation2 + $0x14] sm:$0xff] }
 0x272   :  { %4224 = vmatprep.mubr.msk.bf16.mxu1 %vm4726_vm0, %v4725_v20  ;;  %4278 = vmatprep.subr.bf16.mxu1 %v4725_v20  ;;  %v4674_v42 = vld [vmem:[%s6128_s6 + $0x110] sm:$0xff]  }
 0x273   :  { %4260 = vmatprep.mubr.msk.bf16.mxu0 %vm4726_vm0, %v4725_v20  ;;  %4313 = vmatpush3.bf16.msra.mxu0 %v4658_v43  ;;  %v1895_v43 = vpack.c.bf16 %v1887_v56, %v1886_v40 }
 0x274   :  { %4314 = vmatprep.subr.bf16.mxu0 %v4725_v20 }
 0x275   :  { %4279 = vmatpush3.bf16.msra.mxu1 %v4657_v45  ;;  %v1725_v45 = vld [vmem:[%s6129_s1 + $0x23] sm:$0xff] }
 0x276   :  { %4280 = vmatprep.subr.bf16.mxu1 %v4725_v20 }
 0x277   :  { %4315 = vmatpush3.bf16.msra.mxu0 %v4660_v51  ;;  %v1733_v51 = vpack.c.bf16 %v1726_v46, %v1725_v45 }
 0x278   :  { %4225 = vmatmul.mubr.bf16.gmra.mrb[92].mxu1 %v1406_v52  ;;  %4316 = vmatprep.subr.bf16.mxu0 %v4725_v20  ;;  %v1888_v52 = vld [vmem:[#allocation2 + $0x24] sm:$0xff] }
 0x279   :  { %4261 = vmatmul.mubr.bf16.gmra.mrb[76].mxu0 %v1569_v1  ;;  %4281 = vmatpush3.bf16.msra.mxu1 %v4659_v61  ;;  %v1896_v61 = vpack.c.bf16 %v1889_v49, %v1888_v52  ;;  %v1727_v1 = vld [vmem:[%s6129_s1 + $0x33] sm:$0xff] }
 0x27a   :  { %4228 = vmatprep.mubr.msk.bf16.mxu1 %vm4726_vm0, %v4725_v20  ;;  %4264 = vmatprep.mubr.msk.bf16.mxu0 %vm4726_vm0, %v4725_v20 }
 0x27b   :  { %4282 = vmatprep.subr.bf16.mxu1 %v4725_v20  ;;  %4317 = vmatpush3.bf16.msra.mxu0 %v4662_v54  ;;  %v1728_v54 = vld [vmem:[%s6129_s1 + $0x3b] sm:$0xff] }
 0x27c   :  { %4318 = vmatprep.subr.bf16.mxu0 %v4725_v20 }
 0x27d   :  { %4283 = vmatpush3.bf16.msra.mxu1 %v4661_v59  ;;  %v1734_v59 = vpack.c.bf16 %v1728_v54, %v1727_v1 }
 0x27e   :  { %4284 = vmatprep.subr.bf16.mxu1 %v4725_v20 }
 0x27f   :  { %4319 = vmatpush3.bf16.msra.mxu0 %v4664_v6  ;;  %v1730_v6 = vld [vmem:[%s6129_s1 + $0x4b] sm:$0x3] }
 0x280   :  { %4229 = vmatmul.mubr.bf16.gmra.mrb[96].mxu1 %v1407_v63  ;;  %4320 = vmatprep.subr.bf16.mxu0 %v4725_v20  ;;  %v1897_v63 = vpack.c.bf16 %v1891_v58, %v1890_v62 }
 0x281   :  { %4265 = vmatmul.mubr.bf16.gmra.mrb[80].mxu0 %v1570_v9  ;;  %4285 = vmatpush3.bf16.msra.mxu1 %v4663_v4  ;;  %v1729_v4 = vld [vmem:[%s6129_s1 + $0x43] sm:$0xff]  ;;  %v4679_v9 = vld [vmem:[%s6128_s6 + $0x138] sm:$0xff]  }
 0x282   :  { %4232 = vmatprep.mubr.msk.bf16.mxu1 %vm4726_vm0, %v4725_v20  ;;  %4268 = vmatprep.mubr.msk.bf16.mxu0 %vm4726_vm0, %v4725_v20 }
 0x283   :  { %4286 = vmatprep.subr.bf16.mxu1 %v4725_v20  ;;  %4321 = vmatpush3.bf16.msra.mxu0 %v4665_v8  ;;  %v1735_v8 = vpack.c.bf16 %v1730_v6, %v1729_v4 }
 0x284   :  { %4322 = vmatprep.subr.bf16.mxu0 %v4725_v20 }
 0x285   :  { %4287 = vmatpush3.bf16.msra.mxu1 %v4666_v10  ;;  %v1898_v10 = vpack.c.bf16 %v1893_v7, %v1892_v5 }
 0x286   :  { %4288 = vmatprep.subr.bf16.mxu1 %v4725_v20 }
 0x287   :  { %4323 = vmatpush3.bf16.msra.mxu0 %v4667_v14  ;;  %v2049_v14 = vld [vmem:[%s6129_s1 + $0x14] sm:$0xff] }
 0x288   :  { %4233 = vmatmul.mubr.bf16.gmra.mrb[100].mxu1 %v1408_v12  ;;  %4324 = vmatprep.subr.bf16.mxu0 %v4725_v20  ;;  %v2048_v12 = vld [vmem:[%s6129_s1 + $0xc] sm:$0xff] }
 0x289   :  { %4269 = vmatmul.mubr.bf16.gmra.mrb[84].mxu0 %v1571_v15  ;;  %4236 = vmatprep.mubr.msk.bf16.mxu1 %vm4726_vm0, %v4725_v20  ;;  %v2057_v13 = vpack.c.bf16 %v2048_v12, %v2047_v11  ;;  %v2050_v15 = vld [vmem:[%s6129_s1 + $0x1c] sm:$0xff] }
 0x28a   :  { %4272 = vmatprep.mubr.msk.bf16.mxu0 %vm4726_vm0, %v4725_v20  ;;  %4289 = vmatpush3.bf16.msra.mxu1 %v4668_v16  ;;  %v2058_v16 = vpack.c.bf16 %v2050_v15, %v2049_v14 }
 0x28b   :  { %4290 = vmatprep.subr.bf16.mxu1 %v4725_v20  ;;  %4325 = vmatpush3.bf16.msra.mxu0 %v4669_v21  ;;  %v2059_v21 = vpack.c.bf16 %v2052_v19, %v2051_v17 }
 0x28c   :  { %4326 = vmatprep.subr.bf16.mxu0 %v4725_v20 }
 0x28e   :  { %4291 = vmatpush3.bf16.msra.mxu1 %v4670_v22  ;;  %v2053_v22 = vld [vmem:[%s6129_s1 + $0x34] sm:$0xff] }
 0x28f   :  { %4348 = vmatprep.subr.bf16.mxu1 %v4725_v20  ;;  %4327 = vmatpush3.bf16.msra.mxu0 %v4671_v26  ;;  %v2060_v24 = vpack.c.bf16 %v2054_v23, %v2053_v22 }
 0x290   :  { %4237 = vmatmul.mubr.bf16.gmra.mrb[104].mxu1 %v1409_v25  ;;  %4384 = vmatprep.subr.bf16.mxu0 %v4725_v20 }
 0x291   :  { %4273 = vmatmul.mubr.bf16.gmra.mrb[88].mxu0 %v1572_v27  ;;  %4292 = vmatprep.mubr.msk.bf16.mxu1 %vm4726_vm0, %v4725_v20 }
 0x292   :  { %4328 = vmatprep.mubr.msk.bf16.mxu0 %vm4726_vm0, %v4725_v20 }
 0x298   :  { %4293 = vmatmul.mubr.bf16.vlgmr.msra.gmra.mrb[108].mxu1 %v1731_v31 }
 0x299   :  { %4329 = vmatmul.mubr.bf16.vlgmr.msra.gmra.mrb[92].mxu0 %v1894_v34  ;;  %4349 = vmatpush3.bf16.msra.mxu1 %v4672_v33 }
 0x29a   :  { %4296 = vmatprep.mubr.msk.bf16.mxu1 %vm4726_vm0, %v4725_v20  ;;  %4350 = vmatprep.subr.bf16.mxu1 %v4725_v20 }
 0x29b   :  { %4332 = vmatprep.mubr.msk.bf16.mxu0 %vm4726_vm0, %v4725_v20 }
 0x29d   :  { %4351 = vmatpush3.bf16.msra.mxu1 %v4673_v35 }
 0x29e   :  { %4352 = vmatprep.subr.bf16.mxu1 %v4725_v20 }
 0x2a0   :  { %4297 = vmatmul.mubr.bf16.gmra.mrb[112].mxu1 %v1732_v39 }
 0x2a1   :  { %4333 = vmatmul.mubr.bf16.gmra.mrb[96].mxu0 %v1895_v43  ;;  %4353 = vmatpush3.bf16.msra.mxu1 %v4674_v42 }
 0x2a2   :  { %4300 = vmatprep.mubr.msk.bf16.mxu1 %vm4726_vm0, %v4725_v20  ;;  %4336 = vmatprep.mubr.msk.bf16.mxu0 %vm4726_vm0, %v4725_v20 }
 0x2a3   :  { %4354 = vmatprep.subr.bf16.mxu1 %v4725_v20 }
 0x2a5   :  { %4355 = vmatpush3.bf16.msra.mxu1 %v4675_v48 }
 0x2a6   :  { %4356 = vmatprep.subr.bf16.mxu1 %v4725_v20 }
 0x2a8   :  { %4301 = vmatmul.mubr.bf16.gmra.mrb[116].mxu1 %v1733_v51 }
 0x2a9   :  { %4337 = vmatmul.mubr.bf16.gmra.mrb[100].mxu0 %v1896_v61  ;;  %4357 = vmatpush3.bf16.msra.mxu1 %v4676_v53 }
 0x2aa   :  { %4304 = vmatprep.mubr.msk.bf16.mxu1 %vm4726_vm0, %v4725_v20  ;;  %4340 = vmatprep.mubr.msk.bf16.mxu0 %vm4726_vm0, %v4725_v20 }
 0x2ab   :  { %4358 = vmatprep.subr.bf16.mxu1 %v4725_v20 }
 0x2ad   :  { %4359 = vmatpush3.bf16.msra.mxu1 %v4677_v55 }
 0x2ae   :  { %4360 = vmatprep.subr.bf16.mxu1 %v4725_v20 }
 0x2b0   :  { %4305 = vmatmul.mubr.bf16.gmra.mrb[120].mxu1 %v1734_v59 }
 0x2b1   :  { %4341 = vmatmul.mubr.bf16.gmra.mrb[104].mxu0 %v1897_v63  ;;  %4308 = vmatprep.mubr.msk.bf16.mxu1 %vm4726_vm0, %v4725_v20 }
 0x2b2   :  { %4344 = vmatprep.mubr.msk.bf16.mxu0 %vm4726_vm0, %v4725_v20  ;;  %4361 = vmatpush3.bf16.msra.mxu1 %v4678_v3 }
 0x2b3   :  { %4362 = vmatprep.subr.bf16.mxu1 %v4725_v20 }
 0x2b6   :  { %4363 = vmatpush3.bf16.msra.mxu1 %v4679_v9 }
 0x2b7   :  { %4420 = vmatprep.subr.bf16.mxu1 %v4725_v20 }
 0x2b8   :  { %4309 = vmatmul.mubr.bf16.gmra.mrb[124].mxu1 %v1735_v8 }
 0x2b9   :  { %4345 = vmatmul.mubr.bf16.gmra.mrb[108].mxu0 %v1898_v10  ;;  %4364 = vmatprep.mubr.msk.bf16.mxu1 %vm4726_vm0, %v4725_v20 }
 0x2ba   :  { %4400 = vmatprep.mubr.msk.bf16.mxu0 %vm4726_vm0, %v4725_v20 }
 0x2c0   :  { %4365 = vmatmul.mubr.bf16.vlgmr.msra.gmra.mrb[128].mxu1 %v2057_v13 }
 0x2c1   :  { %4368 = vmatprep.mubr.msk.bf16.mxu1 %vm4726_vm0, %v4725_v20 }
 0x2c8   :  { %4369 = vmatmul.mubr.bf16.gmra.mrb[132].mxu1 %v2058_v16 }
 0x2c9   :  { %4372 = vmatprep.mubr.msk.bf16.mxu1 %vm4726_vm0, %v4725_v20 }
 0x2d0   :  { %4373 = vmatmul.mubr.bf16.gmra.mrb[136].mxu1 %v2059_v21 }
 0x2d1   :  { %4376 = vmatprep.mubr.msk.bf16.mxu1 %vm4726_vm0, %v4725_v20 }
 0x2d5   :  { %v867_v25 = vpop.f32.mrb[48].mxu1 }
 0x2d6   :  { %v1020_v26 = vpop.f32.mrb[32].mxu0  ;;  %v868_v27 = vadd.f32 %v867_v25, %v5189_v38  ;;  %v4078_v28 = vpop.f32.mrb[49].mxu1  ;;  %v2056_v38 = vld [vmem:[%s6129_s1 + $0x4c] sm:$0x3] }
 0x2d7   :  { %v4114_v29 = vpop.f32.mrb[33].mxu0  ;;  %v870_v30 = vpop.f32.mrb[50].mxu1  ;;  %v2061_v56 = vpack.c.bf16 %v2056_v38, %v2055_v36 }
 0x2d8   :  { %v1023_v31 = vpop.f32.mrb[34].mxu0  ;;  %v1059_v32 = vadd.f32 %v1020_v26, %v868_v27  ;;  %v871_v33 = vadd.f32 %v870_v30, %v5201_v41  ;;  %v4079_v34 = vpop.f32.mrb[51].mxu1  ;;  %4377 = vmatmul.mubr.bf16.gmra.mrb[140].mxu1 %v2060_v24 }
 0x2d9   :  { %v4115_v35 = vpop.f32.mrb[35].mxu0  ;;  %4380 = vmatprep.mubr.msk.bf16.mxu1 %vm4726_vm0, %v4725_v20 }
 0x2da   :  { %v1060_v37 = vadd.f32 %v1023_v31, %v871_v33 }
 0x2dd   :  { %v875_v39 = vpop.f32.mrb[52].mxu1 }
 0x2de   :  { %v1028_v40 = vpop.f32.mrb[36].mxu0  ;;  %v876_v41 = vadd.f32 %v875_v39, %v5203_v44  ;;  %v4082_v42 = vpop.f32.mrb[53].mxu1 }
 0x2df   :  { %v4118_v43 = vpop.f32.mrb[37].mxu0  ;;  %v878_v45 = vpop.f32.mrb[54].mxu1 }
 0x2e0   :  { %v1031_v46 = vpop.f32.mrb[38].mxu0  ;;  %v1061_v48 = vadd.f32 %v1028_v40, %v876_v41  ;;  %v879_v49 = vadd.f32 %v878_v45, %v5208_v47  ;;  %v4083_v51 = vpop.f32.mrb[55].mxu1  ;;  %4381 = vmatmul.mubr.bf16.gmra.mrb[144].mxu1 %v2061_v56 }
 0x2e1   :  { %v4119_v52 = vpop.f32.mrb[39].mxu0  ;;  %4436 = vmatprep.mubr.msk.bf16.mxu1 %vm4726_vm0, %v4725_v20 }
 0x2e2   :  { %v1062_v53 = vadd.f32 %v1031_v46, %v879_v49 }
 0x2fb   :  { %v1036_v61 = vpop.f32.mrb[40].mxu0 }
 0x2fc   :  { %v4122_v1 = vpop.f32.mrb[41].mxu0 }
 0x2fd   :  { %v1039_v54 = vpop.f32.mrb[42].mxu0 }
 0x2fe   :  { %v4123_v55 = vpop.f32.mrb[43].mxu0 }
 0x303   :  { %v883_v58 = vpop.f32.mrb[56].mxu1  ;;  %v1044_v44 = vpop.f32.mrb[44].mxu0 }
 0x304   :  { %v884_v59 = vadd.f32 %v883_v58, %v5216_v50  ;;  %v4086_v62 = vpop.f32.mrb[57].mxu1  ;;  %v4126_v63 = vpop.f32.mrb[45].mxu0 }
 0x305   :  { %v886_v3 = vpop.f32.mrb[58].mxu1  ;;  %v1047_v4 = vpop.f32.mrb[46].mxu0 }
 0x306   :  { %v1063_v47 = vadd.f32 %v1036_v61, %v884_v59  ;;  %v887_v6 = vadd.f32 %v886_v3, %v5232_v0  ;;  %v4087_v9 = vpop.f32.mrb[59].mxu1  ;;  %v4127_v5 = vpop.f32.mrb[47].mxu0 }
 0x308   :  { %v1064_v7 = vadd.f32 %v1039_v54, %v887_v6 }
 0x30b   :  { %v891_v8 = vpop.f32.mrb[60].mxu1 }
 0x30c   :  { %v892_v10 = vadd.f32 %v891_v8, %v5238_v57  ;;  %v4090_v11 = vpop.f32.mrb[61].mxu1 }
 0x30d   :  { %v894_v12 = vpop.f32.mrb[62].mxu1 }
 0x30e   :  { %v1065_v13 = vadd.f32 %v1044_v44, %v892_v10  ;;  %v895_v14 = vadd.f32 %v894_v12, %v5244_v60  ;;  %v4091_v15 = vpop.f32.mrb[63].mxu1 }
 0x310   :  { %v1066_v50 = vadd.f32 %v1047_v4, %v895_v14 }
 0x313   :  { %v899_v16 = vpop.f32.mrb[64].mxu1 }
 0x314   :  { %v1052_v17 = vpop.f32.mrb[48].mxu0  ;;  %v900_v19 = vadd.f32 %v899_v16, %v5252_v2  ;;  %v4094_v21 = vpop.f32.mrb[65].mxu1 }
 0x315   :  { %v4130_v22 = vpop.f32.mrb[49].mxu0  ;;  %v902_v0 = vpop.f32.mrb[66].mxu1 }
 0x316   :  { %v1055_v23 = vpop.f32.mrb[50].mxu0  ;;  %v1067_v24 = vadd.f32 %v1052_v17, %v900_v19  ;;  %v903_v25 = vadd.f32 %v902_v0, %v5268_v18  ;;  %v4095_v26 = vpop.f32.mrb[67].mxu1 }
 0x317   :  { %v4131_v57 = vpop.f32.mrb[51].mxu0 }
 0x318   :  { %v1068_v27 = vadd.f32 %v1055_v23, %v903_v25 }
 0x31b   :  { %v1183_v28 = vpop.f32.mrb[68].mxu1 }
 0x31c   :  { %v1346_v29 = vpop.f32.mrb[52].mxu0  ;;  %v1222_v30 = vadd.f32 %v1183_v28, %v1059_v32  ;;  %v4150_v60 = vpop.f32.mrb[69].mxu1 }
 0x31d   :  { %v4186_v31 = vpop.f32.mrb[53].mxu0  ;;  %v1186_v33 = vpop.f32.mrb[70].mxu1 }
 0x31e   :  { %v1349_v34 = vpop.f32.mrb[54].mxu0  ;;  %v1385_v35 = vadd.f32 %v1346_v29, %v1222_v30  ;;  %v1223_v36 = vadd.f32 %v1186_v33, %v1060_v37  ;;  %v4151_v2 = vpop.f32.mrb[71].mxu1 }
 0x31f   :  { %v4187_v38 = vpop.f32.mrb[55].mxu0 }
 0x320   :  { %v1386_v56 = vadd.f32 %v1349_v34, %v1223_v36 }
 0x323   :  { %v1191_v39 = vpop.f32.mrb[72].mxu1 }
 0x324   :  { %v1354_v40 = vpop.f32.mrb[56].mxu0  ;;  %v1224_v41 = vadd.f32 %v1191_v39, %v1061_v48  ;;  %v4154_v42 = vpop.f32.mrb[73].mxu1 }
 0x325   :  { %v4190_v18 = vpop.f32.mrb[57].mxu0  ;;  %v1194_v43 = vpop.f32.mrb[74].mxu1 }
 0x326   :  { %v1357_v45 = vpop.f32.mrb[58].mxu0  ;;  %v1387_v46 = vadd.f32 %v1354_v40, %v1224_v41  ;;  %v1225_v49 = vadd.f32 %v1194_v43, %v1062_v53  ;;  %v4155_v51 = vpop.f32.mrb[75].mxu1 }
 0x327   :  { %v4191_v32 = vpop.f32.mrb[59].mxu0 }
 0x328   :  { %v1388_v52 = vadd.f32 %v1357_v45, %v1225_v49 }
 0x32b   :  { %v1199_v61 = vpop.f32.mrb[76].mxu1 }
 0x32c   :  { %v1362_v1 = vpop.f32.mrb[60].mxu0  ;;  %v1226_v54 = vadd.f32 %v1199_v61, %v1063_v47  ;;  %v4158_v55 = vpop.f32.mrb[77].mxu1 }
 0x32d   :  { %v4194_v37 = vpop.f32.mrb[61].mxu0  ;;  %v1202_v58 = vpop.f32.mrb[78].mxu1 }
 0x32e   :  { %v1365_v44 = vpop.f32.mrb[62].mxu0  ;;  %v1389_v59 = vadd.f32 %v1362_v1, %v1226_v54  ;;  %v1227_v62 = vadd.f32 %v1202_v58, %v1064_v7  ;;  %v4159_v63 = vpop.f32.mrb[79].mxu1 }
 0x32f   :  { %v4195_v48 = vpop.f32.mrb[63].mxu0 }
 0x330   :  { %v1390_v3 = vadd.f32 %v1365_v44, %v1227_v62 }
 0x333   :  { %v1207_v4 = vpop.f32.mrb[80].mxu1 }
 0x334   :  { %v1370_v6 = vpop.f32.mrb[64].mxu0  ;;  %v1228_v9 = vadd.f32 %v1207_v4, %v1065_v13  ;;  %v4162_v5 = vpop.f32.mrb[81].mxu1 }
 0x335   :  { %v4198_v53 = vpop.f32.mrb[65].mxu0  ;;  %v1210_v8 = vpop.f32.mrb[82].mxu1 }
 0x336   :  { %v1373_v10 = vpop.f32.mrb[66].mxu0  ;;  %v1391_v11 = vadd.f32 %v1370_v6, %v1228_v9  ;;  %v1229_v12 = vadd.f32 %v1210_v8, %v1066_v50  ;;  %v4163_v14 = vpop.f32.mrb[83].mxu1 }
 0x337   :  { %v4199_v47 = vpop.f32.mrb[67].mxu0 }
 0x338   :  { %v1392_v15 = vadd.f32 %v1373_v10, %v1229_v12 }
 0x33b   :  { %v1215_v16 = vpop.f32.mrb[84].mxu1 }
 0x33c   :  { %v1378_v17 = vpop.f32.mrb[68].mxu0  ;;  %v1230_v19 = vadd.f32 %v1215_v16, %v1067_v24  ;;  %v4166_v21 = vpop.f32.mrb[85].mxu1  ;;  %v4684_v16 = vld [vmem:[%s6132_s10 + $0x8] sm:$0xff]  }
 0x33d   :  { %v4202_v7 = vpop.f32.mrb[69].mxu0  ;;  %v1218_v22 = vpop.f32.mrb[86].mxu1 }
 0x33e   :  { %v1381_v0 = vpop.f32.mrb[70].mxu0  ;;  %v5579_v23 = vadd.f32 %v1378_v17, %v1230_v19  ;;  %v1231_v25 = vadd.f32 %v1218_v22, %v1068_v27  ;;  %v4167_v13 = vpop.f32.mrb[87].mxu1  ;;  %v4686_v19 = vld [vmem:[%s6132_s10 + $0x10] sm:$0xff]  }
 0x33f   :  { %v4203_v26 = vpop.f32.mrb[71].mxu0 }
 0x340   :  { %v5581_v57 = vadd.f32 %v1381_v0, %v1231_v25 }
 0x343   :  { %v1509_v28 = vpop.f32.mrb[88].mxu1 }
 0x344   :  { %v1672_v29 = vpop.f32.mrb[72].mxu0  ;;  %v1548_v50 = vadd.f32 %v1509_v28, %v1385_v35  ;;  %v4222_v30 = vpop.f32.mrb[89].mxu1 }
 0x345   :  { %v4258_v60 = vpop.f32.mrb[73].mxu0  ;;  %v1512_v31 = vpop.f32.mrb[90].mxu1 }
 0x346   :  { %v1675_v33 = vpop.f32.mrb[74].mxu0  ;;  %v5583_v34 = vadd.f32 %v1672_v29, %v1548_v50  ;;  %v1549_v24 = vadd.f32 %v1512_v31, %v1386_v56  ;;  %v4223_v36 = vpop.f32.mrb[91].mxu1  ;;  %v4685_v60 = vld [vmem:[%s6132_s10 + $0x58] sm:$0xff]  }
 0x347   :  { %v4259_v2 = vpop.f32.mrb[75].mxu0 }
 0x348   :  { %v5585_v38 = vadd.f32 %v1675_v33, %v1549_v24  ;;  %v4689_v33 = vld [vmem:[%s6132_s10 + $0x20] sm:$0xff]  }
 0x34b   :  { %v1517_v39 = vpop.f32.mrb[92].mxu1 }
 0x34c   :  { %v1680_v27 = vpop.f32.mrb[76].mxu0  ;;  %v1550_v40 = vadd.f32 %v1517_v39, %v1387_v46  ;;  %v4226_v41 = vpop.f32.mrb[93].mxu1 }
 0x34d   :  { %v4262_v42 = vpop.f32.mrb[77].mxu0  ;;  %v1520_v18 = vpop.f32.mrb[94].mxu1 }
 0x34e   :  { %v1683_v43 = vpop.f32.mrb[78].mxu0  ;;  %v5587_v45 = vadd.f32 %v1680_v27, %v1550_v40  ;;  %v1551_v35 = vadd.f32 %v1520_v18, %v1388_v52  ;;  %v4227_v49 = vpop.f32.mrb[95].mxu1  ;;  %v4680_v52 = vld [vmem:[%s6132_s10 + $0x40] sm:$0xff]  }
 0x34f   :  { %v4263_v51 = vpop.f32.mrb[79].mxu0  ;;  %4385 = vmatpush3.bf16.msra.mxu0 %v4680_v52  ;;  %v4690_v49 = vld [vmem:[%s6132_s10 + $0x68] sm:$0xff]  }
 0x350   :  { %v5589_v32 = vadd.f32 %v1683_v43, %v1551_v35  ;;  %4386 = vmatprep.subr.bf16.mxu0 %v4725_v20 }
 0x353   :  { %v1525_v61 = vpop.f32.mrb[96].mxu1 }
 0x354   :  { %v1688_v56 = vpop.f32.mrb[80].mxu0  ;;  %v1552_v1 = vadd.f32 %v1525_v61, %v1389_v59  ;;  %v4230_v54 = vpop.f32.mrb[97].mxu1  ;;  %v4693_v61 = vld [vmem:[%s6132_s10 + $0x30] sm:$0xff]  }
 0x355   :  { %v4266_v55 = vpop.f32.mrb[81].mxu0  ;;  %v1528_v37 = vpop.f32.mrb[98].mxu1 }
 0x356   :  { %v1691_v58 = vpop.f32.mrb[82].mxu0  ;;  %v5591_v44 = vadd.f32 %v1688_v56, %v1552_v1  ;;  %v1553_v46 = vadd.f32 %v1528_v37, %v1390_v3  ;;  %v4231_v62 = vpop.f32.mrb[99].mxu1  ;;  %v4682_v3 = vld [vmem:[%s6132_s10] sm:$0xff]   ;;  %v4694_v56 = vld [vmem:[%s6132_s10 + $0x78] sm:$0xff]  }
 0x357   :  { %v4267_v63 = vpop.f32.mrb[83].mxu0  ;;  %4421 = vmatpush3.bf16.msra.mxu1 %v4682_v3 }
 0x358   :  { %v5593_v48 = vadd.f32 %v1691_v58, %v1553_v46  ;;  %4422 = vmatprep.subr.bf16.mxu1 %v4725_v20  ;;  %v4695_v63 = vld [vmem:[%s6132_s10 + $0x38] sm:$0xff]  }
 0x35b   :  { %v1533_v4 = vpop.f32.mrb[100].mxu1  ;;  %4423 = vmatpush3.bf16.msra.mxu1 %v4684_v16 }
 0x35c   :  { %v1696_v6 = vpop.f32.mrb[84].mxu0  ;;  %v1554_v9 = vadd.f32 %v1533_v4, %v1391_v11  ;;  %v4234_v5 = vpop.f32.mrb[101].mxu1  ;;  %v4681_v11 = vld [vmem:[%s6132_s10 + $0x48] sm:$0xff]   ;;  %4424 = vmatprep.subr.bf16.mxu1 %v4725_v20 }
 0x35d   :  { %v4270_v59 = vpop.f32.mrb[85].mxu0  ;;  %v1536_v53 = vpop.f32.mrb[102].mxu1  ;;  %4387 = vmatpush3.bf16.msra.mxu0 %v4681_v11 }
 0x35e   :  { %v1699_v8 = vpop.f32.mrb[86].mxu0  ;;  %v5602_v10 = vadd.f32 %v1696_v6, %v1554_v9  ;;  %v1555_v12 = vadd.f32 %v1536_v53, %v1392_v15  ;;  %v4235_v14 = vpop.f32.mrb[103].mxu1  ;;  %4388 = vmatprep.subr.bf16.mxu0 %v4725_v20  ;;  %v4683_v15 = vld [vmem:[%s6132_s10 + $0x50] sm:$0xff]  }
 0x35f   :  { %v4271_v47 = vpop.f32.mrb[87].mxu0  ;;  %4425 = vmatpush3.bf16.msra.mxu1 %v4686_v19 }
 0x360   :  { %v5610_v17 = vadd.f32 %v1699_v8, %v1555_v12  ;;  %4426 = vmatprep.subr.bf16.mxu1 %v4725_v20 }
 0x361   :  { %4389 = vmatpush3.bf16.msra.mxu0 %v4683_v15 }
 0x362   :  { %4390 = vmatprep.subr.bf16.mxu0 %v4725_v20 }
 0x363   :  { %v1541_v21 = vpop.f32.mrb[104].mxu1 }
 0x364   :  { %v1704_v7 = vpop.f32.mrb[88].mxu0  ;;  %v1556_v22 = vadd.f32 %v1541_v21, %v5579_v23  ;;  %v4238_v0 = vpop.f32.mrb[105].mxu1  ;;  %v4688_v23 = vld [vmem:[%s6132_s10 + $0x18] sm:$0xff]  }
 0x365   :  { %v4274_v25 = vpop.f32.mrb[89].mxu0  ;;  %v1544_v13 = vpop.f32.mrb[106].mxu1  ;;  %4391 = vmatpush3.bf16.msra.mxu0 %v4685_v60  ;;  %4427 = vmatpush3.bf16.msra.mxu1 %v4688_v23 }
 0x366   :  { %v1707_v26 = vpop.f32.mrb[90].mxu0  ;;  %v5623_v28 = vadd.f32 %v1704_v7, %v1556_v22  ;;  %v1557_v29 = vadd.f32 %v1544_v13, %v5581_v57  ;;  %v4239_v50 = vpop.f32.mrb[107].mxu1  ;;  %4392 = vmatprep.subr.bf16.mxu0 %v4725_v20  ;;  %v4687_v57 = vld [vmem:[%s6132_s10 + $0x60] sm:$0xff]   ;;  %4428 = vmatprep.subr.bf16.mxu1 %v4725_v20 }
 0x367   :  { %v4275_v30 = vpop.f32.mrb[91].mxu0 }
 0x368   :  { %v5632_v31 = vadd.f32 %v1707_v26, %v1557_v29 }
 0x369   :  { %4393 = vmatpush3.bf16.msra.mxu0 %v4687_v57  ;;  %4429 = vmatpush3.bf16.msra.mxu1 %v4689_v33 }
 0x36a   :  { %4394 = vmatprep.subr.bf16.mxu0 %v4725_v20  ;;  %4430 = vmatprep.subr.bf16.mxu1 %v4725_v20 }
 0x36b   :  { %v1835_v24 = vpop.f32.mrb[108].mxu1 }
 0x36c   :  { %v1998_v36 = vpop.f32.mrb[92].mxu0  ;;  %v1874_v2 = vadd.f32 %v1835_v24, %v5583_v34  ;;  %v4294_v39 = vpop.f32.mrb[109].mxu1  ;;  %v4691_v34 = vld [vmem:[%s6132_s10 + $0x28] sm:$0xff]  }
 0x36d   :  { %v4330_v27 = vpop.f32.mrb[93].mxu0  ;;  %v1838_v40 = vpop.f32.mrb[110].mxu1  ;;  %4395 = vmatpush3.bf16.msra.mxu0 %v4690_v49  ;;  %4431 = vmatpush3.bf16.msra.mxu1 %v4691_v34 }
 0x36e   :  { %v2001_v41 = vpop.f32.mrb[94].mxu0  ;;  %v5645_v42 = vadd.f32 %v1998_v36, %v1874_v2  ;;  %v1875_v18 = vadd.f32 %v1838_v40, %v5585_v38  ;;  %v4295_v43 = vpop.f32.mrb[111].mxu1  ;;  %4396 = vmatprep.subr.bf16.mxu0 %v4725_v20  ;;  %v4692_v38 = vld [vmem:[%s6132_s10 + $0x70] sm:$0xff]   ;;  %4432 = vmatprep.subr.bf16.mxu1 %v4725_v20 }
 0x36f   :  { %v4331_v35 = vpop.f32.mrb[95].mxu0 }
 0x370   :  { %v5654_v51 = vadd.f32 %v2001_v41, %v1875_v18 }
 0x371   :  { %4397 = vmatpush3.bf16.msra.mxu0 %v4692_v38  ;;  %4433 = vmatpush3.bf16.msra.mxu1 %v4693_v61 }
 0x372   :  { %4398 = vmatprep.subr.bf16.mxu0 %v4725_v20  ;;  %4434 = vmatprep.subr.bf16.mxu1 %v4725_v20 }
 0x373   :  { %v1843_v1 = vpop.f32.mrb[112].mxu1 }
 0x374   :  { %v2006_v54 = vpop.f32.mrb[96].mxu0  ;;  %v1876_v55 = vadd.f32 %v1843_v1, %v5587_v45  ;;  %v4298_v37 = vpop.f32.mrb[113].mxu1 }
 0x375   :  { %v4334_v58 = vpop.f32.mrb[97].mxu0  ;;  %v1846_v46 = vpop.f32.mrb[114].mxu1  ;;  %4399 = vmatpush3.bf16.msra.mxu0 %v4694_v56  ;;  %4435 = vmatpush3.bf16.msra.mxu1 %v4695_v63 }
 0x376   :  { %v2009_v62 = vpop.f32.mrb[98].mxu0  ;;  %v5673_v52 = vadd.f32 %v2006_v54, %v1876_v55  ;;  %v1877_v4 = vadd.f32 %v1846_v46, %v5589_v32  ;;  %v4299_v6 = vpop.f32.mrb[115].mxu1  ;;  %4456 = vmatprep.subr.bf16.mxu0 %v4725_v20  ;;  %4492 = vmatprep.subr.bf16.mxu1 %v4725_v20 }
 0x377   :  { %v4335_v9 = vpop.f32.mrb[99].mxu0 }
 0x378   :  { %v5676_v45 = vadd.f32 %v2009_v62, %v1877_v4 }
 0x37b   :  { %v1851_v5 = vpop.f32.mrb[116].mxu1 }
 0x37c   :  { %v2014_v59 = vpop.f32.mrb[100].mxu0  ;;  %v1878_v53 = vadd.f32 %v1851_v5, %v5591_v44  ;;  %v4302_v8 = vpop.f32.mrb[117].mxu1 }
 0x37d   :  { %v4338_v3 = vpop.f32.mrb[101].mxu0  ;;  %v1854_v32 = vpop.f32.mrb[118].mxu1 }
 0x37e   :  { %v2017_v12 = vpop.f32.mrb[102].mxu0  ;;  %v2041_v14 = vadd.f32 %v2014_v59, %v1878_v53  ;;  %v1879_v47 = vadd.f32 %v1854_v32, %v5593_v48  ;;  %v4303_v11 = vpop.f32.mrb[119].mxu1 }
 0x37f   :  { %v4339_v16 = vpop.f32.mrb[103].mxu0 }
 0x380   :  { %v2042_v15 = vadd.f32 %v2017_v12, %v1879_v47 }
 0x383   :  { %v1859_v19 = vpop.f32.mrb[120].mxu1 }
 0x384   :  { %v2022_v21 = vpop.f32.mrb[104].mxu0  ;;  %v1880_v7 = vadd.f32 %v1859_v19, %v5602_v10  ;;  %v4306_v22 = vpop.f32.mrb[121].mxu1 }
 0x385   :  { %v4342_v0 = vpop.f32.mrb[105].mxu0  ;;  %v1862_v25 = vpop.f32.mrb[122].mxu1 }
 0x386   :  { %v2025_v44 = vpop.f32.mrb[106].mxu0  ;;  %v5684_v13 = vadd.f32 %v2022_v21, %v1880_v7  ;;  %v1881_v26 = vadd.f32 %v1862_v25, %v5610_v17  ;;  %v4307_v29 = vpop.f32.mrb[123].mxu1  ;;  %v5698_v17 = vld [vmem:[%s6133_s7] ss:$0 sm:$0xff] }
 0x387   :  { %v4343_v50 = vpop.f32.mrb[107].mxu0 }
 0x388   :  { %v5687_v30 = vadd.f32 %v2025_v44, %v1881_v26 }
 0x38b   :  { %v1867_v48 = vpop.f32.mrb[124].mxu1 }
 0x38c   :  { %v2030_v60 = vpop.f32.mrb[108].mxu0  ;;  %v1882_v23 = vadd.f32 %v1867_v48, %v5623_v28  ;;  %v4310_v57 = vpop.f32.mrb[125].mxu1 }
 0x38d   :  { %v4346_v33 = vpop.f32.mrb[109].mxu0  ;;  %v1870_v24 = vpop.f32.mrb[126].mxu1 }
 0x38e   :  { %v2033_v10 = vpop.f32.mrb[110].mxu0  ;;  %v5690_v36 = vadd.f32 %v2030_v60, %v1882_v23  ;;  %v1883_v2 = vadd.f32 %v1870_v24, %v5632_v31  ;;  %v4311_v39 = vpop.f32.mrb[127].mxu1 }
 0x38f   :  { %v4347_v27 = vpop.f32.mrb[111].mxu0 }
 0x390   :  { %v5693_v40 = vadd.f32 %v2033_v10, %v1883_v2 }
 0x393   :  { %v2161_v41 = vpop.f32.mrb[128].mxu1 }
 0x394   :  { %v2200_v28 = vadd.f32 %v2161_v41, %v5645_v42  ;;  %v4366_v18 = vpop.f32.mrb[129].mxu1 }
 0x395   :  { %v2164_v43 = vpop.f32.mrb[130].mxu1 }
 0x396   :  { %v2216_v35 = vadd.f32 %v5698_v17, %v2200_v28  ;;  %v2201_v49 = vadd.f32 %v2164_v43, %v5654_v51  ;;  %v4367_v34 = vpop.f32.mrb[131].mxu1 }
 0x398   :  { %v5703_v31 = vmax.f32 %v2216_v35, 0.0  ;;  %v2217_v38 = vadd.f32 %v5698_v17, %v2201_v49 }
 0x39a   :  { %v5706_v61 = vmax.f32 %v2217_v38, 0.0  ;;  %v2249_v1 = vmul.f32 %v5703_v31, %v5703_v31 }
 0x39b   :  { %v2169_v56 = vpop.f32.mrb[132].mxu1 }
 0x39c   :  { %v2236_v42 = vadd.f32 %v5706_v61, %v5703_v31  ;;  %v2250_v54 = vmul.f32 %v5706_v61, %v5706_v61  ;;  %v2202_v55 = vadd.f32 %v2169_v56, %v5673_v52  ;;  %v4370_v51 = vpop.f32.mrb[133].mxu1 }
 0x39d   :  { %v2172_v37 = vpop.f32.mrb[134].mxu1 }
 0x39e   :  { %v2254_v58 = vadd.f32 %v2250_v54, %v2249_v1  ;;  %v2218_v46 = vadd.f32 %v5698_v17, %v2202_v55  ;;  %v2203_v62 = vadd.f32 %v2172_v37, %v5676_v45  ;;  %v4371_v63 = vpop.f32.mrb[135].mxu1 }
 0x3a0   :  { %v5717_v4 = vmax.f32 %v2218_v46, 0.0  ;;  %v2219_v6 = vadd.f32 %v5698_v17, %v2203_v62 }
 0x3a2   :  { %v2237_v9 = vadd.f32 %v2236_v42, %v5717_v4  ;;  %v2251_v5 = vmul.f32 %v5717_v4, %v5717_v4  ;;  %v5723_v59 = vmax.f32 %v2219_v6, 0.0 }
 0x3a3   :  { %v2177_v52 = vpop.f32.mrb[136].mxu1 }
 0x3a4   :  { %v2255_v53 = vadd.f32 %v2254_v58, %v2251_v5  ;;  %v2238_v8 = vadd.f32 %v2237_v9, %v5723_v59  ;;  %v2252_v3 = vmul.f32 %v5723_v59, %v5723_v59  ;;  %v2204_v45 = vadd.f32 %v2177_v52, %v2041_v14  ;;  %v4374_v32 = vpop.f32.mrb[137].mxu1 }
 0x3a5   :  { %v2180_v12 = vpop.f32.mrb[138].mxu1 }
 0x3a6   :  { %v2256_v47 = vadd.f32 %v2255_v53, %v2252_v3  ;;  %v2220_v11 = vadd.f32 %v5698_v17, %v2204_v45  ;;  %v2205_v16 = vadd.f32 %v2180_v12, %v2042_v15  ;;  %v4375_v19 = vpop.f32.mrb[139].mxu1 }
 0x3a8   :  { %v5729_v21 = vmax.f32 %v2220_v11, 0.0  ;;  %v2221_v7 = vadd.f32 %v5698_v17, %v2205_v16 }
 0x3aa   :  { %v2240_v22 = vsel %vm2239_vm4, %v5729_v21, 0.0  ;;  %v2253_v0 = vmul.f32 %v5729_v21, %v5729_v21  ;;  %v5736_v25 = vmax.f32 %v2221_v7, 0.0  ;;  %v2272_v15 = vrot.slane %v5729_v21, 7 }
 0x3ab   :  { %v2241_v14 = vadd.f32 %v2240_v22, %v2238_v8  ;;  %v2185_v44 = vpop.f32.mrb[140].mxu1 }
 0x3ac   :  { %v2257_v26 = vsel %vm2239_vm4, %v2253_v0, 0.0  ;;  %v2273_v29 = vrot.slane %v5736_v25, 7  ;;  %v2300_v50 = vmul.f32 %v5736_v25, %v5736_v25  ;;  %v4378_v48 = vpop.f32.mrb[141].mxu1  ;;  %v2206_v23 = vadd.f32 %v2185_v44, %v5684_v13 }
 0x3ad   :  { %v2258_v60 = vadd.f32 %v2257_v26, %v2256_v47  ;;  %v2188_v57 = vpop.f32.mrb[142].mxu1  ;;  %v2311_v33 = vrot.slane %v2253_v0, 7  ;;  %v2242_v52 = vrot.slane %v2241_v14, 4 }
 0x3ae   :  { %v2274_v24 = vsel %vm280_vm1, %v2272_v15, %v2273_v29  ;;  %v2312_v10 = vrot.slane %v2300_v50, 7  ;;  %v2207_v2 = vadd.f32 %v2188_v57, %v5687_v30  ;;  %v4379_v39 = vpop.f32.mrb[143].mxu1  ;;  %v2222_v27 = vadd.f32 %v5698_v17, %v2206_v23 }
 0x3af   :  { %v2259_v32 = vrot.slane %v2258_v60, 4  ;;  %v2243_v11 = vadd.f32 %v2242_v52, %v2241_v14 }
 0x3b0   :  { %v2313_v41 = vsel %vm280_vm1, %v2311_v33, %v2312_v10  ;;  %v2223_v28 = vadd.f32 %v5698_v17, %v2207_v2  ;;  %v5749_v18 = vmax.f32 %v2222_v27, 0.0 }
 0x3b1   :  { %v2260_v22 = vadd.f32 %v2259_v32, %v2258_v60 }
 0x3b2   :  { %v5751_v43 = vmax.f32 %v2223_v28, 0.0  ;;  %v2275_v13 = vrot.slane %v5749_v18, 7  ;;  %v2301_v35 = vmul.f32 %v5749_v18, %v5749_v18 }
 0x3b3   :  { %v2193_v49 = vpop.f32.mrb[144].mxu1  ;;  %v2261_v23 = vrot.slane %v2260_v22, 2 }
 0x3b4   :  { %v2277_v34 = vrot.slane %v5751_v43, 7  ;;  %v2302_v30 = vmul.f32 %v5751_v43, %v5751_v43  ;;  %v2208_v38 = vadd.f32 %v2193_v49, %v5690_v36  ;;  %v4382_v56 = vpop.f32.mrb[145].mxu1  ;;  %v2276_v1 = vsel %vm280_vm1, %v2273_v29, %v2275_v13 }
 0x3b5   :  { %v2314_v42 = vrot.slane %v2301_v35, 7  ;;  %v2196_v54 = vpop.f32.mrb[146].mxu1  ;;  %v2288_v55 = vadd.f32 %v2276_v1, %v2274_v24  ;;  %v2244_v29 = vrot.slane %v2243_v11, 2  ;;  %v2262_v39 = vadd.f32 %v2261_v23, %v2260_v22 }
 0x3b6   :  { %v2278_v51 = vsel %vm280_vm1, %v2275_v13, %v2277_v34  ;;  %v2316_v37 = vrot.slane %v2302_v30, 7  ;;  %v2224_v58 = vadd.f32 %v5698_v17, %v2208_v38  ;;  %v4383_v46 = vpop.f32.mrb[147].mxu1  ;;  %v2209_v63 = vadd.f32 %v2196_v54, %v5693_v40 }
 0x3b7   :  { %v2315_v62 = vsel %vm280_vm1, %v2312_v10, %v2314_v42  ;;  %v2289_v9 = vadd.f32 %v2288_v55, %v2278_v51  ;;  %v2245_v24 = vadd.f32 %v2244_v29, %v2243_v11  ;;  %v2263_v35 = vrot.slane %v2262_v39, 1 }
 0x3b8   :  { %v2327_v6 = vadd.f32 %v2315_v62, %v2313_v41  ;;  %v2317_v36 = vsel %vm280_vm1, %v2314_v42, %v2316_v37  ;;  %v5766_v5 = vmax.f32 %v2224_v58, 0.0  ;;  %v2225_v53 = vadd.f32 %v5698_v17, %v2209_v63 }
 0x3b9   :  { %v2246_v41 = vrot.slane %v2245_v24, 1  ;;  %v2264_v1 = vadd.f32 %v2263_v35, %v2262_v39  ;;  %v4696_v39 = vld [vmem:[%s6132_s10 + $0x80] sm:$0xff]  }
 0x3ba   :  { %v2328_v8 = vadd.f32 %v2327_v6, %v2317_v36  ;;  %v2279_v3 = vrot.slane %v5766_v5, 7  ;;  %v2303_v45 = vmul.f32 %v5766_v5, %v5766_v5  ;;  %v5772_v12 = vmax.f32 %v2225_v53, 0.0 }
 0x3bb   :  { %v2247_v30 = vadd.f32 %v2246_v41, %v2245_v24 }
 0x3bc   :  { %v2280_v40 = vsel %vm280_vm1, %v2277_v34, %v2279_v3  ;;  %v2318_v47 = vrot.slane %v2303_v45, 7  ;;  %v2281_v19 = vrot.slane %v5772_v12, 7  ;;  %v2304_v7 = vmul.f32 %v5772_v12, %v5772_v12 }
 0x3bd   :  { %v2290_v16 = vadd.f32 %v2289_v9, %v2280_v40 }
 0x3be   :  { %v2319_v17 = vsel %vm280_vm1, %v2316_v37, %v2318_v47  ;;  %v2282_v44 = vsel %vm280_vm1, %v2279_v3, %v2281_v19  ;;  %v2320_v26 = vrot.slane %v2304_v7, 7 }
 0x3bf   :  { %v2329_v0 = vadd.f32 %v2328_v8, %v2319_v17  ;;  %v2291_v15 = vsel %vm2239_vm4, %v2282_v44, 0.0 }
 0x3c0   :  { %v2292_v50 = vadd.f32 %v2291_v15, %v2290_v16  ;;  %v2321_v48 = vsel %vm280_vm1, %v2318_v47, %v2320_v26 }
 0x3c1   :  { %v2330_v14 = vsel %vm2239_vm4, %v2321_v48, 0.0 }
 0x3c2   :  { %v2293_v57 = vrot.slane %v2292_v50, 4  ;;  %v2331_v33 = vadd.f32 %v2330_v14, %v2329_v0 }
 0x3c4   :  { %v2294_v10 = vadd.f32 %v2293_v57, %v2292_v50  ;;  %v2332_v2 = vrot.slane %v2331_v33, 4 }
 0x3c6   :  { %v2295_v60 = vrot.slane %v2294_v10, 2  ;;  %v2333_v27 = vadd.f32 %v2332_v2, %v2331_v33 }
 0x3c8   :  { %v2296_v28 = vadd.f32 %v2295_v60, %v2294_v10  ;;  %v2334_v13 = vrot.slane %v2333_v27, 2 }
 0x3ca   :  { %v2297_v49 = vrot.slane %v2296_v28, 1  ;;  %v2335_v34 = vadd.f32 %v2334_v13, %v2333_v27 }
 0x3cc   :  { %v2298_v38 = vadd.f32 %v2297_v49, %v2296_v28  ;;  %v2336_v56 = vrot.slane %v2335_v34, 1  ;;  %v4698_v49 = vld [vmem:[%s6132_s10 + $0xc0] sm:$0xff]  }
 0x3ce   :  { %v2299_v42 = vadd.f32 %v2298_v38, %v2247_v30  ;;  %v2337_v54 = vadd.f32 %v2336_v56, %v2335_v34  ;;  %v4697_v34 = vld [vmem:[%s6132_s10 + $0x88] sm:$0xff]  }
 0x3cf   :  { %v4700_v56 = vld [vmem:[%s6132_s10 + $0xc8] sm:$0xff]  }
 0x3d0   :  { %v2338_v55 = vadd.f32 %v2337_v54, %v2264_v1  ;;  %v2340_v51 = vmul.f32 0.014285714, %v2299_v42  ;;  %v4699_v54 = vld [vmem:[%s6132_s10 + $0x90] sm:$0xff]  }
 0x3d2   :  { %v2341_v37 = vmul.f32 0.014285714, %v2338_v55  ;;  %v2342_v58 = vmul.f32 %v2340_v51, %v2340_v51  ;;  %v2348_v46 = vsub.f32 %v5703_v31, %v2340_v51  ;;  %v2349_v62 = vsub.f32 %v5706_v61, %v2340_v51 }
 0x3d3   :  { %v2350_v63 = vsub.f32 %v5717_v4, %v2340_v51  ;;  %v2351_v6 = vsub.f32 %v5723_v59, %v2340_v51  ;;  %v2378_v9 = vsub.f32 %v5736_v25, %v2340_v51  ;;  %v2379_v36 = vsub.f32 %v5749_v18, %v2340_v51  ;;  %v60_v59 = vld [vmem:[%s6134_s8] sm:$0x1] }
 0x3d4   :  { %v2343_v52 = vsub.f32 %v2341_v37, %v2342_v58  ;;  %v2380_v53 = vsub.f32 %v5751_v43, %v2340_v51  ;;  %v2381_v8 = vsub.f32 %v5766_v5, %v2340_v51  ;;  %v2382_v3 = vsub.f32 %v5772_v12, %v2340_v51  ;;  %v4702_v37 = vld [vmem:[%s6132_s10 + $0xd0] sm:$0xff]   ;;  %v4701_v58 = vld [vmem:[%s6132_s10 + $0x98] sm:$0xff]  }
 0x3d5   :  { %v2352_v45 = vsub.f32 %v5729_v21, %v2340_v51  ;;  %v2353_v61 = vlaneseq  ;;  %v3632_v21 = vld [vmem:[%s6135_s9] ss:$0 sm:$0xff] }
 0x3d6   :  { %v2344_v31 = vmax.f32 %v2343_v52, 0.0 }
 0x3d7   :  { %v5793_v4 = vshrl.u32 %v2353_v61, 7 }
 0x3d8   :  { %v2345_v32 = vadd.f32 1e-05, %v2344_v31 }
 0x3d9   :  { %v2355_v25 = vsub.s32 0, %v5793_v4 }
 0x3da   :  { %4720 = vrsqrt.f32 %v2345_v32  ;;  %v4707_v32 = vld [vmem:[%s6132_s10 + $0xe8] sm:$0xff]  }
 0x3e4   :  { %v4721_v18 = vpop.eup %4720 }
 0x3e5   :  { %v2347_v43 = vmul.f32 %v4721_v18, %v60_v59 }
 0x3e7   :  { %v2356_v5 = vrot.slane %v2347_v43, %v2355_v25  ;;  %v4708_v43 = vld [vmem:[%s6132_s10 + $0xb0] sm:$0xff]  }
 0x3e9   :  { %v2357_v12 = vmul.f32 %v2356_v5, %v2348_v46  ;;  %v2358_v40 = vmul.f32 %v2356_v5, %v2349_v62  ;;  %v2359_v47 = vmul.f32 %v2356_v5, %v2350_v63  ;;  %v2360_v11 = vmul.f32 %v2356_v5, %v2351_v6  ;;  %v4704_v63 = vld [vmem:[%s6132_s10 + $0xd8] sm:$0xff]  }
 0x3ea   :  { %v2383_v16 = vmul.f32 %v2378_v9, %v2356_v5  ;;  %v2384_v19 = vmul.f32 %v2379_v36, %v2356_v5  ;;  %v2385_v7 = vmul.f32 %v2380_v53, %v2356_v5  ;;  %v2386_v17 = vmul.f32 %v2381_v8, %v2356_v5  ;;  %v4703_v36 = vld [vmem:[%s6132_s10 + $0xa0] sm:$0xff]  }
 0x3eb   :  { %v5804_v22 = vadd.f32 %v3632_v21, %v2357_v12  ;;  %v5806_v0 = vadd.f32 %v3632_v21, %v2358_v40  ;;  %v5808_v44 = vadd.f32 %v3632_v21, %v2359_v47  ;;  %v5810_v26 = vadd.f32 %v3632_v21, %v2360_v11  ;;  %v4705_v8 = vld [vmem:[%s6132_s10 + $0xe0] sm:$0xff]   ;;  %v4710_v12 = vld [vmem:[%s6132_s10 + $0xb8] sm:$0xff]  }
 0x3ec   :  { %v2387_v15 = vmul.f32 %v2382_v3, %v2356_v5  ;;  %v5812_v29 = vadd.f32 %v3632_v21, %v2383_v16  ;;  %v5814_v50 = vadd.f32 %v3632_v21, %v2384_v19  ;;  %v5816_v48 = vadd.f32 %v3632_v21, %v2385_v7  ;;  %v4706_v3 = vld [vmem:[%s6132_s10 + $0xa8] sm:$0xff]   ;;  %v4711_v11 = vld [vmem:[%s6132_s10 + $0xf8] sm:$0xff]  }
 0x3ed   :  { %v5818_v14 = vadd.f32 %v3632_v21, %v2386_v17  ;;  %2373 = vst [vmem:[#allocation2 + $0x2] sm:$0xff] %v5804_v22  ;;  %2374 = vst [vmem:[#allocation2 + $0xa] sm:$0xff] %v5806_v0  ;;  %v2361_v23 = vmul.f32 %v2356_v5, %v2352_v45  ;;  %v2714_v57 = vpack.c.bf16 %v5806_v0, %v5804_v22  ;;  %v4714_v22 = vld [vmem:[%s6132_s10 + $0x110] sm:$0xff]  }
 0x3ee   :  { %2375 = vst [vmem:[#allocation2 + $0x12] sm:$0xff] %v5808_v44  ;;  %2376 = vst [vmem:[#allocation2 + $0x1a] sm:$0xff] %v5810_v26  ;;  %v2715_v33 = vpack.c.bf16 %v5810_v26, %v5808_v44  ;;  %v2392_v24 = vadd.f32 %v3632_v21, %v2387_v15  ;;  %v2717_v10 = vpack.c.bf16 %v5816_v48, %v5814_v50  ;;  %v4716_v44 = vld [vmem:[%s6132_s10 + $0x120] sm:$0xff]  }
 0x3ef   :  { %2394 = vst [vmem:[#allocation2 + $0x2a] sm:$0xff] %v5812_v29  ;;  %2395 = vst [vmem:[#allocation2 + $0x32] sm:$0xff] %v5814_v50  ;;  %v2372_v2 = vadd.f32 %v3632_v21, %v2361_v23  ;;  %v4709_v21 = vld [vmem:[%s6132_s10 + $0xf0] sm:$0xff]  }
 0x3f0   :  { %2396 = vst [vmem:[#allocation2 + $0x3a] sm:$0xff] %v5816_v48  ;;  %2397 = vst [vmem:[#allocation2 + $0x42] sm:$0xff] %v5818_v14 }
 0x3f1   :  { %2398 = vst [vmem:[#allocation2 + $0x4a] sm:$0x3] %v2392_v24  ;;  %2377 = vst [vmem:[#allocation2 + $0x22] sm:$0x87] %v2372_v2   ;;  %v4712_v24 = vld [vmem:[%s6132_s10 + $0x100] sm:$0xff]  }
 0x3f4   :  { %v2430_v60 = vld [vmem:[#allocation2 + $0x1] sm:$0xff]  ;;  %v2431_v27 = vld [vmem:[#allocation2 + $0x9] sm:$0xff] }
 0x3f5   :  { %v2399_v41 = vld [vmem:[#allocation2] sm:$0xff]  ;;  %v2440_v28 = vpack.c.bf16 %v2431_v27, %v2430_v60  ;;  %v2400_v13 = vld [vmem:[#allocation2 + $0x8] sm:$0xff]  ;;  %v2432_v30 = vld [vmem:[#allocation2 + $0x11] sm:$0xff] }
 0x3f6   :  { %v2409_v35 = vpack.c.bf16 %v2400_v13, %v2399_v41  ;;  %v2433_v38 = vld [vmem:[#allocation2 + $0x19] sm:$0xff]  ;;  %v2401_v1 = vld [vmem:[#allocation2 + $0x10] sm:$0xff]  ;;  %v2867_v15 = vld [vmem:[#allocation2 + $0x3] sm:$0xff] }
 0x3f7   :  { %4401 = vmatmul.mubr.bf16.vlgmr.msra.gmra.mrb[112].mxu0 %v2440_v28  ;;  %v2402_v42 = vld [vmem:[#allocation2 + $0x18] sm:$0xff]  ;;  %v2441_v55 = vpack.c.bf16 %v2433_v38, %v2432_v30  ;;  %v2405_v61 = vld [vmem:[#allocation2 + $0x30] sm:$0xff]  ;;  %v2438_v40 = vld [vmem:[#allocation2 + $0x41] sm:$0xff] }
 0x3f8   :  { %4437 = vmatmul.mubr.bf16.vlgmr.msra.gmra.mrb[148].mxu1 %v2409_v35  ;;  %4457 = vmatpush3.bf16.msra.mxu0 %v4696_v39  ;;  %v2410_v51 = vpack.c.bf16 %v2402_v42, %v2401_v1  ;;  %v2434_v46 = vld [vmem:[#allocation2 + $0x21] sm:$0xff]  ;;  %v2435_v62 = vld [vmem:[#allocation2 + $0x29] sm:$0xff]  ;;  %v2436_v45 = vld [vmem:[#allocation2 + $0x31] sm:$0xff] }
 0x3f9   :  { %4458 = vmatprep.subr.bf16.mxu0 %v4725_v20  ;;  %4404 = vmatprep.mubr.msk.bf16.mxu0 %vm4726_vm0, %v4725_v20  ;;  %v2403_v6 = vld [vmem:[#allocation2 + $0x20] sm:$0xff]  ;;  %v2404_v9 = vld [vmem:[#allocation2 + $0x28] sm:$0xff]  ;;  %v2442_v52 = vpack.c.bf16 %v2435_v62, %v2434_v46  ;;  %v2406_v59 = vld [vmem:[#allocation2 + $0x38] sm:$0xff] }
 0x3fa   :  { %4440 = vmatprep.mubr.msk.bf16.mxu1 %vm4726_vm0, %v4725_v20  ;;  %4493 = vmatpush3.bf16.msra.mxu1 %v4698_v49  ;;  %v2411_v53 = vpack.c.bf16 %v2404_v9, %v2403_v6  ;;  %v2437_v31 = vld [vmem:[#allocation2 + $0x39] sm:$0xff]  ;;  %v2412_v5 = vpack.c.bf16 %v2406_v59, %v2405_v61  ;;  %v2439_v47 = vld [vmem:[#allocation2 + $0x49] sm:$0x3]  ;;  %v2868_v23 = vld [vmem:[#allocation2 + $0xb] sm:$0xff] }
 0x3fb   :  { %4494 = vmatprep.subr.bf16.mxu1 %v4725_v20  ;;  %v2443_v18 = vpack.c.bf16 %v2437_v31, %v2436_v45  ;;  %v2407_v16 = vld [vmem:[#allocation2 + $0x40] sm:$0xff]  ;;  %v2408_v19 = vld [vmem:[#allocation2 + $0x48] sm:$0x3]  ;;  %v2444_v7 = vpack.c.bf16 %v2439_v47, %v2438_v40  ;;  %v2877_v2 = vpack.c.bf16 %v2868_v23, %v2867_v15  ;;  %v2869_v60 = vld [vmem:[#allocation2 + $0x13] sm:$0xff] }
 0x3fc   :  { %4459 = vmatpush3.bf16.msra.mxu0 %v4697_v34  ;;  %v2413_v17 = vpack.c.bf16 %v2408_v19, %v2407_v16  ;;  %v4713_v39 = vld [vmem:[%s6132_s10 + $0x108] sm:$0xff]   ;;  %v2870_v27 = vld [vmem:[#allocation2 + $0x1b] sm:$0xff]  ;;  %v2873_v49 = vld [vmem:[#allocation2 + $0x33] sm:$0xff] }
 0x3fd   :  { %4460 = vmatprep.subr.bf16.mxu0 %v4725_v20  ;;  %v2878_v0 = vpack.c.bf16 %v2870_v27, %v2869_v60  ;;  %v2708_v41 = vld [vmem:[#allocation2 + $0x22] sm:$0xff]  ;;  %v2872_v13 = vld [vmem:[#allocation2 + $0x2b] sm:$0xff]  ;;  %v4719_v38 = vld [vmem:[%s6132_s10 + $0x138] sm:$0xff]  }
 0x3fe   :  { %4495 = vmatpush3.bf16.msra.mxu1 %v4700_v56  ;;  %v2871_v28 = vld [vmem:[#allocation2 + $0x23] sm:$0xff]  ;;  %v2716_v26 = vpack.c.bf16 %v5812_v29, %v2708_v41  ;;  %v2874_v29 = vld [vmem:[#allocation2 + $0x3b] sm:$0xff]  ;;  %v4718_v34 = vld [vmem:[%s6132_s10 + $0x130] sm:$0xff]  }
 0x3ff   :  { %4405 = vmatmul.mubr.bf16.gmra.mrb[116].mxu0 %v2441_v55  ;;  %4496 = vmatprep.subr.bf16.mxu1 %v4725_v20  ;;  %v4717_v35 = vld [vmem:[%s6132_s10 + $0x128] sm:$0xff]   ;;  %v2880_v30 = vpack.c.bf16 %v2874_v29, %v2873_v49  ;;  %v3037_v6 = vld [vmem:[#allocation2 + $0x3c] sm:$0xff] }
 0x400   :  { %4441 = vmatmul.mubr.bf16.gmra.mrb[152].mxu1 %v2410_v51  ;;  %4461 = vmatpush3.bf16.msra.mxu0 %v4699_v54  ;;  %v2713_v56 = vld [vmem:[#allocation2 + $0x4a] sm:$0x3]  ;;  %v3031_v54 = vld [vmem:[#allocation2 + $0xc] sm:$0xff]  ;;  %v3032_v51 = vld [vmem:[#allocation2 + $0x14] sm:$0xff] }
 0x401   :  { %4408 = vmatprep.mubr.msk.bf16.mxu0 %vm4726_vm0, %v4725_v20  ;;  %4444 = vmatprep.mubr.msk.bf16.mxu1 %vm4726_vm0, %v4725_v20  ;;  %v2875_v1 = vld [vmem:[#allocation2 + $0x43] sm:$0xff]  ;;  %v2876_v42 = vld [vmem:[#allocation2 + $0x4b] sm:$0x3]  ;;  %v2718_v50 = vpack.c.bf16 %v2713_v56, %v5818_v14 }
 0x402   :  { %4462 = vmatprep.subr.bf16.mxu0 %v4725_v20  ;;  %4497 = vmatpush3.bf16.msra.mxu1 %v4702_v37  ;;  %v2881_v48 = vpack.c.bf16 %v2876_v42, %v2875_v1  ;;  %v3033_v37 = vld [vmem:[#allocation2 + $0x1c] sm:$0xff]  ;;  %v3034_v14 = vld [vmem:[#allocation2 + $0x24] sm:$0xff]  ;;  %v3035_v46 = vld [vmem:[#allocation2 + $0x2c] sm:$0xff] }
 0x403   :  { %4498 = vmatprep.subr.bf16.mxu1 %v4725_v20  ;;  %v3042_v62 = vpack.c.bf16 %v3035_v46, %v3034_v14 }
 0x404   :  { %4463 = vmatpush3.bf16.msra.mxu0 %v4701_v58  ;;  %v3041_v58 = vpack.c.bf16 %v3033_v37, %v3032_v51 }
 0x405   :  { %4464 = vmatprep.subr.bf16.mxu0 %v4725_v20 }
 0x406   :  { %4499 = vmatpush3.bf16.msra.mxu1 %v4704_v63  ;;  %v3036_v63 = vld [vmem:[#allocation2 + $0x34] sm:$0xff] }
 0x407   :  { %4409 = vmatmul.mubr.bf16.gmra.mrb[120].mxu0 %v2442_v52  ;;  %4500 = vmatprep.subr.bf16.mxu1 %v4725_v20  ;;  %v3043_v9 = vpack.c.bf16 %v3037_v6, %v3036_v63  ;;  %v3039_v52 = vld [vmem:[#allocation2 + $0x4c] sm:$0x3] }
 0x408   :  { %4445 = vmatmul.mubr.bf16.gmra.mrb[156].mxu1 %v2411_v53  ;;  %4465 = vmatpush3.bf16.msra.mxu0 %v4703_v36  ;;  %v3038_v36 = vld [vmem:[#allocation2 + $0x44] sm:$0xff] }
 0x409   :  { %4412 = vmatprep.mubr.msk.bf16.mxu0 %vm4726_vm0, %v4725_v20  ;;  %4448 = vmatprep.mubr.msk.bf16.mxu1 %vm4726_vm0, %v4725_v20  ;;  %v3044_v53 = vpack.c.bf16 %v3039_v52, %v3038_v36 }
 0x40a   :  { %4466 = vmatprep.subr.bf16.mxu0 %v4725_v20  ;;  %4501 = vmatpush3.bf16.msra.mxu1 %v4705_v8 }
 0x40b   :  { %4502 = vmatprep.subr.bf16.mxu1 %v4725_v20 }
 0x40c   :  { %4467 = vmatpush3.bf16.msra.mxu0 %v4706_v3 }
 0x40d   :  { %4468 = vmatprep.subr.bf16.mxu0 %v4725_v20 }
 0x40e   :  { %4503 = vmatpush3.bf16.msra.mxu1 %v4707_v32 }
 0x40f   :  { %4413 = vmatmul.mubr.bf16.gmra.mrb[124].mxu0 %v2443_v18  ;;  %4504 = vmatprep.subr.bf16.mxu1 %v4725_v20 }
 0x410   :  { %4449 = vmatmul.mubr.bf16.gmra.mrb[160].mxu1 %v2412_v5  ;;  %4416 = vmatprep.mubr.msk.bf16.mxu0 %vm4726_vm0, %v4725_v20 }
 0x411   :  { %4452 = vmatprep.mubr.msk.bf16.mxu1 %vm4726_vm0, %v4725_v20  ;;  %4469 = vmatpush3.bf16.msra.mxu0 %v4708_v43 }
 0x412   :  { %4505 = vmatpush3.bf16.msra.mxu1 %v4709_v21  ;;  %4470 = vmatprep.subr.bf16.mxu0 %v4725_v20 }
 0x413   :  { %4506 = vmatprep.subr.bf16.mxu1 %v4725_v20 }
 0x415   :  { %4471 = vmatpush3.bf16.msra.mxu0 %v4710_v12 }
 0x416   :  { %4507 = vmatpush3.bf16.msra.mxu1 %v4711_v11  ;;  %4528 = vmatprep.subr.bf16.mxu0 %v4725_v20 }
 0x417   :  { %4417 = vmatmul.mubr.bf16.gmra.mrb[128].mxu0 %v2444_v7 }
 0x418   :  { %4453 = vmatmul.mubr.bf16.gmra.mrb[164].mxu1 %v2413_v17  ;;  %4472 = vmatprep.mubr.msk.bf16.mxu0 %vm4726_vm0, %v4725_v20 }
 0x419   :  { %4508 = vmatprep.mubr.msk.bf16.mxu1 %vm4726_vm0, %v4725_v20 }
 0x41f   :  { %4473 = vmatmul.mubr.bf16.vlgmr.msra.gmra.mrb[132].mxu0 %v2714_v57  ;;  %v4715_v57 = vld [vmem:[%s6132_s10 + $0x118] sm:$0xff]  }
 0x420   :  { %4509 = vmatmul.mubr.bf16.vlgmr.msra.gmra.mrb[168].mxu1 %v2877_v2  ;;  %4529 = vmatpush3.bf16.msra.mxu0 %v4712_v24 }
 0x421   :  { %4530 = vmatprep.subr.bf16.mxu0 %v4725_v20  ;;  %4476 = vmatprep.mubr.msk.bf16.mxu0 %vm4726_vm0, %v4725_v20 }
 0x422   :  { %4512 = vmatprep.mubr.msk.bf16.mxu1 %vm4726_vm0, %v4725_v20 }
 0x424   :  { %4531 = vmatpush3.bf16.msra.mxu0 %v4713_v39 }
 0x425   :  { %4532 = vmatprep.subr.bf16.mxu0 %v4725_v20 }
 0x427   :  { %4477 = vmatmul.mubr.bf16.gmra.mrb[136].mxu0 %v2715_v33  ;;  %v2879_v33 = vpack.c.bf16 %v2872_v13, %v2871_v28 }
 0x428   :  { %4513 = vmatmul.mubr.bf16.gmra.mrb[172].mxu1 %v2878_v0  ;;  %4533 = vmatpush3.bf16.msra.mxu0 %v4714_v22 }
 0x429   :  { %4480 = vmatprep.mubr.msk.bf16.mxu0 %vm4726_vm0, %v4725_v20  ;;  %4516 = vmatprep.mubr.msk.bf16.mxu1 %vm4726_vm0, %v4725_v20 }
 0x42a   :  { %4534 = vmatprep.subr.bf16.mxu0 %v4725_v20 }
 0x42c   :  { %4535 = vmatpush3.bf16.msra.mxu0 %v4715_v57 }
 0x42d   :  { %4536 = vmatprep.subr.bf16.mxu0 %v4725_v20 }
 0x42f   :  { %4481 = vmatmul.mubr.bf16.gmra.mrb[140].mxu0 %v2716_v26 }
 0x430   :  { %4517 = vmatmul.mubr.bf16.gmra.mrb[176].mxu1 %v2879_v33  ;;  %4537 = vmatpush3.bf16.msra.mxu0 %v4716_v44 }
 0x431   :  { %4484 = vmatprep.mubr.msk.bf16.mxu0 %vm4726_vm0, %v4725_v20  ;;  %4520 = vmatprep.mubr.msk.bf16.mxu1 %vm4726_vm0, %v4725_v20 }
 0x432   :  { %4538 = vmatprep.subr.bf16.mxu0 %v4725_v20 }
 0x434   :  { %4539 = vmatpush3.bf16.msra.mxu0 %v4717_v35 }
 0x435   :  { %4540 = vmatprep.subr.bf16.mxu0 %v4725_v20 }
 0x437   :  { %4485 = vmatmul.mubr.bf16.gmra.mrb[144].mxu0 %v2717_v10  ;;  %v3030_v10 = vld [vmem:[#allocation2 + $0x4] sm:$0xff] }
 0x438   :  { %4521 = vmatmul.mubr.bf16.gmra.mrb[180].mxu1 %v2880_v30  ;;  %4488 = vmatprep.mubr.msk.bf16.mxu0 %vm4726_vm0, %v4725_v20  ;;  %v3040_v55 = vpack.c.bf16 %v3031_v54, %v3030_v10 }
 0x439   :  { %4524 = vmatprep.mubr.msk.bf16.mxu1 %vm4726_vm0, %v4725_v20  ;;  %4541 = vmatpush3.bf16.msra.mxu0 %v4718_v34 }
 0x43a   :  { %4542 = vmatprep.subr.bf16.mxu0 %v4725_v20 }
 0x43d   :  { %4543 = vmatpush3.bf16.msra.mxu0 %v4719_v38 }
 0x43f   :  { %4489 = vmatmul.mubr.bf16.gmra.mrb[148].mxu0 %v2718_v50 }
 0x440   :  { %4525 = vmatmul.mubr.bf16.gmra.mrb[184].mxu1 %v2881_v48  ;;  %4544 = vmatprep.mubr.msk.bf16.mxu0 %vm4726_vm0, %v4725_v20 }
 0x447   :  { %4545 = vmatmul.mubr.bf16.vlgmr.msra.gmra.mrb[152].mxu0 %v3040_v55 }
 0x448   :  { %4548 = vmatprep.mubr.msk.bf16.mxu0 %vm4726_vm0, %v4725_v20 }
 0x44f   :  { %4549 = vmatmul.mubr.bf16.gmra.mrb[156].mxu0 %v3041_v58 }
 0x450   :  { %4552 = vmatprep.mubr.msk.bf16.mxu0 %vm4726_vm0, %v4725_v20 }
 0x457   :  { %4553 = vmatmul.mubr.bf16.gmra.mrb[160].mxu0 %v3042_v62 }
 0x458   :  { %4556 = vmatprep.mubr.msk.bf16.mxu0 %vm4726_vm0, %v4725_v20 }
 0x45f   :  { %4557 = vmatmul.mubr.bf16.gmra.mrb[164].mxu0 %v3043_v9 }
 0x460   :  { %4560 = vmatprep.mubr.msk.bf16.mxu0 %vm4726_vm0, %v4725_v20 }
 0x467   :  { %4561 = vmatmul.mubr.bf16.gmra.mrb[168].mxu0 %v3044_v53 }
 0x4ca   :  { %v2544_v8 = vpop.f32.mrb[112].mxu0 }
 0x4cb   :  { %v2665_v3 = vpop.f32.mrb[148].mxu1  ;;  %v4402_v45 = vpop.f32.mrb[113].mxu0 }
 0x4cc   :  { %v2666_v31 = vadd.f32 %v2665_v3, %v2544_v8  ;;  %v4438_v32 = vpop.f32.mrb[149].mxu1  ;;  %v2547_v61 = vpop.f32.mrb[114].mxu0 }
 0x4cd   :  { %v2668_v59 = vpop.f32.mrb[150].mxu1  ;;  %v4403_v18 = vpop.f32.mrb[115].mxu0 }
 0x4ce   :  { %v2669_v43 = vadd.f32 %v2668_v59, %v2547_v61  ;;  %v4439_v5 = vpop.f32.mrb[151].mxu1 }
 0x4d2   :  { %v2552_v21 = vpop.f32.mrb[116].mxu0 }
 0x4d3   :  { %v2673_v12 = vpop.f32.mrb[152].mxu1  ;;  %v4406_v40 = vpop.f32.mrb[117].mxu0 }
 0x4d4   :  { %v2674_v47 = vadd.f32 %v2673_v12, %v2552_v21  ;;  %v4442_v11 = vpop.f32.mrb[153].mxu1  ;;  %v2555_v20 = vpop.f32.mrb[118].mxu0 }
 0x4d5   :  { %v2676_v16 = vpop.f32.mrb[154].mxu1  ;;  %v4407_v19 = vpop.f32.mrb[119].mxu0 }
 0x4d6   :  { %v2677_v7 = vadd.f32 %v2676_v16, %v2555_v20  ;;  %v4443_v17 = vpop.f32.mrb[155].mxu1 }
 0x4da   :  { %v2560_v15 = vpop.f32.mrb[120].mxu0 }
 0x4db   :  { %v2681_v23 = vpop.f32.mrb[156].mxu1  ;;  %v4410_v24 = vpop.f32.mrb[121].mxu0 }
 0x4dc   :  { %v2682_v2 = vadd.f32 %v2681_v23, %v2560_v15  ;;  %v4446_v39 = vpop.f32.mrb[157].mxu1  ;;  %v2563_v60 = vpop.f32.mrb[122].mxu0 }
 0x4dd   :  { %v2684_v27 = vpop.f32.mrb[158].mxu1  ;;  %v4411_v22 = vpop.f32.mrb[123].mxu0 }
 0x4de   :  { %v2685_v0 = vadd.f32 %v2684_v27, %v2563_v60  ;;  %v4447_v57 = vpop.f32.mrb[159].mxu1 }
 0x4e2   :  { %v2568_v41 = vpop.f32.mrb[124].mxu0 }
 0x4e3   :  { %v2689_v28 = vpop.f32.mrb[160].mxu1  ;;  %v4414_v13 = vpop.f32.mrb[125].mxu0 }
 0x4e4   :  { %v2690_v44 = vadd.f32 %v2689_v28, %v2568_v41  ;;  %v4450_v26 = vpop.f32.mrb[161].mxu1  ;;  %v2571_v33 = vpop.f32.mrb[126].mxu0 }
 0x4e5   :  { %v2692_v35 = vpop.f32.mrb[162].mxu1  ;;  %v4415_v49 = vpop.f32.mrb[127].mxu0 }
 0x4e6   :  { %v2693_v29 = vadd.f32 %v2692_v35, %v2571_v33  ;;  %v4451_v34 = vpop.f32.mrb[163].mxu1 }
 0x4ea   :  { %v2576_v30 = vpop.f32.mrb[128].mxu0 }
 0x4eb   :  { %v2697_v38 = vpop.f32.mrb[164].mxu1  ;;  %v4418_v56 = vpop.f32.mrb[129].mxu0 }
 0x4ec   :  { %v2698_v1 = vadd.f32 %v2697_v38, %v2576_v30  ;;  %v4454_v42 = vpop.f32.mrb[165].mxu1  ;;  %v2579_v50 = vpop.f32.mrb[130].mxu0 }
 0x4ed   :  { %v2700_v48 = vpop.f32.mrb[166].mxu1  ;;  %v4419_v10 = vpop.f32.mrb[131].mxu0 }
 0x4ee   :  { %v2701_v54 = vadd.f32 %v2700_v48, %v2579_v50  ;;  %v4455_v55 = vpop.f32.mrb[167].mxu1 }
 0x4f2   :  { %v2818_v51 = vpop.f32.mrb[132].mxu0 }
 0x4f3   :  { %v2857_v37 = vadd.f32 %v2818_v51, %v2666_v31  ;;  %v2981_v58 = vpop.f32.mrb[168].mxu1  ;;  %v4474_v14 = vpop.f32.mrb[133].mxu0 }
 0x4f4   :  { %v4510_v46 = vpop.f32.mrb[169].mxu1  ;;  %v2821_v62 = vpop.f32.mrb[134].mxu0 }
 0x4f5   :  { %v3020_v63 = vadd.f32 %v2981_v58, %v2857_v37  ;;  %v2858_v6 = vadd.f32 %v2821_v62, %v2669_v43  ;;  %v2984_v9 = vpop.f32.mrb[170].mxu1  ;;  %v4475_v36 = vpop.f32.mrb[135].mxu0 }
 0x4f6   :  { %v4511_v52 = vpop.f32.mrb[171].mxu1 }
 0x4f7   :  { %v3021_v53 = vadd.f32 %v2984_v9, %v2858_v6 }
 0x4fa   :  { %v2826_v8 = vpop.f32.mrb[136].mxu0 }
 0x4fb   :  { %v2859_v3 = vadd.f32 %v2826_v8, %v2674_v47  ;;  %v2989_v45 = vpop.f32.mrb[172].mxu1  ;;  %v4478_v32 = vpop.f32.mrb[137].mxu0 }
 0x4fc   :  { %v4514_v61 = vpop.f32.mrb[173].mxu1  ;;  %v2829_v59 = vpop.f32.mrb[138].mxu0 }
 0x4fd   :  { %v3022_v18 = vadd.f32 %v2989_v45, %v2859_v3  ;;  %v2860_v5 = vadd.f32 %v2829_v59, %v2677_v7  ;;  %v2992_v21 = vpop.f32.mrb[174].mxu1  ;;  %v4479_v31 = vpop.f32.mrb[139].mxu0 }
 0x4fe   :  { %v4515_v12 = vpop.f32.mrb[175].mxu1 }
 0x4ff   :  { %v3023_v40 = vadd.f32 %v2992_v21, %v2860_v5 }
 0x502   :  { %v2834_v11 = vpop.f32.mrb[140].mxu0 }
 0x503   :  { %v2861_v20 = vadd.f32 %v2834_v11, %v2682_v2  ;;  %v2997_v16 = vpop.f32.mrb[176].mxu1  ;;  %v4482_v43 = vpop.f32.mrb[141].mxu0 }
 0x504   :  { %v4518_v19 = vpop.f32.mrb[177].mxu1  ;;  %v2837_v17 = vpop.f32.mrb[142].mxu0 }
 0x505   :  { %v3024_v15 = vadd.f32 %v2997_v16, %v2861_v20  ;;  %v2862_v23 = vadd.f32 %v2837_v17, %v2685_v0  ;;  %v3000_v24 = vpop.f32.mrb[178].mxu1  ;;  %v4483_v47 = vpop.f32.mrb[143].mxu0 }
 0x506   :  { %v4519_v39 = vpop.f32.mrb[179].mxu1 }
 0x507   :  { %v3025_v60 = vadd.f32 %v3000_v24, %v2862_v23 }
 0x50a   :  { %v2842_v27 = vpop.f32.mrb[144].mxu0 }
 0x50b   :  { %v2863_v22 = vadd.f32 %v2842_v27, %v2690_v44  ;;  %v3005_v57 = vpop.f32.mrb[180].mxu1  ;;  %v4486_v7 = vpop.f32.mrb[145].mxu0 }
 0x50c   :  { %v4522_v41 = vpop.f32.mrb[181].mxu1  ;;  %v2845_v28 = vpop.f32.mrb[146].mxu0 }
 0x50d   :  { %v5985_v13 = vadd.f32 %v3005_v57, %v2863_v22  ;;  %v2864_v26 = vadd.f32 %v2845_v28, %v2693_v29  ;;  %v3008_v2 = vpop.f32.mrb[182].mxu1  ;;  %v4487_v33 = vpop.f32.mrb[147].mxu0  ;;  %v5996_v29 = vld [vmem:[%s6136_s11] ss:$0 sm:$0xff] }
 0x50e   :  { %v4523_v35 = vpop.f32.mrb[183].mxu1 }
 0x50f   :  { %v5987_v49 = vadd.f32 %v3008_v2, %v2864_v26 }
 0x512   :  { %v2850_v34 = vpop.f32.mrb[148].mxu0 }
 0x513   :  { %v2865_v0 = vadd.f32 %v2850_v34, %v2698_v1  ;;  %v3013_v30 = vpop.f32.mrb[184].mxu1  ;;  %v4490_v38 = vpop.f32.mrb[149].mxu0 }
 0x514   :  { %v4526_v56 = vpop.f32.mrb[185].mxu1  ;;  %v2853_v42 = vpop.f32.mrb[150].mxu0 }
 0x515   :  { %v5989_v50 = vadd.f32 %v3013_v30, %v2865_v0  ;;  %v2866_v44 = vadd.f32 %v2853_v42, %v2701_v54  ;;  %v3016_v48 = vpop.f32.mrb[186].mxu1  ;;  %v4491_v10 = vpop.f32.mrb[151].mxu0 }
 0x516   :  { %v4527_v55 = vpop.f32.mrb[187].mxu1 }
 0x517   :  { %v5991_v51 = vadd.f32 %v3016_v48, %v2866_v44 }
 0x51a   :  { %v3144_v37 = vpop.f32.mrb[152].mxu0 }
 0x51b   :  { %v3183_v58 = vadd.f32 %v3144_v37, %v3020_v63  ;;  %v4546_v1 = vpop.f32.mrb[153].mxu0 }
 0x51c   :  { %v3147_v14 = vpop.f32.mrb[154].mxu0 }
 0x51d   :  { %v3199_v46 = vadd.f32 %v5996_v29, %v3183_v58  ;;  %v3184_v62 = vadd.f32 %v3147_v14, %v3021_v53  ;;  %v4547_v6 = vpop.f32.mrb[155].mxu0 }
 0x51f   :  { %v5999_v9 = vmax.f32 %v3199_v46, 0.0  ;;  %v3200_v54 = vadd.f32 %v5996_v29, %v3184_v62 }
 0x521   :  { %v6002_v36 = vmax.f32 %v3200_v54, 0.0  ;;  %v3231_v8 = vmul.f32 %v5999_v9, %v5999_v9 }
 0x522   :  { %v3152_v52 = vpop.f32.mrb[156].mxu0 }
 0x523   :  { %v3219_v3 = vadd.f32 %v6002_v36, %v5999_v9  ;;  %v3232_v63 = vmul.f32 %v6002_v36, %v6002_v36  ;;  %v3185_v45 = vadd.f32 %v3152_v52, %v3022_v18  ;;  %v4550_v32 = vpop.f32.mrb[157].mxu0 }
 0x524   :  { %v3155_v53 = vpop.f32.mrb[158].mxu0 }
 0x525   :  { %v3236_v61 = vadd.f32 %v3232_v63, %v3231_v8  ;;  %v3201_v59 = vadd.f32 %v5996_v29, %v3185_v45  ;;  %v3186_v5 = vadd.f32 %v3155_v53, %v3023_v40  ;;  %v4551_v21 = vpop.f32.mrb[159].mxu0 }
 0x527   :  { %v6011_v31 = vmax.f32 %v3201_v59, 0.0  ;;  %v3202_v12 = vadd.f32 %v5996_v29, %v3186_v5 }
 0x529   :  { %v3220_v11 = vadd.f32 %v3219_v3, %v6011_v31  ;;  %v3233_v20 = vmul.f32 %v6011_v31, %v6011_v31  ;;  %v6017_v16 = vmax.f32 %v3202_v12, 0.0 }
 0x52a   :  { %v3160_v43 = vpop.f32.mrb[160].mxu0 }
 0x52b   :  { %v3237_v18 = vadd.f32 %v3236_v61, %v3233_v20  ;;  %v3221_v19 = vadd.f32 %v3220_v11, %v6017_v16  ;;  %v3234_v17 = vmul.f32 %v6017_v16, %v6017_v16  ;;  %v3187_v40 = vadd.f32 %v3160_v43, %v3024_v15  ;;  %v4554_v23 = vpop.f32.mrb[161].mxu0 }
 0x52c   :  { %v3163_v24 = vpop.f32.mrb[162].mxu0 }
 0x52d   :  { %v3238_v47 = vadd.f32 %v3237_v18, %v3234_v17  ;;  %v3203_v39 = vadd.f32 %v5996_v29, %v3187_v40  ;;  %v3188_v27 = vadd.f32 %v3163_v24, %v3025_v60  ;;  %v4555_v22 = vpop.f32.mrb[163].mxu0 }
 0x52f   :  { %v6023_v57 = vmax.f32 %v3203_v39, 0.0  ;;  %v3204_v7 = vadd.f32 %v5996_v29, %v3188_v27 }
 0x531   :  { %v3222_v41 = vsel %vm2239_vm4, %v6023_v57, 0.0  ;;  %v3235_v28 = vmul.f32 %v6023_v57, %v6023_v57  ;;  %v6030_v26 = vmax.f32 %v3204_v7, 0.0  ;;  %v3254_v35 = vrot.slane %v6023_v57, 7 }
 0x532   :  { %v3223_v15 = vadd.f32 %v3222_v41, %v3221_v19  ;;  %v3168_v2 = vpop.f32.mrb[164].mxu0 }
 0x533   :  { %v3239_v33 = vsel %vm2239_vm4, %v3235_v28, 0.0  ;;  %v3255_v60 = vrot.slane %v6030_v26, 7  ;;  %v3282_v34 = vmul.f32 %v6030_v26, %v6030_v26  ;;  %v4558_v0 = vpop.f32.mrb[165].mxu0  ;;  %v3189_v38 = vadd.f32 %v3168_v2, %v5985_v13 }
 0x534   :  { %v3240_v30 = vadd.f32 %v3239_v33, %v3238_v47  ;;  %v3171_v56 = vpop.f32.mrb[166].mxu0  ;;  %v3293_v42 = vrot.slane %v3235_v28, 7  ;;  %v3224_v18 = vrot.slane %v3223_v15, 4 }
 0x535   :  { %v3256_v44 = vsel %vm280_vm1, %v3254_v35, %v3255_v60  ;;  %v3294_v48 = vrot.slane %v3282_v34, 7  ;;  %v3190_v10 = vadd.f32 %v3171_v56, %v5987_v49  ;;  %v4559_v55 = vpop.f32.mrb[167].mxu0  ;;  %v3205_v37 = vadd.f32 %v5996_v29, %v3189_v38 }
 0x536   :  { %v3241_v24 = vrot.slane %v3240_v30, 4  ;;  %v3225_v27 = vadd.f32 %v3224_v18, %v3223_v15 }
 0x537   :  { %v3295_v58 = vsel %vm280_vm1, %v3293_v42, %v3294_v48  ;;  %v3206_v1 = vadd.f32 %v5996_v29, %v3190_v10  ;;  %v6043_v14 = vmax.f32 %v3205_v37, 0.0 }
 0x538   :  { %v3242_v28 = vadd.f32 %v3241_v24, %v3240_v30  ;;  %v3226_v34 = vrot.slane %v3225_v27, 2 }
 0x539   :  { %v6045_v46 = vmax.f32 %v3206_v1, 0.0  ;;  %v3257_v13 = vrot.slane %v6043_v14, 7  ;;  %v3283_v62 = vmul.f32 %v6043_v14, %v6043_v14 }
 0x53a   :  { %v3176_v6 = vpop.f32.mrb[168].mxu0  ;;  %v3243_v56 = vrot.slane %v3242_v28, 2 }
 0x53b   :  { %v3259_v54 = vrot.slane %v6045_v46, 7  ;;  %v3284_v49 = vmul.f32 %v6045_v46, %v6045_v46  ;;  %v3191_v52 = vadd.f32 %v3176_v6, %v5989_v50  ;;  %v4562_v8 = vpop.f32.mrb[169].mxu0  ;;  %v3258_v3 = vsel %vm280_vm1, %v3255_v60, %v3257_v13 }
 0x53c   :  { %v3296_v63 = vrot.slane %v3283_v62, 7  ;;  %v3179_v45 = vpop.f32.mrb[170].mxu0  ;;  %v3270_v32 = vadd.f32 %v3258_v3, %v3256_v44  ;;  %v3244_v37 = vadd.f32 %v3243_v56, %v3242_v28 }
 0x53d   :  { %v3260_v53 = vsel %vm280_vm1, %v3257_v13, %v3259_v54  ;;  %v3298_v61 = vrot.slane %v3284_v49, 7  ;;  %v3207_v59 = vadd.f32 %v5996_v29, %v3191_v52  ;;  %v4563_v5 = vpop.f32.mrb[171].mxu0  ;;  %v3192_v12 = vadd.f32 %v3179_v45, %v5991_v51 }
 0x53e   :  { %v3297_v21 = vsel %vm280_vm1, %v3294_v48, %v3296_v63  ;;  %v3271_v20 = vadd.f32 %v3270_v32, %v3260_v53  ;;  %v3227_v48 = vadd.f32 %v3226_v34, %v3225_v27  ;;  %v3245_v6 = vrot.slane %v3244_v37, 1 }
 0x53f   :  { %v3309_v11 = vadd.f32 %v3297_v21, %v3295_v58  ;;  %v3299_v50 = vsel %vm280_vm1, %v3296_v63, %v3298_v61  ;;  %v6060_v43 = vmax.f32 %v3207_v59, 0.0  ;;  %v3208_v19 = vadd.f32 %v5996_v29, %v3192_v12 }
 0x540   :  { %v3228_v1 = vrot.slane %v3227_v48, 1  ;;  %v3246_v63 = vadd.f32 %v3245_v6, %v3244_v37 }
 0x541   :  { %v3310_v17 = vadd.f32 %v3309_v11, %v3299_v50  ;;  %v3261_v40 = vrot.slane %v6060_v43, 7  ;;  %v3285_v23 = vmul.f32 %v6060_v43, %v6060_v43  ;;  %v6066_v47 = vmax.f32 %v3208_v19, 0.0 }
 0x542   :  { %v3229_v52 = vadd.f32 %v3228_v1, %v3227_v48 }
 0x543   :  { %v3262_v51 = vsel %vm280_vm1, %v3259_v54, %v3261_v40  ;;  %v3300_v39 = vrot.slane %v3285_v23, 7  ;;  %v3263_v7 = vrot.slane %v6066_v47, 7  ;;  %v3286_v41 = vmul.f32 %v6066_v47, %v6066_v47 }
 0x544   :  { %v3272_v22 = vadd.f32 %v3271_v20, %v3262_v51 }
 0x545   :  { %v3301_v29 = vsel %vm280_vm1, %v3298_v61, %v3300_v39  ;;  %v3264_v33 = vsel %vm280_vm1, %v3261_v40, %v3263_v7  ;;  %v3302_v35 = vrot.slane %v3286_v41, 7 }
 0x546   :  { %v3311_v2 = vadd.f32 %v3310_v17, %v3301_v29  ;;  %v3273_v60 = vsel %vm2239_vm4, %v3264_v33, 0.0 }
 0x547   :  { %v3274_v0 = vadd.f32 %v3273_v60, %v3272_v22  ;;  %v3303_v38 = vsel %vm280_vm1, %v3300_v39, %v3302_v35 }
 0x548   :  { %v3312_v15 = vsel %vm2239_vm4, %v3303_v38, 0.0 }
 0x549   :  { %v3275_v42 = vrot.slane %v3274_v0, 4  ;;  %v3313_v44 = vadd.f32 %v3312_v15, %v3311_v2 }
 0x54b   :  { %v3276_v10 = vadd.f32 %v3275_v42, %v3274_v0  ;;  %v3314_v55 = vrot.slane %v3313_v44, 4 }
 0x54d   :  { %v3277_v30 = vrot.slane %v3276_v10, 2  ;;  %v3315_v58 = vadd.f32 %v3314_v55, %v3313_v44 }
 0x54f   :  { %v3278_v13 = vadd.f32 %v3277_v30, %v3276_v10  ;;  %v3316_v62 = vrot.slane %v3315_v58, 2 }
 0x551   :  { %v3279_v54 = vrot.slane %v3278_v13, 1  ;;  %v3317_v49 = vadd.f32 %v3316_v62, %v3315_v58 }
 0x553   :  { %v3280_v8 = vadd.f32 %v3279_v54, %v3278_v13  ;;  %v3318_v3 = vrot.slane %v3317_v49, 1 }
 0x555   :  { %v3281_v45 = vadd.f32 %v3280_v8, %v3229_v52  ;;  %v3319_v32 = vadd.f32 %v3318_v3, %v3317_v49 }
 0x557   :  { %v3320_v53 = vadd.f32 %v3319_v32, %v3246_v63  ;;  %v3321_v61 = vmul.f32 0.014285714, %v3281_v45 }
 0x559   :  { %v3322_v59 = vmul.f32 0.014285714, %v3320_v53  ;;  %v3323_v5 = vmul.f32 %v3321_v61, %v3321_v61  ;;  %v3329_v21 = vsub.f32 %v5999_v9, %v3321_v61  ;;  %v3330_v12 = vsub.f32 %v6002_v36, %v3321_v61  ;;  %v63_v36 = vld [vmem:[%s6137_s12] sm:$0x1] }
 0x55a   :  { %v3331_v11 = vsub.f32 %v6011_v31, %v3321_v61  ;;  %v3332_v20 = vsub.f32 %v6017_v16, %v3321_v61  ;;  %v3333_v50 = vsub.f32 %v6023_v57, %v3321_v61  ;;  %v3359_v18 = vsub.f32 %v6030_v26, %v3321_v61  ;;  %v3738_v26 = vld [vmem:[%s6138_s13] ss:$0 sm:$0xff] }
 0x55b   :  { %v3324_v19 = vsub.f32 %v3322_v59, %v3323_v5  ;;  %v3360_v17 = vsub.f32 %v6043_v14, %v3321_v61  ;;  %v3361_v40 = vsub.f32 %v6045_v46, %v3321_v61  ;;  %v3362_v23 = vsub.f32 %v6060_v43, %v3321_v61 }
 0x55c   :  { %v3363_v24 = vsub.f32 %v6066_v47, %v3321_v61 }
 0x55d   :  { %v3325_v9 = vmax.f32 %v3324_v19, 0.0 }
 0x55f   :  { %v3326_v51 = vadd.f32 1e-05, %v3325_v9 }
 0x561   :  { %4722 = vrsqrt.f32 %v3326_v51 }
 0x56b   :  { %v4723_v31 = vpop.eup %4722 }
 0x56c   :  { %v3328_v16 = vmul.f32 %v4723_v31, %v63_v36 }
 0x56e   :  { %v3337_v57 = vrot.slane %v3328_v16, %v2355_v25 }
 0x570   :  { %v3338_v14 = vmul.f32 %v3337_v57, %v3329_v21  ;;  %v3339_v46 = vmul.f32 %v3337_v57, %v3330_v12  ;;  %v3340_v43 = vmul.f32 %v3337_v57, %v3331_v11  ;;  %v3341_v47 = vmul.f32 %v3337_v57, %v3332_v20 }
 0x571   :  { %v3342_v39 = vmul.f32 %v3337_v57, %v3333_v50  ;;  %v3364_v27 = vmul.f32 %v3359_v18, %v3337_v57  ;;  %v3365_v22 = vmul.f32 %v3360_v17, %v3337_v57  ;;  %v3366_v7 = vmul.f32 %v3361_v40, %v3337_v57 }
 0x572   :  { %v3349_v41 = vadd.f32 %v3738_v26, %v3338_v14  ;;  %v3350_v29 = vadd.f32 %v3738_v26, %v3339_v46  ;;  %v3351_v28 = vadd.f32 %v3738_v26, %v3340_v43  ;;  %v3352_v2 = vadd.f32 %v3738_v26, %v3341_v47 }
 0x573   :  { %v3353_v33 = vadd.f32 %v3738_v26, %v3342_v39  ;;  %v3367_v35 = vmul.f32 %v3362_v23, %v3337_v57  ;;  %v3368_v4 = vmul.f32 %v3363_v24, %v3337_v57  ;;  %v3369_v25 = vadd.f32 %v3738_v26, %v3364_v27 }
 0x574   :  { %3354 = vst [vmem:[%s6139_s14] sm:$0xff] %v3349_v41  ;;  %3355 = vst [vmem:[%s6139_s14 + $0x8] sm:$0xff] %v3350_v29  ;;  %v3370_v60 = vadd.f32 %v3738_v26, %v3365_v22  ;;  %v3371_v34 = vadd.f32 %v3738_v26, %v3366_v7 }
 0x575   :  { %3356 = vst [vmem:[%s6139_s14 + $0x10] sm:$0xff] %v3351_v28  ;;  %3357 = vst [vmem:[%s6139_s14 + $0x18] sm:$0xff] %v3352_v2  ;;  %v3372_v0 = vadd.f32 %v3738_v26, %v3367_v35  ;;  %v3373_v38 = vadd.f32 %v3738_v26, %v3368_v4 }
 0x576   :  { %3358 = vst [vmem:[%s6139_s14 + $0x20] ss:$5 sps:$4 sm:$0x87] %v3353_v33   ;;  %3740 = vst [vmem:[%s6139_s14 + $0x29] sm:$0xff] %v3369_v25 }
 0x577   :  { %3741 = vst [vmem:[%s6139_s14 + $0x31] sm:$0xff] %v3370_v60  ;;  %3742 = vst [vmem:[%s6139_s14 + $0x39] sm:$0xff] %v3371_v34 }
 0x578   :  { %3743 = vst [vmem:[%s6139_s14 + $0x41] sm:$0xff] %v3372_v0  ;;  %3744 = vst [vmem:[%s6139_s14 + $0x49] sm:$0x3] %v3373_v38 }

// kernel: decoder_forward.5
= control target key start
LH: loop header
LB: loop body
LE: loop exit
PB: predicated region body
PF: predicated region fallthrough
CT: control target
= control target key end

     0   :  { %v8491_v1 = vmov 0   ;;  %v8492_v2 = vmov 0.0   ;;  %vm8493_vm0 = vmmov 0   ;;  %vm538_vm1 = vcmask 1040384   ;;  %s10956_s3 = inlined_call_operand.vmem [shape: bf16[128,384], index: 3, kind: input, shape index: {}]   ;;  %s10957_s0 = inlined_call_operand.vmem [shape: bf16[70,128], index: 0, kind: input, shape index: {}]   ;;  %s10958_s2 = inlined_call_operand.vmem [shape: bf16[3,105,35], index: 2, kind: input, shape index: {}]   ;;  %s10959_s6 = inlined_call_operand.vmem [shape: bf16[5,128,128], index: 6, kind: input, shape index: {}]   ;;  %s10960_s1 = inlined_call_operand.vmem [shape: f32[218,128], index: 1, kind: input, shape index: {}]   ;;  %s10961_s5 = inlined_call_operand.vmem [shape: bf16[5,128,128], index: 5, kind: input, shape index: {}]   ;;  %s10962_s4 = inlined_call_operand.vmem [shape: f32[1,128], index: 4, kind: input, shape index: {}]   ;;  %s10963_s10 = inlined_call_operand.vmem [shape: bf16[5,128,128], index: 10, kind: input, shape index: {}]   ;;  %s10964_s7 = inlined_call_operand.vmem [shape: f32[1,128], index: 7, kind: input, shape index: {}]   ;;  %s10965_s8 = inlined_call_operand.vmem [shape: f32[1,128], index: 8, kind: input, shape index: {}]   ;;  %s10966_s9 = inlined_call_operand.vmem [shape: f32[1,128], index: 9, kind: input, shape index: {}]   ;;  %s10967_s11 = inlined_call_operand.vmem [shape: f32[1,128], index: 11, kind: input, shape index: {}]   ;;  %s10968_s12 = inlined_call_operand.vmem [shape: f32[1,128], index: 12, kind: input, shape index: {}]   ;;  %s10969_s13 = inlined_call_operand.vmem [shape: f32[1,128], index: 13, kind: input, shape index: {}]   ;;  %s10970_s14 = inlined_call_operand.vmem [shape: f32[2,105,128], index: 14, kind: output, shape index: {}]  }
   0x1   :  { %v8308_v0 = vld [vmem:[%s10956_s3 + $0x4] ss:$12 sps:$4 sm:$0xff]   ;;  %326 = vmatprep.mubr.bf16.mxu1 %v8491_v1  ;;  %447 = vst [vmem:[#allocation2] sm:$0xff] %v8492_v2  ;;  %448 = vst [vmem:[#allocation2 + $0x8] sm:$0xff] %v8492_v2  ;;  %7190 = vmatprep.subr.bf16.mxu0 %v8492_v2  ;;  %v8310_v3 = vld [vmem:[%s10956_s3] ss:$12 sps:$4 sm:$0xff]  }
   0x2   :  { %449 = vst [vmem:[#allocation2 + $0x10] sm:$0xff] %v8492_v2  ;;  %450 = vst [vmem:[#allocation2 + $0x18] sm:$0xff] %v8492_v2  ;;  %7196 = vmatprep.mubr.msk.bf16.mxu0 %vm8493_vm0, %v8492_v2  ;;  %294 = vmatprep.subr.bf16.mxu1 %v8308_v0  ;;  %v8311_v4 = vld [vmem:[%s10956_s3 + $0x1c] ss:$12 sps:$4 sm:$0xff]   ;;  %v8313_v5 = vld [vmem:[%s10956_s3 + $0x18] ss:$12 sps:$4 sm:$0xff]  }
   0x3   :  { %451 = vst [vmem:[#allocation2 + $0x20] sm:$0xff] %v8492_v2  ;;  %452 = vst [vmem:[#allocation2 + $0x28] sm:$0xff] %v8492_v2  ;;  %295 = vmatpush1.bf16.msra.mxu1 %v8310_v3  ;;  %v8314_v6 = vld [vmem:[%s10956_s3 + $0x34] ss:$12 sps:$4 sm:$0xff]   ;;  %v8316_v7 = vld [vmem:[%s10956_s3 + $0x30] ss:$12 sps:$4 sm:$0xff]  }
   0x4   :  { %453 = vst [vmem:[#allocation2 + $0x30] sm:$0xff] %v8492_v2  ;;  %454 = vst [vmem:[#allocation2 + $0x38] sm:$0xff] %v8492_v2  ;;  %296 = vmatprep.subr.bf16.mxu1 %v8311_v4  ;;  %v8317_v8 = vld [vmem:[%s10956_s3 + $0x4c] ss:$12 sps:$4 sm:$0xff]   ;;  %v8319_v9 = vld [vmem:[%s10956_s3 + $0x48] ss:$12 sps:$4 sm:$0xff]  }
   0x5   :  { %455 = vst [vmem:[#allocation2 + $0x40] sm:$0xff] %v8492_v2  ;;  %456 = vst [vmem:[#allocation2 + $0x48] sm:$0xff] %v8492_v2  ;;  %v8320_v10 = vld [vmem:[%s10956_s3 + $0x64] ss:$12 sps:$4 sm:$0xff]   ;;  %v8322_v11 = vld [vmem:[%s10956_s3 + $0x60] ss:$12 sps:$4 sm:$0xff]  }
   0x6   :  { %457 = vst [vmem:[#allocation2 + $0x50] sm:$0xff] %v8492_v2  ;;  %458 = vst [vmem:[#allocation2 + $0x58] sm:$0xff] %v8492_v2  ;;  %v8323_v12 = vld [vmem:[%s10956_s3 + $0x7c] ss:$12 sps:$4 sm:$0xff]   ;;  %v8325_v13 = vld [vmem:[%s10956_s3 + $0x78] ss:$12 sps:$4 sm:$0xff]  }
   0x7   :  { %459 = vst [vmem:[#allocation2 + $0x60] sm:$0xff] %v8492_v2  ;;  %460 = vst [vmem:[#allocation2 + $0x68] sm:$0xff] %v8492_v2  ;;  %297 = vmatpush1.bf16.msra.mxu1 %v8313_v5  ;;  %v8326_v14 = vld [vmem:[%s10956_s3 + $0x94] ss:$12 sps:$4 sm:$0xff]   ;;  %v8328_v15 = vld [vmem:[%s10956_s3 + $0x90] ss:$12 sps:$4 sm:$0xff]  }
   0x8   :  { %461 = vst [vmem:[#allocation2 + $0x70] sm:$0xff] %v8492_v2  ;;  %462 = vst [vmem:[#allocation2 + $0x78] sm:$0xff] %v8492_v2  ;;  %298 = vmatprep.subr.bf16.mxu1 %v8314_v6  ;;  %v8329_v16 = vld [vmem:[%s10956_s3 + $0xac] ss:$12 sps:$4 sm:$0xff]   ;;  %v8331_v17 = vld [vmem:[%s10956_s3 + $0xa8] ss:$12 sps:$4 sm:$0xff]  }
   0x9   :  { %463 = vst [vmem:[#allocation2 + $0x80] sm:$0xff] %v8492_v2  ;;  %464 = vst [vmem:[#allocation2 + $0x88] sm:$0xff] %v8492_v2  ;;  %v8332_v18 = vld [vmem:[%s10957_s0] sm:$0xff]   ;;  %v8334_v19 = vld [vmem:[%s10956_s3 + $0x8] ss:$12 sps:$4 sm:$0xff]   ;;  %vm539_vm2 = vcmask 1041408  }
   0xa   :  { %465 = vst [vmem:[#allocation2 + $0x90] sm:$0xff] %v8492_v2  ;;  %466 = vst [vmem:[#allocation2 + $0x98] sm:$0xff] %v8492_v2  ;;  %v8335_v20 = vld [vmem:[%s10956_s3 + $0x20] ss:$12 sps:$4 sm:$0xff]   ;;  %v8337_v22 = vld [vmem:[%s10956_s3 + $0x38] ss:$12 sps:$4 sm:$0xff]  }
   0xb   :  { %467 = vst [vmem:[#allocation2 + $0xa0] sm:$0xff] %v8492_v2  ;;  %468 = vst [vmem:[#allocation2 + $0xa8] sm:$0xff] %v8492_v2  ;;  %299 = vmatpush1.bf16.msra.mxu1 %v8316_v7  ;;  %v8333_v21 = vld [vmem:[%s10957_s0 + $0x8] sm:$0xff]   ;;  %v8338_v23 = vld [vmem:[%s10956_s3 + $0x50] ss:$12 sps:$4 sm:$0xff]   ;;  %v8494_v43 = vmov 65535  }
   0xc   :  { %469 = vst [vmem:[#allocation2 + $0xb0] sm:$0xff] %v8492_v2  ;;  %470 = vst [vmem:[#allocation2 + $0xb8] sm:$0xff] %v8492_v2  ;;  %300 = vmatprep.subr.bf16.mxu1 %v8317_v8  ;;  %v8336_v24 = vld [vmem:[%s10957_s0 + $0x10] sm:$0xff]   ;;  %v8341_v26 = vld [vmem:[%s10956_s3 + $0x80] ss:$12 sps:$4 sm:$0xff]   ;;  %v540_v44 = vsel %vm538_vm1, 4294967295, %v8494_v43 }
   0xd   :  { %471 = vst [vmem:[#allocation2 + $0xc0] sm:$0xff] %v8492_v2  ;;  %472 = vst [vmem:[#allocation2 + $0xc8] sm:$0xff] %v8492_v2  ;;  %v8340_v25 = vld [vmem:[%s10956_s3 + $0x68] ss:$12 sps:$4 sm:$0xff]   ;;  %v8339_v27 = vld [vmem:[%s10957_s0 + $0x18] sm:$0xff]   ;;  %v8717_v46 = vsel %vm539_vm2, %v540_v44, 0 }
   0xe   :  { %473 = vst [vmem:[#allocation2 + $0xd0] sm:$0xff] %v8492_v2  ;;  %474 = vst [vmem:[#allocation2 + $0xd8] sm:$0x3] %v8492_v2  ;;  %v8343_v28 = vld [vmem:[%s10956_s3 + $0x98] ss:$12 sps:$4 sm:$0xff]   ;;  %vm516_vm3 = vcmask 285696  }
   0xf   :  { %301 = vmatpush1.bf16.msra.mxu1 %v8319_v9  ;;  %v8344_v29 = vld [vmem:[%s10956_s3 + $0xb0] ss:$12 sps:$4 sm:$0xff]   ;;  %v8342_v30 = vld [vmem:[%s10957_s0 + $0x20] ss:$0 sps:$4 sm:$0x77]   ;;  %vm4237_vm5 = vcmask 1042432  }
  0x10   :  { %302 = vmatprep.subr.bf16.mxu1 %v8320_v10  ;;  %v8723_v54 = vld [vmem:[%s10958_s2 + $0x38] sm:$0xff]   ;;  %v8734_v7 = vld [vmem:[%s10958_s2 + $0x40] sm:$0xff]   ;;  %vm987_vm4 = vsmask.f32 6400 }
  0x13   :  { %303 = vmatpush1.bf16.msra.mxu1 %v8322_v11 }
  0x14   :  { %304 = vmatprep.subr.bf16.mxu1 %v8323_v12 }
  0x17   :  { %305 = vmatpush1.bf16.msra.mxu1 %v8325_v13 }
  0x18   :  { %306 = vmatprep.subr.bf16.mxu1 %v8326_v14 }
  0x1b   :  { %307 = vmatpush1.bf16.msra.mxu1 %v8328_v15 }
  0x1c   :  { %308 = vmatprep.subr.bf16.mxu1 %v8329_v16 }
  0x1f   :  { %309 = vmatpush1.bf16.msra.mxu1 %v8331_v17 }
  0x20   :  { %7086 = vmatprep.subr.bf16.mxu1 %v8492_v2 }
  0x22   :  { %327 = vmatmul.mubr.bf16.vlgmr.msra.gmra.mrb[0].mxu1 %v8332_v18 }
  0x23   :  { %336 = vmatprep.mubr.bf16.mxu1 %v8491_v1  ;;  %7087 = vmatpush3.bf16.msra.mxu1 %v8334_v19 }
  0x24   :  { %7088 = vmatprep.subr.bf16.mxu1 %v8492_v2 }
  0x27   :  { %7089 = vmatpush3.bf16.msra.mxu1 %v8335_v20 }
  0x28   :  { %7090 = vmatprep.subr.bf16.mxu1 %v8492_v2 }
  0x2a   :  { %337 = vmatmul.mubr.bf16.gmra.mrb[4].mxu1 %v8333_v21 }
  0x2b   :  { %346 = vmatprep.mubr.bf16.mxu1 %v8491_v1  ;;  %7091 = vmatpush3.bf16.msra.mxu1 %v8337_v22 }
  0x2c   :  { %7092 = vmatprep.subr.bf16.mxu1 %v8492_v2 }
  0x2f   :  { %7093 = vmatpush3.bf16.msra.mxu1 %v8338_v23 }
  0x30   :  { %7094 = vmatprep.subr.bf16.mxu1 %v8492_v2 }
  0x32   :  { %347 = vmatmul.mubr.bf16.gmra.mrb[8].mxu1 %v8336_v24 }
  0x33   :  { %356 = vmatprep.mubr.bf16.mxu1 %v8491_v1  ;;  %7095 = vmatpush3.bf16.msra.mxu1 %v8340_v25 }
  0x34   :  { %7096 = vmatprep.subr.bf16.mxu1 %v8492_v2 }
  0x37   :  { %7097 = vmatpush3.bf16.msra.mxu1 %v8341_v26 }
  0x38   :  { %7098 = vmatprep.subr.bf16.mxu1 %v8492_v2 }
  0x3a   :  { %357 = vmatmul.mubr.bf16.gmra.mrb[12].mxu1 %v8339_v27 }
  0x3b   :  { %366 = vmatprep.mubr.bf16.mxu1 %v8491_v1  ;;  %7099 = vmatpush3.bf16.msra.mxu1 %v8343_v28 }
  0x3c   :  { %7100 = vmatprep.subr.bf16.mxu1 %v8492_v2 }
  0x3f   :  { %7101 = vmatpush3.bf16.msra.mxu1 %v8344_v29 }
  0x40   :  { %7122 = vmatprep.subr.bf16.mxu1 %v8492_v2 }
  0x42   :  { %367 = vmatmul.mubr.bf16.gmra.mrb[16].mxu1 %v8342_v30 }
  0x43   :  { %7102 = vmatprep.mubr.msk.bf16.mxu1 %vm8493_vm0, %v8492_v2 }
  0x4a   :  { %7103 = vmatmul.mubr.bf16.vlgmr.msra.gmra.mrb[20].mxu1 %v8332_v18 }
  0x4b   :  { %7106 = vmatprep.mubr.msk.bf16.mxu1 %vm8493_vm0, %v8492_v2 }
  0x52   :  { %7107 = vmatmul.mubr.bf16.gmra.mrb[24].mxu1 %v8333_v21 }
  0x53   :  { %7110 = vmatprep.mubr.msk.bf16.mxu1 %vm8493_vm0, %v8492_v2 }
  0x5a   :  { %7111 = vmatmul.mubr.bf16.gmra.mrb[28].mxu1 %v8336_v24 }
  0x5b   :  { %7114 = vmatprep.mubr.msk.bf16.mxu1 %vm8493_vm0, %v8492_v2 }
  0x62   :  { %7115 = vmatmul.mubr.bf16.gmra.mrb[32].mxu1 %v8339_v27 }
  0x63   :  { %7118 = vmatprep.mubr.msk.bf16.mxu1 %vm8493_vm0, %v8492_v2 }
  0x6a   :  { %7119 = vmatmul.mubr.bf16.gmra.mrb[36].mxu1 %v8342_v30 }
  0x6b   :  { %7128 = vmatprep.mubr.msk.bf16.mxu1 %vm8493_vm0, %v8492_v2 }
  0xf5   :  { %v328_v31 = vpop.f32.mrb[0].mxu1 }
  0xf6   :  { %v330_v32 = vpop.f32.mrb[1].mxu1 }
  0xf7   :  { %v332_v33 = vpop.f32.mrb[2].mxu1 }
  0xf8   :  { %v475_v34 = vpack.c.bf16 %v332_v33, %v328_v31  ;;  %v334_v35 = vpop.f32.mrb[3].mxu1  ;;  %v8750_v33 = vld [vmem:[%s10958_s2 + $0x48] sm:$0xff]  }
  0xf9   :  { %v478_v36 = vpack.c.bf16 %v334_v35, %v330_v32 }
  0xfb   :  { %7123 = vmatpush3.bf16.msra.mxu1 %v478_v36 }
  0xfc   :  { %7124 = vmatprep.subr.bf16.mxu1 %v8492_v2 }
  0xfd   :  { %v338_v37 = vpop.f32.mrb[4].mxu1 }
  0xfe   :  { %v340_v38 = vpop.f32.mrb[5].mxu1 }
  0xff   :  { %v342_v39 = vpop.f32.mrb[6].mxu1 }
 0x100   :  { %v476_v40 = vpack.c.bf16 %v342_v39, %v338_v37  ;;  %v344_v41 = vpop.f32.mrb[7].mxu1 }
 0x101   :  { %v479_v42 = vpack.c.bf16 %v344_v41, %v340_v38 }
 0x103   :  { %7125 = vmatpush3.bf16.msra.mxu1 %v479_v42 }
 0x104   :  { %7126 = vmatprep.subr.bf16.mxu1 %v8492_v2 }
 0x105   :  { %v348_v45 = vpop.f32.mrb[8].mxu1 }
 0x106   :  { %v350_v47 = vpop.f32.mrb[9].mxu1  ;;  %v477_v0 = vpack.c.bf16 %v348_v45, %v348_v45 }
 0x107   :  { %v480_v48 = vpack.c.bf16 %v350_v47, %v350_v47  ;;  %v352_v49 = vpop.f32.mrb[10].mxu1 }
 0x108   :  { %v981_v50 = vpack.c.bf16 %v352_v49, %v348_v45  ;;  %v354_v51 = vpop.f32.mrb[11].mxu1  ;;  %v691_v14 = vand.u32 %v8717_v46, %v477_v0  ;;  %v8773_v49 = vld [vmem:[%s10958_s2 + $0x50] sm:$0xff]  }
 0x109   :  { %v543_v52 = vand.u32 %v8717_v46, %v480_v48  ;;  %v984_v53 = vpack.c.bf16 %v354_v51, %v350_v47  ;;  %v8800_v0 = vld [vmem:[%s10958_s2 + $0x70] sm:$0xff]  }
 0x10a   :  { %v1109_v56 = vshrl.u32 %v981_v50, 16  ;;  %v1112_v57 = vshll.u32 %v981_v50, 16 }
 0x10b   :  { %7127 = vmatpush3.bf16.msra.mxu1 %v543_v52  ;;  %v989_v59 = vshrl.u32 %v984_v53, 16  ;;  %v992_v60 = vshll.u32 %v984_v53, 16 }
 0x10c   :  { %7156 = vmatprep.subr.bf16.mxu1 %v8492_v2  ;;  %v1111_v3 = vrot.slane %v1109_v56, 1  ;;  %v1114_v4 = vrot.slane %v1112_v57, 2  ;;  %v8786_v56 = vld [vmem:[%s10958_s2 + $0x58] sm:$0xff]  }
 0x10d   :  { %v358_v55 = vpop.f32.mrb[12].mxu1  ;;  %v991_v8 = vrot.slane %v989_v59, 1  ;;  %v994_v9 = vrot.slane %v992_v60, 2 }
 0x10e   :  { %v360_v58 = vpop.f32.mrb[13].mxu1  ;;  %7129 = vmatmul.mubr.msk.bf16.vlgmr.msra.gmra.mrb[40].mxu1 %vm516_vm3, %v8723_v54  ;;  %v1115_v18 = vor.u32 %v1114_v4, %v1111_v3 }
 0x10f   :  { %v362_v61 = vpop.f32.mrb[14].mxu1  ;;  %7157 = vmatpush3.bf16.msra.mxu1 %v475_v34  ;;  %7132 = vmatprep.mubr.msk.bf16.mxu1 %vm8493_vm0, %v8492_v2  ;;  %v995_v22 = vor.u32 %v994_v9, %v991_v8 }
 0x110   :  { %v982_v62 = vpack.c.bf16 %v362_v61, %v358_v55  ;;  %v364_v63 = vpop.f32.mrb[15].mxu1  ;;  %7158 = vmatprep.subr.bf16.mxu1 %v8492_v2 }
 0x111   :  { %v985_v1 = vpack.c.bf16 %v364_v63, %v360_v58 }
 0x112   :  { %v1117_v5 = vshrl.u32 %v982_v62, 16  ;;  %v1120_v6 = vshll.u32 %v982_v62, 16 }
 0x113   :  { %v997_v10 = vshrl.u32 %v985_v1, 16  ;;  %v1000_v11 = vshll.u32 %v985_v1, 16  ;;  %7159 = vmatpush3.bf16.msra.mxu1 %v476_v40  ;;  %v8806_v1 = vld [vmem:[%s10958_s2 + $0x60] sm:$0xff]  }
 0x114   :  { %v1119_v12 = vrot.slane %v1117_v5, 1  ;;  %v1122_v13 = vrot.slane %v1120_v6, 2  ;;  %7160 = vmatprep.subr.bf16.mxu1 %v8492_v2 }
 0x115   :  { %v999_v15 = vrot.slane %v997_v10, 1  ;;  %v1002_v16 = vrot.slane %v1000_v11, 2  ;;  %v368_v17 = vpop.f32.mrb[16].mxu1 }
 0x116   :  { %v1123_v19 = vor.u32 %v1122_v13, %v1119_v12  ;;  %7133 = vmatmul.mubr.msk.bf16.gmra.mrb[44].mxu1 %vm516_vm3, %v8734_v7  ;;  %v983_v20 = vpack.c.bf16 %v368_v17, %v368_v17  ;;  %v370_v21 = vpop.f32.mrb[17].mxu1  ;;  %v8821_v13 = vld [vmem:[%s10958_s2 + $0x78] sm:$0xff]  }
 0x117   :  { %v1003_v23 = vor.u32 %v1002_v16, %v999_v15  ;;  %7161 = vmatpush3.bf16.msra.mxu1 %v691_v14  ;;  %7136 = vmatprep.mubr.msk.bf16.mxu1 %vm8493_vm0, %v8492_v2  ;;  %v986_v24 = vpack.c.bf16 %v370_v21, %v370_v21  ;;  %v372_v25 = vpop.f32.mrb[18].mxu1  ;;  %v8826_v14 = vld [vmem:[%s10958_s2 + $0x68] sm:$0x1f]  }
 0x118   :  { %v1126_v26 = vshrl.u32 %v983_v20, 16  ;;  %v1129_v27 = vshll.u32 %v983_v20, 16  ;;  %v373_v28 = vpop.f32.mrb[19].mxu1  ;;  %v1124_v29 = vsel %vm987_vm4, %v1115_v18, %v1123_v19  ;;  %7986 = vmatprep.subr.bf16.mxu1 %v8492_v2 }
 0x119   :  { %v1006_v30 = vshrl.u32 %v986_v24, 16  ;;  %v1009_v31 = vshll.u32 %v986_v24, 16  ;;  %v8745_v32 = vsel %vm987_vm4, %v995_v22, %v1003_v23 }
 0x11a   :  { %v1128_v34 = vrot.slane %v1126_v26, 1  ;;  %v1131_v35 = vrot.slane %v1129_v27, 2 }
 0x11b   :  { %v1008_v36 = vrot.slane %v1006_v30, 1  ;;  %v1011_v37 = vrot.slane %v1009_v31, 2  ;;  %v8845_v30 = vld [vmem:[%s10958_s2 + $0x80] sm:$0xff]  }
 0x11c   :  { %v8752_v38 = vor.u32 %v1131_v35, %v1128_v34  ;;  %v8353_v31 = vld [vmem:[%s10958_s2] sm:$0xff]  }
 0x11d   :  { %v8754_v39 = vor.u32 %v1011_v37, %v1008_v36  ;;  %v409_v40 = vpop.f32.mrb[20].mxu1 }
 0x11e   :  { %7137 = vmatmul.mubr.msk.bf16.gmra.mrb[48].mxu1 %vm516_vm3, %v8750_v33  ;;  %v7104_v41 = vpop.f32.mrb[21].mxu1  ;;  %v1133_v42 = vsel %vm987_vm4, %v1123_v19, %v8752_v38  ;;  %v1137_v17 = vand.u32 %v8752_v38, %v8717_v46 }
 0x11f   :  { %v1017_v43 = vand.u32 %v8754_v39, %v8717_v46  ;;  %7140 = vmatprep.mubr.msk.bf16.mxu1 %vm8493_vm0, %v8492_v2  ;;  %v412_v44 = vpop.f32.mrb[22].mxu1  ;;  %v8766_v45 = vsel %vm987_vm4, %v1003_v23, %v8754_v39  ;;  %v8356_v41 = vld [vmem:[%s10958_s2 + $0x10] sm:$0xff]  }
 0x120   :  { %v8768_v47 = vpack.c.bf16 %v412_v44, %v409_v40  ;;  %v7105_v48 = vpop.f32.mrb[23].mxu1  ;;  %v8354_v40 = vld [vmem:[%s10958_s2 + $0x8] sm:$0xff]   ;;  %v8358_v44 = vld [vmem:[%s10958_s2 + $0x18] sm:$0xff]  }
 0x121   :  { %v8368_v48 = vld [vmem:[%s10959_s6 + $0x10] sm:$0xff]  }
 0x122   :  { %7191 = vmatpush3.bf16.msra.mxu0 %v8768_v47 }
 0x123   :  { %7192 = vmatprep.subr.bf16.mxu0 %v8492_v2 }
 0x125   :  { %v417_v50 = vpop.f32.mrb[24].mxu1 }
 0x126   :  { %7141 = vmatmul.mubr.msk.bf16.gmra.mrb[52].mxu1 %vm516_vm3, %v8773_v49  ;;  %v7108_v51 = vpop.f32.mrb[25].mxu1 }
 0x127   :  { %v420_v52 = vpop.f32.mrb[26].mxu1  ;;  %7144 = vmatprep.mubr.msk.bf16.mxu1 %vm8493_vm0, %v8492_v2  ;;  %v8369_v51 = vld [vmem:[%s10959_s6 + $0x18] sm:$0xff]  }
 0x128   :  { %v8781_v53 = vpack.c.bf16 %v420_v52, %v417_v50  ;;  %v7109_v55 = vpop.f32.mrb[27].mxu1  ;;  %v8359_v50 = vld [vmem:[%s10958_s2 + $0x20] sm:$0xff]  }
 0x129   :  { %v8370_v52 = vld [vmem:[%s10959_s6 + $0x20] sm:$0xff]   ;;  %v8371_v55 = vld [vmem:[%s10959_s6 + $0x28] sm:$0xff]  }
 0x12a   :  { %7193 = vmatpush3.bf16.msra.mxu0 %v8781_v53 }
 0x12b   :  { %7194 = vmatprep.subr.bf16.mxu0 %v8492_v2 }
 0x12d   :  { %v425_v57 = vpop.f32.mrb[28].mxu1 }
 0x12e   :  { %v784_v58 = vpack.c.bf16 %v425_v57, %v425_v57  ;;  %7145 = vmatmul.mubr.msk.bf16.gmra.mrb[56].mxu1 %vm516_vm3, %v8786_v56  ;;  %v7112_v59 = vpop.f32.mrb[29].mxu1 }
 0x12f   :  { %7148 = vmatprep.mubr.msk.bf16.mxu1 %vm8493_vm0, %v8492_v2  ;;  %v428_v60 = vpop.f32.mrb[30].mxu1  ;;  %v8373_v59 = vld [vmem:[%s10959_s6 + $0x38] sm:$0xff]  }
 0x130   :  { %v8795_v61 = vand.u32 %v784_v58, %v8717_v46  ;;  %v1228_v62 = vpack.c.bf16 %v428_v60, %v425_v57  ;;  %v7113_v63 = vpop.f32.mrb[31].mxu1  ;;  %v8372_v57 = vld [vmem:[%s10959_s6 + $0x30] sm:$0xff]   ;;  %v1450_v60 = vld [vmem:[%s10960_s1] sm:$0xff] }
 0x131   :  { %v8361_v58 = vld [vmem:[%s10958_s2 + $0x30] sm:$0x1f]  }
 0x132   :  { %7195 = vmatpush3.bf16.msra.mxu0 %v8795_v61  ;;  %v1232_v3 = vshrl.u32 %v1228_v62, 16  ;;  %v1235_v4 = vshll.u32 %v1228_v62, 16  ;;  %v8958_v62 = vld [vmem:[%s10958_s2 + $0x88] sm:$0xff]  }
 0x133   :  { %7258 = vmatprep.subr.bf16.mxu0 %v8492_v2 }
 0x134   :  { %v1234_v9 = vrot.slane %v1232_v3, 1  ;;  %v1237_v10 = vrot.slane %v1235_v4, 2  ;;  %v1453_v3 = vld [vmem:[%s10960_s1 + $0x18] sm:$0xff]  ;;  %v8970_v4 = vld [vmem:[#allocation2] sm:$0xff] }
 0x135   :  { %7197 = vmatmul.mubr.msk.bf16.vlgmr.msra.gmra.mrb[0].mxu0 %vm516_vm3, %v8800_v0  ;;  %v433_v5 = vpop.f32.mrb[32].mxu1 }
 0x136   :  { %7149 = vmatmul.mubr.msk.bf16.gmra.mrb[60].mxu1 %vm516_vm3, %v8806_v1  ;;  %7259 = vmatpush3.bf16.msra.mxu0 %v1124_v29  ;;  %v7116_v6 = vpop.f32.mrb[33].mxu1  ;;  %v1238_v18 = vor.u32 %v1237_v10, %v1234_v9  ;;  %v1456_v10 = vld [vmem:[%s10960_s1 + $0x30] sm:$0xff] }
 0x137   :  { %7152 = vmatprep.mubr.msk.bf16.mxu1 %vm8493_vm0, %v8492_v2  ;;  %7200 = vmatprep.mubr.msk.bf16.mxu0 %vm8493_vm0, %v8492_v2  ;;  %v436_v8 = vpop.f32.mrb[34].mxu1  ;;  %v1455_v6 = vld [vmem:[%s10960_s1 + $0x28] sm:$0xff] }
 0x138   :  { %7260 = vmatprep.subr.bf16.mxu0 %v8492_v2  ;;  %v1229_v11 = vpack.c.bf16 %v436_v8, %v433_v5  ;;  %v7117_v12 = vpop.f32.mrb[35].mxu1  ;;  %v1454_v5 = vld [vmem:[%s10960_s1 + $0x20] sm:$0xff] }
 0x139   :  { %v1479_v9 = vpack.c.bf16 %v1455_v6, %v1454_v5  ;;  %v1459_v12 = vld [vmem:[%s10960_s1 + $0x48] sm:$0xff] }
 0x13a   :  { %7261 = vmatpush3.bf16.msra.mxu0 %v1133_v42  ;;  %v1240_v15 = vshrl.u32 %v1229_v11, 16  ;;  %v1243_v16 = vshll.u32 %v1229_v11, 16  ;;  %v8366_v42 = vld [vmem:[%s10959_s6] sm:$0xff]   ;;  %v1457_v11 = vld [vmem:[%s10960_s1 + $0x38] sm:$0xff] }
 0x13b   :  { %7262 = vmatprep.subr.bf16.mxu0 %v8492_v2 }
 0x13c   :  { %v1242_v19 = vrot.slane %v1240_v15, 1  ;;  %v1245_v20 = vrot.slane %v1243_v16, 2  ;;  %v1480_v15 = vpack.c.bf16 %v1457_v11, %v1456_v10  ;;  %v9011_v16 = vld [vmem:[%s10958_s2 + $0x98] sm:$0xff]  }
 0x13d   :  { %7201 = vmatmul.mubr.msk.bf16.gmra.mrb[4].mxu0 %vm516_vm3, %v8821_v13  ;;  %v441_v21 = vpop.f32.mrb[36].mxu1 }
 0x13e   :  { %7153 = vmatmul.mubr.msk.bf16.gmra.mrb[64].mxu1 %vm516_vm3, %v8826_v14  ;;  %7204 = vmatprep.mubr.msk.bf16.mxu0 %vm8493_vm0, %v8492_v2  ;;  %v1246_v22 = vor.u32 %v1245_v20, %v1242_v19  ;;  %v1230_v23 = vpack.c.bf16 %v441_v21, %v441_v21  ;;  %v7120_v24 = vpop.f32.mrb[37].mxu1  ;;  %v1463_v19 = vld [vmem:[%s10960_s1 + $0x68] sm:$0xff]  ;;  %v8374_v20 = vld [vmem:[%s10961_s5] sm:$0xff]  }
 0x13f   :  { %7162 = vmatprep.mubr.msk.bf16.mxu1 %vm8493_vm0, %v8492_v2  ;;  %7263 = vmatpush3.bf16.msra.mxu0 %v1137_v17  ;;  %v444_v25 = vpop.f32.mrb[38].mxu1  ;;  %v1461_v17 = vld [vmem:[%s10960_s1 + $0x58] sm:$0xff]  ;;  %v9035_v21 = vld [vmem:[%s10958_s2 + $0xa0] sm:$0x1f]   ;;  %v1464_v24 = vld [vmem:[%s10960_s1 + $0x70] sm:$0xff] }
 0x140   :  { %v8840_v26 = vsel %vm987_vm4, %v1238_v18, %v1246_v22  ;;  %v1249_v27 = vshrl.u32 %v1230_v23, 16  ;;  %v1252_v28 = vshll.u32 %v1230_v23, 16  ;;  %v7121_v29 = vpop.f32.mrb[39].mxu1  ;;  %7326 = vmatprep.subr.bf16.mxu0 %v8366_v42  ;;  %v1462_v18 = vld [vmem:[%s10960_s1 + $0x60] sm:$0xff]  ;;  %v1465_v25 = vld [vmem:[%s10960_s1 + $0x78] sm:$0xff] }
 0x141   :  { %v1483_v23 = vpack.c.bf16 %v1463_v19, %v1462_v18  ;;  %v1467_v29 = vld [vmem:[%s10960_s1 + $0x88] sm:$0xff] }
 0x142   :  { %v1251_v34 = vrot.slane %v1249_v27, 1  ;;  %v1254_v35 = vrot.slane %v1252_v28, 2  ;;  %v8375_v27 = vld [vmem:[%s10961_s5 + $0x8] sm:$0xff]   ;;  %v1466_v28 = vld [vmem:[%s10960_s1 + $0x80] sm:$0xff] }
 0x144   :  { %v8850_v36 = vor.u32 %v1254_v35, %v1251_v34  ;;  %v1485_v34 = vpack.c.bf16 %v1467_v29, %v1466_v28  ;;  %v8376_v35 = vld [vmem:[%s10961_s5 + $0x10] sm:$0xff]  }
 0x145   :  { %7205 = vmatmul.mubr.msk.bf16.gmra.mrb[8].mxu0 %vm516_vm3, %v8845_v30 }
 0x146   :  { %7163 = vmatmul.mubr.msk.bf16.vlgmr.msra.gmra.mrb[68].mxu1 %vm516_vm3, %v8353_v31  ;;  %v1260_v37 = vand.u32 %v8850_v36, %v8717_v46  ;;  %7264 = vmatprep.mubr.msk.bf16.mxu0 %vm8493_vm0, %v8492_v2  ;;  %v8861_v38 = vsel %vm987_vm4, %v1246_v22, %v8850_v36  ;;  %v8380_v46 = vld [vmem:[%s10961_s5 + $0x30] sm:$0xff]  }
 0x147   :  { %7166 = vmatprep.mubr.msk.bf16.mxu1 %vm8493_vm0, %v8492_v2  ;;  %7989 = vmatpush3.bf16.msra.mxu1 %v8768_v47  ;;  %v8367_v47 = vld [vmem:[%s10959_s6 + $0x8] sm:$0xff]   ;;  %v1476_v36 = vld [vmem:[%s10960_s1 + $0xd0] sm:$0x3f] }
 0x148   :  { %7987 = vmatprep.subr.bf16.mxu1 %v8492_v2 }
 0x14b   :  { %7990 = vmatpush3.bf16.msra.mxu1 %v8781_v53  ;;  %v8360_v53 = vld [vmem:[%s10958_s2 + $0x28] sm:$0xff]  }
 0x14c   :  { %7988 = vmatprep.subr.bf16.mxu1 %v8492_v2 }
 0x14d   :  { %7265 = vmatmul.mubr.msk.bf16.vlgmr.msra.gmra.mrb[12].mxu0 %vm516_vm3, %v8353_v31  ;;  %v1484_v31 = vpack.c.bf16 %v1465_v25, %v1464_v24 }
 0x14e   :  { %7167 = vmatmul.mubr.msk.bf16.gmra.mrb[72].mxu1 %vm516_vm3, %v8354_v40  ;;  %7268 = vmatprep.mubr.msk.bf16.mxu0 %vm8493_vm0, %v8492_v2 }
 0x14f   :  { %7170 = vmatprep.mubr.msk.bf16.mxu1 %vm8493_vm0, %v8492_v2  ;;  %7991 = vmatpush3.bf16.msra.mxu1 %v8795_v61  ;;  %v1451_v61 = vld [vmem:[%s10960_s1 + $0x8] sm:$0xff] }
 0x150   :  { %7224 = vmatprep.subr.bf16.mxu1 %v8492_v2  ;;  %7327 = vmatpush3.bf16.msra.mxu0 %v8366_v42  ;;  %v1477_v63 = vpack.c.bf16 %v1451_v61, %v1450_v60  ;;  %v8377_v42 = vld [vmem:[%s10961_s5 + $0x18] sm:$0xff]  }
 0x151   :  { %7328 = vmatprep.subr.bf16.mxu0 %v8367_v47 }
 0x154   :  { %7329 = vmatpush3.bf16.msra.mxu0 %v8367_v47 }
 0x155   :  { %7269 = vmatmul.mubr.msk.bf16.gmra.mrb[16].mxu0 %vm516_vm3, %v8354_v40  ;;  %7330 = vmatprep.subr.bf16.mxu0 %v8368_v48  ;;  %v1468_v40 = vld [vmem:[%s10960_s1 + $0x90] sm:$0xff] }
 0x156   :  { %7171 = vmatmul.mubr.msk.bf16.gmra.mrb[76].mxu1 %vm516_vm3, %v8356_v41  ;;  %7272 = vmatprep.mubr.msk.bf16.mxu0 %vm8493_vm0, %v8492_v2 }
 0x157   :  { %7174 = vmatprep.mubr.msk.bf16.mxu1 %vm8493_vm0, %v8492_v2 }
 0x158   :  { %7331 = vmatpush3.bf16.msra.mxu0 %v8368_v48  ;;  %v8378_v48 = vld [vmem:[%s10961_s5 + $0x20] sm:$0xff]  }
 0x159   :  { %7332 = vmatprep.subr.bf16.mxu0 %v8369_v51 }
 0x15c   :  { %7333 = vmatpush3.bf16.msra.mxu0 %v8369_v51  ;;  %v1473_v51 = vld [vmem:[%s10960_s1 + $0xb8] sm:$0xff] }
 0x15d   :  { %7273 = vmatmul.mubr.msk.bf16.gmra.mrb[20].mxu0 %vm516_vm3, %v8356_v41  ;;  %7334 = vmatprep.subr.bf16.mxu0 %v8370_v52  ;;  %v1469_v41 = vld [vmem:[%s10960_s1 + $0x98] sm:$0xff] }
 0x15e   :  { %7175 = vmatmul.mubr.msk.bf16.gmra.mrb[80].mxu1 %vm516_vm3, %v8358_v44  ;;  %7276 = vmatprep.mubr.msk.bf16.mxu0 %vm8493_vm0, %v8492_v2  ;;  %v1486_v47 = vpack.c.bf16 %v1469_v41, %v1468_v40 }
 0x15f   :  { %7178 = vmatprep.mubr.msk.bf16.mxu1 %vm8493_vm0, %v8492_v2 }
 0x160   :  { %7335 = vmatpush3.bf16.msra.mxu0 %v8370_v52  ;;  %v1474_v52 = vld [vmem:[%s10960_s1 + $0xc0] sm:$0xff] }
 0x161   :  { %7336 = vmatprep.subr.bf16.mxu0 %v8371_v55 }
 0x164   :  { %7337 = vmatpush3.bf16.msra.mxu0 %v8371_v55 }
 0x165   :  { %7277 = vmatmul.mubr.msk.bf16.gmra.mrb[24].mxu0 %vm516_vm3, %v8358_v44  ;;  %7338 = vmatprep.subr.bf16.mxu0 %v8372_v57  ;;  %v1470_v44 = vld [vmem:[%s10960_s1 + $0xa0] sm:$0xff] }
 0x166   :  { %7179 = vmatmul.mubr.msk.bf16.gmra.mrb[84].mxu1 %vm516_vm3, %v8359_v50  ;;  %7280 = vmatprep.mubr.msk.bf16.mxu0 %vm8493_vm0, %v8492_v2 }
 0x167   :  { %7182 = vmatprep.mubr.msk.bf16.mxu1 %vm8493_vm0, %v8492_v2 }
 0x168   :  { %7339 = vmatpush3.bf16.msra.mxu0 %v8372_v57  ;;  %v1490_v57 = vpack.c.bf16 %v1476_v36, %v1476_v36 }
 0x169   :  { %7340 = vmatprep.subr.bf16.mxu0 %v8373_v59 }
 0x16c   :  { %7341 = vmatpush3.bf16.msra.mxu0 %v8373_v59 }
 0x16d   :  { %7281 = vmatmul.mubr.msk.bf16.gmra.mrb[28].mxu0 %vm516_vm3, %v8359_v50  ;;  %7370 = vmatprep.subr.bf16.mxu0 %v8374_v20  ;;  %v1472_v50 = vld [vmem:[%s10960_s1 + $0xb0] sm:$0xff] }
 0x16e   :  { %7183 = vmatmul.mubr.msk.bf16.gmra.mrb[88].mxu1 %vm516_vm3, %v8360_v53  ;;  %7284 = vmatprep.mubr.msk.bf16.mxu0 %vm8493_vm0, %v8492_v2 }
 0x16f   :  { %7186 = vmatprep.mubr.msk.bf16.mxu1 %vm8493_vm0, %v8492_v2 }
 0x175   :  { %7285 = vmatmul.mubr.msk.bf16.gmra.mrb[32].mxu0 %vm516_vm3, %v8360_v53  ;;  %v1488_v53 = vpack.c.bf16 %v1473_v51, %v1472_v50 }
 0x176   :  { %7187 = vmatmul.mubr.msk.bf16.gmra.mrb[92].mxu1 %vm516_vm3, %v8361_v58  ;;  %7288 = vmatprep.mubr.msk.bf16.mxu0 %vm8493_vm0, %v8492_v2 }
 0x177   :  { %7208 = vmatprep.mubr.msk.bf16.mxu1 %vm8493_vm0, %v8492_v2  ;;  %v1452_v2 = vld [vmem:[%s10960_s1 + $0x10] sm:$0xff] }
 0x178   :  { %v1478_v8 = vpack.c.bf16 %v1453_v3, %v1452_v2 }
 0x17d   :  { %7289 = vmatmul.mubr.msk.bf16.gmra.mrb[36].mxu0 %vm516_vm3, %v8361_v58 }
 0x17e   :  { %7209 = vmatmul.mubr.msk.bf16.vlgmr.msra.gmra.mrb[96].mxu1 %vm516_vm3, %v8958_v62  ;;  %7342 = vmatprep.mubr.bf16.mxu0 %v1477_v63 }
 0x17f   :  { %7225 = vmatpush3.bf16.msra.mxu1 %v8745_v32  ;;  %7212 = vmatprep.mubr.msk.bf16.mxu1 %vm8493_vm0, %v8970_v4  ;;  %v8984_v32 = vld [vmem:[%s10958_s2 + $0x90] sm:$0xff]  }
 0x180   :  { %7226 = vmatprep.subr.bf16.mxu1 %v8970_v4 }
 0x183   :  { %7227 = vmatpush3.bf16.msra.mxu1 %v8766_v45  ;;  %v1458_v45 = vld [vmem:[%s10960_s1 + $0x40] sm:$0xff] }
 0x184   :  { %7228 = vmatprep.subr.bf16.mxu1 %v8970_v4  ;;  %v1481_v39 = vpack.c.bf16 %v1459_v12, %v1458_v45 }
 0x185   :  { %7343 = vmatmul.mubr.bf16.vlgmr.msra.gmra.mrb[40].mxu0 %v1478_v8 }
 0x186   :  { %7213 = vmatmul.mubr.msk.bf16.gmra.mrb[100].mxu1 %vm516_vm3, %v8984_v32  ;;  %7346 = vmatprep.mubr.bf16.mxu0 %v1479_v9 }
 0x187   :  { %7229 = vmatpush3.bf16.msra.mxu1 %v1017_v43  ;;  %7216 = vmatprep.mubr.msk.bf16.mxu1 %vm8493_vm0, %v8970_v4  ;;  %v1460_v43 = vld [vmem:[%s10960_s1 + $0x50] sm:$0xff] }
 0x188   :  { %7292 = vmatprep.subr.bf16.mxu1 %v8970_v4  ;;  %7371 = vmatpush3.bf16.msra.mxu0 %v8374_v20  ;;  %v1482_v22 = vpack.c.bf16 %v1461_v17, %v1460_v43 }
 0x189   :  { %7372 = vmatprep.subr.bf16.mxu0 %v8375_v27 }
 0x18c   :  { %7373 = vmatpush3.bf16.msra.mxu0 %v8375_v27 }
 0x18d   :  { %7347 = vmatmul.mubr.bf16.gmra.mrb[44].mxu0 %v1480_v15  ;;  %7374 = vmatprep.subr.bf16.mxu0 %v8376_v35 }
 0x18e   :  { %7217 = vmatmul.mubr.msk.bf16.gmra.mrb[104].mxu1 %vm516_vm3, %v9011_v16  ;;  %7350 = vmatprep.mubr.bf16.mxu0 %v1481_v39 }
 0x18f   :  { %7220 = vmatprep.mubr.msk.bf16.mxu1 %vm8493_vm0, %v8970_v4 }
 0x190   :  { %7375 = vmatpush3.bf16.msra.mxu0 %v8376_v35 }
 0x191   :  { %7376 = vmatprep.subr.bf16.mxu0 %v8377_v42 }
 0x194   :  { %7377 = vmatpush3.bf16.msra.mxu0 %v8377_v42 }
 0x195   :  { %7351 = vmatmul.mubr.bf16.gmra.mrb[48].mxu0 %v1482_v22  ;;  %7378 = vmatprep.subr.bf16.mxu0 %v8378_v48 }
 0x196   :  { %7221 = vmatmul.mubr.msk.bf16.gmra.mrb[108].mxu1 %vm516_vm3, %v9035_v21  ;;  %7354 = vmatprep.mubr.bf16.mxu0 %v1483_v23 }
 0x197   :  { %7230 = vmatprep.mubr.msk.bf16.mxu1 %vm8493_vm0, %v8970_v4 }
 0x198   :  { %7379 = vmatpush3.bf16.msra.mxu0 %v8378_v48 }
 0x19d   :  { %7355 = vmatmul.mubr.bf16.gmra.mrb[52].mxu0 %v1484_v31 }
 0x19e   :  { %7231 = vmatmul.mubr.msk.bf16.vlgmr.msra.gmra.mrb[112].mxu1 %vm516_vm3, %v8723_v54  ;;  %7358 = vmatprep.mubr.bf16.mxu0 %v1485_v34  ;;  %v1471_v54 = vld [vmem:[%s10960_s1 + $0xa8] sm:$0xff]  ;;  %v9187_v34 = vld [vmem:[%s10962_s4] ss:$0 sm:$0xff] }
 0x19f   :  { %7293 = vmatpush3.bf16.msra.mxu1 %v8840_v26  ;;  %7234 = vmatprep.mubr.msk.bf16.mxu1 %vm8493_vm0, %v8970_v4  ;;  %v1487_v26 = vpack.c.bf16 %v1471_v54, %v1470_v44 }
 0x1a0   :  { %7294 = vmatprep.subr.bf16.mxu1 %v8970_v4 }
 0x1a3   :  { %7295 = vmatpush3.bf16.msra.mxu1 %v8861_v38  ;;  %v8379_v38 = vld [vmem:[%s10961_s5 + $0x28] sm:$0xff]  }
 0x1a4   :  { %7296 = vmatprep.subr.bf16.mxu1 %v8970_v4  ;;  %7380 = vmatprep.subr.bf16.mxu0 %v8379_v38 }
 0x1a5   :  { %7359 = vmatmul.mubr.bf16.gmra.mrb[56].mxu0 %v1486_v47 }
 0x1a6   :  { %7235 = vmatmul.mubr.msk.bf16.gmra.mrb[116].mxu1 %vm516_vm3, %v8734_v7  ;;  %7362 = vmatprep.mubr.bf16.mxu0 %v1487_v26  ;;  %v1475_v7 = vld [vmem:[%s10960_s1 + $0xc8] sm:$0xff] }
 0x1a7   :  { %7238 = vmatprep.mubr.msk.bf16.mxu1 %vm8493_vm0, %v8970_v4  ;;  %7297 = vmatpush3.bf16.msra.mxu1 %v1260_v37  ;;  %v1489_v55 = vpack.c.bf16 %v1475_v7, %v1474_v52  ;;  %v8381_v37 = vld [vmem:[%s10961_s5 + $0x38] sm:$0xff]  }
 0x1a8   :  { %7381 = vmatpush3.bf16.msra.mxu0 %v8379_v38 }
 0x1a9   :  { %7382 = vmatprep.subr.bf16.mxu0 %v8380_v46 }
 0x1ac   :  { %7383 = vmatpush3.bf16.msra.mxu0 %v8380_v46 }
 0x1ad   :  { %7363 = vmatmul.mubr.bf16.gmra.mrb[60].mxu0 %v1488_v53  ;;  %7384 = vmatprep.subr.bf16.mxu0 %v8381_v37 }
 0x1ae   :  { %7239 = vmatmul.mubr.msk.bf16.gmra.mrb[120].mxu1 %vm516_vm3, %v8750_v33  ;;  %7366 = vmatprep.mubr.bf16.mxu0 %v1489_v55 }
 0x1af   :  { %7242 = vmatprep.mubr.msk.bf16.mxu1 %vm8493_vm0, %v8970_v4 }
 0x1b0   :  { %7385 = vmatpush3.bf16.msra.mxu0 %v8381_v37 }
 0x1b5   :  { %7367 = vmatmul.mubr.bf16.gmra.mrb[64].mxu0 %v1490_v57 }
 0x1b6   :  { %7243 = vmatmul.mubr.msk.bf16.gmra.mrb[124].mxu1 %vm516_vm3, %v8773_v49 }
 0x1b7   :  { %7246 = vmatprep.mubr.msk.bf16.mxu1 %vm8493_vm0, %v8970_v4 }
 0x1be   :  { %7247 = vmatmul.mubr.msk.bf16.gmra.mrb[128].mxu1 %vm516_vm3, %v8786_v56 }
 0x1bf   :  { %7250 = vmatprep.mubr.msk.bf16.mxu1 %vm8493_vm0, %v8970_v4 }
 0x1c6   :  { %7251 = vmatmul.mubr.msk.bf16.gmra.mrb[132].mxu1 %vm516_vm3, %v8806_v1 }
 0x1c7   :  { %7254 = vmatprep.mubr.msk.bf16.mxu1 %vm8493_vm0, %v8970_v4 }
 0x1ce   :  { %7255 = vmatmul.mubr.msk.bf16.gmra.mrb[136].mxu1 %vm516_vm3, %v8826_v14 }
 0x1cf   :  { %7298 = vmatprep.mubr.msk.bf16.mxu1 %vm8493_vm0, %v8970_v4 }
 0x1d6   :  { %7299 = vmatmul.mubr.msk.bf16.vlgmr.msra.gmra.mrb[140].mxu1 %vm516_vm3, %v8800_v0 }
 0x1d7   :  { %7302 = vmatprep.mubr.msk.bf16.mxu1 %vm8493_vm0, %v8970_v4 }
 0x1de   :  { %7303 = vmatmul.mubr.msk.bf16.gmra.mrb[144].mxu1 %vm516_vm3, %v8821_v13 }
 0x1df   :  { %7306 = vmatprep.mubr.msk.bf16.mxu1 %vm8493_vm0, %v8970_v4 }
 0x1e1   :  { %v579_v33 = vpop.f32.mrb[40].mxu1 }
 0x1e2   :  { %v7130_v49 = vpop.f32.mrb[41].mxu1 }
 0x1e3   :  { %v582_v56 = vpop.f32.mrb[42].mxu1 }
 0x1e4   :  { %v7131_v1 = vpop.f32.mrb[43].mxu1 }
 0x1e6   :  { %7307 = vmatmul.mubr.msk.bf16.gmra.mrb[148].mxu1 %vm516_vm3, %v8845_v30 }
 0x1e7   :  { %7310 = vmatprep.mubr.msk.bf16.mxu1 %vm8493_vm0, %v8970_v4 }
 0x1e9   :  { %v587_v0 = vpop.f32.mrb[44].mxu1 }
 0x1ea   :  { %v7134_v14 = vpop.f32.mrb[45].mxu1 }
 0x1eb   :  { %v9148_v58 = vpop.f32.mrb[46].mxu1 }
 0x1ec   :  { %v7135_v59 = vpop.f32.mrb[47].mxu1 }
 0x1ee   :  { %7311 = vmatmul.mubr.msk.bf16.gmra.mrb[152].mxu1 %vm516_vm3, %v8958_v62 }
 0x1ef   :  { %7314 = vmatprep.mubr.msk.bf16.mxu1 %vm8493_vm0, %v8970_v4 }
 0x1f1   :  { %v9154_v13 = vpop.f32.mrb[48].mxu1 }
 0x1f2   :  { %v7138_v60 = vpop.f32.mrb[49].mxu1 }
 0x1f3   :  { %v9156_v61 = vpop.f32.mrb[50].mxu1 }
 0x1f4   :  { %v7139_v30 = vpop.f32.mrb[51].mxu1 }
 0x1f6   :  { %7315 = vmatmul.mubr.msk.bf16.gmra.mrb[156].mxu1 %vm516_vm3, %v8984_v32 }
 0x1f7   :  { %7318 = vmatprep.mubr.msk.bf16.mxu1 %vm8493_vm0, %v8970_v4 }
 0x1f9   :  { %v9162_v63 = vpop.f32.mrb[52].mxu1 }
 0x1fa   :  { %v7142_v2 = vpop.f32.mrb[53].mxu1 }
 0x1fb   :  { %v9164_v3 = vpop.f32.mrb[54].mxu1 }
 0x1fc   :  { %v7143_v62 = vpop.f32.mrb[55].mxu1 }
 0x1fe   :  { %7319 = vmatmul.mubr.msk.bf16.gmra.mrb[160].mxu1 %vm516_vm3, %v9011_v16 }
 0x1ff   :  { %7322 = vmatprep.mubr.msk.bf16.mxu1 %vm8493_vm0, %v8970_v4 }
 0x201   :  { %v9170_v5 = vpop.f32.mrb[56].mxu1 }
 0x202   :  { %v7146_v6 = vpop.f32.mrb[57].mxu1 }
 0x203   :  { %v9172_v8 = vpop.f32.mrb[58].mxu1 }
 0x204   :  { %v7147_v32 = vpop.f32.mrb[59].mxu1 }
 0x206   :  { %7323 = vmatmul.mubr.msk.bf16.gmra.mrb[164].mxu1 %vm516_vm3, %v9035_v21 }
 0x208   :  { %v878_v9 = vpop.f32.mrb[0].mxu0 }
 0x209   :  { %v9176_v10 = vpop.f32.mrb[60].mxu1  ;;  %v7198_v11 = vpop.f32.mrb[1].mxu0 }
 0x20a   :  { %v7150_v45 = vpop.f32.mrb[61].mxu1  ;;  %v881_v12 = vpop.f32.mrb[2].mxu0 }
 0x20b   :  { %v9178_v15 = vpop.f32.mrb[62].mxu1  ;;  %v7199_v16 = vpop.f32.mrb[3].mxu0 }
 0x20c   :  { %v7151_v39 = vpop.f32.mrb[63].mxu1 }
 0x210   :  { %v886_v4 = vpop.f32.mrb[4].mxu0 }
 0x211   :  { %v9180_v43 = vpop.f32.mrb[64].mxu1  ;;  %v7202_v17 = vpop.f32.mrb[5].mxu0 }
 0x212   :  { %v7154_v18 = vpop.f32.mrb[65].mxu1  ;;  %v889_v19 = vpop.f32.mrb[6].mxu0 }
 0x213   :  { %v9182_v20 = vpop.f32.mrb[66].mxu1  ;;  %v7203_v22 = vpop.f32.mrb[7].mxu0 }
 0x214   :  { %v7155_v21 = vpop.f32.mrb[67].mxu1 }
 0x218   :  { %v894_v23 = vpop.f32.mrb[8].mxu0 }
 0x219   :  { %v727_v24 = vpop.f32.mrb[68].mxu1  ;;  %v7206_v25 = vpop.f32.mrb[9].mxu0 }
 0x21a   :  { %v728_v27 = vadd.f32 %v727_v24, %v579_v33  ;;  %v7164_v28 = vpop.f32.mrb[69].mxu1  ;;  %v897_v29 = vpop.f32.mrb[10].mxu0 }
 0x21b   :  { %v730_v31 = vpop.f32.mrb[70].mxu1  ;;  %v7207_v35 = vpop.f32.mrb[11].mxu0 }
 0x21c   :  { %v731_v40 = vadd.f32 %v730_v31, %v582_v56  ;;  %v933_v41 = vadd.f32 %v878_v9, %v728_v27  ;;  %v7165_v42 = vpop.f32.mrb[71].mxu1 }
 0x21e   :  { %v953_v44 = vadd.f32 %v9187_v34, %v933_v41  ;;  %v934_v54 = vadd.f32 %v881_v12, %v731_v40 }
 0x220   :  { %967 = vst [vmem:[#allocation2 + $0x2] sm:$0xff] %v953_v44  ;;  %v954_v47 = vadd.f32 %v9187_v34, %v934_v54  ;;  %v9191_v26 = vpop.f32.mrb[12].mxu0 }
 0x221   :  { %v735_v48 = vpop.f32.mrb[72].mxu1  ;;  %v7266_v50 = vpop.f32.mrb[13].mxu0 }
 0x222   :  { %968 = vst [vmem:[#allocation2 + $0xa] sm:$0xff] %v954_v47  ;;  %v736_v51 = vadd.f32 %v735_v48, %v587_v0  ;;  %v7168_v38 = vpop.f32.mrb[73].mxu1  ;;  %v9193_v52 = vpop.f32.mrb[14].mxu0 }
 0x223   :  { %v738_v7 = vpop.f32.mrb[74].mxu1  ;;  %v7267_v53 = vpop.f32.mrb[15].mxu0 }
 0x224   :  { %v739_v55 = vadd.f32 %v738_v7, %v9148_v58  ;;  %v935_v46 = vadd.f32 %v886_v4, %v736_v51  ;;  %v7169_v36 = vpop.f32.mrb[75].mxu1 }
 0x226   :  { %v955_v37 = vadd.f32 %v9187_v34, %v935_v46  ;;  %v936_v57 = vadd.f32 %v889_v19, %v739_v55 }
 0x227   :  { %v1393_v1 = vld [vmem:[#allocation2] sm:$0xff] }
 0x228   :  { %969 = vst [vmem:[#allocation2 + $0x12] sm:$0xff] %v955_v37  ;;  %v956_v33 = vadd.f32 %v9187_v34, %v936_v57  ;;  %v9198_v49 = vpop.f32.mrb[16].mxu0 }
 0x229   :  { %v743_v56 = vpop.f32.mrb[76].mxu1  ;;  %v1394_v0 = vld [vmem:[#allocation2 + $0x8] sm:$0xff]  ;;  %v7270_v14 = vpop.f32.mrb[17].mxu0 }
 0x22a   :  { %970 = vst [vmem:[#allocation2 + $0x1a] sm:$0xff] %v956_v33  ;;  %v744_v59 = vadd.f32 %v743_v56, %v9154_v13  ;;  %v7172_v60 = vpop.f32.mrb[77].mxu1  ;;  %v1420_v30 = vpack.c.bf16 %v1394_v0, %v1393_v1  ;;  %v9201_v58 = vpop.f32.mrb[18].mxu0 }
 0x22b   :  { %v746_v2 = vpop.f32.mrb[78].mxu1  ;;  %v7271_v62 = vpop.f32.mrb[19].mxu0 }
 0x22c   :  { %v747_v6 = vadd.f32 %v746_v2, %v9156_v61  ;;  %v937_v32 = vadd.f32 %v894_v23, %v744_v59  ;;  %7386 = vmatprep.mubr.bf16.mxu0 %v1420_v30  ;;  %v7173_v9 = vpop.f32.mrb[79].mxu1 }
 0x22e   :  { %v957_v11 = vadd.f32 %v9187_v34, %v937_v32  ;;  %v938_v45 = vadd.f32 %v897_v29, %v747_v6 }
 0x22f   :  { %v1395_v39 = vld [vmem:[#allocation2 + $0x10] sm:$0xff] }
 0x230   :  { %971 = vst [vmem:[#allocation2 + $0x22] sm:$0xff] %v957_v11  ;;  %v9206_v12 = vadd.f32 %v9187_v34, %v938_v45  ;;  %v9208_v16 = vpop.f32.mrb[20].mxu0 }
 0x231   :  { %v751_v13 = vpop.f32.mrb[80].mxu1  ;;  %v1396_v4 = vld [vmem:[#allocation2 + $0x18] sm:$0xff]  ;;  %v7274_v17 = vpop.f32.mrb[21].mxu0 }
 0x232   :  { %972 = vst [vmem:[#allocation2 + $0x2a] sm:$0xff] %v9206_v12  ;;  %v752_v61 = vadd.f32 %v751_v13, %v9162_v63  ;;  %v7176_v18 = vpop.f32.mrb[81].mxu1  ;;  %v1421_v19 = vpack.c.bf16 %v1396_v4, %v1395_v39  ;;  %v9212_v22 = vpop.f32.mrb[22].mxu0  ;;  %v8383_v13 = vld [vmem:[%s10961_s5 + $0x48] sm:$0xff]   ;;  %v8384_v4 = vld [vmem:[%s10961_s5 + $0x50] sm:$0xff]  }
 0x233   :  { %v754_v21 = vpop.f32.mrb[82].mxu1  ;;  %v7275_v23 = vpop.f32.mrb[23].mxu0 }
 0x234   :  { %v755_v24 = vadd.f32 %v754_v21, %v9164_v3  ;;  %7387 = vmatmul.mubr.bf16.vlgmr.msra.gmra.mrb[40].mxu0 %v1421_v19  ;;  %v7177_v25 = vpop.f32.mrb[83].mxu1 }
 0x237   :  { %v1397_v29 = vld [vmem:[#allocation2 + $0x20] sm:$0xff] }
 0x238   :  { %v9215_v27 = vpop.f32.mrb[24].mxu0 }
 0x239   :  { %v759_v28 = vpop.f32.mrb[84].mxu1  ;;  %v1398_v31 = vld [vmem:[#allocation2 + $0x28] sm:$0xff]  ;;  %v7278_v35 = vpop.f32.mrb[25].mxu0 }
 0x23a   :  { %v760_v40 = vadd.f32 %v759_v28, %v9170_v5  ;;  %v7180_v41 = vpop.f32.mrb[85].mxu1  ;;  %v1422_v63 = vpack.c.bf16 %v1398_v31, %v1397_v29  ;;  %v9218_v42 = vpop.f32.mrb[26].mxu0  ;;  %v8385_v28 = vld [vmem:[%s10961_s5 + $0x58] sm:$0xff]  }
 0x23b   :  { %v762_v44 = vpop.f32.mrb[86].mxu1  ;;  %v7279_v54 = vpop.f32.mrb[27].mxu0  ;;  %v8386_v41 = vld [vmem:[%s10961_s5 + $0x60] sm:$0xff]  }
 0x23c   :  { %v763_v47 = vadd.f32 %v762_v44, %v9172_v8  ;;  %7390 = vmatprep.mubr.bf16.mxu0 %v1422_v63  ;;  %v7181_v3 = vpop.f32.mrb[87].mxu1  ;;  %v8387_v63 = vld [vmem:[%s10961_s5 + $0x68] sm:$0xff]  }
 0x240   :  { %v9221_v48 = vpop.f32.mrb[28].mxu0 }
 0x241   :  { %v767_v50 = vpop.f32.mrb[88].mxu1  ;;  %v7282_v51 = vpop.f32.mrb[29].mxu0 }
 0x242   :  { %v768_v38 = vadd.f32 %v767_v50, %v9176_v10  ;;  %v7184_v7 = vpop.f32.mrb[89].mxu1  ;;  %v9224_v53 = vpop.f32.mrb[30].mxu0 }
 0x243   :  { %v770_v5 = vpop.f32.mrb[90].mxu1  ;;  %v7283_v55 = vpop.f32.mrb[31].mxu0 }
 0x244   :  { %v9227_v46 = vadd.f32 %v770_v5, %v9178_v15  ;;  %v7185_v36 = vpop.f32.mrb[91].mxu1  ;;  %v8382_v15 = vld [vmem:[%s10961_s5 + $0x40] sm:$0xff]  }
 0x245   :  { %7414 = vmatprep.subr.bf16.mxu0 %v8382_v15 }
 0x246   :  { %7415 = vmatpush3.bf16.msra.mxu0 %v8382_v15 }
 0x247   :  { %7416 = vmatprep.subr.bf16.mxu0 %v8383_v13 }
 0x248   :  { %v9229_v37 = vpop.f32.mrb[32].mxu0 }
 0x249   :  { %v775_v8 = vpop.f32.mrb[92].mxu1  ;;  %v7286_v57 = vpop.f32.mrb[33].mxu0 }
 0x24a   :  { %v9232_v33 = vadd.f32 %v775_v8, %v9180_v43  ;;  %v7188_v56 = vpop.f32.mrb[93].mxu1  ;;  %v9234_v1 = vpop.f32.mrb[34].mxu0  ;;  %7417 = vmatpush3.bf16.msra.mxu0 %v8383_v13  ;;  %v8388_v57 = vld [vmem:[%s10961_s5 + $0x70] sm:$0xff]  }
 0x24b   :  { %v778_v10 = vpop.f32.mrb[94].mxu1  ;;  %v7287_v0 = vpop.f32.mrb[35].mxu0  ;;  %7418 = vmatprep.subr.bf16.mxu0 %v8384_v4 }
 0x24c   :  { %v9237_v14 = vadd.f32 %v778_v10, %v9182_v20  ;;  %v7189_v59 = vpop.f32.mrb[95].mxu1 }
 0x24d   :  { %v8389_v59 = vld [vmem:[%s10961_s5 + $0x78] sm:$0xff]  }
 0x24e   :  { %7419 = vmatpush3.bf16.msra.mxu0 %v8384_v4 }
 0x24f   :  { %7420 = vmatprep.subr.bf16.mxu0 %v8385_v28 }
 0x250   :  { %v9239_v60 = vpop.f32.mrb[36].mxu0 }
 0x251   :  { %v902_v30 = vpop.f32.mrb[96].mxu1  ;;  %v7290_v2 = vpop.f32.mrb[37].mxu0 }
 0x252   :  { %v939_v62 = vadd.f32 %v902_v30, %v752_v61  ;;  %v7210_v43 = vpop.f32.mrb[97].mxu1  ;;  %v9244_v6 = vpop.f32.mrb[38].mxu0  ;;  %7421 = vmatpush3.bf16.msra.mxu0 %v8385_v28 }
 0x253   :  { %v905_v32 = vpop.f32.mrb[98].mxu1  ;;  %v7291_v9 = vpop.f32.mrb[39].mxu0  ;;  %7422 = vmatprep.subr.bf16.mxu0 %v8386_v41 }
 0x254   :  { %v9247_v20 = vadd.f32 %v9187_v34, %v939_v62  ;;  %v940_v11 = vadd.f32 %v905_v32, %v755_v24  ;;  %v7211_v45 = vpop.f32.mrb[99].mxu1 }
 0x256   :  { %973 = vst [vmem:[#allocation2 + $0x32] sm:$0xff] %v9247_v20  ;;  %v9254_v39 = vadd.f32 %v9187_v34, %v940_v11  ;;  %7423 = vmatpush3.bf16.msra.mxu0 %v8386_v41 }
 0x257   :  { %7424 = vmatprep.subr.bf16.mxu0 %v8387_v63 }
 0x258   :  { %974 = vst [vmem:[#allocation2 + $0x3a] sm:$0xff] %v9254_v39  ;;  %v2475_v17 = vpack.c.bf16 %v9254_v39, %v9247_v20  ;;  %v8412_v39 = vld [vmem:[%s10959_s6 + $0xb0] sm:$0xff]  }
 0x259   :  { %v910_v61 = vpop.f32.mrb[100].mxu1 }
 0x25a   :  { %v941_v18 = vadd.f32 %v910_v61, %v760_v40  ;;  %v7214_v19 = vpop.f32.mrb[101].mxu1  ;;  %7425 = vmatpush3.bf16.msra.mxu0 %v8387_v63 }
 0x25b   :  { %v913_v21 = vpop.f32.mrb[102].mxu1  ;;  %7426 = vmatprep.subr.bf16.mxu0 %v8388_v57 }
 0x25c   :  { %v9263_v23 = vadd.f32 %v9187_v34, %v941_v18  ;;  %v942_v24 = vadd.f32 %v913_v21, %v763_v47  ;;  %v7215_v25 = vpop.f32.mrb[103].mxu1 }
 0x25d   :  { %v1399_v31 = vld [vmem:[#allocation2 + $0x30] sm:$0xff] }
 0x25e   :  { %975 = vst [vmem:[#allocation2 + $0x42] sm:$0xff] %v9263_v23  ;;  %v9270_v29 = vadd.f32 %v9187_v34, %v942_v24  ;;  %7427 = vmatpush3.bf16.msra.mxu0 %v8388_v57 }
 0x25f   :  { %v1400_v35 = vld [vmem:[#allocation2 + $0x38] sm:$0xff]  ;;  %7428 = vmatprep.subr.bf16.mxu0 %v8389_v59 }
 0x260   :  { %976 = vst [vmem:[#allocation2 + $0x4a] sm:$0xff] %v9270_v29  ;;  %v1423_v40 = vpack.c.bf16 %v1400_v35, %v1399_v31  ;;  %v2476_v44 = vpack.c.bf16 %v9270_v29, %v9263_v23 }
 0x261   :  { %v918_v54 = vpop.f32.mrb[104].mxu1 }
 0x262   :  { %v943_v47 = vadd.f32 %v918_v54, %v768_v38  ;;  %v7218_v3 = vpop.f32.mrb[105].mxu1  ;;  %7391 = vmatmul.mubr.bf16.gmra.mrb[44].mxu0 %v1423_v40 }
 0x263   :  { %v921_v50 = vpop.f32.mrb[106].mxu1  ;;  %7429 = vmatpush3.bf16.msra.mxu0 %v8389_v59 }
 0x264   :  { %v9282_v51 = vadd.f32 %v9187_v34, %v943_v47  ;;  %v944_v7 = vadd.f32 %v921_v50, %v9227_v46  ;;  %v7219_v5 = vpop.f32.mrb[107].mxu1 }
 0x265   :  { %v1401_v36 = vld [vmem:[#allocation2 + $0x40] sm:$0xff] }
 0x266   :  { %977 = vst [vmem:[#allocation2 + $0x52] sm:$0xff] %v9282_v51  ;;  %v9287_v55 = vadd.f32 %v9187_v34, %v944_v7 }
 0x267   :  { %v1402_v8 = vld [vmem:[#allocation2 + $0x48] sm:$0xff] }
 0x268   :  { %978 = vst [vmem:[#allocation2 + $0x5a] sm:$0xff] %v9287_v55  ;;  %v1424_v38 = vpack.c.bf16 %v1402_v8, %v1401_v36  ;;  %v2477_v46 = vpack.c.bf16 %v9287_v55, %v9282_v51  ;;  %v8414_v55 = vld [vmem:[%s10961_s5 + $0xc0] sm:$0xff]  }
 0x269   :  { %v926_v56 = vpop.f32.mrb[108].mxu1 }
 0x26a   :  { %v945_v10 = vadd.f32 %v926_v56, %v9232_v33  ;;  %v7222_v0 = vpop.f32.mrb[109].mxu1  ;;  %7394 = vmatprep.mubr.bf16.mxu0 %v1424_v38 }
 0x26b   :  { %v929_v15 = vpop.f32.mrb[110].mxu1 }
 0x26c   :  { %v9300_v30 = vadd.f32 %v9187_v34, %v945_v10  ;;  %v946_v2 = vadd.f32 %v929_v15, %v9237_v14  ;;  %v7223_v62 = vpop.f32.mrb[111].mxu1 }
 0x26d   :  { %v1403_v43 = vld [vmem:[#allocation2 + $0x50] sm:$0xff] }
 0x26e   :  { %979 = vst [vmem:[#allocation2 + $0x62] sm:$0xff] %v9300_v30  ;;  %v966_v33 = vadd.f32 %v9187_v34, %v946_v2 }
 0x26f   :  { %v1404_v32 = vld [vmem:[#allocation2 + $0x58] sm:$0xff] }
 0x270   :  { %980 = vst [vmem:[#allocation2 + $0x6a] sm:$0x1] %v966_v33  ;;  %v1425_v9 = vpack.c.bf16 %v1404_v32, %v1403_v43 }
 0x271   :  { %v1053_v11 = vpop.f32.mrb[112].mxu1 }
 0x272   :  { %7395 = vmatmul.mubr.bf16.gmra.mrb[48].mxu0 %v1425_v9  ;;  %v7232_v45 = vpop.f32.mrb[113].mxu1  ;;  %v1174_v13 = vadd.f32 %v9191_v26, %v1053_v11  ;;  %v9313_v26 = vld [vmem:[%s10959_s6 + $0x40] sm:$0xff]  }
 0x273   :  { %v1056_v4 = vpop.f32.mrb[114].mxu1  ;;  %7458 = vmatprep.subr.bf16.mxu0 %v9313_v26 }
 0x274   :  { %v7233_v61 = vpop.f32.mrb[115].mxu1  ;;  %v1177_v14 = vadd.f32 %v9193_v52, %v1056_v4 }
 0x279   :  { %v1061_v18 = vpop.f32.mrb[116].mxu1 }
 0x27a   :  { %v7236_v19 = vpop.f32.mrb[117].mxu1  ;;  %v1182_v21 = vadd.f32 %v9198_v49, %v1061_v18 }
 0x27b   :  { %v1064_v24 = vpop.f32.mrb[118].mxu1 }
 0x27c   :  { %v7237_v25 = vpop.f32.mrb[119].mxu1  ;;  %v1185_v28 = vadd.f32 %v9201_v58, %v1064_v24  ;;  %v1405_v24 = vld [vmem:[#allocation2 + $0x60] sm:$0xff] }
 0x281   :  { %v1069_v31 = vpop.f32.mrb[120].mxu1 }
 0x282   :  { %v7240_v35 = vpop.f32.mrb[121].mxu1  ;;  %v1190_v40 = vadd.f32 %v9208_v16, %v1069_v31 }
 0x283   :  { %v1072_v41 = vpop.f32.mrb[122].mxu1 }
 0x284   :  { %v7241_v63 = vpop.f32.mrb[123].mxu1  ;;  %v1193_v52 = vadd.f32 %v9212_v22, %v1072_v41 }
 0x289   :  { %v1077_v49 = vpop.f32.mrb[124].mxu1 }
 0x28a   :  { %v7244_v54 = vpop.f32.mrb[125].mxu1  ;;  %v1198_v47 = vadd.f32 %v9215_v27, %v1077_v49 }
 0x28b   :  { %v1080_v58 = vpop.f32.mrb[126].mxu1 }
 0x28c   :  { %v7245_v3 = vpop.f32.mrb[127].mxu1  ;;  %v1201_v50 = vadd.f32 %v9218_v42, %v1080_v58 }
 0x291   :  { %v1085_v16 = vpop.f32.mrb[128].mxu1 }
 0x292   :  { %v7248_v7 = vpop.f32.mrb[129].mxu1  ;;  %v9320_v5 = vadd.f32 %v9221_v48, %v1085_v16 }
 0x293   :  { %v1088_v36 = vpop.f32.mrb[130].mxu1 }
 0x294   :  { %v7249_v8 = vpop.f32.mrb[131].mxu1  ;;  %v9323_v38 = vadd.f32 %v9224_v53, %v1088_v36 }
 0x299   :  { %v1093_v22 = vpop.f32.mrb[132].mxu1 }
 0x29a   :  { %v7252_v57 = vpop.f32.mrb[133].mxu1  ;;  %v9326_v56 = vadd.f32 %v9229_v37, %v1093_v22 }
 0x29b   :  { %v1096_v27 = vpop.f32.mrb[134].mxu1 }
 0x29c   :  { %v7253_v10 = vpop.f32.mrb[135].mxu1  ;;  %v9329_v0 = vadd.f32 %v9234_v1, %v1096_v27 }
 0x2a1   :  { %v1101_v42 = vpop.f32.mrb[136].mxu1 }
 0x2a2   :  { %v7256_v59 = vpop.f32.mrb[137].mxu1  ;;  %v9332_v48 = vadd.f32 %v9239_v60, %v1101_v42 }
 0x2a3   :  { %v1104_v15 = vpop.f32.mrb[138].mxu1 }
 0x2a4   :  { %v7257_v2 = vpop.f32.mrb[139].mxu1  ;;  %v9335_v53 = vadd.f32 %v9244_v6, %v1104_v15 }
 0x2a9   :  { %v1296_v62 = vpop.f32.mrb[140].mxu1 }
 0x2aa   :  { %v1351_v33 = vadd.f32 %v1296_v62, %v1174_v13  ;;  %v7300_v43 = vpop.f32.mrb[141].mxu1 }
 0x2ab   :  { %v1299_v37 = vpop.f32.mrb[142].mxu1 }
 0x2ac   :  { %v1365_v32 = vadd.f32 %v9187_v34, %v1351_v33  ;;  %v1352_v9 = vadd.f32 %v1299_v37, %v1177_v14  ;;  %v7301_v11 = vpop.f32.mrb[143].mxu1 }
 0x2ae   :  { %1379 = vst [vmem:[#allocation2 + $0x6f] sm:$0xff] %v1365_v32  ;;  %v1366_v1 = vadd.f32 %v9187_v34, %v1352_v9 }
 0x2b0   :  { %1380 = vst [vmem:[#allocation2 + $0x77] sm:$0xff] %v1366_v1 }
 0x2b1   :  { %v1304_v45 = vpop.f32.mrb[144].mxu1 }
 0x2b2   :  { %v1353_v60 = vadd.f32 %v1304_v45, %v1182_v21  ;;  %v7304_v4 = vpop.f32.mrb[145].mxu1 }
 0x2b3   :  { %v1307_v61 = vpop.f32.mrb[146].mxu1 }
 0x2b4   :  { %v1367_v18 = vadd.f32 %v9187_v34, %v1353_v60  ;;  %v1354_v6 = vadd.f32 %v1307_v61, %v1185_v28  ;;  %v7305_v19 = vpop.f32.mrb[147].mxu1 }
 0x2b5   :  { %v1406_v13 = vld [vmem:[#allocation2 + $0x68] sm:$0xff] }
 0x2b6   :  { %1381 = vst [vmem:[#allocation2 + $0x7f] sm:$0xff] %v1367_v18  ;;  %v1368_v25 = vadd.f32 %v9187_v34, %v1354_v6  ;;  %v1426_v31 = vpack.c.bf16 %v1406_v13, %v1405_v24 }
 0x2b7   :  { %v1407_v58 = vld [vmem:[#allocation2 + $0x70] sm:$0xff] }
 0x2b8   :  { %1382 = vst [vmem:[#allocation2 + $0x87] sm:$0xff] %v1368_v25  ;;  %7398 = vmatprep.mubr.bf16.mxu0 %v1426_v31  ;;  %v2459_v29 = vld [vmem:[#allocation2 + $0x72] sm:$0xff] }
 0x2b9   :  { %v1312_v14 = vpop.f32.mrb[148].mxu1 }
 0x2ba   :  { %v1355_v35 = vadd.f32 %v1312_v14, %v1190_v40  ;;  %v7308_v41 = vpop.f32.mrb[149].mxu1 }
 0x2bb   :  { %v1315_v63 = vpop.f32.mrb[150].mxu1 }
 0x2bc   :  { %v1369_v21 = vadd.f32 %v9187_v34, %v1355_v35  ;;  %v1356_v49 = vadd.f32 %v1315_v63, %v1193_v52  ;;  %v7309_v54 = vpop.f32.mrb[151].mxu1 }
 0x2bd   :  { %v1408_v3 = vld [vmem:[#allocation2 + $0x78] sm:$0xff]  ;;  %v1892_v54 = vld [vmem:[#allocation2 + $0x9] sm:$0xff] }
 0x2be   :  { %1383 = vst [vmem:[#allocation2 + $0x8f] sm:$0xff] %v1369_v21  ;;  %v1370_v28 = vadd.f32 %v9187_v34, %v1356_v49  ;;  %v1427_v16 = vpack.c.bf16 %v1408_v3, %v1407_v58 }
 0x2bf   :  { %v1409_v10 = vld [vmem:[#allocation2 + $0x80] sm:$0xff] }
 0x2c0   :  { %1384 = vst [vmem:[#allocation2 + $0x97] sm:$0xff] %v1370_v28  ;;  %7399 = vmatmul.mubr.bf16.gmra.mrb[52].mxu0 %v1427_v16 }
 0x2c1   :  { %v1320_v7 = vpop.f32.mrb[152].mxu1 }
 0x2c2   :  { %v1357_v36 = vadd.f32 %v1320_v7, %v1198_v47  ;;  %v7312_v8 = vpop.f32.mrb[153].mxu1  ;;  %v1891_v7 = vld [vmem:[#allocation2 + $0x1] sm:$0xff] }
 0x2c3   :  { %v1323_v22 = vpop.f32.mrb[154].mxu1  ;;  %v1896_v8 = vld [vmem:[#allocation2 + $0x29] sm:$0xff] }
 0x2c4   :  { %v1371_v40 = vadd.f32 %v9187_v34, %v1357_v36  ;;  %v1358_v57 = vadd.f32 %v1323_v22, %v1201_v50  ;;  %v7313_v27 = vpop.f32.mrb[155].mxu1  ;;  %v1918_v36 = vpack.c.bf16 %v1892_v54, %v1891_v7  ;;  %v1893_v22 = vld [vmem:[#allocation2 + $0x11] sm:$0xff] }
 0x2c5   :  { %v1410_v42 = vld [vmem:[#allocation2 + $0x88] sm:$0xff] }
 0x2c6   :  { %1385 = vst [vmem:[#allocation2 + $0x9f] sm:$0xff] %v1371_v40  ;;  %v1372_v52 = vadd.f32 %v9187_v34, %v1358_v57  ;;  %v1428_v59 = vpack.c.bf16 %v1410_v42, %v1409_v10  ;;  %v1895_v57 = vld [vmem:[#allocation2 + $0x21] sm:$0xff]  ;;  %v8392_v10 = vld [vmem:[%s10959_s6 + $0x50] sm:$0xff]   ;;  %v1898_v42 = vld [vmem:[#allocation2 + $0x39] sm:$0xff] }
 0x2c7   :  { %v1411_v50 = vld [vmem:[#allocation2 + $0x90] sm:$0xff]  ;;  %v1920_v27 = vpack.c.bf16 %v1896_v8, %v1895_v57  ;;  %v2171_v8 = vld [vmem:[%s10960_s1 + $0x19] sm:$0xff] }
 0x2c8   :  { %1386 = vst [vmem:[#allocation2 + $0xa7] sm:$0xff] %v1372_v52  ;;  %7402 = vmatprep.mubr.bf16.mxu0 %v1428_v59  ;;  %v1900_v52 = vld [vmem:[#allocation2 + $0x49] sm:$0xff]  ;;  %v1897_v59 = vld [vmem:[#allocation2 + $0x31] sm:$0xff] }
 0x2c9   :  { %v1328_v15 = vpop.f32.mrb[156].mxu1  ;;  %v2462_v23 = vld [vmem:[#allocation2 + $0x8a] sm:$0xff] }
 0x2ca   :  { %v1359_v2 = vadd.f32 %v1328_v15, %v9320_v5  ;;  %v7316_v62 = vpop.f32.mrb[157].mxu1  ;;  %v1921_v15 = vpack.c.bf16 %v1898_v42, %v1897_v59  ;;  %v2175_v42 = vld [vmem:[%s10960_s1 + $0x39] sm:$0xff]  ;;  %v2177_v59 = vld [vmem:[%s10960_s1 + $0x49] sm:$0xff] }
 0x2cb   :  { %v1331_v33 = vpop.f32.mrb[158].mxu1  ;;  %v8393_v62 = vld [vmem:[%s10959_s6 + $0x58] sm:$0xff]  }
 0x2cc   :  { %v1373_v47 = vadd.f32 %v9187_v34, %v1359_v2  ;;  %v1360_v43 = vadd.f32 %v1331_v33, %v9323_v38  ;;  %v7317_v37 = vpop.f32.mrb[159].mxu1  ;;  %v1899_v2 = vld [vmem:[#allocation2 + $0x41] sm:$0xff] }
 0x2cd   :  { %v1412_v32 = vld [vmem:[#allocation2 + $0x98] sm:$0xff]  ;;  %v1922_v33 = vpack.c.bf16 %v1900_v52, %v1899_v2  ;;  %v2176_v52 = vld [vmem:[%s10960_s1 + $0x41] sm:$0xff] }
 0x2ce   :  { %1387 = vst [vmem:[#allocation2 + $0xaf] sm:$0xff] %v1373_v47  ;;  %v1374_v9 = vadd.f32 %v9187_v34, %v1360_v43  ;;  %v1429_v11 = vpack.c.bf16 %v1412_v32, %v1411_v50  ;;  %v1902_v47 = vld [vmem:[#allocation2 + $0x59] sm:$0xff]  ;;  %v1904_v43 = vld [vmem:[#allocation2 + $0x69] sm:$0xff]  ;;  %v1901_v37 = vld [vmem:[#allocation2 + $0x51] sm:$0xff] }
 0x2cf   :  { %v1413_v38 = vld [vmem:[#allocation2 + $0xa0] sm:$0xff]  ;;  %v1923_v50 = vpack.c.bf16 %v1902_v47, %v1901_v37  ;;  %v2181_v37 = vld [vmem:[%s10960_s1 + $0x69] sm:$0xff] }
 0x2d0   :  { %1388 = vst [vmem:[#allocation2 + $0xb7] sm:$0xff] %v1374_v9  ;;  %7403 = vmatmul.mubr.bf16.gmra.mrb[56].mxu0 %v1429_v11  ;;  %v1903_v32 = vld [vmem:[#allocation2 + $0x61] sm:$0xff]  ;;  %v2179_v47 = vld [vmem:[%s10960_s1 + $0x59] sm:$0xff] }
 0x2d1   :  { %v1336_v1 = vpop.f32.mrb[160].mxu1  ;;  %v8395_v9 = vld [vmem:[%s10959_s6 + $0x68] sm:$0xff]   ;;  %v1924_v11 = vpack.c.bf16 %v1904_v43, %v1903_v32 }
 0x2d2   :  { %v1361_v45 = vadd.f32 %v1336_v1, %v9326_v56  ;;  %v7320_v60 = vpop.f32.mrb[161].mxu1  ;;  %v9373_v1 = vpop.f32.mrb[64].mxu0  ;;  %v2180_v43 = vld [vmem:[%s10960_s1 + $0x61] sm:$0xff] }
 0x2d3   :  { %v1339_v5 = vpop.f32.mrb[162].mxu1  ;;  %v9378_v60 = vpop.f32.mrb[65].mxu0 }
 0x2d4   :  { %v1375_v4 = vadd.f32 %v9187_v34, %v1361_v45  ;;  %v1362_v61 = vadd.f32 %v1339_v5, %v9329_v0  ;;  %v7321_v18 = vpop.f32.mrb[163].mxu1  ;;  %v8396_v45 = vld [vmem:[%s10959_s6 + $0x70] sm:$0xff]   ;;  %v1906_v5 = vld [vmem:[#allocation2 + $0x79] sm:$0xff] }
 0x2d5   :  { %v1414_v6 = vld [vmem:[#allocation2 + $0xa8] sm:$0xff] }
 0x2d6   :  { %1389 = vst [vmem:[#allocation2 + $0xbf] sm:$0xff] %v1375_v4  ;;  %v1376_v19 = vadd.f32 %v9187_v34, %v1362_v61  ;;  %v1430_v24 = vpack.c.bf16 %v1414_v6, %v1413_v38  ;;  %v7369_v4 = vpop.f32.mrb[66].mxu0  ;;  %v1908_v61 = vld [vmem:[#allocation2 + $0x89] sm:$0xff]  ;;  %v1905_v38 = vld [vmem:[#allocation2 + $0x71] sm:$0xff] }
 0x2d7   :  { %v1415_v0 = vld [vmem:[#allocation2 + $0xb0] sm:$0xff]  ;;  %v9380_v18 = vpop.f32.mrb[67].mxu0  ;;  %v1925_v6 = vpack.c.bf16 %v1906_v5, %v1905_v38  ;;  %v2183_v5 = vld [vmem:[%s10960_s1 + $0x79] sm:$0xff]  ;;  %v2184_v4 = vld [vmem:[%s10960_s1 + $0x81] sm:$0xff] }
 0x2d8   :  { %1390 = vst [vmem:[#allocation2 + $0xc7] sm:$0xff] %v1376_v19  ;;  %7406 = vmatprep.mubr.bf16.mxu0 %v1430_v24  ;;  %v1907_v19 = vld [vmem:[#allocation2 + $0x81] sm:$0xff]  ;;  %v8397_v24 = vld [vmem:[%s10959_s6 + $0x78] sm:$0xff]   ;;  %v8404_v38 = vld [vmem:[%s10961_s5 + $0xb0] sm:$0xff]  }
 0x2d9   :  { %v1344_v13 = vpop.f32.mrb[164].mxu1 }
 0x2da   :  { %v1363_v25 = vadd.f32 %v1344_v13, %v9332_v48  ;;  %v7324_v31 = vpop.f32.mrb[165].mxu1  ;;  %v1926_v13 = vpack.c.bf16 %v1908_v61, %v1907_v19  ;;  %v2185_v61 = vld [vmem:[%s10960_s1 + $0x89] sm:$0xff] }
 0x2db   :  { %v1347_v56 = vpop.f32.mrb[166].mxu1  ;;  %v1910_v31 = vld [vmem:[#allocation2 + $0x99] sm:$0xff]  ;;  %v2203_v19 = vpack.c.bf16 %v2185_v61, %v2184_v4 }
 0x2dc   :  { %v1377_v14 = vadd.f32 %v9187_v34, %v1363_v25  ;;  %v1364_v35 = vadd.f32 %v1347_v56, %v9335_v53  ;;  %v7325_v41 = vpop.f32.mrb[167].mxu1  ;;  %v1894_v53 = vld [vmem:[#allocation2 + $0x19] sm:$0xff]  ;;  %v1912_v56 = vld [vmem:[#allocation2 + $0xa9] sm:$0xff] }
 0x2dd   :  { %v1416_v63 = vld [vmem:[#allocation2 + $0xb8] sm:$0xff]  ;;  %v1919_v40 = vpack.c.bf16 %v1894_v53, %v1893_v22  ;;  %v8398_v25 = vld [vmem:[%s10961_s5 + $0x80] sm:$0xff]  }
 0x2de   :  { %1391 = vst [vmem:[#allocation2 + $0xcf] sm:$0xff] %v1377_v14  ;;  %v1378_v21 = vadd.f32 %v9187_v34, %v1364_v35  ;;  %v1431_v49 = vpack.c.bf16 %v1416_v63, %v1415_v0  ;;  %v8391_v34 = vld [vmem:[%s10959_s6 + $0x48] sm:$0xff]   ;;  %v1909_v14 = vld [vmem:[#allocation2 + $0x91] sm:$0xff]  ;;  %v1914_v63 = vld [vmem:[#allocation2 + $0xb9] sm:$0xff] }
 0x2df   :  { %v1417_v58 = vld [vmem:[#allocation2 + $0xc0] sm:$0xff]  ;;  %v1927_v35 = vpack.c.bf16 %v1910_v31, %v1909_v14  ;;  %v2170_v53 = vld [vmem:[%s10960_s1 + $0x11] sm:$0xff] }
 0x2e0   :  { %1392 = vst [vmem:[#allocation2 + $0xd7] sm:$0x1] %v1378_v21  ;;  %7407 = vmatmul.mubr.bf16.gmra.mrb[60].mxu0 %v1431_v49  ;;  %v1911_v41 = vld [vmem:[#allocation2 + $0xa1] sm:$0xff]  ;;  %v1913_v49 = vld [vmem:[#allocation2 + $0xb1] sm:$0xff]  ;;  %v2196_v57 = vpack.c.bf16 %v2171_v8, %v2170_v53 }
 0x2e1   :  { %v1928_v0 = vpack.c.bf16 %v1912_v56, %v1911_v41  ;;  %v1929_v54 = vpack.c.bf16 %v1914_v63, %v1913_v49  ;;  %v2172_v22 = vld [vmem:[%s10960_s1 + $0x21] sm:$0xff]  ;;  %v2189_v56 = vld [vmem:[%s10960_s1 + $0xa9] sm:$0xff]  ;;  %v2191_v63 = vld [vmem:[%s10960_s1 + $0xb9] sm:$0xff] }
 0x2e2   :  { %v2188_v31 = vld [vmem:[%s10960_s1 + $0xa1] sm:$0xff]  ;;  %v2193_v49 = vld [vmem:[%s10960_s1 + $0xc9] sm:$0xff]  ;;  %v2447_v8 = vld [vmem:[#allocation2 + $0x12] sm:$0xff] }
 0x2e3   :  { %v8406_v14 = vld [vmem:[%s10959_s6 + $0x80] sm:$0xff]   ;;  %v2205_v41 = vpack.c.bf16 %v2189_v56, %v2188_v31  ;;  %v2724_v61 = vld [vmem:[%s10960_s1 + $0x12] sm:$0xff] }
 0x2e4   :  { %v2449_v53 = vld [vmem:[#allocation2 + $0x22] sm:$0xff]  ;;  %v2728_v31 = vld [vmem:[%s10960_s1 + $0x32] sm:$0xff]  ;;  %v2729_v56 = vld [vmem:[%s10960_s1 + $0x3a] sm:$0xff] }
 0x2e5   :  { %v1418_v3 = vld [vmem:[#allocation2 + $0xc8] sm:$0xff]  ;;  %v1419_v28 = vld [vmem:[#allocation2 + $0xd0] sm:$0x3f] }
 0x2e6   :  { %v1432_v48 = vpack.c.bf16 %v1418_v3, %v1417_v58  ;;  %v1433_v16 = vpack.c.bf16 %v1419_v28, %v1419_v28  ;;  %v1916_v21 = vld [vmem:[#allocation2 + $0xc9] sm:$0xff]  ;;  %v1915_v58 = vld [vmem:[#allocation2 + $0xc1] sm:$0xff] }
 0x2e7   :  { %v1930_v3 = vpack.c.bf16 %v1916_v21, %v1915_v58  ;;  %v2168_v28 = vld [vmem:[%s10960_s1 + $0x1] sm:$0xff] }
 0x2e8   :  { %7410 = vmatprep.mubr.bf16.mxu0 %v1432_v48  ;;  %v2169_v48 = vld [vmem:[%s10960_s1 + $0x9] sm:$0xff]  ;;  %v2192_v21 = vld [vmem:[%s10960_s1 + $0xc1] sm:$0xff] }
 0x2e9   :  { %7411 = vmatmul.mubr.bf16.gmra.mrb[68].mxu0 %v1433_v16  ;;  %v1917_v16 = vld [vmem:[#allocation2 + $0xd1] sm:$0x3f]  ;;  %v2195_v7 = vpack.c.bf16 %v2169_v48, %v2168_v28  ;;  %v2207_v58 = vpack.c.bf16 %v2193_v49, %v2192_v21  ;;  %v8417_v21 = vld [vmem:[%s10961_s5 + $0xd8] sm:$0xff]  }
 0x2ea   :  { %7430 = vmatprep.mubr.bf16.mxu0 %v1918_v36  ;;  %v1931_v36 = vpack.c.bf16 %v1917_v16, %v1917_v16  ;;  %v2446_v48 = vld [vmem:[#allocation2 + $0xa] sm:$0xff]  ;;  %v2445_v16 = vld [vmem:[#allocation2 + $0x2] sm:$0xff]  ;;  %v2732_v49 = vld [vmem:[%s10960_s1 + $0x52] sm:$0xff] }
 0x2f1   :  { %7431 = vmatmul.mubr.bf16.vlgmr.msra.gmra.mrb[40].mxu0 %v1919_v40  ;;  %v2173_v40 = vld [vmem:[%s10960_s1 + $0x29] sm:$0xff] }
 0x2f2   :  { %7434 = vmatprep.mubr.bf16.mxu0 %v1920_v27  ;;  %7459 = vmatpush3.bf16.msra.mxu0 %v9313_v26  ;;  %v8394_v26 = vld [vmem:[%s10959_s6 + $0x60] sm:$0xff]   ;;  %v8399_v27 = vld [vmem:[%s10961_s5 + $0x88] sm:$0xff]  }
 0x2f3   :  { %7460 = vmatprep.subr.bf16.mxu0 %v8391_v34 }
 0x2f6   :  { %7461 = vmatpush3.bf16.msra.mxu0 %v8391_v34  ;;  %v2197_v34 = vpack.c.bf16 %v2173_v40, %v2172_v22  ;;  %v8407_v40 = vld [vmem:[%s10959_s6 + $0x88] sm:$0xff]  }
 0x2f7   :  { %7462 = vmatprep.subr.bf16.mxu0 %v8392_v10 }
 0x2f9   :  { %7435 = vmatmul.mubr.bf16.gmra.mrb[44].mxu0 %v1921_v15  ;;  %v8400_v15 = vld [vmem:[%s10961_s5 + $0x90] sm:$0xff]  }
 0x2fa   :  { %7438 = vmatprep.mubr.bf16.mxu0 %v1922_v33  ;;  %7463 = vmatpush3.bf16.msra.mxu0 %v8392_v10  ;;  %v2174_v10 = vld [vmem:[%s10960_s1 + $0x31] sm:$0xff] }
 0x2fb   :  { %7464 = vmatprep.subr.bf16.mxu0 %v8393_v62  ;;  %v2198_v2 = vpack.c.bf16 %v2175_v42, %v2174_v10  ;;  %v8401_v33 = vld [vmem:[%s10961_s5 + $0x98] sm:$0xff]   ;;  %v2458_v10 = vld [vmem:[#allocation2 + $0x6a] sm:$0xff] }
 0x2fc   :  { %v8411_v42 = vld [vmem:[%s10959_s6 + $0xa8] sm:$0xff]   ;;  %v2478_v20 = vpack.c.bf16 %v2458_v10, %v9300_v30  ;;  %v8413_v30 = vld [vmem:[%s10959_s6 + $0xb8] sm:$0xff]  }
 0x2fd   :  { %v2741_v10 = vld [vmem:[%s10960_s1 + $0x9a] sm:$0xff] }
 0x2fe   :  { %7465 = vmatpush3.bf16.msra.mxu0 %v8393_v62  ;;  %v2199_v62 = vpack.c.bf16 %v2177_v59, %v2176_v52  ;;  %v2461_v52 = vld [vmem:[#allocation2 + $0x82] sm:$0xff]  ;;  %v2466_v59 = vld [vmem:[#allocation2 + $0xaa] sm:$0xff] }
 0x2ff   :  { %7466 = vmatprep.subr.bf16.mxu0 %v8394_v26  ;;  %v2480_v51 = vpack.c.bf16 %v2462_v23, %v2461_v52  ;;  %v2746_v52 = vld [vmem:[%s10960_s1 + $0xc2] sm:$0xff] }
 0x301   :  { %7439 = vmatmul.mubr.bf16.gmra.mrb[48].mxu0 %v1923_v50  ;;  %v8402_v50 = vld [vmem:[%s10961_s5 + $0xa0] sm:$0xff]  }
 0x302   :  { %7442 = vmatprep.mubr.bf16.mxu0 %v1924_v11  ;;  %7467 = vmatpush3.bf16.msra.mxu0 %v8394_v26  ;;  %v2178_v26 = vld [vmem:[%s10960_s1 + $0x51] sm:$0xff]  ;;  %v8403_v11 = vld [vmem:[%s10961_s5 + $0xa8] sm:$0xff]  }
 0x303   :  { %7468 = vmatprep.subr.bf16.mxu0 %v8395_v9  ;;  %v2200_v32 = vpack.c.bf16 %v2179_v47, %v2178_v26  ;;  %v2468_v26 = vld [vmem:[#allocation2 + $0xba] sm:$0xff]  ;;  %v2470_v47 = vld [vmem:[#allocation2 + $0xca] sm:$0xff] }
 0x306   :  { %7469 = vmatpush3.bf16.msra.mxu0 %v8395_v9  ;;  %v2201_v9 = vpack.c.bf16 %v2181_v37, %v2180_v43  ;;  %v2467_v43 = vld [vmem:[#allocation2 + $0xb2] sm:$0xff] }
 0x307   :  { %7470 = vmatprep.subr.bf16.mxu0 %v8396_v45  ;;  %v2483_v37 = vpack.c.bf16 %v2468_v26, %v2467_v43 }
 0x309   :  { %7443 = vmatmul.mubr.bf16.gmra.mrb[52].mxu0 %v1925_v6 }
 0x30a   :  { %7446 = vmatprep.mubr.bf16.mxu0 %v1926_v13  ;;  %7471 = vmatpush3.bf16.msra.mxu0 %v8396_v45  ;;  %v2182_v45 = vld [vmem:[%s10960_s1 + $0x71] sm:$0xff] }
 0x30b   :  { %7472 = vmatprep.subr.bf16.mxu0 %v8397_v24  ;;  %v2202_v6 = vpack.c.bf16 %v2183_v5, %v2182_v45  ;;  %v2186_v13 = vld [vmem:[%s10960_s1 + $0x91] sm:$0xff] }
 0x30c   :  { %v2471_v45 = vld [vmem:[#allocation2 + $0xd2] sm:$0x3f] }
 0x30d   :  { %v2485_v4 = vpack.c.bf16 %v2471_v45, %v2471_v45  ;;  %v3003_v45 = vld [vmem:[#allocation2 + $0x23] sm:$0xff] }
 0x30e   :  { %7473 = vmatpush3.bf16.msra.mxu0 %v8397_v24  ;;  %v8405_v24 = vld [vmem:[%s10961_s5 + $0xb8] sm:$0xff]  }
 0x30f   :  { %7502 = vmatprep.subr.bf16.mxu0 %v8398_v25 }
 0x311   :  { %7447 = vmatmul.mubr.bf16.gmra.mrb[56].mxu0 %v1927_v35 }
 0x312   :  { %7450 = vmatprep.mubr.bf16.mxu0 %v1928_v0  ;;  %v2190_v0 = vld [vmem:[%s10960_s1 + $0xb1] sm:$0xff] }
 0x319   :  { %7451 = vmatmul.mubr.bf16.gmra.mrb[60].mxu0 %v1929_v54  ;;  %v2206_v54 = vpack.c.bf16 %v2191_v63, %v2190_v0  ;;  %v2752_v0 = vpack.c.bf16 %v2729_v56, %v2728_v31  ;;  %v8426_v31 = vld [vmem:[%s10959_s6 + $0xe0] sm:$0xff]  }
 0x31a   :  { %7454 = vmatprep.mubr.bf16.mxu0 %v1930_v3  ;;  %v2194_v3 = vld [vmem:[%s10960_s1 + $0xd1] sm:$0x3f]  ;;  %v3010_v56 = vld [vmem:[#allocation2 + $0x5b] sm:$0xff] }
 0x31b   :  { %v2208_v28 = vpack.c.bf16 %v2194_v3, %v2194_v3  ;;  %v2735_v3 = vld [vmem:[%s10960_s1 + $0x6a] sm:$0xff] }
 0x321   :  { %7455 = vmatmul.mubr.bf16.gmra.mrb[72].mxu0 %v1931_v36  ;;  %v2448_v36 = vld [vmem:[#allocation2 + $0x1a] sm:$0xff] }
 0x322   :  { %7474 = vmatprep.mubr.bf16.mxu0 %v2195_v7  ;;  %v2472_v7 = vpack.c.bf16 %v2446_v48, %v2445_v16  ;;  %v2473_v22 = vpack.c.bf16 %v2448_v36, %v2447_v8  ;;  %v2736_v36 = vld [vmem:[%s10960_s1 + $0x72] sm:$0xff]  ;;  %v2738_v8 = vld [vmem:[%s10960_s1 + $0x82] sm:$0xff] }
 0x329   :  { %7475 = vmatmul.mubr.bf16.vlgmr.msra.gmra.mrb[40].mxu0 %v2196_v57  ;;  %v2474_v57 = vpack.c.bf16 %v9206_v12, %v2449_v53  ;;  %v8410_v12 = vld [vmem:[%s10959_s6 + $0xa0] sm:$0xff]  }
 0x32a   :  { %7478 = vmatprep.mubr.bf16.mxu0 %v2197_v34  ;;  %7503 = vmatpush3.bf16.msra.mxu0 %v8398_v25  ;;  %v2187_v25 = vld [vmem:[%s10960_s1 + $0x99] sm:$0xff]  ;;  %v8408_v34 = vld [vmem:[%s10959_s6 + $0x90] sm:$0xff]  }
 0x32b   :  { %7504 = vmatprep.subr.bf16.mxu0 %v8399_v27  ;;  %v2204_v35 = vpack.c.bf16 %v2187_v25, %v2186_v13  ;;  %v8415_v25 = vld [vmem:[%s10961_s5 + $0xc8] sm:$0xff]   ;;  %v2737_v53 = vld [vmem:[%s10960_s1 + $0x7a] sm:$0xff] }
 0x32e   :  { %7505 = vmatpush3.bf16.msra.mxu0 %v8399_v27  ;;  %v8409_v27 = vld [vmem:[%s10959_s6 + $0x98] sm:$0xff]  }
 0x32f   :  { %7506 = vmatprep.subr.bf16.mxu0 %v8400_v15 }
 0x331   :  { %7479 = vmatmul.mubr.bf16.gmra.mrb[44].mxu0 %v2198_v2 }
 0x332   :  { %7482 = vmatprep.mubr.bf16.mxu0 %v2199_v62  ;;  %7507 = vmatpush3.bf16.msra.mxu0 %v8400_v15  ;;  %v2463_v15 = vld [vmem:[#allocation2 + $0x92] sm:$0xff]  ;;  %v2465_v62 = vld [vmem:[#allocation2 + $0xa2] sm:$0xff] }
 0x333   :  { %7508 = vmatprep.subr.bf16.mxu0 %v8401_v33 }
 0x336   :  { %7509 = vmatpush3.bf16.msra.mxu0 %v8401_v33  ;;  %v2482_v33 = vpack.c.bf16 %v2466_v59, %v2465_v62 }
 0x337   :  { %7510 = vmatprep.subr.bf16.mxu0 %v8402_v50 }
 0x339   :  { %7483 = vmatmul.mubr.bf16.gmra.mrb[48].mxu0 %v2200_v32 }
 0x33a   :  { %7486 = vmatprep.mubr.bf16.mxu0 %v2201_v9  ;;  %7511 = vmatpush3.bf16.msra.mxu0 %v8402_v50  ;;  %v2469_v50 = vld [vmem:[#allocation2 + $0xc2] sm:$0xff] }
 0x33b   :  { %7512 = vmatprep.subr.bf16.mxu0 %v8403_v11  ;;  %v2484_v32 = vpack.c.bf16 %v2470_v47, %v2469_v50  ;;  %v2722_v9 = vld [vmem:[%s10960_s1 + $0x2] sm:$0xff]  ;;  %v2748_v47 = vld [vmem:[%s10960_s1 + $0xd2] sm:$0x3f] }
 0x33c   :  { %v2762_v43 = vpack.c.bf16 %v2748_v47, %v2748_v47  ;;  %v3281_v47 = vld [vmem:[%s10960_s1 + $0x2b] sm:$0xff] }
 0x33e   :  { %7513 = vmatpush3.bf16.msra.mxu0 %v8403_v11  ;;  %v2723_v11 = vld [vmem:[%s10960_s1 + $0xa] sm:$0xff] }
 0x33f   :  { %7514 = vmatprep.subr.bf16.mxu0 %v8404_v38  ;;  %v2749_v5 = vpack.c.bf16 %v2723_v11, %v2722_v9  ;;  %v3001_v9 = vld [vmem:[#allocation2 + $0x13] sm:$0xff] }
 0x341   :  { %7487 = vmatmul.mubr.bf16.gmra.mrb[52].mxu0 %v2202_v6  ;;  %v2726_v6 = vld [vmem:[%s10960_s1 + $0x22] sm:$0xff] }
 0x342   :  { %7490 = vmatprep.mubr.bf16.mxu0 %v2203_v19  ;;  %7515 = vmatpush3.bf16.msra.mxu0 %v8404_v38  ;;  %v2725_v38 = vld [vmem:[%s10960_s1 + $0x1a] sm:$0xff]  ;;  %v2727_v19 = vld [vmem:[%s10960_s1 + $0x2a] sm:$0xff] }
 0x343   :  { %7516 = vmatprep.subr.bf16.mxu0 %v8405_v24  ;;  %v2751_v13 = vpack.c.bf16 %v2727_v19, %v2726_v6  ;;  %v3005_v6 = vld [vmem:[#allocation2 + $0x33] sm:$0xff] }
 0x346   :  { %7517 = vmatpush3.bf16.msra.mxu0 %v8405_v24  ;;  %v2750_v24 = vpack.c.bf16 %v2725_v38, %v2724_v61  ;;  %v3006_v61 = vld [vmem:[#allocation2 + $0x3b] sm:$0xff]  ;;  %v3008_v38 = vld [vmem:[#allocation2 + $0x4b] sm:$0xff] }
 0x347   :  { %7546 = vmatprep.subr.bf16.mxu0 %v8406_v14  ;;  %v3029_v19 = vpack.c.bf16 %v3006_v61, %v3005_v6  ;;  %v3287_v61 = vld [vmem:[%s10960_s1 + $0x5b] sm:$0xff]  ;;  %v3289_v6 = vld [vmem:[%s10960_s1 + $0x6b] sm:$0xff] }
 0x349   :  { %7491 = vmatmul.mubr.bf16.gmra.mrb[56].mxu0 %v2204_v35  ;;  %v2731_v35 = vld [vmem:[%s10960_s1 + $0x4a] sm:$0xff] }
 0x34a   :  { %7494 = vmatprep.mubr.bf16.mxu0 %v2205_v41  ;;  %v8416_v41 = vld [vmem:[%s10961_s5 + $0xd0] sm:$0xff]  }
 0x351   :  { %7495 = vmatmul.mubr.bf16.gmra.mrb[60].mxu0 %v2206_v54  ;;  %v2733_v54 = vld [vmem:[%s10960_s1 + $0x5a] sm:$0xff] }
 0x352   :  { %7498 = vmatprep.mubr.bf16.mxu0 %v2207_v58  ;;  %v2734_v58 = vld [vmem:[%s10960_s1 + $0x62] sm:$0xff]  ;;  %v2754_v48 = vpack.c.bf16 %v2733_v54, %v2732_v49  ;;  %v8428_v49 = vld [vmem:[%s10959_s6 + $0xf0] sm:$0xff]  }
 0x353   :  { %v2755_v16 = vpack.c.bf16 %v2735_v3, %v2734_v58  ;;  %v3014_v54 = vld [vmem:[#allocation2 + $0x7b] sm:$0xff]  ;;  %v3016_v58 = vld [vmem:[#allocation2 + $0x8b] sm:$0xff]  ;;  %v3013_v3 = vld [vmem:[#allocation2 + $0x73] sm:$0xff] }
 0x359   :  { %7499 = vmatmul.mubr.bf16.gmra.mrb[76].mxu0 %v2208_v28  ;;  %v8418_v28 = vld [vmem:[%s10961_s5 + $0xe0] sm:$0xff]  }
 0x35a   :  { %7518 = vmatprep.mubr.bf16.mxu0 %v2472_v7  ;;  %v8419_v7 = vld [vmem:[%s10961_s5 + $0xe8] sm:$0xff]  }
 0x361   :  { %7519 = vmatmul.mubr.bf16.vlgmr.msra.gmra.mrb[40].mxu0 %v2473_v22  ;;  %v2739_v22 = vld [vmem:[%s10960_s1 + $0x8a] sm:$0xff] }
 0x362   :  { %7522 = vmatprep.mubr.bf16.mxu0 %v2474_v57  ;;  %7547 = vmatpush3.bf16.msra.mxu0 %v8406_v14  ;;  %v2730_v14 = vld [vmem:[%s10960_s1 + $0x42] sm:$0xff]  ;;  %v2756_v57 = vpack.c.bf16 %v2737_v53, %v2736_v36 }
 0x363   :  { %7548 = vmatprep.subr.bf16.mxu0 %v8407_v40  ;;  %v2753_v63 = vpack.c.bf16 %v2731_v35, %v2730_v14  ;;  %v3012_v14 = vld [vmem:[#allocation2 + $0x6b] sm:$0xff]  ;;  %v3009_v35 = vld [vmem:[#allocation2 + $0x53] sm:$0xff]  ;;  %v8430_v36 = vld [vmem:[%s10961_s5 + $0x100] sm:$0xff]  }
 0x364   :  { %v3018_v53 = vld [vmem:[#allocation2 + $0x9b] sm:$0xff] }
 0x366   :  { %7549 = vmatpush3.bf16.msra.mxu0 %v8407_v40  ;;  %v8420_v40 = vld [vmem:[%s10961_s5 + $0xf0] sm:$0xff]  }
 0x367   :  { %7550 = vmatprep.subr.bf16.mxu0 %v8408_v34 }
 0x369   :  { %7523 = vmatmul.mubr.bf16.gmra.mrb[44].mxu0 %v2475_v17  ;;  %v2460_v17 = vld [vmem:[#allocation2 + $0x7a] sm:$0xff] }
 0x36a   :  { %7526 = vmatprep.mubr.bf16.mxu0 %v2476_v44  ;;  %7551 = vmatpush3.bf16.msra.mxu0 %v8408_v34  ;;  %v2479_v44 = vpack.c.bf16 %v2460_v17, %v2459_v29  ;;  %v2757_v34 = vpack.c.bf16 %v2739_v22, %v2738_v8  ;;  %v2744_v29 = vld [vmem:[%s10960_s1 + $0xb2] sm:$0xff] }
 0x36b   :  { %7552 = vmatprep.subr.bf16.mxu0 %v8409_v27  ;;  %v3020_v8 = vld [vmem:[#allocation2 + $0xab] sm:$0xff]  ;;  %v3017_v22 = vld [vmem:[#allocation2 + $0x93] sm:$0xff] }
 0x36e   :  { %7553 = vmatpush3.bf16.msra.mxu0 %v8409_v27  ;;  %v8421_v27 = vld [vmem:[%s10961_s5 + $0xf8] sm:$0xff]  }
 0x36f   :  { %7554 = vmatprep.subr.bf16.mxu0 %v8410_v12 }
 0x371   :  { %7527 = vmatmul.mubr.bf16.gmra.mrb[48].mxu0 %v2477_v46  ;;  %v2464_v46 = vld [vmem:[#allocation2 + $0x9a] sm:$0xff] }
 0x372   :  { %7530 = vmatprep.mubr.bf16.mxu0 %v2478_v20  ;;  %7555 = vmatpush3.bf16.msra.mxu0 %v8410_v12  ;;  %v2481_v2 = vpack.c.bf16 %v2464_v46, %v2463_v15  ;;  %v2740_v12 = vld [vmem:[%s10960_s1 + $0x92] sm:$0xff]  ;;  %v2743_v20 = vld [vmem:[%s10960_s1 + $0xaa] sm:$0xff] }
 0x373   :  { %7556 = vmatprep.subr.bf16.mxu0 %v8411_v42  ;;  %v2758_v17 = vpack.c.bf16 %v2741_v10, %v2740_v12  ;;  %v3022_v12 = vld [vmem:[#allocation2 + $0xbb] sm:$0xff] }
 0x376   :  { %7557 = vmatpush3.bf16.msra.mxu0 %v8411_v42  ;;  %v2742_v42 = vld [vmem:[%s10960_s1 + $0xa2] sm:$0xff] }
 0x377   :  { %7558 = vmatprep.subr.bf16.mxu0 %v8412_v39  ;;  %v2759_v23 = vpack.c.bf16 %v2743_v20, %v2742_v42  ;;  %v3024_v20 = vld [vmem:[#allocation2 + $0xcb] sm:$0xff] }
 0x379   :  { %7531 = vmatmul.mubr.bf16.gmra.mrb[52].mxu0 %v2479_v44  ;;  %v2745_v44 = vld [vmem:[%s10960_s1 + $0xba] sm:$0xff] }
 0x37a   :  { %7534 = vmatprep.mubr.bf16.mxu0 %v2480_v51  ;;  %7559 = vmatpush3.bf16.msra.mxu0 %v8412_v39  ;;  %v8422_v39 = vld [vmem:[%s10959_s6 + $0xc0] sm:$0xff]   ;;  %v2760_v59 = vpack.c.bf16 %v2745_v44, %v2744_v29 }
 0x37b   :  { %7560 = vmatprep.subr.bf16.mxu0 %v8413_v30 }
 0x37e   :  { %7561 = vmatpush3.bf16.msra.mxu0 %v8413_v30  ;;  %v2747_v30 = vld [vmem:[%s10960_s1 + $0xca] sm:$0xff] }
 0x37f   :  { %7590 = vmatprep.subr.bf16.mxu0 %v8414_v55  ;;  %v2761_v62 = vpack.c.bf16 %v2747_v30, %v2746_v52  ;;  %v3023_v52 = vld [vmem:[#allocation2 + $0xc3] sm:$0xff] }
 0x381   :  { %7535 = vmatmul.mubr.bf16.gmra.mrb[56].mxu0 %v2481_v2 }
 0x382   :  { %7538 = vmatprep.mubr.bf16.mxu0 %v2482_v33 }
 0x389   :  { %7539 = vmatmul.mubr.bf16.gmra.mrb[60].mxu0 %v2483_v37  ;;  %v2999_v37 = vld [vmem:[#allocation2 + $0x3] sm:$0xff] }
 0x38a   :  { %7542 = vmatprep.mubr.bf16.mxu0 %v2484_v32  ;;  %v3004_v32 = vld [vmem:[#allocation2 + $0x2b] sm:$0xff] }
 0x391   :  { %7543 = vmatmul.mubr.bf16.gmra.mrb[80].mxu0 %v2485_v4  ;;  %v8424_v4 = vld [vmem:[%s10959_s6 + $0xd0] sm:$0xff]  }
 0x392   :  { %7562 = vmatprep.mubr.bf16.mxu0 %v2749_v5  ;;  %v3028_v5 = vpack.c.bf16 %v3004_v32, %v3003_v45  ;;  %v3284_v32 = vld [vmem:[%s10960_s1 + $0x43] sm:$0xff] }
 0x399   :  { %7563 = vmatmul.mubr.bf16.vlgmr.msra.gmra.mrb[40].mxu0 %v2750_v24  ;;  %v3007_v24 = vld [vmem:[#allocation2 + $0x43] sm:$0xff] }
 0x39a   :  { %7566 = vmatprep.mubr.bf16.mxu0 %v2751_v13  ;;  %7591 = vmatpush3.bf16.msra.mxu0 %v8414_v55  ;;  %v8425_v13 = vld [vmem:[%s10959_s6 + $0xd8] sm:$0xff]  }
 0x39b   :  { %7592 = vmatprep.subr.bf16.mxu0 %v8415_v25 }
 0x39e   :  { %7593 = vmatpush3.bf16.msra.mxu0 %v8415_v25  ;;  %v3030_v25 = vpack.c.bf16 %v3008_v38, %v3007_v24  ;;  %v3288_v38 = vld [vmem:[%s10960_s1 + $0x63] sm:$0xff] }
 0x39f   :  { %7594 = vmatprep.subr.bf16.mxu0 %v8416_v41 }
 0x3a1   :  { %7567 = vmatmul.mubr.bf16.gmra.mrb[44].mxu0 %v2752_v0  ;;  %v3011_v0 = vld [vmem:[#allocation2 + $0x63] sm:$0xff] }
 0x3a2   :  { %7570 = vmatprep.mubr.bf16.mxu0 %v2753_v63  ;;  %7595 = vmatpush3.bf16.msra.mxu0 %v8416_v41  ;;  %v3031_v41 = vpack.c.bf16 %v3010_v56, %v3009_v35  ;;  %v8427_v63 = vld [vmem:[%s10959_s6 + $0xe8] sm:$0xff]   ;;  %v3291_v56 = vld [vmem:[%s10960_s1 + $0x7b] sm:$0xff] }
 0x3a3   :  { %7596 = vmatprep.subr.bf16.mxu0 %v8417_v21  ;;  %v3293_v35 = vld [vmem:[%s10960_s1 + $0x8b] sm:$0xff] }
 0x3a6   :  { %7597 = vmatpush3.bf16.msra.mxu0 %v8417_v21  ;;  %v3032_v21 = vpack.c.bf16 %v3012_v14, %v3011_v0  ;;  %v3292_v14 = vld [vmem:[%s10960_s1 + $0x83] sm:$0xff] }
 0x3a7   :  { %7598 = vmatprep.subr.bf16.mxu0 %v8418_v28 }
 0x3a9   :  { %7571 = vmatmul.mubr.bf16.gmra.mrb[48].mxu0 %v2754_v48  ;;  %v3015_v48 = vld [vmem:[#allocation2 + $0x83] sm:$0xff] }
 0x3aa   :  { %7574 = vmatprep.mubr.bf16.mxu0 %v2755_v16  ;;  %7599 = vmatpush3.bf16.msra.mxu0 %v8418_v28  ;;  %v3033_v28 = vpack.c.bf16 %v3014_v54, %v3013_v3  ;;  %v8429_v16 = vld [vmem:[%s10959_s6 + $0xf8] sm:$0xff]   ;;  %v3297_v3 = vld [vmem:[%s10960_s1 + $0xab] sm:$0xff] }
 0x3ab   :  { %7600 = vmatprep.subr.bf16.mxu0 %v8419_v7  ;;  %v3295_v54 = vld [vmem:[%s10960_s1 + $0x9b] sm:$0xff] }
 0x3ae   :  { %7601 = vmatpush3.bf16.msra.mxu0 %v8419_v7  ;;  %v3034_v7 = vpack.c.bf16 %v3016_v58, %v3015_v48  ;;  %v3296_v58 = vld [vmem:[%s10960_s1 + $0xa3] sm:$0xff] }
 0x3af   :  { %7602 = vmatprep.subr.bf16.mxu0 %v8420_v40 }
 0x3b1   :  { %7575 = vmatmul.mubr.bf16.gmra.mrb[52].mxu0 %v2756_v57  ;;  %v3019_v57 = vld [vmem:[#allocation2 + $0xa3] sm:$0xff] }
 0x3b2   :  { %7578 = vmatprep.mubr.bf16.mxu0 %v2757_v34  ;;  %7603 = vmatpush3.bf16.msra.mxu0 %v8420_v40  ;;  %v3035_v40 = vpack.c.bf16 %v3018_v53, %v3017_v22  ;;  %v3036_v34 = vpack.c.bf16 %v3020_v8, %v3019_v57  ;;  %v3300_v53 = vld [vmem:[%s10960_s1 + $0xc3] sm:$0xff]  ;;  %v3301_v8 = vld [vmem:[%s10960_s1 + $0xcb] sm:$0xff] }
 0x3b3   :  { %7604 = vmatprep.subr.bf16.mxu0 %v8421_v27 }
 0x3b6   :  { %7605 = vmatpush3.bf16.msra.mxu0 %v8421_v27 }
 0x3b7   :  { %7634 = vmatprep.subr.bf16.mxu0 %v8422_v39 }
 0x3b9   :  { %7579 = vmatmul.mubr.bf16.gmra.mrb[56].mxu0 %v2758_v17 }
 0x3ba   :  { %7582 = vmatprep.mubr.bf16.mxu0 %v2759_v23  ;;  %v3021_v23 = vld [vmem:[#allocation2 + $0xb3] sm:$0xff] }
 0x3bb   :  { %v3037_v44 = vpack.c.bf16 %v3022_v12, %v3021_v23  ;;  %v3302_v23 = vld [vmem:[%s10960_s1 + $0xd3] sm:$0x3f] }
 0x3bc   :  { %v7412_v51 = vpop.f32.mrb[68].mxu0 }
 0x3bd   :  { %v9631_v55 = vadd.f32 %v7412_v51, %v9373_v1  ;;  %v1877_v46 = vpop.f32.mrb[69].mxu0  ;;  %v3000_v1 = vld [vmem:[#allocation2 + $0xb] sm:$0xff]  ;;  %v3038_v51 = vpack.c.bf16 %v3024_v20, %v3023_v52 }
 0x3be   :  { %v9634_v15 = vadd.f32 %v1877_v46, %v9378_v60  ;;  %v7413_v2 = vpop.f32.mrb[70].mxu0  ;;  %v3026_v50 = vpack.c.bf16 %v3000_v1, %v2999_v37  ;;  %v3002_v60 = vld [vmem:[#allocation2 + $0x1b] sm:$0xff]  ;;  %v3277_v46 = vld [vmem:[%s10960_s1 + $0xb] sm:$0xff] }
 0x3bf   :  { %v1880_v33 = vpop.f32.mrb[71].mxu0  ;;  %v3027_v11 = vpack.c.bf16 %v3002_v60, %v3001_v9  ;;  %v8431_v37 = vld [vmem:[%s10961_s5 + $0x108] sm:$0xff]   ;;  %v3283_v60 = vld [vmem:[%s10960_s1 + $0x3b] sm:$0xff] }
 0x3c0   :  { %v9637_v26 = vadd.f32 %v1880_v33, %v9380_v18  ;;  %v8423_v18 = vld [vmem:[%s10959_s6 + $0xc8] sm:$0xff]   ;;  %v3279_v33 = vld [vmem:[%s10960_s1 + $0x1b] sm:$0xff] }
 0x3c1   :  { %7583 = vmatmul.mubr.bf16.gmra.mrb[60].mxu0 %v2760_v59  ;;  %v3025_v59 = vld [vmem:[#allocation2 + $0xd3] sm:$0x3f]  ;;  %v3285_v9 = vld [vmem:[%s10960_s1 + $0x4b] sm:$0xff] }
 0x3c2   :  { %7586 = vmatprep.mubr.bf16.mxu0 %v2761_v62  ;;  %v3039_v2 = vpack.c.bf16 %v3025_v59, %v3025_v59  ;;  %v3278_v62 = vld [vmem:[%s10960_s1 + $0x13] sm:$0xff]  ;;  %v3557_v59 = vld [vmem:[#allocation2 + $0x24] sm:$0xff] }
 0x3c9   :  { %7587 = vmatmul.mubr.bf16.gmra.mrb[84].mxu0 %v2762_v43  ;;  %v3304_v43 = vpack.c.bf16 %v3279_v33, %v3278_v62  ;;  %v3560_v62 = vld [vmem:[#allocation2 + $0x3c] sm:$0xff]  ;;  %v3562_v33 = vld [vmem:[#allocation2 + $0x4c] sm:$0xff] }
 0x3ca   :  { %7606 = vmatprep.mubr.bf16.mxu0 %v3026_v50  ;;  %v3282_v50 = vld [vmem:[%s10960_s1 + $0x33] sm:$0xff] }
 0x3cb   :  { %v3306_v45 = vpack.c.bf16 %v3283_v60, %v3282_v50  ;;  %v8442_v50 = vld [vmem:[%s10959_s6 + $0x120] sm:$0xff]  }
 0x3cc   :  { %v3564_v60 = vld [vmem:[#allocation2 + $0x5c] sm:$0xff] }
 0x3d1   :  { %7607 = vmatmul.mubr.bf16.vlgmr.msra.gmra.mrb[40].mxu0 %v3027_v11  ;;  %v8432_v11 = vld [vmem:[%s10961_s5 + $0x110] sm:$0xff]  }
 0x3d2   :  { %7610 = vmatprep.mubr.bf16.mxu0 %v3028_v5  ;;  %7635 = vmatpush3.bf16.msra.mxu0 %v8422_v39  ;;  %v8433_v5 = vld [vmem:[%s10961_s5 + $0x118] sm:$0xff]  }
 0x3d3   :  { %7636 = vmatprep.subr.bf16.mxu0 %v8423_v18 }
 0x3d6   :  { %7637 = vmatpush3.bf16.msra.mxu0 %v8423_v18  ;;  %v3307_v18 = vpack.c.bf16 %v3285_v9, %v3284_v32  ;;  %v3566_v32 = vld [vmem:[#allocation2 + $0x6c] sm:$0xff]  ;;  %v3563_v9 = vld [vmem:[#allocation2 + $0x54] sm:$0xff] }
 0x3d7   :  { %7638 = vmatprep.subr.bf16.mxu0 %v8424_v4 }
 0x3d9   :  { %7611 = vmatmul.mubr.bf16.gmra.mrb[44].mxu0 %v3029_v19  ;;  %v8434_v19 = vld [vmem:[%s10961_s5 + $0x120] sm:$0xff]  }
 0x3da   :  { %7614 = vmatprep.mubr.bf16.mxu0 %v3030_v25  ;;  %7639 = vmatpush3.bf16.msra.mxu0 %v8424_v4  ;;  %v3286_v4 = vld [vmem:[%s10960_s1 + $0x53] sm:$0xff]  ;;  %v8435_v25 = vld [vmem:[%s10961_s5 + $0x128] sm:$0xff]  }
 0x3db   :  { %7640 = vmatprep.subr.bf16.mxu0 %v8425_v13  ;;  %v3308_v24 = vpack.c.bf16 %v3287_v61, %v3286_v4  ;;  %v8444_v4 = vld [vmem:[%s10959_s6 + $0x130] sm:$0xff]   ;;  %v3568_v61 = vld [vmem:[#allocation2 + $0x7c] sm:$0xff] }
 0x3de   :  { %7641 = vmatpush3.bf16.msra.mxu0 %v8425_v13  ;;  %v3309_v13 = vpack.c.bf16 %v3289_v6, %v3288_v38  ;;  %v3570_v38 = vld [vmem:[#allocation2 + $0x8c] sm:$0xff]  ;;  %v3567_v6 = vld [vmem:[#allocation2 + $0x74] sm:$0xff] }
 0x3df   :  { %7642 = vmatprep.subr.bf16.mxu0 %v8426_v31 }
 0x3e1   :  { %7615 = vmatmul.mubr.bf16.gmra.mrb[48].mxu0 %v3031_v41  ;;  %v8436_v41 = vld [vmem:[%s10961_s5 + $0x130] sm:$0xff]  }
 0x3e2   :  { %7618 = vmatprep.mubr.bf16.mxu0 %v3032_v21  ;;  %7643 = vmatpush3.bf16.msra.mxu0 %v8426_v31  ;;  %v3290_v31 = vld [vmem:[%s10960_s1 + $0x73] sm:$0xff] }
 0x3e3   :  { %7644 = vmatprep.subr.bf16.mxu0 %v8427_v63  ;;  %v3310_v0 = vpack.c.bf16 %v3291_v56, %v3290_v31  ;;  %v8437_v21 = vld [vmem:[%s10961_s5 + $0x138] sm:$0xff]   ;;  %v3574_v56 = vld [vmem:[#allocation2 + $0xac] sm:$0xff] }
 0x3e4   :  { %v3572_v31 = vld [vmem:[#allocation2 + $0x9c] sm:$0xff] }
 0x3e6   :  { %7645 = vmatpush3.bf16.msra.mxu0 %v8427_v63  ;;  %v3311_v63 = vpack.c.bf16 %v3293_v35, %v3292_v14  ;;  %v3571_v14 = vld [vmem:[#allocation2 + $0x94] sm:$0xff] }
 0x3e7   :  { %7646 = vmatprep.subr.bf16.mxu0 %v8428_v49  ;;  %v3589_v35 = vpack.c.bf16 %v3572_v31, %v3571_v14 }
 0x3e9   :  { %7619 = vmatmul.mubr.bf16.gmra.mrb[52].mxu0 %v3033_v28  ;;  %v8438_v28 = vld [vmem:[%s10959_s6 + $0x100] sm:$0xff]  }
 0x3ea   :  { %7622 = vmatprep.mubr.bf16.mxu0 %v3034_v7  ;;  %7647 = vmatpush3.bf16.msra.mxu0 %v8428_v49  ;;  %v3294_v49 = vld [vmem:[%s10960_s1 + $0x93] sm:$0xff] }
 0x3eb   :  { %7648 = vmatprep.subr.bf16.mxu0 %v8429_v16  ;;  %v3312_v48 = vpack.c.bf16 %v3295_v54, %v3294_v49  ;;  %v3298_v7 = vld [vmem:[%s10960_s1 + $0xb3] sm:$0xff] }
 0x3ee   :  { %7649 = vmatpush3.bf16.msra.mxu0 %v8429_v16  ;;  %v3313_v16 = vpack.c.bf16 %v3297_v3, %v3296_v58  ;;  %v3578_v58 = vld [vmem:[#allocation2 + $0xcc] sm:$0xff] }
 0x3ef   :  { %7678 = vmatprep.subr.bf16.mxu0 %v8430_v36 }
 0x3f1   :  { %7623 = vmatmul.mubr.bf16.gmra.mrb[56].mxu0 %v3035_v40 }
 0x3f2   :  { %7626 = vmatprep.mubr.bf16.mxu0 %v3036_v34 }
 0x3f4   :  { %v7456_v27 = vpop.f32.mrb[72].mxu0 }
 0x3f5   :  { %v9667_v10 = vadd.f32 %v7456_v27, %v9631_v55  ;;  %v2127_v42 = vpop.f32.mrb[73].mxu0  ;;  %v3276_v55 = vld [vmem:[%s10960_s1 + $0x3] sm:$0xff] }
 0x3f6   :  { %v9670_v39 = vadd.f32 %v2127_v42, %v9634_v15  ;;  %v7457_v17 = vpop.f32.mrb[74].mxu0  ;;  %v3303_v15 = vpack.c.bf16 %v3277_v46, %v3276_v55  ;;  %v3315_v42 = vpack.c.bf16 %v3301_v8, %v3300_v53  ;;  %v3555_v55 = vld [vmem:[#allocation2 + $0x14] sm:$0xff] }
 0x3f7   :  { %v2130_v29 = vpop.f32.mrb[75].mxu0 }
 0x3f8   :  { %v9673_v30 = vadd.f32 %v2130_v29, %v9637_v26  ;;  %v3280_v26 = vld [vmem:[%s10960_s1 + $0x23] sm:$0xff]  ;;  %v3316_v29 = vpack.c.bf16 %v3302_v23, %v3302_v23 }
 0x3f9   :  { %7627 = vmatmul.mubr.bf16.gmra.mrb[60].mxu0 %v3037_v44  ;;  %v3305_v1 = vpack.c.bf16 %v3281_v47, %v3280_v26  ;;  %v3553_v44 = vld [vmem:[#allocation2 + $0x4] sm:$0xff]  ;;  %v3559_v26 = vld [vmem:[#allocation2 + $0x34] sm:$0xff] }
 0x3fa   :  { %7630 = vmatprep.mubr.bf16.mxu0 %v3038_v51  ;;  %v3558_v51 = vld [vmem:[#allocation2 + $0x2c] sm:$0xff]  ;;  %v3583_v47 = vpack.c.bf16 %v3560_v62, %v3559_v26  ;;  %v3845_v26 = vld [vmem:[%s10960_s1 + $0x7c] sm:$0xff] }
 0x401   :  { %7631 = vmatmul.mubr.bf16.gmra.mrb[88].mxu0 %v3039_v2  ;;  %v8440_v2 = vld [vmem:[%s10959_s6 + $0x110] sm:$0xff]  }
 0x402   :  { %7650 = vmatprep.mubr.bf16.mxu0 %v3303_v15  ;;  %v3582_v15 = vpack.c.bf16 %v3558_v51, %v3557_v59  ;;  %v3841_v59 = vld [vmem:[%s10960_s1 + $0x5c] sm:$0xff] }
 0x409   :  { %7651 = vmatmul.mubr.bf16.vlgmr.msra.gmra.mrb[40].mxu0 %v3304_v43  ;;  %v3561_v43 = vld [vmem:[#allocation2 + $0x44] sm:$0xff] }
 0x40a   :  { %7654 = vmatprep.mubr.bf16.mxu0 %v3305_v1  ;;  %7679 = vmatpush3.bf16.msra.mxu0 %v8430_v36  ;;  %v3299_v36 = vld [vmem:[%s10960_s1 + $0xbb] sm:$0xff] }
 0x40b   :  { %7680 = vmatprep.subr.bf16.mxu0 %v8431_v37  ;;  %v3314_v34 = vpack.c.bf16 %v3299_v36, %v3298_v7  ;;  %v8441_v1 = vld [vmem:[%s10959_s6 + $0x118] sm:$0xff]   ;;  %v3577_v36 = vld [vmem:[#allocation2 + $0xc4] sm:$0xff] }
 0x40c   :  { %v3592_v8 = vpack.c.bf16 %v3578_v58, %v3577_v36 }
 0x40e   :  { %7681 = vmatpush3.bf16.msra.mxu0 %v8431_v37  ;;  %v3584_v37 = vpack.c.bf16 %v3562_v33, %v3561_v43  ;;  %v3844_v33 = vld [vmem:[%s10960_s1 + $0x74] sm:$0xff]  ;;  %v3847_v43 = vld [vmem:[%s10960_s1 + $0x8c] sm:$0xff] }
 0x40f   :  { %7682 = vmatprep.subr.bf16.mxu0 %v8432_v11 }
 0x411   :  { %7655 = vmatmul.mubr.bf16.gmra.mrb[44].mxu0 %v3306_v45  ;;  %v3565_v45 = vld [vmem:[#allocation2 + $0x64] sm:$0xff] }
 0x412   :  { %7658 = vmatprep.mubr.bf16.mxu0 %v3307_v18  ;;  %7683 = vmatpush3.bf16.msra.mxu0 %v8432_v11  ;;  %v3585_v11 = vpack.c.bf16 %v3564_v60, %v3563_v9  ;;  %v8443_v18 = vld [vmem:[%s10959_s6 + $0x128] sm:$0xff]   ;;  %v3849_v60 = vld [vmem:[%s10960_s1 + $0x9c] sm:$0xff] }
 0x413   :  { %7684 = vmatprep.subr.bf16.mxu0 %v8433_v5  ;;  %v3851_v9 = vld [vmem:[%s10960_s1 + $0xac] sm:$0xff] }
 0x416   :  { %7685 = vmatpush3.bf16.msra.mxu0 %v8433_v5  ;;  %v3586_v5 = vpack.c.bf16 %v3566_v32, %v3565_v45  ;;  %v3850_v32 = vld [vmem:[%s10960_s1 + $0xa4] sm:$0xff] }
 0x417   :  { %7686 = vmatprep.subr.bf16.mxu0 %v8434_v19  ;;  %v3867_v45 = vpack.c.bf16 %v3851_v9, %v3850_v32 }
 0x419   :  { %7659 = vmatmul.mubr.bf16.gmra.mrb[48].mxu0 %v3308_v24  ;;  %v3569_v24 = vld [vmem:[#allocation2 + $0x84] sm:$0xff] }
 0x41a   :  { %7662 = vmatprep.mubr.bf16.mxu0 %v3309_v13  ;;  %7687 = vmatpush3.bf16.msra.mxu0 %v8434_v19  ;;  %v3587_v19 = vpack.c.bf16 %v3568_v61, %v3567_v6  ;;  %v8445_v13 = vld [vmem:[%s10959_s6 + $0x138] sm:$0xff]   ;;  %v3855_v61 = vld [vmem:[%s10960_s1 + $0xcc] sm:$0xff] }
 0x41b   :  { %7688 = vmatprep.subr.bf16.mxu0 %v8435_v25 }
 0x41e   :  { %7689 = vmatpush3.bf16.msra.mxu0 %v8435_v25  ;;  %v3588_v25 = vpack.c.bf16 %v3570_v38, %v3569_v24 }
 0x41f   :  { %7690 = vmatprep.subr.bf16.mxu0 %v8436_v41 }
 0x421   :  { %7663 = vmatmul.mubr.bf16.gmra.mrb[52].mxu0 %v3310_v0 }
 0x422   :  { %7666 = vmatprep.mubr.bf16.mxu0 %v3311_v63  ;;  %7691 = vmatpush3.bf16.msra.mxu0 %v8436_v41  ;;  %v3573_v41 = vld [vmem:[#allocation2 + $0xa4] sm:$0xff] }
 0x423   :  { %7692 = vmatprep.subr.bf16.mxu0 %v8437_v21  ;;  %v3590_v0 = vpack.c.bf16 %v3574_v56, %v3573_v41 }
 0x426   :  { %7693 = vmatpush3.bf16.msra.mxu0 %v8437_v21  ;;  %v3576_v21 = vld [vmem:[#allocation2 + $0xbc] sm:$0xff] }
 0x427   :  { %7722 = vmatprep.subr.bf16.mxu0 %v8438_v28 }
 0x429   :  { %7667 = vmatmul.mubr.bf16.gmra.mrb[56].mxu0 %v3312_v48  ;;  %v3575_v48 = vld [vmem:[#allocation2 + $0xb4] sm:$0xff] }
 0x42a   :  { %7670 = vmatprep.mubr.bf16.mxu0 %v3313_v16  ;;  %v3591_v7 = vpack.c.bf16 %v3576_v21, %v3575_v48 }
 0x42c   :  { %v7500_v22 = vpop.f32.mrb[76].mxu0 }
 0x42d   :  { %v9778_v40 = vadd.f32 %v7500_v22, %v9667_v10  ;;  %v2404_v57 = vpop.f32.mrb[77].mxu0  ;;  %v3554_v10 = vld [vmem:[#allocation2 + $0xc] sm:$0xff]  ;;  %v3830_v22 = vld [vmem:[%s10960_s1 + $0x4] sm:$0xff] }
 0x42e   :  { %v9781_v27 = vadd.f32 %v2404_v57, %v9670_v39  ;;  %v7501_v12 = vpop.f32.mrb[78].mxu0  ;;  %v3580_v52 = vpack.c.bf16 %v3554_v10, %v3553_v44  ;;  %v3556_v39 = vld [vmem:[#allocation2 + $0x1c] sm:$0xff]  ;;  %v3579_v57 = vld [vmem:[#allocation2 + $0xd4] sm:$0x3f] }
 0x42f   :  { %v2407_v20 = vpop.f32.mrb[79].mxu0  ;;  %v3581_v46 = vpack.c.bf16 %v3556_v39, %v3555_v55  ;;  %v3832_v12 = vld [vmem:[%s10960_s1 + $0x14] sm:$0xff]  ;;  %v3837_v44 = vld [vmem:[%s10960_s1 + $0x3c] sm:$0xff]  ;;  %v3839_v39 = vld [vmem:[%s10960_s1 + $0x4c] sm:$0xff] }
 0x430   :  { %v9784_v17 = vadd.f32 %v2407_v20, %v9673_v30  ;;  %v8439_v30 = vld [vmem:[%s10959_s6 + $0x108] sm:$0xff]   ;;  %v3836_v10 = vld [vmem:[%s10960_s1 + $0x34] sm:$0xff] }
 0x431   :  { %7671 = vmatmul.mubr.bf16.gmra.mrb[60].mxu0 %v3314_v34  ;;  %v3834_v20 = vld [vmem:[%s10960_s1 + $0x24] sm:$0xff]  ;;  %v3860_v51 = vpack.c.bf16 %v3837_v44, %v3836_v10 }
 0x432   :  { %7674 = vmatprep.mubr.bf16.mxu0 %v3315_v42  ;;  %v3833_v42 = vld [vmem:[%s10960_s1 + $0x1c] sm:$0xff] }
 0x433   :  { %v3858_v23 = vpack.c.bf16 %v3833_v42, %v3832_v12  ;;  %v8451_v12 = vld [vmem:[%s10963_s10 + $0x68] sm:$0xff]   ;;  %v8452_v42 = vld [vmem:[%s10963_s10 + $0x70] sm:$0xff]  }
 0x439   :  { %7675 = vmatmul.mubr.bf16.gmra.mrb[92].mxu0 %v3316_v29 }
 0x43a   :  { %7694 = vmatprep.mubr.bf16.mxu0 %v3580_v52  ;;  %v3838_v52 = vld [vmem:[%s10960_s1 + $0x44] sm:$0xff] }
 0x43b   :  { %v3861_v55 = vpack.c.bf16 %v3839_v39, %v3838_v52 }
 0x441   :  { %7695 = vmatmul.mubr.bf16.vlgmr.msra.gmra.mrb[40].mxu0 %v3581_v46  ;;  %v3840_v46 = vld [vmem:[%s10960_s1 + $0x54] sm:$0xff] }
 0x442   :  { %7698 = vmatprep.mubr.bf16.mxu0 %v3582_v15  ;;  %7723 = vmatpush3.bf16.msra.mxu0 %v8438_v28  ;;  %v3843_v15 = vld [vmem:[%s10960_s1 + $0x6c] sm:$0xff] }
 0x443   :  { %7724 = vmatprep.subr.bf16.mxu0 %v8439_v30 }
 0x446   :  { %7725 = vmatpush3.bf16.msra.mxu0 %v8439_v30  ;;  %v3842_v30 = vld [vmem:[%s10960_s1 + $0x64] sm:$0xff] }
 0x447   :  { %7726 = vmatprep.subr.bf16.mxu0 %v8440_v2  ;;  %v3863_v62 = vpack.c.bf16 %v3843_v15, %v3842_v30 }
 0x449   :  { %7699 = vmatmul.mubr.bf16.gmra.mrb[44].mxu0 %v3583_v47  ;;  %v3846_v47 = vld [vmem:[%s10960_s1 + $0x84] sm:$0xff] }
 0x44a   :  { %7702 = vmatprep.mubr.bf16.mxu0 %v3584_v37  ;;  %7727 = vmatpush3.bf16.msra.mxu0 %v8440_v2  ;;  %v3862_v2 = vpack.c.bf16 %v3841_v59, %v3840_v46  ;;  %v3865_v37 = vpack.c.bf16 %v3847_v43, %v3846_v47 }
 0x44b   :  { %7728 = vmatprep.subr.bf16.mxu0 %v8441_v1 }
 0x44e   :  { %7729 = vmatpush3.bf16.msra.mxu0 %v8441_v1  ;;  %v3864_v1 = vpack.c.bf16 %v3845_v26, %v3844_v33 }
 0x44f   :  { %7730 = vmatprep.subr.bf16.mxu0 %v8442_v50 }
 0x451   :  { %7703 = vmatmul.mubr.bf16.gmra.mrb[48].mxu0 %v3585_v11 }
 0x452   :  { %7706 = vmatprep.mubr.bf16.mxu0 %v3586_v5  ;;  %7731 = vmatpush3.bf16.msra.mxu0 %v8442_v50  ;;  %v3848_v50 = vld [vmem:[%s10960_s1 + $0x94] sm:$0xff]  ;;  %v3853_v5 = vld [vmem:[%s10960_s1 + $0xbc] sm:$0xff] }
 0x453   :  { %7732 = vmatprep.subr.bf16.mxu0 %v8443_v18  ;;  %v3866_v11 = vpack.c.bf16 %v3849_v60, %v3848_v50 }
 0x456   :  { %7733 = vmatpush3.bf16.msra.mxu0 %v8443_v18  ;;  %v3852_v18 = vld [vmem:[%s10960_s1 + $0xb4] sm:$0xff] }
 0x457   :  { %7734 = vmatprep.subr.bf16.mxu0 %v8444_v4  ;;  %v3868_v24 = vpack.c.bf16 %v3853_v5, %v3852_v18 }
 0x459   :  { %7707 = vmatmul.mubr.bf16.gmra.mrb[52].mxu0 %v3587_v19 }
 0x45a   :  { %7710 = vmatprep.mubr.bf16.mxu0 %v3588_v25  ;;  %7735 = vmatpush3.bf16.msra.mxu0 %v8444_v4  ;;  %v3854_v4 = vld [vmem:[%s10960_s1 + $0xc4] sm:$0xff] }
 0x45b   :  { %7736 = vmatprep.subr.bf16.mxu0 %v8445_v13  ;;  %v3869_v31 = vpack.c.bf16 %v3855_v61, %v3854_v4 }
 0x45e   :  { %7737 = vmatpush3.bf16.msra.mxu0 %v8445_v13 }
 0x461   :  { %7711 = vmatmul.mubr.bf16.gmra.mrb[56].mxu0 %v3589_v35  ;;  %v3856_v35 = vld [vmem:[%s10960_s1 + $0xd4] sm:$0x3f] }
 0x462   :  { %7714 = vmatprep.mubr.bf16.mxu0 %v3590_v0  ;;  %v3870_v41 = vpack.c.bf16 %v3856_v35, %v3856_v35 }
 0x464   :  { %v7544_v63 = vpop.f32.mrb[80].mxu0 }
 0x465   :  { %v9811_v49 = vadd.f32 %v7544_v63, %v9778_v40  ;;  %v2681_v54 = vpop.f32.mrb[81].mxu0  ;;  %v3831_v40 = vld [vmem:[%s10960_s1 + $0xc] sm:$0xff] }
 0x466   :  { %v9814_v3 = vadd.f32 %v2681_v54, %v9781_v27  ;;  %v7545_v28 = vpop.f32.mrb[82].mxu0  ;;  %v3857_v34 = vpack.c.bf16 %v3831_v40, %v3830_v22  ;;  %v3593_v27 = vpack.c.bf16 %v3579_v57, %v3579_v57  ;;  %v8446_v22 = vld [vmem:[%s10963_s10 + $0x40] sm:$0xff]   ;;  %v8447_v40 = vld [vmem:[%s10963_s10 + $0x48] sm:$0xff]   ;;  %v8448_v57 = vld [vmem:[%s10963_s10 + $0x50] sm:$0xff]  }
 0x467   :  { %v2684_v16 = vpop.f32.mrb[83].mxu0  ;;  %7766 = vmatprep.subr.bf16.mxu1 %v8446_v22 }
 0x468   :  { %v9817_v53 = vadd.f32 %v2684_v16, %v9784_v17  ;;  %v3835_v17 = vld [vmem:[%s10960_s1 + $0x2c] sm:$0xff]  ;;  %7767 = vmatpush3.bf16.msra.mxu1 %v8446_v22 }
 0x469   :  { %7715 = vmatmul.mubr.bf16.gmra.mrb[60].mxu0 %v3591_v7  ;;  %v3859_v29 = vpack.c.bf16 %v3835_v17, %v3834_v20  ;;  %7768 = vmatprep.subr.bf16.mxu1 %v8447_v40  ;;  %v8453_v20 = vld [vmem:[%s10963_s10 + $0x78] sm:$0xff]  }
 0x46a   :  { %7718 = vmatprep.mubr.bf16.mxu0 %v3592_v8 }
 0x46c   :  { %7769 = vmatpush3.bf16.msra.mxu1 %v8447_v40 }
 0x46d   :  { %7770 = vmatprep.subr.bf16.mxu1 %v8448_v57 }
 0x470   :  { %7771 = vmatpush3.bf16.msra.mxu1 %v8448_v57 }
 0x471   :  { %7719 = vmatmul.mubr.bf16.gmra.mrb[96].mxu0 %v3593_v27  ;;  %v8450_v27 = vld [vmem:[%s10963_s10 + $0x60] sm:$0xff]  }
 0x472   :  { %7738 = vmatprep.mubr.bf16.mxu0 %v3857_v34  ;;  %v8449_v34 = vld [vmem:[%s10963_s10 + $0x58] sm:$0xff]  }
 0x473   :  { %7772 = vmatprep.subr.bf16.mxu1 %v8449_v34 }
 0x474   :  { %7773 = vmatpush3.bf16.msra.mxu1 %v8449_v34 }
 0x475   :  { %7774 = vmatprep.subr.bf16.mxu1 %v8450_v27 }
 0x478   :  { %7775 = vmatpush3.bf16.msra.mxu1 %v8450_v27 }
 0x479   :  { %7739 = vmatmul.mubr.bf16.vlgmr.msra.gmra.mrb[40].mxu0 %v3858_v23  ;;  %7776 = vmatprep.subr.bf16.mxu1 %v8451_v12 }
 0x47a   :  { %7742 = vmatprep.mubr.bf16.mxu0 %v3859_v29 }
 0x47c   :  { %7777 = vmatpush3.bf16.msra.mxu1 %v8451_v12 }
 0x47d   :  { %7778 = vmatprep.subr.bf16.mxu1 %v8452_v42 }
 0x480   :  { %7779 = vmatpush3.bf16.msra.mxu1 %v8452_v42 }
 0x481   :  { %7743 = vmatmul.mubr.bf16.gmra.mrb[44].mxu0 %v3860_v51  ;;  %7780 = vmatprep.subr.bf16.mxu1 %v8453_v20  ;;  %v9936_v51 = vld [vmem:[%s10964_s7] ss:$0 sm:$0xff] }
 0x482   :  { %7746 = vmatprep.mubr.bf16.mxu0 %v3861_v55 }
 0x484   :  { %7781 = vmatpush3.bf16.msra.mxu1 %v8453_v20 }
 0x489   :  { %7747 = vmatmul.mubr.bf16.gmra.mrb[48].mxu0 %v3862_v2 }
 0x48a   :  { %7750 = vmatprep.mubr.bf16.mxu0 %v3863_v62 }
 0x491   :  { %7751 = vmatmul.mubr.bf16.gmra.mrb[52].mxu0 %v3864_v1 }
 0x492   :  { %7754 = vmatprep.mubr.bf16.mxu0 %v3865_v37 }
 0x499   :  { %7755 = vmatmul.mubr.bf16.gmra.mrb[56].mxu0 %v3866_v11 }
 0x49a   :  { %7758 = vmatprep.mubr.bf16.mxu0 %v3867_v45 }
 0x49c   :  { %v7588_v38 = vpop.f32.mrb[84].mxu0 }
 0x49d   :  { %v2998_v6 = vadd.f32 %v7588_v38, %v9811_v49  ;;  %v2958_v19 = vpop.f32.mrb[85].mxu0 }
 0x49e   :  { %v2996_v13 = vadd.f32 %v2958_v19, %v9814_v3  ;;  %v7589_v25 = vpop.f32.mrb[86].mxu0 }
 0x49f   :  { %v2961_v56 = vpop.f32.mrb[87].mxu0 }
 0x4a0   :  { %v2997_v14 = vadd.f32 %v2961_v56, %v9817_v53 }
 0x4a1   :  { %7759 = vmatmul.mubr.bf16.gmra.mrb[60].mxu0 %v3868_v24 }
 0x4a2   :  { %7762 = vmatprep.mubr.bf16.mxu0 %v3869_v31 }
 0x4a9   :  { %7763 = vmatmul.mubr.bf16.gmra.mrb[100].mxu0 %v3870_v41 }
 0x4d4   :  { %v7632_v0 = vpop.f32.mrb[88].mxu0 }
 0x4d5   :  { %v3275_v63 = vadd.f32 %v7632_v0, %v2998_v6  ;;  %v3235_v21 = vpop.f32.mrb[89].mxu0 }
 0x4d6   :  { %v3273_v49 = vadd.f32 %v3235_v21, %v2996_v13  ;;  %v7633_v54 = vpop.f32.mrb[90].mxu0 }
 0x4d7   :  { %v3238_v58 = vpop.f32.mrb[91].mxu0 }
 0x4d8   :  { %v3274_v3 = vadd.f32 %v3238_v58, %v2997_v14 }
 0x50c   :  { %v7676_v28 = vpop.f32.mrb[92].mxu0 }
 0x50d   :  { %v3552_v48 = vadd.f32 %v7676_v28, %v3275_v63  ;;  %v3512_v16 = vpop.f32.mrb[93].mxu0  ;;  %v9978_v63 = vld [vmem:[%s10963_s10] sm:$0xff]  }
 0x50e   :  { %v3550_v7 = vadd.f32 %v3512_v16, %v3273_v49  ;;  %v7677_v36 = vpop.f32.mrb[94].mxu0  ;;  %7810 = vmatprep.subr.bf16.mxu1 %v9978_v63 }
 0x50f   :  { %v3515_v53 = vpop.f32.mrb[95].mxu0 }
 0x510   :  { %v3551_v8 = vadd.f32 %v3515_v53, %v3274_v3 }
 0x544   :  { %v7720_v17 = vpop.f32.mrb[96].mxu0 }
 0x545   :  { %v9927_v23 = vadd.f32 %v7720_v17, %v3552_v48  ;;  %v3789_v29 = vpop.f32.mrb[97].mxu0 }
 0x546   :  { %v9929_v10 = vadd.f32 %v3789_v29, %v3550_v7  ;;  %v7721_v44 = vpop.f32.mrb[98].mxu0 }
 0x547   :  { %v3792_v52 = vpop.f32.mrb[99].mxu0 }
 0x548   :  { %v9931_v39 = vadd.f32 %v3792_v52, %v3551_v8 }
 0x54c   :  { %v7740_v55 = vpop.f32.mrb[40].mxu0 }
 0x54d   :  { %v3970_v46 = vpop.f32.mrb[41].mxu0  ;;  %v4115_v59 = vadd.f32 %v7740_v55, %v9936_v51 }
 0x54e   :  { %v4113_v30 = vadd.f32 %v9936_v51, %v3970_v46  ;;  %v7741_v15 = vpop.f32.mrb[42].mxu0 }
 0x54f   :  { %v4116_v2 = vadd.f32 %v7741_v15, %v9936_v51  ;;  %v3973_v62 = vpop.f32.mrb[43].mxu0  ;;  %v9944_v47 = vmax.f32 %v4115_v59, 0.0 }
 0x550   :  { %v9941_v33 = vmax.f32 %v4113_v30, 0.0  ;;  %v4114_v26 = vadd.f32 %v9936_v51, %v3973_v62 }
 0x551   :  { %v9948_v1 = vmax.f32 %v4116_v2, 0.0  ;;  %v4190_v45 = vmul.f32 %v9944_v47, %v9944_v47 }
 0x552   :  { %v9946_v43 = vmax.f32 %v4114_v26, 0.0  ;;  %v4188_v37 = vmul.f32 %v9941_v33, %v9941_v33 }
 0x553   :  { %v4191_v38 = vmul.f32 %v9948_v1, %v9948_v1 }
 0x554   :  { %v4167_v50 = vadd.f32 %v9946_v43, %v9941_v33  ;;  %v4189_v60 = vmul.f32 %v9946_v43, %v9946_v43  ;;  %v7744_v32 = vpop.f32.mrb[44].mxu0 }
 0x555   :  { %v4119_v9 = vadd.f32 %v7744_v32, %v9936_v51  ;;  %v3986_v11 = vpop.f32.mrb[45].mxu0 }
 0x556   :  { %v4168_v18 = vadd.f32 %v4167_v50, %v9944_v47  ;;  %v4202_v5 = vadd.f32 %v4189_v60, %v4188_v37  ;;  %v4117_v4 = vadd.f32 %v9936_v51, %v3986_v11  ;;  %v7745_v61 = vpop.f32.mrb[46].mxu0 }
 0x557   :  { %v4120_v6 = vadd.f32 %v7745_v61, %v9936_v51  ;;  %v3989_v19 = vpop.f32.mrb[47].mxu0  ;;  %v9968_v56 = vmax.f32 %v4119_v9, 0.0 }
 0x558   :  { %v4203_v24 = vadd.f32 %v4202_v5, %v4190_v45  ;;  %v9964_v13 = vmax.f32 %v4117_v4, 0.0  ;;  %v4169_v25 = vadd.f32 %v4168_v18, %v9948_v1  ;;  %v4118_v31 = vadd.f32 %v9936_v51, %v3989_v19 }
 0x559   :  { %v9980_v21 = vmax.f32 %v4120_v6, 0.0  ;;  %v4194_v16 = vmul.f32 %v9968_v56, %v9968_v56 }
 0x55a   :  { %v4170_v14 = vadd.f32 %v4169_v25, %v9964_v13  ;;  %v4192_v35 = vmul.f32 %v9964_v13, %v9964_v13  ;;  %v4204_v41 = vadd.f32 %v4203_v24, %v4191_v38  ;;  %v9973_v0 = vmax.f32 %v4118_v31, 0.0 }
 0x55b   :  { %v4195_v22 = vmul.f32 %v9980_v21, %v9980_v21 }
 0x55c   :  { %v4205_v49 = vadd.f32 %v4204_v41, %v4192_v35  ;;  %v4171_v54 = vadd.f32 %v4170_v14, %v9973_v0  ;;  %v4193_v58 = vmul.f32 %v9973_v0, %v9973_v0  ;;  %v7748_v3 = vpop.f32.mrb[48].mxu0 }
 0x55d   :  { %v4123_v28 = vadd.f32 %v7748_v3, %v9936_v51  ;;  %v4002_v48 = vpop.f32.mrb[49].mxu0 }
 0x55e   :  { %v4172_v7 = vadd.f32 %v4171_v54, %v9968_v56  ;;  %v4206_v36 = vadd.f32 %v4205_v49, %v4193_v58  ;;  %v4121_v53 = vadd.f32 %v9936_v51, %v4002_v48  ;;  %v7749_v8 = vpop.f32.mrb[50].mxu0 }
 0x55f   :  { %v4124_v40 = vadd.f32 %v7749_v8, %v9936_v51  ;;  %v4005_v57 = vpop.f32.mrb[51].mxu0  ;;  %v9998_v20 = vmax.f32 %v4123_v28, 0.0 }
 0x560   :  { %v4207_v34 = vadd.f32 %v4206_v36, %v4194_v16  ;;  %v9994_v27 = vmax.f32 %v4121_v53, 0.0  ;;  %v4173_v12 = vadd.f32 %v4172_v7, %v9980_v21  ;;  %v4122_v42 = vadd.f32 %v9936_v51, %v4005_v57 }
 0x561   :  { %v10005_v55 = vmax.f32 %v4124_v40, 0.0  ;;  %v4198_v26 = vmul.f32 %v9998_v20, %v9998_v20 }
 0x562   :  { %v4174_v17 = vadd.f32 %v4173_v12, %v9994_v27  ;;  %v4196_v29 = vmul.f32 %v9994_v27, %v9994_v27  ;;  %v4208_v44 = vadd.f32 %v4207_v34, %v4195_v22  ;;  %v10003_v52 = vmax.f32 %v4122_v42, 0.0 }
 0x563   :  { %v4199_v9 = vmul.f32 %v10005_v55, %v10005_v55 }
 0x564   :  { %v4209_v46 = vadd.f32 %v4208_v44, %v4196_v29  ;;  %v4175_v59 = vadd.f32 %v4174_v17, %v10003_v52  ;;  %v4197_v30 = vmul.f32 %v10003_v52, %v10003_v52  ;;  %v7752_v15 = vpop.f32.mrb[52].mxu0 }
 0x565   :  { %v4127_v2 = vadd.f32 %v7752_v15, %v9936_v51  ;;  %v4018_v62 = vpop.f32.mrb[53].mxu0 }
 0x566   :  { %v4176_v37 = vadd.f32 %v4175_v59, %v9998_v20  ;;  %v4210_v50 = vadd.f32 %v4209_v46, %v4197_v30  ;;  %v4125_v60 = vadd.f32 %v9936_v51, %v4018_v62  ;;  %v7753_v32 = vpop.f32.mrb[54].mxu0 }
 0x567   :  { %v10017_v11 = vmax.f32 %v4127_v2, 0.0  ;;  %v4128_v45 = vadd.f32 %v7753_v32, %v9936_v51  ;;  %v4021_v18 = vpop.f32.mrb[55].mxu0 }
 0x568   :  { %v4211_v5 = vadd.f32 %v4210_v50, %v4198_v26  ;;  %v10020_v4 = vmax.f32 %v4125_v60, 0.0  ;;  %v4177_v61 = vadd.f32 %v4176_v37, %v10005_v55  ;;  %v4126_v38 = vadd.f32 %v9936_v51, %v4021_v18 }
 0x569   :  { %v4300_v6 = vmul.f32 %v10017_v11, %v10017_v11  ;;  %v10026_v19 = vmax.f32 %v4128_v45, 0.0  ;;  %v4239_v35 = vrot.slane %v10017_v11, 5 }
 0x56a   :  { %v4178_v24 = vadd.f32 %v4177_v61, %v10020_v4  ;;  %v4200_v25 = vmul.f32 %v10020_v4, %v10020_v4  ;;  %v4212_v31 = vadd.f32 %v4211_v5, %v4199_v9  ;;  %v10031_v14 = vmax.f32 %v4126_v38, 0.0 }
 0x56b   :  { %v4328_v41 = vrot.slane %v4300_v6, 5  ;;  %v4241_v49 = vrot.slane %v10026_v19, 5  ;;  %v4301_v54 = vmul.f32 %v10026_v19, %v10026_v19 }
 0x56c   :  { %v4213_v58 = vadd.f32 %v4212_v31, %v4200_v25  ;;  %v4179_v3 = vsel %vm538_vm1, %v10031_v14, 0.0  ;;  %v4201_v28 = vmul.f32 %v10031_v14, %v10031_v14  ;;  %v4238_v48 = vrot.slane %v10031_v14, 5  ;;  %v7756_v16 = vpop.f32.mrb[56].mxu0 }
 0x56d   :  { %v4242_v7 = vsel %vm4237_vm5, %v4239_v35, %v4241_v49  ;;  %v4330_v36 = vrot.slane %v4301_v54, 5  ;;  %v10043_v53 = vadd.f32 %v4179_v3, %v4178_v24  ;;  %v4131_v8 = vadd.f32 %v7756_v16, %v9936_v51  ;;  %v4034_v22 = vpop.f32.mrb[57].mxu0 }
 0x56e   :  { %v4214_v40 = vsel %vm538_vm1, %v4201_v28, 0.0  ;;  %v4240_v57 = vsel %vm4237_vm5, %v4238_v48, %v4239_v35  ;;  %v4327_v34 = vrot.slane %v4201_v28, 5  ;;  %v4129_v12 = vadd.f32 %v9936_v51, %v4034_v22  ;;  %v7757_v42 = vpop.f32.mrb[58].mxu0 }
 0x56f   :  { %v4331_v17 = vsel %vm4237_vm5, %v4328_v41, %v4330_v36  ;;  %v10050_v29 = vadd.f32 %v4214_v40, %v4213_v58  ;;  %v10052_v44 = vmax.f32 %v4131_v8, 0.0  ;;  %v4037_v46 = vpop.f32.mrb[59].mxu0  ;;  %v4279_v30 = vadd.f32 %v4242_v7, %v4240_v57 }
 0x570   :  { %v10054_v59 = vmax.f32 %v4129_v12, 0.0  ;;  %v4329_v15 = vsel %vm4237_vm5, %v4327_v34, %v4328_v41  ;;  %v4132_v2 = vadd.f32 %v7757_v42, %v9936_v51  ;;  %v4130_v9 = vadd.f32 %v9936_v51, %v4037_v46 }
 0x571   :  { %v4304_v62 = vmul.f32 %v10052_v44, %v10052_v44  ;;  %v4368_v50 = vadd.f32 %v4331_v17, %v4329_v15  ;;  %v4247_v32 = vrot.slane %v10052_v44, 5 }
 0x572   :  { %v4243_v26 = vrot.slane %v10054_v59, 5  ;;  %v4302_v37 = vmul.f32 %v10054_v59, %v10054_v59  ;;  %v10063_v60 = vmax.f32 %v4132_v2, 0.0  ;;  %v10071_v25 = vmax.f32 %v4130_v9, 0.0 }
 0x573   :  { %v4336_v6 = vrot.slane %v4304_v62, 5 }
 0x574   :  { %v4244_v45 = vsel %vm4237_vm5, %v4241_v49, %v4243_v26  ;;  %v4332_v18 = vrot.slane %v4302_v37, 5  ;;  %v4249_v5 = vrot.slane %v10063_v60, 5  ;;  %v4305_v61 = vmul.f32 %v10063_v60, %v10063_v60  ;;  %v7760_v38 = vpop.f32.mrb[60].mxu0 }
 0x575   :  { %v4280_v24 = vadd.f32 %v4279_v30, %v4244_v45  ;;  %v4050_v31 = vpop.f32.mrb[61].mxu0  ;;  %v4135_v58 = vadd.f32 %v7760_v38, %v9936_v51  ;;  %v4245_v28 = vrot.slane %v10071_v25, 5  ;;  %v4303_v7 = vmul.f32 %v10071_v25, %v10071_v25 }
 0x576   :  { %v4333_v35 = vsel %vm4237_vm5, %v4330_v36, %v4332_v18  ;;  %v4250_v41 = vsel %vm4237_vm5, %v4247_v32, %v4249_v5  ;;  %v4338_v54 = vrot.slane %v4305_v61, 5  ;;  %v7761_v49 = vpop.f32.mrb[62].mxu0  ;;  %v4133_v22 = vadd.f32 %v9936_v51, %v4050_v31 }
 0x577   :  { %v4369_v3 = vadd.f32 %v4368_v50, %v4333_v35  ;;  %v4053_v48 = vpop.f32.mrb[63].mxu0  ;;  %v10080_v8 = vmax.f32 %v4135_v58, 0.0  ;;  %v4246_v36 = vsel %vm4237_vm5, %v4243_v26, %v4245_v28  ;;  %v4248_v40 = vsel %vm4237_vm5, %v4245_v28, %v4247_v32 }
 0x578   :  { %v4339_v16 = vsel %vm4237_vm5, %v4336_v6, %v4338_v54  ;;  %v4281_v57 = vadd.f32 %v4280_v24, %v4246_v36  ;;  %v4334_v34 = vrot.slane %v4303_v7, 5  ;;  %v10088_v17 = vmax.f32 %v4133_v22, 0.0 }
 0x579   :  { %v4308_v12 = vmul.f32 %v10080_v8, %v10080_v8  ;;  %v4255_v42 = vrot.slane %v10080_v8, 5  ;;  %v4136_v46 = vadd.f32 %v7761_v49, %v9936_v51  ;;  %v4134_v30 = vadd.f32 %v9936_v51, %v4053_v48 }
 0x57a   :  { %v4282_v15 = vadd.f32 %v4281_v57, %v4248_v40  ;;  %v4335_v2 = vsel %vm4237_vm5, %v4332_v18, %v4334_v34  ;;  %v4337_v62 = vsel %vm4237_vm5, %v4334_v34, %v4336_v6  ;;  %v4251_v32 = vrot.slane %v10088_v17, 5 }
 0x57b   :  { %v4344_v26 = vrot.slane %v4308_v12, 5  ;;  %v4370_v50 = vadd.f32 %v4369_v3, %v4335_v2  ;;  %v4306_v9 = vmul.f32 %v10088_v17, %v10088_v17  ;;  %v10097_v45 = vmax.f32 %v4136_v46, 0.0 }
 0x57c   :  { %v7764_v37 = vpop.f32.mrb[100].mxu0  ;;  %v4283_v38 = vadd.f32 %v4282_v15, %v4250_v41  ;;  %v10099_v24 = vmax.f32 %v4134_v30, 0.0  ;;  %v4252_v58 = vsel %vm4237_vm5, %v4249_v5, %v4251_v32 }
 0x57d   :  { %v4066_v61 = vpop.f32.mrb[101].mxu0  ;;  %v4106_v31 = vadd.f32 %v7764_v37, %v9927_v23  ;;  %v4371_v6 = vadd.f32 %v4370_v50, %v4337_v62  ;;  %v4340_v49 = vrot.slane %v4306_v9, 5  ;;  %v4257_v3 = vrot.slane %v10097_v45, 5 }
 0x57e   :  { %v4104_v18 = vadd.f32 %v4066_v61, %v9929_v10  ;;  %v7765_v35 = vpop.f32.mrb[102].mxu0  ;;  %v4284_v48 = vadd.f32 %v4283_v38, %v4252_v58  ;;  %v4309_v7 = vmul.f32 %v10097_v45, %v10097_v45  ;;  %v4253_v41 = vrot.slane %v10099_v24, 5 }
 0x57f   :  { %v4069_v28 = vpop.f32.mrb[103].mxu0  ;;  %v4307_v22 = vmul.f32 %v10099_v24, %v10099_v24  ;;  %v4341_v23 = vsel %vm4237_vm5, %v4338_v54, %v4340_v49  ;;  %v4372_v10 = vadd.f32 %v4371_v6, %v4339_v16  ;;  %v4258_v36 = vsel %vm4237_vm5, %v4255_v42, %v4257_v3 }
 0x580   :  { %v4139_v5 = vadd.f32 %v9936_v51, %v4106_v31  ;;  %v4346_v40 = vrot.slane %v4309_v7, 5  ;;  %v4254_v57 = vsel %vm4237_vm5, %v4251_v32, %v4253_v41  ;;  %v4256_v34 = vsel %vm4237_vm5, %v4253_v41, %v4255_v42 }
 0x581   :  { %v4342_v12 = vrot.slane %v4307_v22, 5  ;;  %v4373_v46 = vadd.f32 %v4372_v10, %v4341_v23  ;;  %v4285_v30 = vadd.f32 %v4284_v48, %v4254_v57  ;;  %v4137_v2 = vadd.f32 %v9936_v51, %v4104_v18 }
 0x582   :  { %v10115_v15 = vmax.f32 %v4139_v5, 0.0  ;;  %v4347_v62 = vsel %vm4237_vm5, %v4344_v26, %v4346_v40  ;;  %v4105_v37 = vadd.f32 %v4069_v28, %v9931_v39  ;;  %v4181_v39 = vrot.slane %v10043_v53, 4 }
 0x583   :  { %v4343_v54 = vsel %vm4237_vm5, %v4340_v49, %v4342_v12  ;;  %v4345_v16 = vsel %vm4237_vm5, %v4342_v12, %v4344_v26  ;;  %v4286_v50 = vadd.f32 %v4285_v30, %v4256_v34  ;;  %v10122_v32 = vmax.f32 %v4137_v2, 0.0 }
 0x584   :  { %v4374_v9 = vadd.f32 %v4373_v46, %v4343_v54  ;;  %v4138_v42 = vadd.f32 %v9936_v51, %v4105_v37  ;;  %v4312_v31 = vmul.f32 %v10115_v15, %v10115_v15  ;;  %v4263_v58 = vrot.slane %v10115_v15, 5 }
 0x585   :  { %v4287_v61 = vadd.f32 %v4286_v50, %v4258_v36  ;;  %v4259_v18 = vrot.slane %v10122_v32, 5  ;;  %v4310_v35 = vmul.f32 %v10122_v32, %v10122_v32  ;;  %v4216_v7 = vrot.slane %v10050_v29, 4 }
 0x586   :  { %v4375_v38 = vadd.f32 %v4374_v9, %v4345_v16  ;;  %v10130_v6 = vmax.f32 %v4138_v42, 0.0  ;;  %v4352_v41 = vrot.slane %v4312_v31, 5  ;;  %v4182_v57 = vadd.f32 %v4181_v39, %v10043_v53 }
 0x587   :  { %v4260_v49 = vsel %vm4237_vm5, %v4257_v3, %v4259_v18  ;;  %v4348_v51 = vrot.slane %v4310_v35, 5  ;;  %v4217_v30 = vadd.f32 %v4216_v7, %v10050_v29  ;;  %v4291_v54 = vsel %vm538_vm1, %v4263_v58, 0.0 }
 0x588   :  { %v4376_v26 = vadd.f32 %v4375_v38, %v4347_v62  ;;  %v4261_v28 = vrot.slane %v10130_v6, 5  ;;  %v4311_v48 = vmul.f32 %v10130_v6, %v10130_v6  ;;  %v4288_v22 = vadd.f32 %v4287_v61, %v4260_v49 }
 0x589   :  { %v4349_v23 = vsel %vm4237_vm5, %v4346_v40, %v4348_v51  ;;  %v4183_v40 = vrot.slane %v4182_v57, 2  ;;  %v4380_v50 = vsel %vm538_vm1, %v4352_v41, 0.0  ;;  %v4218_v9 = vrot.slane %v4217_v30, 2 }
 0x58a   :  { %v4262_v10 = vsel %vm4237_vm5, %v4259_v18, %v4261_v28  ;;  %v4264_v36 = vsel %vm4237_vm5, %v4261_v28, %v4263_v58  ;;  %v4350_v5 = vrot.slane %v4311_v48, 5  ;;  %v4377_v3 = vadd.f32 %v4376_v26, %v4349_v23 }
 0x58b   :  { %v4289_v34 = vadd.f32 %v4288_v22, %v4262_v10  ;;  %v4184_v61 = vadd.f32 %v4183_v40, %v4182_v57  ;;  %v4219_v18 = vadd.f32 %v4218_v9, %v4217_v30 }
 0x58c   :  { %v4351_v12 = vsel %vm4237_vm5, %v4348_v51, %v4350_v5  ;;  %v4353_v46 = vsel %vm4237_vm5, %v4350_v5, %v4352_v41 }
 0x58d   :  { %v4290_v2 = vadd.f32 %v4289_v34, %v4264_v36  ;;  %v4378_v62 = vadd.f32 %v4377_v3, %v4351_v12  ;;  %v4185_v26 = vrot.slane %v4184_v61, 1  ;;  %v4220_v51 = vrot.slane %v4219_v18, 1 }
 0x58f   :  { %v4292_v16 = vadd.f32 %v4291_v54, %v4290_v2  ;;  %v4379_v37 = vadd.f32 %v4378_v62, %v4353_v46  ;;  %v4186_v48 = vadd.f32 %v4185_v26, %v4184_v61  ;;  %v4221_v23 = vadd.f32 %v4220_v51, %v4219_v18 }
 0x590   :  { %v4412_v61 = vlaneseq }
 0x591   :  { %v4293_v42 = vrot.slane %v4292_v16, 4  ;;  %v4381_v53 = vadd.f32 %v4380_v50, %v4379_v37 }
 0x593   :  { %v4294_v38 = vadd.f32 %v4293_v42, %v4292_v16  ;;  %v4382_v31 = vrot.slane %v4381_v53, 4 }
 0x595   :  { %v4295_v35 = vrot.slane %v4294_v38, 2  ;;  %v4383_v39 = vadd.f32 %v4382_v31, %v4381_v53  ;;  %v92_v31 = vld [vmem:[%s10965_s8] sm:$0x1] }
 0x597   :  { %v4296_v29 = vadd.f32 %v4295_v35, %v4294_v38  ;;  %v4384_v49 = vrot.slane %v4383_v39, 2  ;;  %v10206_v38 = vshrl.u32 %v4412_v61, 7 }
 0x599   :  { %v4297_v28 = vrot.slane %v4296_v29, 1  ;;  %v4385_v58 = vadd.f32 %v4384_v49, %v4383_v39  ;;  %v4414_v18 = vsub.s32 0, %v10206_v38 }
 0x59b   :  { %v4298_v7 = vadd.f32 %v4297_v28, %v4296_v29  ;;  %v4386_v22 = vrot.slane %v4385_v58, 1  ;;  %v10219_v29 = vld [vmem:[%s10966_s9] ss:$0 sm:$0xff] }
 0x59d   :  { %v4299_v41 = vadd.f32 %v4298_v7, %v4186_v48  ;;  %v4387_v10 = vadd.f32 %v4386_v22, %v4385_v58 }
 0x59f   :  { %v4388_v36 = vadd.f32 %v4387_v10, %v4221_v23  ;;  %v10148_v5 = vmul.f32 0.004761905, %v4299_v41 }
 0x5a1   :  { %v4391_v57 = vmul.f32 0.004761905, %v4388_v36  ;;  %v4392_v3 = vmul.f32 %v10148_v5, %v10148_v5  ;;  %v4475_v34 = vsub.f32 %v10130_v6, %v10148_v5  ;;  %v4398_v12 = vsub.f32 %v9941_v33, %v10148_v5 }
 0x5a2   :  { %v4399_v46 = vsub.f32 %v9946_v43, %v10148_v5  ;;  %v4400_v30 = vsub.f32 %v9944_v47, %v10148_v5  ;;  %v4401_v2 = vsub.f32 %v9948_v1, %v10148_v5  ;;  %v4402_v62 = vsub.f32 %v9964_v13, %v10148_v5 }
 0x5a3   :  { %v4393_v54 = vsub.f32 %v4391_v57, %v4392_v3  ;;  %v4403_v40 = vsub.f32 %v9973_v0, %v10148_v5  ;;  %v4404_v6 = vsub.f32 %v9968_v56, %v10148_v5  ;;  %v4405_v33 = vsub.f32 %v9980_v21, %v10148_v5 }
 0x5a4   :  { %v4406_v43 = vsub.f32 %v9994_v27, %v10148_v5  ;;  %v4407_v47 = vsub.f32 %v10003_v52, %v10148_v5  ;;  %v4408_v1 = vsub.f32 %v9998_v20, %v10148_v5  ;;  %v4409_v13 = vsub.f32 %v10005_v55, %v10148_v5 }
 0x5a5   :  { %v4394_v16 = vmax.f32 %v4393_v54, 0.0  ;;  %v4410_v0 = vsub.f32 %v10020_v4, %v10148_v5  ;;  %v4411_v56 = vsub.f32 %v10031_v14, %v10148_v5  ;;  %v4464_v21 = vsub.f32 %v10017_v11, %v10148_v5 }
 0x5a6   :  { %v4465_v27 = vsub.f32 %v10026_v19, %v10148_v5  ;;  %v4466_v52 = vsub.f32 %v10054_v59, %v10148_v5  ;;  %v4467_v20 = vsub.f32 %v10071_v25, %v10148_v5  ;;  %v4468_v55 = vsub.f32 %v10052_v44, %v10148_v5 }
 0x5a7   :  { %v4395_v37 = vadd.f32 1e-05, %v4394_v16  ;;  %v4469_v4 = vsub.f32 %v10063_v60, %v10148_v5  ;;  %v4470_v14 = vsub.f32 %v10088_v17, %v10148_v5  ;;  %v4471_v11 = vsub.f32 %v10099_v24, %v10148_v5 }
 0x5a8   :  { %v4472_v50 = vsub.f32 %v10080_v8, %v10148_v5  ;;  %v4473_v9 = vsub.f32 %v10097_v45, %v10148_v5  ;;  %v4474_v42 = vsub.f32 %v10122_v32, %v10148_v5  ;;  %v4476_v53 = vsub.f32 %v10115_v15, %v10148_v5 }
 0x5a9   :  { %8486 = vrsqrt.f32 %v4395_v37 }
 0x5b3   :  { %v8487_v35 = vpop.eup %8486 }
 0x5b4   :  { %v4397_v39 = vmul.f32 %v8487_v35, %v92_v31 }
 0x5b6   :  { %v10214_v26 = vrot.slane %v4397_v39, %v4414_v18 }
 0x5b8   :  { %v4488_v49 = vmul.f32 %v4475_v34, %v10214_v26  ;;  %v4416_v51 = vmul.f32 %v10214_v26, %v4398_v12  ;;  %v4417_v28 = vmul.f32 %v10214_v26, %v4399_v46  ;;  %v4418_v58 = vmul.f32 %v10214_v26, %v4400_v30 }
 0x5b9   :  { %v4419_v48 = vmul.f32 %v10214_v26, %v4401_v2  ;;  %v4420_v7 = vmul.f32 %v10214_v26, %v4402_v62  ;;  %v4421_v22 = vmul.f32 %v10214_v26, %v4403_v40  ;;  %v4422_v23 = vmul.f32 %v10214_v26, %v4404_v6 }
 0x5ba   :  { %v10230_v41 = vadd.f32 %v10219_v29, %v4488_v49  ;;  %v10233_v10 = vadd.f32 %v10219_v29, %v4416_v51  ;;  %v10236_v36 = vadd.f32 %v10219_v29, %v4417_v28  ;;  %v10239_v57 = vadd.f32 %v10219_v29, %v4418_v58 }
 0x5bb   :  { %v10242_v3 = vadd.f32 %v10219_v29, %v4419_v48  ;;  %v10245_v34 = vadd.f32 %v10219_v29, %v4420_v7  ;;  %v10248_v12 = vadd.f32 %v10219_v29, %v4421_v22  ;;  %v4423_v46 = vmul.f32 %v10214_v26, %v4405_v33  ;;  %v8455_v7 = vld [vmem:[%s10963_s10 + $0x8] sm:$0xff]  }
 0x5bc   :  { %4515 = vst [vmem:[#allocation2 + $0xca] sm:$0xff] %v10230_v41  ;;  %4450 = vst [vmem:[#allocation2 + $0x2] sm:$0xff] %v10233_v10  ;;  %v10256_v30 = vadd.f32 %v10219_v29, %v4422_v23  ;;  %v4424_v2 = vmul.f32 %v10214_v26, %v4406_v43  ;;  %v4425_v62 = vmul.f32 %v10214_v26, %v4407_v47 }
 0x5bd   :  { %4451 = vst [vmem:[#allocation2 + $0xa] sm:$0xff] %v10236_v36  ;;  %4452 = vst [vmem:[#allocation2 + $0x12] sm:$0xff] %v10239_v57  ;;  %v4426_v54 = vmul.f32 %v10214_v26, %v4408_v1  ;;  %v10265_v40 = vadd.f32 %v10219_v29, %v4423_v46  ;;  %v4427_v6 = vmul.f32 %v10214_v26, %v4409_v13 }
 0x5be   :  { %4453 = vst [vmem:[#allocation2 + $0x1a] sm:$0xff] %v10242_v3  ;;  %4454 = vst [vmem:[#allocation2 + $0x22] sm:$0xff] %v10245_v34  ;;  %v4428_v33 = vmul.f32 %v10214_v26, %v4410_v0  ;;  %v4429_v16 = vmul.f32 %v10214_v26, %v4411_v56  ;;  %v10272_v43 = vadd.f32 %v10219_v29, %v4424_v2  ;;  %v8456_v2 = vld [vmem:[%s10963_s10 + $0x10] sm:$0xff]  }
 0x5bf   :  { %4455 = vst [vmem:[#allocation2 + $0x2a] sm:$0xff] %v10248_v12  ;;  %4456 = vst [vmem:[#allocation2 + $0x32] sm:$0xff] %v10256_v30  ;;  %v10275_v47 = vadd.f32 %v10219_v29, %v4425_v62  ;;  %v10278_v1 = vadd.f32 %v10219_v29, %v4426_v54  ;;  %v4477_v37 = vmul.f32 %v4464_v21, %v10214_v26 }
 0x5c0   :  { %4457 = vst [vmem:[#allocation2 + $0x3a] sm:$0xff] %v10265_v40  ;;  %v10283_v13 = vadd.f32 %v10219_v29, %v4427_v6  ;;  %v10286_v0 = vadd.f32 %v10219_v29, %v4428_v33  ;;  %v4449_v56 = vadd.f32 %v10219_v29, %v4429_v16  ;;  %v4478_v61 = vmul.f32 %v4465_v27, %v10214_v26 }
 0x5c1   :  { %4458 = vst [vmem:[#allocation2 + $0x42] sm:$0xff] %v10272_v43  ;;  %4459 = vst [vmem:[#allocation2 + $0x4a] sm:$0xff] %v10275_v47  ;;  %v10297_v21 = vadd.f32 %v10219_v29, %v4477_v37  ;;  %v4479_v31 = vmul.f32 %v4466_v52, %v10214_v26  ;;  %v4480_v19 = vmul.f32 %v4467_v20, %v10214_v26 }
 0x5c2   :  { %4460 = vst [vmem:[#allocation2 + $0x52] sm:$0xff] %v10278_v1  ;;  %v4481_v27 = vmul.f32 %v4468_v55, %v10214_v26  ;;  %4461 = vst [vmem:[#allocation2 + $0x5a] sm:$0xff] %v10283_v13  ;;  %v10314_v35 = vadd.f32 %v10219_v29, %v4478_v61  ;;  %v4482_v59 = vmul.f32 %v4469_v4, %v10214_v26 }
 0x5c3   :  { %4462 = vst [vmem:[#allocation2 + $0x62] sm:$0xff] %v10286_v0  ;;  %4463 = vst [vmem:[#allocation2 + $0x6a] sm:$0xe1] %v4449_v56   ;;  %v4483_v25 = vmul.f32 %v4470_v14, %v10214_v26  ;;  %v4484_v44 = vmul.f32 %v4471_v11, %v10214_v26  ;;  %v10330_v52 = vadd.f32 %v10219_v29, %v4479_v31  ;;  %v4574_v55 = vld [vmem:[#allocation2 + $0x1] sm:$0xff] }
 0x5c4   :  { %4504 = vst [vmem:[#allocation2 + $0x72] sm:$0xff] %v10297_v21  ;;  %v10333_v20 = vadd.f32 %v10219_v29, %v4480_v19  ;;  %v10336_v60 = vadd.f32 %v10219_v29, %v4481_v27  ;;  %v4485_v17 = vmul.f32 %v4472_v50, %v10214_v26  ;;  %v4575_v4 = vld [vmem:[#allocation2 + $0x9] sm:$0xff]  ;;  %v4576_v24 = vld [vmem:[#allocation2 + $0x11] sm:$0xff]  ;;  %4505 = vst [vmem:[#allocation2 + $0x7a] sm:$0xff] %v10314_v35 }
 0x5c5   :  { %v10344_v14 = vadd.f32 %v10219_v29, %v4482_v59  ;;  %v10347_v11 = vadd.f32 %v10219_v29, %v4483_v25  ;;  %v10350_v39 = vadd.f32 %v10219_v29, %v4484_v44  ;;  %v4486_v8 = vmul.f32 %v4473_v9, %v10214_v26  ;;  %v4577_v49 = vld [vmem:[#allocation2 + $0x19] sm:$0xff]  ;;  %v4578_v51 = vld [vmem:[#allocation2 + $0x21] sm:$0xff]  ;;  %4506 = vst [vmem:[#allocation2 + $0x82] sm:$0xff] %v10330_v52 }
 0x5c6   :  { %v4601_v50 = vpack.c.bf16 %v4575_v4, %v4574_v55  ;;  %v4579_v28 = vld [vmem:[#allocation2 + $0x29] sm:$0xff]  ;;  %4507 = vst [vmem:[#allocation2 + $0x8a] sm:$0xff] %v10333_v20  ;;  %4508 = vst [vmem:[#allocation2 + $0x92] sm:$0xff] %v10336_v60  ;;  %v10360_v58 = vadd.f32 %v10219_v29, %v4485_v17  ;;  %v4487_v48 = vmul.f32 %v4474_v42, %v10214_v26  ;;  %v4580_v54 = vld [vmem:[#allocation2 + $0x31] sm:$0xff] }
 0x5c7   :  { %v4489_v45 = vmul.f32 %v4476_v53, %v10214_v26  ;;  %v4602_v9 = vpack.c.bf16 %v4577_v49, %v4576_v24  ;;  %4509 = vst [vmem:[#allocation2 + $0x9a] sm:$0xff] %v10344_v14  ;;  %4510 = vst [vmem:[#allocation2 + $0xa2] sm:$0xff] %v10347_v11  ;;  %v10377_v22 = vadd.f32 %v10219_v29, %v4486_v8  ;;  %v4581_v6 = vld [vmem:[#allocation2 + $0x39] sm:$0xff]  ;;  %v8459_v8 = vld [vmem:[%s10963_s10 + $0x28] sm:$0xff]  }
 0x5c8   :  { %4511 = vst [vmem:[#allocation2 + $0xaa] sm:$0xff] %v10350_v39  ;;  %v5043_v32 = vpack.c.bf16 %v10236_v36, %v10233_v10  ;;  %7782 = vmatprep.mubr.bf16.mxu1 %v4601_v50  ;;  %v4603_v15 = vpack.c.bf16 %v4579_v28, %v4578_v51  ;;  %4512 = vst [vmem:[#allocation2 + $0xb2] sm:$0xff] %v10360_v58  ;;  %v10383_v5 = vadd.f32 %v10219_v29, %v4487_v48  ;;  %v4582_v56 = vld [vmem:[#allocation2 + $0x41] sm:$0xff]  ;;  %v4583_v61 = vld [vmem:[#allocation2 + $0x49] sm:$0xff] }
 0x5c9   :  { %v4502_v42 = vadd.f32 %v10219_v29, %v4489_v45  ;;  %v5044_v53 = vpack.c.bf16 %v10242_v3, %v10239_v57  ;;  %7783 = vmatmul.mubr.bf16.vlgmr.msra.gmra.mrb[168].mxu1 %v4602_v9  ;;  %4513 = vst [vmem:[#allocation2 + $0xba] sm:$0xff] %v10377_v22  ;;  %v5045_v26 = vpack.c.bf16 %v10248_v12, %v10245_v34  ;;  %v8457_v27 = vld [vmem:[%s10963_s10 + $0x18] sm:$0xff]   ;;  %v8458_v25 = vld [vmem:[%s10963_s10 + $0x20] sm:$0xff]   ;;  %v8460_v49 = vld [vmem:[%s10963_s10 + $0x30] sm:$0xff]  }
 0x5ca   :  { %v5046_v23 = vpack.c.bf16 %v10265_v40, %v10256_v30  ;;  %7786 = vmatprep.mubr.bf16.mxu1 %v4603_v15  ;;  %7811 = vmatpush3.bf16.msra.mxu1 %v9978_v63  ;;  %4514 = vst [vmem:[#allocation2 + $0xc2] sm:$0xff] %v10383_v5  ;;  %v5047_v29 = vpack.c.bf16 %v10275_v47, %v10272_v43  ;;  %v4584_v44 = vld [vmem:[#allocation2 + $0x51] sm:$0xff]  ;;  %v4585_v17 = vld [vmem:[#allocation2 + $0x59] sm:$0xff]  ;;  %v4586_v55 = vld [vmem:[#allocation2 + $0x61] sm:$0xff] }
 0x5cb   :  { %4516 = vst [vmem:[#allocation2 + $0xd2] sm:$0x3f] %v4502_v42  ;;  %v5048_v46 = vpack.c.bf16 %v10283_v13, %v10278_v1  ;;  %7812 = vmatprep.subr.bf16.mxu1 %v8455_v7  ;;  %v5050_v62 = vpack.c.bf16 %v10314_v35, %v10297_v21  ;;  %v5051_v63 = vpack.c.bf16 %v10333_v20, %v10330_v52  ;;  %v4587_v4 = vld [vmem:[#allocation2 + $0x69] sm:$0xff]  ;;  %v4588_v51 = vld [vmem:[#allocation2 + $0x71] sm:$0xff]  ;;  %v4589_v28 = vld [vmem:[#allocation2 + $0x79] sm:$0xff] }
 0x5cc   :  { %v5052_v33 = vpack.c.bf16 %v10344_v14, %v10336_v60  ;;  %v5053_v16 = vpack.c.bf16 %v10350_v39, %v10347_v11  ;;  %v5054_v37 = vpack.c.bf16 %v10377_v22, %v10360_v58  ;;  %v5055_v31 = vpack.c.bf16 %v10230_v41, %v10383_v5  ;;  %v4590_v48 = vld [vmem:[#allocation2 + $0x81] sm:$0xff]  ;;  %v8473_v10 = vld [vmem:[%s10963_s10 + $0xd8] sm:$0xff]   ;;  %v5029_v57 = vld [vmem:[#allocation2 + $0x6a] sm:$0xff] }
 0x5cd   :  { %v4604_v19 = vpack.c.bf16 %v4581_v6, %v4580_v54  ;;  %v4605_v59 = vpack.c.bf16 %v4583_v61, %v4582_v56  ;;  %v4606_v24 = vpack.c.bf16 %v4585_v17, %v4584_v44  ;;  %v4607_v50 = vpack.c.bf16 %v4587_v4, %v4586_v55  ;;  %v4591_v45 = vld [vmem:[#allocation2 + $0x89] sm:$0xff]  ;;  %v8462_v42 = vld [vmem:[%s10963_s10 + $0x80] sm:$0xff]   ;;  %v8477_v30 = vld [vmem:[%s10963_s10 + $0xf8] sm:$0xff]  }
 0x5ce   :  { %7813 = vmatpush3.bf16.msra.mxu1 %v8455_v7  ;;  %v4608_v9 = vpack.c.bf16 %v4589_v28, %v4588_v51  ;;  %v8461_v7 = vld [vmem:[%s10963_s10 + $0x38] sm:$0xff]   ;;  %v4609_v15 = vpack.c.bf16 %v4591_v45, %v4590_v48  ;;  %v4594_v6 = vld [vmem:[#allocation2 + $0xa1] sm:$0xff]  ;;  %v4519_v51 = vld [vmem:[#allocation2 + $0x10] sm:$0xff]  ;;  %v5049_v34 = vpack.c.bf16 %v5029_v57, %v10286_v0 }
 0x5cf   :  { %7814 = vmatprep.subr.bf16.mxu1 %v8456_v2  ;;  %v4593_v54 = vld [vmem:[#allocation2 + $0x99] sm:$0xff]  ;;  %v4595_v56 = vld [vmem:[#allocation2 + $0xa9] sm:$0xff] }
 0x5d0   :  { %v4520_v28 = vld [vmem:[#allocation2 + $0x18] sm:$0xff]  ;;  %v4521_v48 = vld [vmem:[#allocation2 + $0x20] sm:$0xff]  ;;  %v4522_v45 = vld [vmem:[#allocation2 + $0x28] sm:$0xff] }
 0x5d1   :  { %7787 = vmatmul.mubr.bf16.gmra.mrb[172].mxu1 %v4604_v19  ;;  %v4611_v19 = vpack.c.bf16 %v4595_v56, %v4594_v6  ;;  %v4599_v44 = vld [vmem:[#allocation2 + $0xc9] sm:$0xff]  ;;  %v4524_v6 = vld [vmem:[#allocation2 + $0x38] sm:$0xff]  ;;  %v4525_v56 = vld [vmem:[#allocation2 + $0x40] sm:$0xff] }
 0x5d2   :  { %7790 = vmatprep.mubr.bf16.mxu1 %v4605_v59  ;;  %7815 = vmatpush3.bf16.msra.mxu1 %v8456_v2  ;;  %v4592_v2 = vld [vmem:[#allocation2 + $0x91] sm:$0xff]  ;;  %v4597_v59 = vld [vmem:[#allocation2 + $0xb9] sm:$0xff]  ;;  %v8475_v3 = vld [vmem:[%s10963_s10 + $0xe8] sm:$0xff]  }
 0x5d3   :  { %7816 = vmatprep.subr.bf16.mxu1 %v8457_v27  ;;  %v4610_v61 = vpack.c.bf16 %v4593_v54, %v4592_v2  ;;  %v4600_v4 = vld [vmem:[#allocation2 + $0xd1] sm:$0x3f]  ;;  %v8474_v36 = vld [vmem:[%s10963_s10 + $0xe0] sm:$0xff]   ;;  %v8479_v14 = vld [vmem:[%s10963_s10 + $0x108] sm:$0xff]  }
 0x5d4   :  { %v8464_v2 = vld [vmem:[%s10963_s10 + $0x90] sm:$0xff]   ;;  %v8478_v40 = vld [vmem:[%s10963_s10 + $0x100] sm:$0xff]  }
 0x5d5   :  { %v4523_v54 = vld [vmem:[#allocation2 + $0x30] sm:$0xff]  ;;  %v5293_v47 = vld [vmem:[#allocation2 + $0x3] sm:$0xff]  ;;  %v5296_v35 = vld [vmem:[#allocation2 + $0x1b] sm:$0xff] }
 0x5d6   :  { %7817 = vmatpush3.bf16.msra.mxu1 %v8457_v27  ;;  %v4596_v27 = vld [vmem:[#allocation2 + $0xb1] sm:$0xff]  ;;  %v5297_v52 = vld [vmem:[#allocation2 + $0x23] sm:$0xff]  ;;  %v5300_v58 = vld [vmem:[#allocation2 + $0x3b] sm:$0xff] }
 0x5d7   :  { %7818 = vmatprep.subr.bf16.mxu1 %v8458_v25  ;;  %v4612_v17 = vpack.c.bf16 %v4597_v59, %v4596_v27  ;;  %v8465_v27 = vld [vmem:[%s10963_s10 + $0x98] sm:$0xff]   ;;  %v8476_v12 = vld [vmem:[%s10963_s10 + $0xf0] sm:$0xff]   ;;  %v5301_v22 = vld [vmem:[#allocation2 + $0x43] sm:$0xff] }
 0x5d8   :  { %v5042_v43 = vld [vmem:[#allocation2 + $0xd2] sm:$0x3f] }
 0x5d9   :  { %7791 = vmatmul.mubr.bf16.gmra.mrb[176].mxu1 %v4606_v24  ;;  %v4517_v24 = vld [vmem:[#allocation2] sm:$0xff]  ;;  %v5294_v1 = vld [vmem:[#allocation2 + $0xb] sm:$0xff]  ;;  %v5056_v13 = vpack.c.bf16 %v5042_v43, %v5042_v43  ;;  %v5295_v21 = vld [vmem:[#allocation2 + $0x13] sm:$0xff] }
 0x5da   :  { %7794 = vmatprep.mubr.bf16.mxu1 %v4607_v50  ;;  %7819 = vmatpush3.bf16.msra.mxu1 %v8458_v25  ;;  %v4598_v25 = vld [vmem:[#allocation2 + $0xc1] sm:$0xff]  ;;  %v4614_v50 = vpack.c.bf16 %v4600_v4, %v4600_v4  ;;  %v5320_v0 = vpack.c.bf16 %v5294_v1, %v5293_v47  ;;  %v5298_v20 = vld [vmem:[#allocation2 + $0x2b] sm:$0xff]  ;;  %v5321_v60 = vpack.c.bf16 %v5296_v35, %v5295_v21  ;;  %v5299_v39 = vld [vmem:[#allocation2 + $0x33] sm:$0xff] }
 0x5db   :  { %7820 = vmatprep.subr.bf16.mxu1 %v8459_v8  ;;  %v4613_v55 = vpack.c.bf16 %v4599_v44, %v4598_v25  ;;  %v4527_v25 = vld [vmem:[#allocation2 + $0x50] sm:$0xff]  ;;  %v4528_v44 = vld [vmem:[#allocation2 + $0x58] sm:$0xff]  ;;  %v5322_v11 = vpack.c.bf16 %v5298_v20, %v5297_v52  ;;  %v5323_v5 = vpack.c.bf16 %v5300_v58, %v5299_v39  ;;  %v5582_v21 = vld [vmem:[#allocation2 + $0x64] sm:$0xff] }
 0x5dc   :  { %v4549_v4 = vpack.c.bf16 %v4528_v44, %v4527_v25  ;;  %v4542_v25 = vld [vmem:[#allocation2 + $0xc8] sm:$0xff]  ;;  %v8480_v41 = vld [vmem:[%s10963_s10 + $0x110] sm:$0xff]  }
 0x5dd   :  { %v5575_v57 = vld [vmem:[#allocation2 + $0x2c] sm:$0xff] }
 0x5de   :  { %7821 = vmatpush3.bf16.msra.mxu1 %v8459_v8  ;;  %v4518_v8 = vld [vmem:[#allocation2 + $0x8] sm:$0xff] }
 0x5df   :  { %7822 = vmatprep.subr.bf16.mxu1 %v8460_v49  ;;  %v5579_v43 = vld [vmem:[#allocation2 + $0x4c] sm:$0xff] }
 0x5e0   :  { %v5583_v35 = vld [vmem:[#allocation2 + $0x6c] sm:$0xff] }
 0x5e1   :  { %7795 = vmatmul.mubr.bf16.gmra.mrb[180].mxu1 %v4608_v9  ;;  %v4545_v9 = vpack.c.bf16 %v4520_v28, %v4519_v51  ;;  %v4532_v51 = vld [vmem:[#allocation2 + $0x78] sm:$0xff]  ;;  %v4533_v28 = vld [vmem:[#allocation2 + $0x80] sm:$0xff]  ;;  %v5603_v20 = vpack.c.bf16 %v5583_v35, %v5582_v21 }
 0x5e2   :  { %7798 = vmatprep.mubr.bf16.mxu1 %v4609_v15  ;;  %7823 = vmatpush3.bf16.msra.mxu1 %v8460_v49  ;;  %v4544_v49 = vpack.c.bf16 %v4518_v8, %v4517_v24  ;;  %v4546_v15 = vpack.c.bf16 %v4522_v45, %v4521_v48  ;;  %v8467_v24 = vld [vmem:[%s10963_s10 + $0xa8] sm:$0xff]  }
 0x5e3   :  { %7824 = vmatprep.subr.bf16.mxu1 %v8461_v7  ;;  %v4534_v48 = vld [vmem:[#allocation2 + $0x88] sm:$0xff] }
 0x5e6   :  { %7825 = vmatpush3.bf16.msra.mxu1 %v8461_v7  ;;  %v8463_v7 = vld [vmem:[%s10963_s10 + $0x88] sm:$0xff]  }
 0x5e7   :  { %7854 = vmatprep.subr.bf16.mxu1 %v8462_v42 }
 0x5e9   :  { %7799 = vmatmul.mubr.bf16.gmra.mrb[184].mxu1 %v4610_v61  ;;  %v4526_v61 = vld [vmem:[#allocation2 + $0x48] sm:$0xff] }
 0x5ea   :  { %7802 = vmatprep.mubr.bf16.mxu1 %v4611_v19  ;;  %v4547_v19 = vpack.c.bf16 %v4524_v6, %v4523_v54  ;;  %v4548_v59 = vpack.c.bf16 %v4526_v61, %v4525_v56  ;;  %v4536_v54 = vld [vmem:[#allocation2 + $0x98] sm:$0xff]  ;;  %v4537_v6 = vld [vmem:[#allocation2 + $0xa0] sm:$0xff]  ;;  %v4538_v56 = vld [vmem:[#allocation2 + $0xa8] sm:$0xff] }
 0x5f1   :  { %7803 = vmatmul.mubr.bf16.gmra.mrb[188].mxu1 %v4612_v17  ;;  %v4529_v17 = vld [vmem:[#allocation2 + $0x60] sm:$0xff] }
 0x5f2   :  { %7806 = vmatprep.mubr.bf16.mxu1 %v4613_v55  ;;  %v4530_v55 = vld [vmem:[#allocation2 + $0x68] sm:$0xff] }
 0x5f3   :  { %v4550_v8 = vpack.c.bf16 %v4530_v55, %v4529_v17  ;;  %v4543_v55 = vld [vmem:[#allocation2 + $0xd0] sm:$0x3f] }
 0x5f9   :  { %7807 = vmatmul.mubr.bf16.gmra.mrb[192].mxu1 %v4614_v50  ;;  %v8468_v50 = vld [vmem:[%s10963_s10 + $0xb0] sm:$0xff]  }
 0x5fa   :  { %7826 = vmatprep.mubr.bf16.mxu1 %v4544_v49  ;;  %v4531_v49 = vld [vmem:[#allocation2 + $0x70] sm:$0xff] }
 0x5fb   :  { %v4551_v45 = vpack.c.bf16 %v4532_v51, %v4531_v49  ;;  %v5308_v49 = vld [vmem:[#allocation2 + $0x7b] sm:$0xff]  ;;  %v5309_v51 = vld [vmem:[#allocation2 + $0x83] sm:$0xff] }
 0x601   :  { %7827 = vmatmul.mubr.bf16.vlgmr.msra.gmra.mrb[168].mxu1 %v4545_v9  ;;  %v8469_v9 = vld [vmem:[%s10963_s10 + $0xb8] sm:$0xff]  }
 0x602   :  { %7830 = vmatprep.mubr.bf16.mxu1 %v4546_v15  ;;  %7855 = vmatpush3.bf16.msra.mxu1 %v8462_v42  ;;  %v8466_v42 = vld [vmem:[%s10963_s10 + $0xa0] sm:$0xff]  }
 0x603   :  { %7856 = vmatprep.subr.bf16.mxu1 %v8463_v7  ;;  %v8470_v15 = vld [vmem:[%s10963_s10 + $0xc0] sm:$0xff]  }
 0x606   :  { %7857 = vmatpush3.bf16.msra.mxu1 %v8463_v7  ;;  %v4552_v7 = vpack.c.bf16 %v4534_v48, %v4533_v28  ;;  %v5310_v28 = vld [vmem:[#allocation2 + $0x8b] sm:$0xff] }
 0x607   :  { %7858 = vmatprep.subr.bf16.mxu1 %v8464_v2 }
 0x609   :  { %7831 = vmatmul.mubr.bf16.gmra.mrb[172].mxu1 %v4547_v19  ;;  %v4554_v19 = vpack.c.bf16 %v4538_v56, %v4537_v6 }
 0x60a   :  { %7834 = vmatprep.mubr.bf16.mxu1 %v4548_v59  ;;  %7859 = vmatpush3.bf16.msra.mxu1 %v8464_v2  ;;  %v4535_v2 = vld [vmem:[#allocation2 + $0x90] sm:$0xff]  ;;  %v4540_v59 = vld [vmem:[#allocation2 + $0xb8] sm:$0xff] }
 0x60b   :  { %7860 = vmatprep.subr.bf16.mxu1 %v8465_v27  ;;  %v4553_v61 = vpack.c.bf16 %v4536_v54, %v4535_v2  ;;  %v5313_v2 = vld [vmem:[#allocation2 + $0xa3] sm:$0xff]  ;;  %v5314_v54 = vld [vmem:[#allocation2 + $0xab] sm:$0xff] }
 0x60c   :  { %v5330_v56 = vpack.c.bf16 %v5314_v54, %v5313_v2 }
 0x60e   :  { %7861 = vmatpush3.bf16.msra.mxu1 %v8465_v27  ;;  %v4539_v27 = vld [vmem:[#allocation2 + $0xb0] sm:$0xff] }
 0x60f   :  { %7862 = vmatprep.subr.bf16.mxu1 %v8466_v42  ;;  %v4555_v44 = vpack.c.bf16 %v4540_v59, %v4539_v27  ;;  %v5317_v27 = vld [vmem:[#allocation2 + $0xc3] sm:$0xff]  ;;  %v5318_v59 = vld [vmem:[#allocation2 + $0xcb] sm:$0xff] }
 0x611   :  { %7835 = vmatmul.mubr.bf16.gmra.mrb[176].mxu1 %v4549_v4  ;;  %v4557_v4 = vpack.c.bf16 %v4543_v55, %v4543_v55  ;;  %v5571_v55 = vld [vmem:[#allocation2 + $0xc] sm:$0xff] }
 0x612   :  { %7838 = vmatprep.mubr.bf16.mxu1 %v4550_v8  ;;  %7863 = vmatpush3.bf16.msra.mxu1 %v8466_v42  ;;  %v4541_v42 = vld [vmem:[#allocation2 + $0xc0] sm:$0xff]  ;;  %v8472_v8 = vld [vmem:[%s10963_s10 + $0xd0] sm:$0xff]  }
 0x613   :  { %7864 = vmatprep.subr.bf16.mxu1 %v8467_v24  ;;  %v4556_v17 = vpack.c.bf16 %v4542_v25, %v4541_v42  ;;  %v5332_v25 = vpack.c.bf16 %v5318_v59, %v5317_v27 }
 0x616   :  { %7865 = vmatpush3.bf16.msra.mxu1 %v8467_v24  ;;  %v8471_v24 = vld [vmem:[%s10963_s10 + $0xc8] sm:$0xff]  }
 0x617   :  { %7866 = vmatprep.subr.bf16.mxu1 %v8468_v50 }
 0x619   :  { %7839 = vmatmul.mubr.bf16.gmra.mrb[180].mxu1 %v4551_v45  ;;  %v8485_v45 = vld [vmem:[%s10963_s10 + $0x138] sm:$0xff]  }
 0x61a   :  { %7842 = vmatprep.mubr.bf16.mxu1 %v4552_v7  ;;  %7867 = vmatpush3.bf16.msra.mxu1 %v8468_v50  ;;  %v5307_v50 = vld [vmem:[#allocation2 + $0x73] sm:$0xff] }
 0x61b   :  { %7868 = vmatprep.subr.bf16.mxu1 %v8469_v9  ;;  %v5327_v48 = vpack.c.bf16 %v5308_v49, %v5307_v50  ;;  %v5311_v7 = vld [vmem:[#allocation2 + $0x93] sm:$0xff] }
 0x61e   :  { %7869 = vmatpush3.bf16.msra.mxu1 %v8469_v9  ;;  %v5328_v9 = vpack.c.bf16 %v5310_v28, %v5309_v51  ;;  %v5596_v51 = vld [vmem:[#allocation2 + $0xd4] sm:$0x3f] }
 0x61f   :  { %7898 = vmatprep.subr.bf16.mxu1 %v8470_v15  ;;  %v5610_v28 = vpack.c.bf16 %v5596_v51, %v5596_v51 }
 0x621   :  { %7843 = vmatmul.mubr.bf16.gmra.mrb[184].mxu1 %v4553_v61  ;;  %v5315_v61 = vld [vmem:[#allocation2 + $0xb3] sm:$0xff] }
 0x622   :  { %7846 = vmatprep.mubr.bf16.mxu1 %v4554_v19  ;;  %v5316_v19 = vld [vmem:[#allocation2 + $0xbb] sm:$0xff] }
 0x623   :  { %v5331_v42 = vpack.c.bf16 %v5316_v19, %v5315_v61 }
 0x629   :  { %7847 = vmatmul.mubr.bf16.gmra.mrb[188].mxu1 %v4555_v44  ;;  %v5319_v44 = vld [vmem:[#allocation2 + $0xd3] sm:$0x3f] }
 0x62a   :  { %7850 = vmatprep.mubr.bf16.mxu1 %v4556_v17  ;;  %v5570_v17 = vld [vmem:[#allocation2 + $0x4] sm:$0xff] }
 0x631   :  { %7851 = vmatmul.mubr.bf16.gmra.mrb[196].mxu1 %v4557_v4  ;;  %v5333_v4 = vpack.c.bf16 %v5319_v44, %v5319_v44 }
 0x632   :  { %7870 = vmatprep.mubr.bf16.mxu1 %v5043_v32  ;;  %v5302_v32 = vld [vmem:[#allocation2 + $0x4b] sm:$0xff] }
 0x639   :  { %7871 = vmatmul.mubr.bf16.vlgmr.msra.gmra.mrb[168].mxu1 %v5044_v53  ;;  %v8481_v53 = vld [vmem:[%s10963_s10 + $0x118] sm:$0xff]  }
 0x63a   :  { %7874 = vmatprep.mubr.bf16.mxu1 %v5045_v26  ;;  %7899 = vmatpush3.bf16.msra.mxu1 %v8470_v15  ;;  %v5324_v26 = vpack.c.bf16 %v5302_v32, %v5301_v22  ;;  %v5312_v15 = vld [vmem:[#allocation2 + $0x9b] sm:$0xff] }
 0x63b   :  { %7900 = vmatprep.subr.bf16.mxu1 %v8471_v24  ;;  %v5329_v6 = vpack.c.bf16 %v5312_v15, %v5311_v7  ;;  %v5588_v22 = vld [vmem:[#allocation2 + $0x94] sm:$0xff]  ;;  %v5589_v32 = vld [vmem:[#allocation2 + $0x9c] sm:$0xff] }
 0x63e   :  { %7901 = vmatpush3.bf16.msra.mxu1 %v8471_v24  ;;  %v5597_v24 = vpack.c.bf16 %v5571_v55, %v5570_v17 }
 0x63f   :  { %7902 = vmatprep.subr.bf16.mxu1 %v8472_v8 }
 0x641   :  { %7875 = vmatmul.mubr.bf16.gmra.mrb[172].mxu1 %v5046_v23  ;;  %v8482_v23 = vld [vmem:[%s10963_s10 + $0x120] sm:$0xff]  }
 0x642   :  { %7878 = vmatprep.mubr.bf16.mxu1 %v5047_v29  ;;  %7903 = vmatpush3.bf16.msra.mxu1 %v8472_v8  ;;  %v5303_v29 = vld [vmem:[#allocation2 + $0x53] sm:$0xff] }
 0x643   :  { %7904 = vmatprep.subr.bf16.mxu1 %v8473_v10  ;;  %v5572_v8 = vld [vmem:[#allocation2 + $0x14] sm:$0xff] }
 0x646   :  { %7905 = vmatpush3.bf16.msra.mxu1 %v8473_v10  ;;  %v5573_v10 = vld [vmem:[#allocation2 + $0x1c] sm:$0xff] }
 0x647   :  { %7906 = vmatprep.subr.bf16.mxu1 %v8474_v36 }
 0x649   :  { %7879 = vmatmul.mubr.bf16.gmra.mrb[176].mxu1 %v5048_v46  ;;  %v5304_v46 = vld [vmem:[#allocation2 + $0x5b] sm:$0xff] }
 0x64a   :  { %7882 = vmatprep.mubr.bf16.mxu1 %v5049_v34  ;;  %7907 = vmatpush3.bf16.msra.mxu1 %v8474_v36  ;;  %v5574_v36 = vld [vmem:[#allocation2 + $0x24] sm:$0xff] }
 0x64b   :  { %7908 = vmatprep.subr.bf16.mxu1 %v8475_v3  ;;  %v5599_v34 = vpack.c.bf16 %v5575_v57, %v5574_v36 }
 0x64e   :  { %7909 = vmatpush3.bf16.msra.mxu1 %v8475_v3  ;;  %v5598_v3 = vpack.c.bf16 %v5573_v10, %v5572_v8  ;;  %v10547_v10 = vld [vmem:[%s10967_s11] ss:$0 sm:$0xff] }
 0x64f   :  { %7910 = vmatprep.subr.bf16.mxu1 %v8476_v12 }
 0x651   :  { %7883 = vmatmul.mubr.bf16.gmra.mrb[180].mxu1 %v5050_v62  ;;  %v5305_v62 = vld [vmem:[#allocation2 + $0x63] sm:$0xff] }
 0x652   :  { %7886 = vmatprep.mubr.bf16.mxu1 %v5051_v63  ;;  %7911 = vmatpush3.bf16.msra.mxu1 %v8476_v12  ;;  %v5306_v63 = vld [vmem:[#allocation2 + $0x6b] sm:$0xff]  ;;  %v5576_v12 = vld [vmem:[#allocation2 + $0x34] sm:$0xff] }
 0x653   :  { %7912 = vmatprep.subr.bf16.mxu1 %v8477_v30 }
 0x656   :  { %7913 = vmatpush3.bf16.msra.mxu1 %v8477_v30  ;;  %v5577_v30 = vld [vmem:[#allocation2 + $0x3c] sm:$0xff] }
 0x657   :  { %7942 = vmatprep.subr.bf16.mxu1 %v8478_v40  ;;  %v5600_v47 = vpack.c.bf16 %v5577_v30, %v5576_v12 }
 0x659   :  { %7887 = vmatmul.mubr.bf16.gmra.mrb[184].mxu1 %v5052_v33  ;;  %v5325_v33 = vpack.c.bf16 %v5304_v46, %v5303_v29  ;;  %v5592_v46 = vld [vmem:[#allocation2 + $0xb4] sm:$0xff] }
 0x65a   :  { %7890 = vmatprep.mubr.bf16.mxu1 %v5053_v16  ;;  %v8483_v16 = vld [vmem:[%s10963_s10 + $0x128] sm:$0xff]  }
 0x661   :  { %7891 = vmatmul.mubr.bf16.gmra.mrb[188].mxu1 %v5054_v37  ;;  %v5326_v37 = vpack.c.bf16 %v5306_v63, %v5305_v62  ;;  %v5593_v62 = vld [vmem:[#allocation2 + $0xbc] sm:$0xff] }
 0x662   :  { %7894 = vmatprep.mubr.bf16.mxu1 %v5055_v31  ;;  %v8484_v31 = vld [vmem:[%s10963_s10 + $0x130] sm:$0xff]   ;;  %v5608_v50 = vpack.c.bf16 %v5593_v62, %v5592_v46 }
 0x669   :  { %7895 = vmatmul.mubr.bf16.gmra.mrb[200].mxu1 %v5056_v13  ;;  %v5580_v13 = vld [vmem:[#allocation2 + $0x54] sm:$0xff] }
 0x66a   :  { %7914 = vmatprep.mubr.bf16.mxu1 %v5320_v0  ;;  %v5581_v0 = vld [vmem:[#allocation2 + $0x5c] sm:$0xff] }
 0x66b   :  { %v5602_v52 = vpack.c.bf16 %v5581_v0, %v5580_v13 }
 0x671   :  { %7915 = vmatmul.mubr.bf16.vlgmr.msra.gmra.mrb[168].mxu1 %v5321_v60  ;;  %v5584_v60 = vld [vmem:[#allocation2 + $0x74] sm:$0xff] }
 0x672   :  { %7918 = vmatprep.mubr.bf16.mxu1 %v5322_v11  ;;  %7943 = vmatpush3.bf16.msra.mxu1 %v8478_v40  ;;  %v5578_v40 = vld [vmem:[#allocation2 + $0x44] sm:$0xff] }
 0x673   :  { %7944 = vmatprep.subr.bf16.mxu1 %v8479_v14  ;;  %v5601_v1 = vpack.c.bf16 %v5579_v43, %v5578_v40  ;;  %v5586_v11 = vld [vmem:[#allocation2 + $0x84] sm:$0xff] }
 0x676   :  { %7945 = vmatpush3.bf16.msra.mxu1 %v8479_v14  ;;  %v5585_v14 = vld [vmem:[#allocation2 + $0x7c] sm:$0xff] }
 0x677   :  { %7946 = vmatprep.subr.bf16.mxu1 %v8480_v41  ;;  %v5604_v39 = vpack.c.bf16 %v5585_v14, %v5584_v60 }
 0x679   :  { %7919 = vmatmul.mubr.bf16.gmra.mrb[172].mxu1 %v5323_v5  ;;  %v5590_v5 = vld [vmem:[#allocation2 + $0xa4] sm:$0xff] }
 0x67a   :  { %7922 = vmatprep.mubr.bf16.mxu1 %v5324_v26  ;;  %7947 = vmatpush3.bf16.msra.mxu1 %v8480_v41  ;;  %v5587_v41 = vld [vmem:[#allocation2 + $0x8c] sm:$0xff]  ;;  %v5606_v26 = vpack.c.bf16 %v5589_v32, %v5588_v22 }
 0x67b   :  { %7948 = vmatprep.subr.bf16.mxu1 %v8481_v53  ;;  %v5605_v58 = vpack.c.bf16 %v5587_v41, %v5586_v11 }
 0x67e   :  { %7949 = vmatpush3.bf16.msra.mxu1 %v8481_v53  ;;  %v5591_v53 = vld [vmem:[#allocation2 + $0xac] sm:$0xff] }
 0x67f   :  { %7950 = vmatprep.subr.bf16.mxu1 %v8482_v23 }
 0x681   :  { %7923 = vmatmul.mubr.bf16.gmra.mrb[176].mxu1 %v5325_v33  ;;  %v5594_v33 = vld [vmem:[#allocation2 + $0xc4] sm:$0xff] }
 0x682   :  { %7926 = vmatprep.mubr.bf16.mxu1 %v5326_v37  ;;  %7951 = vmatpush3.bf16.msra.mxu1 %v8482_v23  ;;  %v5607_v23 = vpack.c.bf16 %v5591_v53, %v5590_v5 }
 0x683   :  { %7952 = vmatprep.subr.bf16.mxu1 %v8483_v16 }
 0x686   :  { %7953 = vmatpush3.bf16.msra.mxu1 %v8483_v16  ;;  %v5595_v16 = vld [vmem:[#allocation2 + $0xcc] sm:$0xff] }
 0x687   :  { %7954 = vmatprep.subr.bf16.mxu1 %v8484_v31  ;;  %v5609_v49 = vpack.c.bf16 %v5595_v16, %v5594_v33 }
 0x689   :  { %7927 = vmatmul.mubr.bf16.gmra.mrb[180].mxu1 %v5327_v48 }
 0x68a   :  { %7930 = vmatprep.mubr.bf16.mxu1 %v5328_v9  ;;  %7955 = vmatpush3.bf16.msra.mxu1 %v8484_v31 }
 0x68b   :  { %7956 = vmatprep.subr.bf16.mxu1 %v8485_v45 }
 0x68e   :  { %7957 = vmatpush3.bf16.msra.mxu1 %v8485_v45 }
 0x691   :  { %7931 = vmatmul.mubr.bf16.gmra.mrb[184].mxu1 %v5329_v6 }
 0x692   :  { %7934 = vmatprep.mubr.bf16.mxu1 %v5330_v56 }
 0x699   :  { %7935 = vmatmul.mubr.bf16.gmra.mrb[188].mxu1 %v5331_v42 }
 0x69a   :  { %7938 = vmatprep.mubr.bf16.mxu1 %v5332_v25 }
 0x6a1   :  { %7939 = vmatmul.mubr.bf16.gmra.mrb[204].mxu1 %v5333_v4 }
 0x6a2   :  { %7958 = vmatprep.mubr.bf16.mxu1 %v5597_v24 }
 0x6a9   :  { %7959 = vmatmul.mubr.bf16.vlgmr.msra.gmra.mrb[168].mxu1 %v5598_v3 }
 0x6aa   :  { %7962 = vmatprep.mubr.bf16.mxu1 %v5599_v34 }
 0x6b1   :  { %7963 = vmatmul.mubr.bf16.gmra.mrb[172].mxu1 %v5600_v47 }
 0x6b2   :  { %7966 = vmatprep.mubr.bf16.mxu1 %v5601_v1 }
 0x6b9   :  { %7967 = vmatmul.mubr.bf16.gmra.mrb[176].mxu1 %v5602_v52 }
 0x6ba   :  { %7970 = vmatprep.mubr.bf16.mxu1 %v5603_v20 }
 0x6c1   :  { %7971 = vmatmul.mubr.bf16.gmra.mrb[180].mxu1 %v5604_v39 }
 0x6c2   :  { %7974 = vmatprep.mubr.bf16.mxu1 %v5605_v58 }
 0x6c9   :  { %7975 = vmatmul.mubr.bf16.gmra.mrb[184].mxu1 %v5606_v26 }
 0x6ca   :  { %7978 = vmatprep.mubr.bf16.mxu1 %v5607_v23 }
 0x6cc   :  { %v7808_v29 = vpop.f32.mrb[192].mxu1 }
 0x6cd   :  { %v4810_v63 = vpop.f32.mrb[193].mxu1 }
 0x6ce   :  { %v7809_v37 = vpop.f32.mrb[194].mxu1 }
 0x6cf   :  { %v4813_v31 = vpop.f32.mrb[195].mxu1 }
 0x6d1   :  { %7979 = vmatmul.mubr.bf16.gmra.mrb[188].mxu1 %v5608_v50 }
 0x6d2   :  { %7982 = vmatprep.mubr.bf16.mxu1 %v5609_v49 }
 0x6d9   :  { %7983 = vmatmul.mubr.bf16.gmra.mrb[208].mxu1 %v5610_v28 }
 0x704   :  { %v7852_v48 = vpop.f32.mrb[196].mxu1 }
 0x705   :  { %v5011_v45 = vadd.f32 %v7852_v48, %v7808_v29  ;;  %v5002_v9 = vpop.f32.mrb[197].mxu1 }
 0x706   :  { %v5003_v7 = vadd.f32 %v5002_v9, %v4810_v63  ;;  %v7853_v15 = vpop.f32.mrb[198].mxu1 }
 0x707   :  { %v5005_v2 = vpop.f32.mrb[199].mxu1 }
 0x708   :  { %v5006_v54 = vadd.f32 %v5005_v2, %v4813_v31 }
 0x73c   :  { %v7896_v6 = vpop.f32.mrb[200].mxu1 }
 0x73d   :  { %v5292_v56 = vadd.f32 %v7896_v6, %v5011_v45  ;;  %v5252_v61 = vpop.f32.mrb[201].mxu1 }
 0x73e   :  { %v5290_v19 = vadd.f32 %v5252_v61, %v5003_v7  ;;  %v7897_v27 = vpop.f32.mrb[202].mxu1 }
 0x73f   :  { %v5255_v59 = vpop.f32.mrb[203].mxu1 }
 0x740   :  { %v5291_v42 = vadd.f32 %v5255_v59, %v5006_v54 }
 0x774   :  { %v7940_v25 = vpop.f32.mrb[204].mxu1 }
 0x775   :  { %v10538_v44 = vadd.f32 %v7940_v25, %v5292_v56  ;;  %v5529_v17 = vpop.f32.mrb[205].mxu1 }
 0x776   :  { %v10540_v55 = vadd.f32 %v5529_v17, %v5290_v19  ;;  %v7941_v4 = vpop.f32.mrb[206].mxu1 }
 0x777   :  { %v5532_v24 = vpop.f32.mrb[207].mxu1 }
 0x778   :  { %v10542_v8 = vadd.f32 %v5532_v24, %v5291_v42 }
 0x77c   :  { %v7960_v36 = vpop.f32.mrb[168].mxu1 }
 0x77d   :  { %v5710_v57 = vpop.f32.mrb[169].mxu1  ;;  %v5855_v3 = vadd.f32 %v7960_v36, %v10547_v10 }
 0x77e   :  { %v5853_v34 = vadd.f32 %v10547_v10, %v5710_v57  ;;  %v7961_v12 = vpop.f32.mrb[170].mxu1 }
 0x77f   :  { %v5856_v30 = vadd.f32 %v7961_v12, %v10547_v10  ;;  %v5713_v40 = vpop.f32.mrb[171].mxu1  ;;  %v10555_v1 = vmax.f32 %v5855_v3, 0.0 }
 0x780   :  { %v10552_v43 = vmax.f32 %v5853_v34, 0.0  ;;  %v5854_v47 = vadd.f32 %v10547_v10, %v5713_v40 }
 0x781   :  { %v10559_v0 = vmax.f32 %v5856_v30, 0.0  ;;  %v5930_v11 = vmul.f32 %v10555_v1, %v10555_v1 }
 0x782   :  { %v10557_v13 = vmax.f32 %v5854_v47, 0.0  ;;  %v5928_v21 = vmul.f32 %v10552_v43, %v10552_v43 }
 0x783   :  { %v5931_v32 = vmul.f32 %v10559_v0, %v10559_v0 }
 0x784   :  { %v5907_v35 = vadd.f32 %v10557_v13, %v10552_v43  ;;  %v5929_v52 = vmul.f32 %v10557_v13, %v10557_v13  ;;  %v7964_v20 = vpop.f32.mrb[172].mxu1 }
 0x785   :  { %v5859_v60 = vadd.f32 %v7964_v20, %v10547_v10  ;;  %v5726_v14 = vpop.f32.mrb[173].mxu1 }
 0x786   :  { %v5908_v41 = vadd.f32 %v5907_v35, %v10555_v1  ;;  %v5942_v39 = vadd.f32 %v5929_v52, %v5928_v21  ;;  %v5857_v58 = vadd.f32 %v10547_v10, %v5726_v14  ;;  %v7965_v22 = vpop.f32.mrb[174].mxu1 }
 0x787   :  { %v5860_v5 = vadd.f32 %v7965_v22, %v10547_v10  ;;  %v5729_v53 = vpop.f32.mrb[175].mxu1  ;;  %v10579_v62 = vmax.f32 %v5859_v60, 0.0 }
 0x788   :  { %v5943_v26 = vadd.f32 %v5942_v39, %v5930_v11  ;;  %v10575_v23 = vmax.f32 %v5857_v58, 0.0  ;;  %v5909_v29 = vadd.f32 %v5908_v41, %v10559_v0  ;;  %v5858_v46 = vadd.f32 %v10547_v10, %v5729_v53 }
 0x789   :  { %v10586_v31 = vmax.f32 %v5860_v5, 0.0  ;;  %v5934_v9 = vmul.f32 %v10579_v62, %v10579_v62 }
 0x78a   :  { %v5910_v63 = vadd.f32 %v5909_v29, %v10575_v23  ;;  %v5932_v33 = vmul.f32 %v10575_v23, %v10575_v23  ;;  %v5944_v16 = vadd.f32 %v5943_v26, %v5931_v32  ;;  %v10584_v37 = vmax.f32 %v5858_v46, 0.0 }
 0x78b   :  { %v5935_v6 = vmul.f32 %v10586_v31, %v10586_v31 }
 0x78c   :  { %v5945_v50 = vadd.f32 %v5944_v16, %v5932_v33  ;;  %v5911_v49 = vadd.f32 %v5910_v63, %v10584_v37  ;;  %v5933_v51 = vmul.f32 %v10584_v37, %v10584_v37  ;;  %v7968_v28 = vpop.f32.mrb[176].mxu1 }
 0x78d   :  { %v5863_v48 = vadd.f32 %v7968_v28, %v10547_v10  ;;  %v5742_v45 = vpop.f32.mrb[177].mxu1 }
 0x78e   :  { %v5912_v7 = vadd.f32 %v5911_v49, %v10579_v62  ;;  %v5946_v15 = vadd.f32 %v5945_v50, %v5933_v51  ;;  %v5861_v2 = vadd.f32 %v10547_v10, %v5742_v45  ;;  %v7969_v54 = vpop.f32.mrb[178].mxu1 }
 0x78f   :  { %v5864_v56 = vadd.f32 %v7969_v54, %v10547_v10  ;;  %v5745_v61 = vpop.f32.mrb[179].mxu1  ;;  %v10603_v25 = vmax.f32 %v5863_v48, 0.0 }
 0x790   :  { %v5947_v19 = vadd.f32 %v5946_v15, %v5934_v9  ;;  %v10599_v27 = vmax.f32 %v5861_v2, 0.0  ;;  %v5913_v59 = vadd.f32 %v5912_v7, %v10586_v31  ;;  %v5862_v42 = vadd.f32 %v10547_v10, %v5745_v61 }
 0x791   :  { %v10610_v57 = vmax.f32 %v5864_v56, 0.0  ;;  %v5938_v21 = vmul.f32 %v10603_v25, %v10603_v25 }
 0x792   :  { %v5914_v17 = vadd.f32 %v5913_v59, %v10599_v27  ;;  %v5936_v4 = vmul.f32 %v10599_v27, %v10599_v27  ;;  %v5948_v24 = vadd.f32 %v5947_v19, %v5935_v6  ;;  %v10608_v36 = vmax.f32 %v5862_v42, 0.0 }
 0x793   :  { %v5939_v14 = vmul.f32 %v10610_v57, %v10610_v57 }
 0x794   :  { %v5949_v3 = vadd.f32 %v5948_v24, %v5936_v4  ;;  %v5915_v34 = vadd.f32 %v5914_v17, %v10608_v36  ;;  %v5937_v12 = vmul.f32 %v10608_v36, %v10608_v36  ;;  %v7972_v30 = vpop.f32.mrb[180].mxu1 }
 0x795   :  { %v5867_v40 = vadd.f32 %v7972_v30, %v10547_v10  ;;  %v5758_v47 = vpop.f32.mrb[181].mxu1 }
 0x796   :  { %v5916_v35 = vadd.f32 %v5915_v34, %v10603_v25  ;;  %v5950_v52 = vadd.f32 %v5949_v3, %v5937_v12  ;;  %v5865_v20 = vadd.f32 %v10547_v10, %v5758_v47  ;;  %v7973_v60 = vpop.f32.mrb[182].mxu1 }
 0x797   :  { %v10622_v11 = vmax.f32 %v5867_v40, 0.0  ;;  %v5868_v41 = vadd.f32 %v7973_v60, %v10547_v10  ;;  %v5761_v39 = vpop.f32.mrb[183].mxu1 }
 0x798   :  { %v5951_v58 = vadd.f32 %v5950_v52, %v5938_v21  ;;  %v10625_v22 = vmax.f32 %v5865_v20, 0.0  ;;  %v5917_v32 = vadd.f32 %v5916_v35, %v10610_v57  ;;  %v5866_v5 = vadd.f32 %v10547_v10, %v5761_v39 }
 0x799   :  { %v6039_v53 = vmul.f32 %v10622_v11, %v10622_v11  ;;  %v10631_v26 = vmax.f32 %v5868_v41, 0.0  ;;  %v5978_v16 = vrot.slane %v10622_v11, 5 }
 0x79a   :  { %v5918_v29 = vadd.f32 %v5917_v32, %v10625_v22  ;;  %v5940_v46 = vmul.f32 %v10625_v22, %v10625_v22  ;;  %v5952_v63 = vadd.f32 %v5951_v58, %v5939_v14  ;;  %v10636_v33 = vmax.f32 %v5866_v5, 0.0 }
 0x79b   :  { %v6067_v50 = vrot.slane %v6039_v53, 5  ;;  %v5980_v49 = vrot.slane %v10631_v26, 5  ;;  %v6040_v51 = vmul.f32 %v10631_v26, %v10631_v26 }
 0x79c   :  { %v5953_v28 = vadd.f32 %v5952_v63, %v5940_v46  ;;  %v5919_v48 = vsel %vm538_vm1, %v10636_v33, 0.0  ;;  %v5941_v45 = vmul.f32 %v10636_v33, %v10636_v33  ;;  %v5977_v9 = vrot.slane %v10636_v33, 5  ;;  %v7976_v7 = vpop.f32.mrb[184].mxu1 }
 0x79d   :  { %v5981_v15 = vsel %vm4237_vm5, %v5978_v16, %v5980_v49  ;;  %v6069_v2 = vrot.slane %v6040_v51, 5  ;;  %v10648_v54 = vadd.f32 %v5919_v48, %v5918_v29  ;;  %v5871_v6 = vadd.f32 %v7976_v7, %v10547_v10  ;;  %v5774_v56 = vpop.f32.mrb[185].mxu1 }
 0x79e   :  { %v5954_v61 = vsel %vm538_vm1, %v5941_v45, 0.0  ;;  %v5979_v19 = vsel %vm4237_vm5, %v5977_v9, %v5978_v16  ;;  %v6066_v59 = vrot.slane %v5941_v45, 5  ;;  %v5869_v42 = vadd.f32 %v10547_v10, %v5774_v56  ;;  %v7977_v17 = vpop.f32.mrb[186].mxu1 }
 0x79f   :  { %v6070_v4 = vsel %vm4237_vm5, %v6067_v50, %v6069_v2  ;;  %v10655_v24 = vadd.f32 %v5954_v61, %v5953_v28  ;;  %v10657_v3 = vmax.f32 %v5871_v6, 0.0  ;;  %v5777_v34 = vpop.f32.mrb[187].mxu1  ;;  %v6018_v30 = vadd.f32 %v5981_v15, %v5979_v19 }
 0x7a0   :  { %v10659_v12 = vmax.f32 %v5869_v42, 0.0  ;;  %v6068_v40 = vsel %vm4237_vm5, %v6066_v59, %v6067_v50  ;;  %v5872_v47 = vadd.f32 %v7977_v17, %v10547_v10  ;;  %v5870_v41 = vadd.f32 %v10547_v10, %v5777_v34 }
 0x7a1   :  { %v6043_v21 = vmul.f32 %v10657_v3, %v10657_v3  ;;  %v6107_v20 = vadd.f32 %v6070_v4, %v6068_v40  ;;  %v5986_v14 = vrot.slane %v10657_v3, 5 }
 0x7a2   :  { %v5982_v35 = vrot.slane %v10659_v12, 5  ;;  %v6041_v52 = vmul.f32 %v10659_v12, %v10659_v12  ;;  %v10668_v60 = vmax.f32 %v5872_v47, 0.0  ;;  %v10676_v63 = vmax.f32 %v5870_v41, 0.0 }
 0x7a3   :  { %v6075_v29 = vrot.slane %v6043_v21, 5 }
 0x7a4   :  { %v5983_v39 = vsel %vm4237_vm5, %v5980_v49, %v5982_v35  ;;  %v6071_v58 = vrot.slane %v6041_v52, 5  ;;  %v5988_v32 = vrot.slane %v10668_v60, 5  ;;  %v6044_v5 = vmul.f32 %v10668_v60, %v10668_v60  ;;  %v7980_v53 = vpop.f32.mrb[188].mxu1 }
 0x7a5   :  { %v6019_v46 = vadd.f32 %v6018_v30, %v5983_v39  ;;  %v5790_v16 = vpop.f32.mrb[189].mxu1  ;;  %v5875_v48 = vadd.f32 %v7980_v53, %v10547_v10  ;;  %v5984_v9 = vrot.slane %v10676_v63, 5  ;;  %v6042_v6 = vmul.f32 %v10676_v63, %v10676_v63 }
 0x7a6   :  { %v6072_v50 = vsel %vm4237_vm5, %v6069_v2, %v6071_v58  ;;  %v5989_v51 = vsel %vm4237_vm5, %v5986_v14, %v5988_v32  ;;  %v6077_v28 = vrot.slane %v6044_v5, 5  ;;  %v7981_v49 = vpop.f32.mrb[190].mxu1  ;;  %v5873_v61 = vadd.f32 %v10547_v10, %v5790_v16 }
 0x7a7   :  { %v6108_v45 = vadd.f32 %v6107_v20, %v6072_v50  ;;  %v5793_v7 = vpop.f32.mrb[191].mxu1  ;;  %v10685_v56 = vmax.f32 %v5875_v48, 0.0  ;;  %v5985_v2 = vsel %vm4237_vm5, %v5982_v35, %v5984_v9  ;;  %v5987_v19 = vsel %vm4237_vm5, %v5984_v9, %v5986_v14 }
 0x7a8   :  { %v6078_v15 = vsel %vm4237_vm5, %v6075_v29, %v6077_v28  ;;  %v6020_v59 = vadd.f32 %v6019_v46, %v5985_v2  ;;  %v6073_v42 = vrot.slane %v6042_v6, 5  ;;  %v10693_v34 = vmax.f32 %v5873_v61, 0.0 }
 0x7a9   :  { %v6047_v17 = vmul.f32 %v10685_v56, %v10685_v56  ;;  %v5994_v4 = vrot.slane %v10685_v56, 5  ;;  %v5876_v30 = vadd.f32 %v7981_v49, %v10547_v10  ;;  %v5874_v40 = vadd.f32 %v10547_v10, %v5793_v7 }
 0x7aa   :  { %v6021_v47 = vadd.f32 %v6020_v59, %v5987_v19  ;;  %v6074_v21 = vsel %vm4237_vm5, %v6071_v58, %v6073_v42  ;;  %v6076_v35 = vsel %vm4237_vm5, %v6073_v42, %v6075_v29  ;;  %v5990_v41 = vrot.slane %v10693_v34, 5 }
 0x7ab   :  { %v6083_v52 = vrot.slane %v6047_v17, 5  ;;  %v6109_v14 = vadd.f32 %v6108_v45, %v6074_v21  ;;  %v6045_v39 = vmul.f32 %v10693_v34, %v10693_v34  ;;  %v10702_v5 = vmax.f32 %v5876_v30, 0.0 }
 0x7ac   :  { %v7984_v20 = vpop.f32.mrb[208].mxu1  ;;  %v6022_v46 = vadd.f32 %v6021_v47, %v5989_v51  ;;  %v10704_v16 = vmax.f32 %v5874_v40, 0.0  ;;  %v5991_v49 = vsel %vm4237_vm5, %v5988_v32, %v5990_v41 }
 0x7ad   :  { %v5806_v53 = vpop.f32.mrb[209].mxu1  ;;  %v5846_v50 = vadd.f32 %v7984_v20, %v10538_v44  ;;  %v6110_v29 = vadd.f32 %v6109_v14, %v6076_v35  ;;  %v6079_v45 = vrot.slane %v6045_v39, 5  ;;  %v5996_v9 = vrot.slane %v10702_v5, 5 }
 0x7ae   :  { %v5844_v58 = vadd.f32 %v5806_v53, %v10540_v55  ;;  %v7985_v48 = vpop.f32.mrb[210].mxu1  ;;  %v6023_v6 = vadd.f32 %v6022_v46, %v5991_v49  ;;  %v6048_v61 = vmul.f32 %v10702_v5, %v10702_v5  ;;  %v5992_v51 = vrot.slane %v10704_v16, 5 }
 0x7af   :  { %v5809_v7 = vpop.f32.mrb[211].mxu1  ;;  %v6046_v2 = vmul.f32 %v10704_v16, %v10704_v16  ;;  %v6080_v44 = vsel %vm4237_vm5, %v6077_v28, %v6079_v45  ;;  %v6111_v55 = vadd.f32 %v6110_v29, %v6078_v15  ;;  %v5997_v19 = vsel %vm4237_vm5, %v5994_v4, %v5996_v9 }
 0x7b0   :  { %v5879_v32 = vadd.f32 %v10547_v10, %v5846_v50  ;;  %v6085_v59 = vrot.slane %v6048_v61, 5  ;;  %v5993_v42 = vsel %vm4237_vm5, %v5990_v41, %v5992_v51  ;;  %v5995_v17 = vsel %vm4237_vm5, %v5992_v51, %v5994_v4 }
 0x7b1   :  { %v6081_v30 = vrot.slane %v6046_v2, 5  ;;  %v6112_v40 = vadd.f32 %v6111_v55, %v6080_v44  ;;  %v6024_v47 = vadd.f32 %v6023_v6, %v5993_v42  ;;  %v5877_v35 = vadd.f32 %v10547_v10, %v5844_v58 }
 0x7b2   :  { %v10720_v21 = vmax.f32 %v5879_v32, 0.0  ;;  %v6086_v20 = vsel %vm4237_vm5, %v6083_v52, %v6085_v59  ;;  %v5845_v14 = vadd.f32 %v5809_v7, %v10542_v8  ;;  %v5921_v8 = vrot.slane %v10648_v54, 4 }
 0x7b3   :  { %v6082_v28 = vsel %vm4237_vm5, %v6079_v45, %v6081_v30  ;;  %v6084_v15 = vsel %vm4237_vm5, %v6081_v30, %v6083_v52  ;;  %v6025_v39 = vadd.f32 %v6024_v47, %v5995_v17  ;;  %v10727_v41 = vmax.f32 %v5877_v35, 0.0 }
 0x7b4   :  { %v6113_v53 = vadd.f32 %v6112_v40, %v6082_v28  ;;  %v5878_v4 = vadd.f32 %v10547_v10, %v5845_v14  ;;  %v6051_v48 = vmul.f32 %v10720_v21, %v10720_v21  ;;  %v6002_v45 = vrot.slane %v10720_v21, 5 }
 0x7b5   :  { %v6026_v46 = vadd.f32 %v6025_v39, %v5997_v19  ;;  %v5998_v58 = vrot.slane %v10727_v41, 5  ;;  %v6049_v29 = vmul.f32 %v10727_v41, %v10727_v41  ;;  %v5956_v51 = vrot.slane %v10655_v24, 4 }
 0x7b6   :  { %v6114_v50 = vadd.f32 %v6113_v53, %v6084_v15  ;;  %v10735_v49 = vmax.f32 %v5878_v4, 0.0  ;;  %v6091_v2 = vrot.slane %v6051_v48, 5  ;;  %v5922_v17 = vadd.f32 %v5921_v8, %v10648_v54 }
 0x7b7   :  { %v5999_v7 = vsel %vm4237_vm5, %v5996_v9, %v5998_v58  ;;  %v6087_v10 = vrot.slane %v6049_v29, 5  ;;  %v5957_v35 = vadd.f32 %v5956_v51, %v10655_v24  ;;  %v6030_v15 = vsel %vm538_vm1, %v6002_v45, 0.0 }
 0x7b8   :  { %v6115_v52 = vadd.f32 %v6114_v50, %v6086_v20  ;;  %v6000_v6 = vrot.slane %v10735_v49, 5  ;;  %v6050_v61 = vmul.f32 %v10735_v49, %v10735_v49  ;;  %v6027_v44 = vadd.f32 %v6026_v46, %v5999_v7 }
 0x7b9   :  { %v6088_v55 = vsel %vm4237_vm5, %v6085_v59, %v6087_v10  ;;  %v5923_v59 = vrot.slane %v5922_v17, 2  ;;  %v6119_v53 = vsel %vm538_vm1, %v6091_v2, 0.0  ;;  %v5958_v4 = vrot.slane %v5957_v35, 2 }
 0x7ba   :  { %v6001_v19 = vsel %vm4237_vm5, %v5998_v58, %v6000_v6  ;;  %v6003_v32 = vsel %vm4237_vm5, %v6000_v6, %v6002_v45  ;;  %v6089_v42 = vrot.slane %v6050_v61, 5  ;;  %v6116_v9 = vadd.f32 %v6115_v52, %v6088_v55 }
 0x7bb   :  { %v6028_v30 = vadd.f32 %v6027_v44, %v6001_v19  ;;  %v5924_v50 = vadd.f32 %v5923_v59, %v5922_v17  ;;  %v5959_v29 = vadd.f32 %v5958_v4, %v5957_v35 }
 0x7bc   :  { %v6090_v40 = vsel %vm4237_vm5, %v6087_v10, %v6089_v42  ;;  %v6092_v47 = vsel %vm4237_vm5, %v6089_v42, %v6091_v2 }
 0x7bd   :  { %v6029_v20 = vadd.f32 %v6028_v30, %v6003_v32  ;;  %v6117_v28 = vadd.f32 %v6116_v9, %v6090_v40  ;;  %v5925_v7 = vrot.slane %v5924_v50, 1  ;;  %v5960_v6 = vrot.slane %v5959_v29, 1 }
 0x7bf   :  { %v6031_v14 = vadd.f32 %v6030_v15, %v6029_v20  ;;  %v6118_v39 = vadd.f32 %v6117_v28, %v6092_v47  ;;  %v5926_v51 = vadd.f32 %v5925_v7, %v5924_v50  ;;  %v5961_v19 = vadd.f32 %v5960_v6, %v5959_v29  ;;  %v10819_v29 = vld [vmem:[%s10969_s13] ss:$0 sm:$0xff] }
 0x7c1   :  { %v6032_v46 = vrot.slane %v6031_v14, 4  ;;  %v6120_v54 = vadd.f32 %v6119_v53, %v6118_v39 }
 0x7c3   :  { %v6033_v48 = vadd.f32 %v6032_v46, %v6031_v14  ;;  %v6121_v58 = vrot.slane %v6120_v54, 4 }
 0x7c5   :  { %v6034_v8 = vrot.slane %v6033_v48, 2  ;;  %v6122_v52 = vadd.f32 %v6121_v58, %v6120_v54  ;;  %v95_v54 = vld [vmem:[%s10968_s12] sm:$0x1] }
 0x7c7   :  { %v6035_v24 = vadd.f32 %v6034_v8, %v6033_v48  ;;  %v6123_v10 = vrot.slane %v6122_v52, 2 }
 0x7c9   :  { %v6036_v61 = vrot.slane %v6035_v24, 1  ;;  %v6124_v45 = vadd.f32 %v6123_v10, %v6122_v52 }
 0x7cb   :  { %v6037_v44 = vadd.f32 %v6036_v61, %v6035_v24  ;;  %v6125_v55 = vrot.slane %v6124_v45, 1 }
 0x7cd   :  { %v6038_v2 = vadd.f32 %v6037_v44, %v5926_v51  ;;  %v6126_v32 = vadd.f32 %v6125_v55, %v6124_v45 }
 0x7cf   :  { %v6127_v42 = vadd.f32 %v6126_v32, %v5961_v19  ;;  %v10753_v9 = vmul.f32 0.004761905, %v6038_v2 }
 0x7d1   :  { %v6129_v17 = vmul.f32 0.004761905, %v6127_v42  ;;  %v6130_v30 = vmul.f32 %v10753_v9, %v10753_v9  ;;  %v6136_v40 = vsub.f32 %v10552_v43, %v10753_v9  ;;  %v6137_v47 = vsub.f32 %v10557_v13, %v10753_v9 }
 0x7d2   :  { %v6138_v35 = vsub.f32 %v10555_v1, %v10753_v9  ;;  %v6139_v20 = vsub.f32 %v10559_v0, %v10753_v9  ;;  %v6140_v28 = vsub.f32 %v10575_v23, %v10753_v9  ;;  %v6141_v15 = vsub.f32 %v10584_v37, %v10753_v9 }
 0x7d3   :  { %v6131_v59 = vsub.f32 %v6129_v17, %v6130_v30  ;;  %v6142_v14 = vsub.f32 %v10579_v62, %v10753_v9  ;;  %v6143_v43 = vsub.f32 %v10586_v31, %v10753_v9  ;;  %v6144_v13 = vsub.f32 %v10599_v27, %v10753_v9 }
 0x7d4   :  { %v6145_v1 = vsub.f32 %v10608_v36, %v10753_v9  ;;  %v6146_v0 = vsub.f32 %v10603_v25, %v10753_v9  ;;  %v6147_v23 = vsub.f32 %v10610_v57, %v10753_v9  ;;  %v6148_v37 = vsub.f32 %v10625_v22, %v10753_v9 }
 0x7d5   :  { %v6132_v39 = vmax.f32 %v6131_v59, 0.0  ;;  %v6149_v62 = vsub.f32 %v10636_v33, %v10753_v9  ;;  %v6202_v31 = vsub.f32 %v10622_v11, %v10753_v9  ;;  %v6203_v27 = vsub.f32 %v10631_v26, %v10753_v9 }
 0x7d6   :  { %v6204_v36 = vsub.f32 %v10659_v12, %v10753_v9  ;;  %v6205_v25 = vsub.f32 %v10676_v63, %v10753_v9  ;;  %v6206_v57 = vsub.f32 %v10657_v3, %v10753_v9  ;;  %v6207_v22 = vsub.f32 %v10668_v60, %v10753_v9 }
 0x7d7   :  { %v6133_v53 = vadd.f32 1e-05, %v6132_v39  ;;  %v6208_v33 = vsub.f32 %v10693_v34, %v10753_v9  ;;  %v6209_v11 = vsub.f32 %v10704_v16, %v10753_v9  ;;  %v6210_v26 = vsub.f32 %v10685_v56, %v10753_v9 }
 0x7d8   :  { %v6211_v12 = vsub.f32 %v10702_v5, %v10753_v9  ;;  %v6212_v63 = vsub.f32 %v10727_v41, %v10753_v9  ;;  %v6213_v4 = vsub.f32 %v10735_v49, %v10753_v9  ;;  %v6214_v46 = vsub.f32 %v10720_v21, %v10753_v9 }
 0x7d9   :  { %8488 = vrsqrt.f32 %v6133_v53 }
 0x7e3   :  { %v8489_v50 = vpop.eup %8488 }
 0x7e4   :  { %v6135_v48 = vmul.f32 %v8489_v50, %v95_v54 }
 0x7e6   :  { %v6153_v58 = vrot.slane %v6135_v48, %v4414_v18 }
 0x7e8   :  { %v6154_v8 = vmul.f32 %v6153_v58, %v6136_v40  ;;  %v6155_v52 = vmul.f32 %v6153_v58, %v6137_v47  ;;  %v6156_v7 = vmul.f32 %v6153_v58, %v6138_v35  ;;  %v6157_v24 = vmul.f32 %v6153_v58, %v6139_v20 }
 0x7e9   :  { %v6158_v10 = vmul.f32 %v6153_v58, %v6140_v28  ;;  %v6159_v6 = vmul.f32 %v6153_v58, %v6141_v15  ;;  %v6160_v61 = vmul.f32 %v6153_v58, %v6142_v14  ;;  %v6161_v45 = vmul.f32 %v6153_v58, %v6143_v43 }
 0x7ea   :  { %v6162_v51 = vmul.f32 %v6153_v58, %v6144_v13  ;;  %v6163_v44 = vmul.f32 %v6153_v58, %v6145_v1  ;;  %v6164_v55 = vmul.f32 %v6153_v58, %v6146_v0  ;;  %v6165_v19 = vmul.f32 %v6153_v58, %v6147_v23 }
 0x7eb   :  { %v6166_v2 = vmul.f32 %v6153_v58, %v6148_v37  ;;  %v6167_v38 = vmul.f32 %v6153_v58, %v6149_v62  ;;  %v6174_v18 = vadd.f32 %v10819_v29, %v6154_v8  ;;  %v6175_v32 = vadd.f32 %v10819_v29, %v6155_v52 }
 0x7ec   :  { %v6176_v42 = vadd.f32 %v10819_v29, %v6156_v7  ;;  %v6177_v17 = vadd.f32 %v10819_v29, %v6157_v24  ;;  %v6178_v30 = vadd.f32 %v10819_v29, %v6158_v10  ;;  %v6179_v40 = vadd.f32 %v10819_v29, %v6159_v6 }
 0x7ed   :  { %v6180_v47 = vadd.f32 %v10819_v29, %v6160_v61  ;;  %v6181_v35 = vadd.f32 %v10819_v29, %v6161_v45  ;;  %v6182_v20 = vadd.f32 %v10819_v29, %v6162_v51  ;;  %v6183_v28 = vadd.f32 %v10819_v29, %v6163_v44  ;;  %6188 = vst [vmem:[%s10970_s14] sm:$0xff] %v6174_v18 }
 0x7ee   :  { %6189 = vst [vmem:[%s10970_s14 + $0x8] sm:$0xff] %v6175_v32  ;;  %v6184_v15 = vadd.f32 %v10819_v29, %v6164_v55  ;;  %v6185_v59 = vadd.f32 %v10819_v29, %v6165_v19  ;;  %v6186_v14 = vadd.f32 %v10819_v29, %v6166_v2  ;;  %v6187_v43 = vadd.f32 %v10819_v29, %v6167_v38 }
 0x7ef   :  { %6190 = vst [vmem:[%s10970_s14 + $0x10] sm:$0xff] %v6176_v42  ;;  %6191 = vst [vmem:[%s10970_s14 + $0x18] sm:$0xff] %v6177_v17  ;;  %v6215_v13 = vmul.f32 %v6202_v31, %v6153_v58  ;;  %v6216_v1 = vmul.f32 %v6203_v27, %v6153_v58  ;;  %v6217_v0 = vmul.f32 %v6204_v36, %v6153_v58 }
 0x7f0   :  { %6192 = vst [vmem:[%s10970_s14 + $0x20] sm:$0xff] %v6178_v30  ;;  %6193 = vst [vmem:[%s10970_s14 + $0x28] sm:$0xff] %v6179_v40  ;;  %v6218_v23 = vmul.f32 %v6205_v25, %v6153_v58  ;;  %v6219_v37 = vmul.f32 %v6206_v57, %v6153_v58  ;;  %v6220_v39 = vmul.f32 %v6207_v22, %v6153_v58 }
 0x7f1   :  { %6194 = vst [vmem:[%s10970_s14 + $0x30] sm:$0xff] %v6180_v47  ;;  %6195 = vst [vmem:[%s10970_s14 + $0x38] sm:$0xff] %v6181_v35  ;;  %v6221_v62 = vmul.f32 %v6208_v33, %v6153_v58  ;;  %v6222_v31 = vmul.f32 %v6209_v11, %v6153_v58  ;;  %v6223_v27 = vmul.f32 %v6210_v26, %v6153_v58 }
 0x7f2   :  { %6196 = vst [vmem:[%s10970_s14 + $0x40] sm:$0xff] %v6182_v20  ;;  %6197 = vst [vmem:[%s10970_s14 + $0x48] sm:$0xff] %v6183_v28  ;;  %v6224_v3 = vmul.f32 %v6211_v12, %v6153_v58  ;;  %v6225_v60 = vmul.f32 %v6212_v63, %v6153_v58  ;;  %v6226_v34 = vmul.f32 %v6213_v4, %v6153_v58 }
 0x7f3   :  { %6198 = vst [vmem:[%s10970_s14 + $0x50] sm:$0xff] %v6184_v15  ;;  %6199 = vst [vmem:[%s10970_s14 + $0x58] sm:$0xff] %v6185_v59  ;;  %v6227_v16 = vmul.f32 %v6214_v46, %v6153_v58  ;;  %v6228_v36 = vadd.f32 %v10819_v29, %v6215_v13  ;;  %v6229_v56 = vadd.f32 %v10819_v29, %v6216_v1 }
 0x7f4   :  { %6200 = vst [vmem:[%s10970_s14 + $0x60] sm:$0xff] %v6186_v14  ;;  %6201 = vst [vmem:[%s10970_s14 + $0x68] ss:$7 sps:$4 sm:$0xe1] %v6187_v43   ;;  %v6230_v25 = vadd.f32 %v10819_v29, %v6217_v0  ;;  %v6231_v5 = vadd.f32 %v10819_v29, %v6218_v23  ;;  %v6232_v57 = vadd.f32 %v10819_v29, %v6219_v37 }
 0x7f5   :  { %v6233_v41 = vadd.f32 %v10819_v29, %v6220_v39  ;;  %v6234_v22 = vadd.f32 %v10819_v29, %v6221_v62  ;;  %v6235_v49 = vadd.f32 %v10819_v29, %v6222_v31  ;;  %v6236_v53 = vadd.f32 %v10819_v29, %v6223_v27  ;;  %6670 = vst [vmem:[%s10970_s14 + $0x73] sm:$0xff] %v6228_v36 }
 0x7f6   :  { %v6237_v21 = vadd.f32 %v10819_v29, %v6224_v3  ;;  %v6238_v9 = vadd.f32 %v10819_v29, %v6225_v60  ;;  %6671 = vst [vmem:[%s10970_s14 + $0x7b] sm:$0xff] %v6229_v56  ;;  %6672 = vst [vmem:[%s10970_s14 + $0x83] sm:$0xff] %v6230_v25  ;;  %v6239_v33 = vadd.f32 %v10819_v29, %v6226_v34 }
 0x7f7   :  { %v6240_v11 = vadd.f32 %v10819_v29, %v6227_v16  ;;  %6673 = vst [vmem:[%s10970_s14 + $0x8b] sm:$0xff] %v6231_v5  ;;  %6674 = vst [vmem:[%s10970_s14 + $0x93] sm:$0xff] %v6232_v57 }
 0x7f8   :  { %6675 = vst [vmem:[%s10970_s14 + $0x9b] sm:$0xff] %v6233_v41  ;;  %6676 = vst [vmem:[%s10970_s14 + $0xa3] sm:$0xff] %v6234_v22 }
 0x7f9   :  { %6677 = vst [vmem:[%s10970_s14 + $0xab] sm:$0xff] %v6235_v49  ;;  %6678 = vst [vmem:[%s10970_s14 + $0xb3] sm:$0xff] %v6236_v53 }
 0x7fa   :  { %6679 = vst [vmem:[%s10970_s14 + $0xbb] sm:$0xff] %v6237_v21  ;;  %6680 = vst [vmem:[%s10970_s14 + $0xc3] sm:$0xff] %v6238_v9 }
 0x7fb   :  { %6681 = vst [vmem:[%s10970_s14 + $0xcb] sm:$0xff] %v6239_v33  ;;  %6682 = vst [vmem:[%s10970_s14 + $0xd3] sm:$0x3f] %v6240_v11 }

</bundles_post_ra>
